<compile_context>
chip_gen: v7x
topology: tpu7x:2x2x1
jax: 0.10.0
libtpu: 0.0.40
codegen_flags: <defaults>
</compile_context>

<pallas_src>
import functools

import numpy as np
import jax
import jax.numpy as jnp
from jax.experimental import pallas as pl
from jax.experimental.pallas import tpu as pltpu

VMEM_LIMIT = 48 * 1024 * 1024  # safe on v5e/v6e (128 MiB) and v7x (64 MiB)


# ----------------------------------------------------------------------------
# In-kernel helpers (trace-time; taps / masks are static Python structures)
# ----------------------------------------------------------------------------

def _tap_offsets(D, H, W):
    """27 taps: (flat_offset, dd, dh, dw) with d-major / w-minor flat index."""
    taps = []
    for kd in range(3):
        for kh in range(3):
            for kw in range(3):
                dd, dh, dw = kd - 1, kh - 1, kw - 1
                taps.append((dd * H * W + dh * W + dw, dd, dh, dw))
    return tuple(taps)


def _mask_for(m6, dd, dh, dw):
    """Boundary-validity mask (1, N) for a tap, or None for the center factors.

    m6 rows: [d>=1, d<=D-2, h>=1, h<=H-2, w>=1, w<=W-2] as f32.
    """
    factors = []
    if dd == -1:
        factors.append(m6[0:1, :])
    if dd == +1:
        factors.append(m6[1:2, :])
    if dh == -1:
        factors.append(m6[2:3, :])
    if dh == +1:
        factors.append(m6[3:4, :])
    if dw == -1:
        factors.append(m6[4:5, :])
    if dw == +1:
        factors.append(m6[5:6, :])
    if not factors:
        return None
    m = factors[0]
    for f in factors[1:]:
        m = m * f
    return m


def _conv3d_taps(x, w, m6, taps):
    """3x3x3 conv (zero padding) on a flat (Cin, N) volume.

    x: (Cin, N) f32, w: (27, Cout, Cin) f32, m6: (6, N) f32 -> (Cout, N) f32.
    Per tap: one small MXU dot, one lane roll (XLU), one masked add (VPU).
    """
    cout = w.shape[1]
    n = x.shape[1]
    acc = jnp.zeros((cout, n), jnp.float32)
    for k, (off, dd, dh, dw) in enumerate(taps):
        pk = jnp.dot(w[k], x, preferred_element_type=jnp.float32)   # (Cout, N)
        if off != 0:
            # want pk_shifted[:, i] = pk[:, i + off]
            pk = pltpu.roll(pk, shift=(-off) % n, axis=1)
        mk = _mask_for(m6, dd, dh, dw)
        if mk is not None:
            pk = pk * mk
        acc = acc + pk
    return acc


# ----------------------------------------------------------------------------
# Pallas kernels
# ----------------------------------------------------------------------------

def _conv_flat_kernel(p_ref, w_ref, b_ref, o_ref):
    # Tiny im2col conv used only for conv_gate (the gate volume is small).
    o_ref[0] = (jnp.dot(w_ref[...], p_ref[0],
                        preferred_element_type=jnp.float32) + b_ref[...])


def _conv_stats_kernel(x_ref, w_ref, b_ref, m6_ref, *rest, taps, inv_n, has_add):
    # 3x3x3 conv (+ optional elementwise add of the upsampled gate) fused with
    # per-batch BatchNorm statistics (sum and mean-centered M2).
    if has_add:
        add_ref, o_ref, sum_ref, m2_ref = rest
    else:
        o_ref, sum_ref, m2_ref = rest

    x = x_ref[0]                                     # (Cin, N)
    m6 = m6_ref[...]                                 # (6, N)
    s = _conv3d_taps(x, w_ref[...], m6, taps) + b_ref[...]
    if has_add:
        s = s + add_ref[0]
    o_ref[0] = s

    ssum = jnp.sum(s, axis=1, keepdims=True)         # (Cout, 1)
    mean_b = ssum * inv_n
    d = s - mean_b
    sum_ref[0] = ssum
    m2_ref[0] = jnp.sum(d * d, axis=1, keepdims=True)


def _bn_mask_softmax_kernel(s_ref, sc_ref, sh_ref, wm_ref, bm_ref, m6_ref,
                            o_ref, *, taps):
    # Fused: BatchNorm affine + ReLU, conv_mask (Cin=Ci, Cout=1, zero padding)
    # done channel-reduce-first, and the global softmax over D*H*W.
    f = jnp.maximum(s_ref[0] * sc_ref[...] + sh_ref[...], 0.0)      # (Ci, N)
    # G[k, n] = sum_c w_mask[k, c] * F[c, n]  -- one MXU dot for all 27 taps.
    g = jnp.dot(wm_ref[...], f, preferred_element_type=jnp.float32)  # (27, N)
    m6 = m6_ref[...]
    n = f.shape[1]

    logits = jnp.zeros((1, n), jnp.float32) + bm_ref[...]
    for k, (off, dd, dh, dw) in enumerate(taps):
        gk = g[k:k + 1, :]                                           # (1, N)
        if off != 0:
            gk = pltpu.roll(gk, shift=(-off) % n, axis=1)
        mk = _mask_for(m6, dd, dh, dw)
        if mk is not None:
            gk = gk * mk
        logits = logits + gk

    mx = jnp.max(logits, axis=1, keepdims=True)
    e = jnp.exp(logits - mx)
    denom = jnp.sum(e, axis=1, keepdims=True)
    o_ref[0] = e * pl.reciprocal(denom, approx=True)


def _attend_kernel(m_ref, f_ref, o_ref):
    # torch.matmul over the trailing (H, W) dims, mask broadcast over channels:
    # out[d, h, w] = sum_k m[d, h, k] * f[d, k, w]
    o_ref[0] = jnp.einsum('dhk,dkw->dhw', m_ref[0], f_ref[0],
                          preferred_element_type=jnp.float32)


def _affine_relu_kernel(x_ref, sc_ref, sh_ref, o_ref):
    o_ref[0] = jnp.maximum(x_ref[0] * sc_ref[...] + sh_ref[...], 0.0)


# ----------------------------------------------------------------------------
# Pallas wrappers
# ----------------------------------------------------------------------------

def _cparams(*sem):
    return pltpu.CompilerParams(dimension_semantics=sem,
                                vmem_limit_bytes=VMEM_LIMIT)


def conv_flat(patches, wmat, bias):
    B, K, Ng = patches.shape
    Cout = wmat.shape[0]
    return pl.pallas_call(
        _conv_flat_kernel,
        out_shape=jax.ShapeDtypeStruct((B, Cout, Ng), jnp.float32),
        grid=(B,),
        in_specs=[
            pl.BlockSpec((1, K, Ng), lambda b: (b, 0, 0)),
            pl.BlockSpec((Cout, K), lambda b: (0, 0)),
            pl.BlockSpec((Cout, 1), lambda b: (0, 0)),
        ],
        out_specs=pl.BlockSpec((1, Cout, Ng), lambda b: (b, 0, 0)),
        compiler_params=_cparams("parallel"),
    )(patches, wmat, bias)


def conv3d_stats(x, w, bias, m6, taps, add=None):
    """Roll-based 3x3x3 conv + per-batch BN stats; optional fused add."""
    B, Cin, N = x.shape
    Cout = w.shape[1]
    has_add = add is not None
    kernel = functools.partial(_conv_stats_kernel, taps=taps,
                               inv_n=1.0 / N, has_add=has_add)
    in_specs = [
        pl.BlockSpec((1, Cin, N), lambda b: (b, 0, 0)),
        pl.BlockSpec((27, Cout, Cin), lambda b: (0, 0, 0)),
        pl.BlockSpec((Cout, 1), lambda b: (0, 0)),
        pl.BlockSpec((6, N), lambda b: (0, 0)),
    ]
    args = [x, w, bias, m6]
    if has_add:
        in_specs.append(pl.BlockSpec((1, Cout, N), lambda b: (b, 0, 0)))
        args.append(add)
    return pl.pallas_call(
        kernel,
        out_shape=(jax.ShapeDtypeStruct((B, Cout, N), jnp.float32),
                   jax.ShapeDtypeStruct((B, Cout, 1), jnp.float32),
                   jax.ShapeDtypeStruct((B, Cout, 1), jnp.float32)),
        grid=(B,),
        in_specs=in_specs,
        out_specs=(pl.BlockSpec((1, Cout, N), lambda b: (b, 0, 0)),
                   pl.BlockSpec((1, Cout, 1), lambda b: (b, 0, 0)),
                   pl.BlockSpec((1, Cout, 1), lambda b: (b, 0, 0))),
        compiler_params=_cparams("parallel"),
    )(*args)


def bn_mask_softmax(s, scale, shift, wmask, bmask, m6, taps):
    B, Ci, N = s.shape
    kernel = functools.partial(_bn_mask_softmax_kernel, taps=taps)
    return pl.pallas_call(
        kernel,
        out_shape=jax.ShapeDtypeStruct((B, 1, N), jnp.float32),
        grid=(B,),
        in_specs=[
            pl.BlockSpec((1, Ci, N), lambda b: (b, 0, 0)),
            pl.BlockSpec((Ci, 1), lambda b: (0, 0)),
            pl.BlockSpec((Ci, 1), lambda b: (0, 0)),
            pl.BlockSpec((27, Ci), lambda b: (0, 0)),
            pl.BlockSpec((1, 1), lambda b: (0, 0)),
            pl.BlockSpec((6, N), lambda b: (0, 0)),
        ],
        out_specs=pl.BlockSpec((1, 1, N), lambda b: (b, 0, 0)),
        compiler_params=_cparams("parallel"),
    )(s, scale, shift, wmask, bmask, m6)


def attend(sm4, feature):
    """mask.expand_as(feature) @ feature in native (B, C, D, H, W) layout."""
    B, C, D, H, W = feature.shape
    feat_flat = feature.reshape(B * C, D, H, W)       # free (contiguous) merge
    out = pl.pallas_call(
        _attend_kernel,
        out_shape=jax.ShapeDtypeStruct((B * C, D, H, W), jnp.float32),
        grid=(B, C),
        in_specs=[
            pl.BlockSpec((1, D, H, W), lambda b, c: (b, 0, 0, 0)),
            pl.BlockSpec((1, D, H, W), lambda b, c: (b * C + c, 0, 0, 0)),
        ],
        out_specs=pl.BlockSpec((1, D, H, W), lambda b, c: (b * C + c, 0, 0, 0)),
        compiler_params=_cparams("parallel", "parallel"),
    )(sm4, feat_flat)
    return out.reshape(B, C, D, H, W)


def affine_relu(x, scale, shift):
    B, C, N = x.shape
    return pl.pallas_call(
        _affine_relu_kernel,
        out_shape=jax.ShapeDtypeStruct((B, C, N), jnp.float32),
        grid=(B,),
        in_specs=[pl.BlockSpec((1, C, N), lambda b: (b, 0, 0)),
                  pl.BlockSpec((C, 1), lambda b: (0, 0)),
                  pl.BlockSpec((C, 1), lambda b: (0, 0))],
        out_specs=pl.BlockSpec((1, C, N), lambda b: (b, 0, 0)),
        compiler_params=_cparams("parallel"),
    )(x, scale, shift)


# ----------------------------------------------------------------------------
# Glue: boundary table, im2col (gate only), interpolation, params, forward
# ----------------------------------------------------------------------------

def _mask6(D, H, W):
    """(6, N) f32 validity table for the +-1 shifts along d / h / w."""
    dd, hh, ww = np.meshgrid(np.arange(D), np.arange(H), np.arange(W),
                             indexing='ij')
    d = dd.reshape(-1)
    h = hh.reshape(-1)
    w = ww.reshape(-1)
    rows = np.stack([(d >= 1), (d <= D - 2),
                     (h >= 1), (h <= H - 2),
                     (w >= 1), (w <= W - 2)]).astype(np.float32)
    return rows


def _im2col(x):
    """(B, C, D, H, W) -> (B, 27*C, D*H*W) patches (tap-major, channel-minor).

    Only used for the tiny gating tensor.
    """
    B, C, D, H, W = x.shape
    xp = jnp.pad(x, ((0, 0), (0, 0), (1, 1), (1, 1), (1, 1)))
    taps = [xp[:, :, kd:kd + D, kh:kh + H, kw:kw + W]
            for kd in range(3) for kh in range(3) for kw in range(3)]
    pats = jnp.stack(taps, axis=1)                    # (B, 27, C, D, H, W)
    return pats.reshape(B, 27 * C, D * H * W)


def interp_matrix_1d(n_out, n_in):
    """1-D linear-interp matrix matching F.interpolate(..., align_corners=True)."""
    m = np.zeros((n_out, n_in), dtype=np.float32)
    if n_in == 1 or n_out == 1:
        m[:, 0] = 1.0
        return m
    for i in range(n_out):
        coord = i * (n_in - 1) / (n_out - 1)
        i0 = min(int(np.floor(coord)), n_in - 2)
        frac = coord - i0
        m[i, i0] += 1.0 - frac
        m[i, i0 + 1] += frac
    return m


def _bn_train_scale_shift(sums, m2s, n_per_block, gamma, beta, eps=1e-5):
    """Combine per-batch (sum, centered M2) stats -> BN affine scale/shift."""
    B = sums.shape[0]
    total = B * n_per_block
    mean_b = sums / n_per_block                       # (B, C, 1)
    mean = jnp.sum(sums, axis=0) / total              # (C, 1)
    m2 = (jnp.sum(m2s, axis=0)
          + n_per_block * jnp.sum((mean_b - mean) ** 2, axis=0))
    var = m2 / total                                  # biased variance
    scale = gamma * jax.lax.rsqrt(var + eps)
    shift = beta - mean * scale
    return scale, shift


def init_params(key, c_in, c_gate, c_inner):
    ks = jax.random.split(key, 8)

    def conv_w(k, cin, cout):
        # (27, cout, cin): tap-major weight layout for the roll-based conv.
        return jax.random.normal(k, (27, cout, cin), jnp.float32) * 0.1

    return dict(
        # conv_gate uses the im2col path: weight stored as (27, Cin, Cout)
        w_gate=jax.random.normal(ks[0], (27, c_gate, c_inner), jnp.float32) * 0.1,
        b_gate=jax.random.normal(ks[1], (c_inner, 1), jnp.float32) * 0.1,
        w_fea=conv_w(ks[2], c_in, c_inner),
        b_fea=jax.random.normal(ks[3], (c_inner, 1), jnp.float32) * 0.1,
        w_mask=jax.random.normal(ks[4], (27, c_inner), jnp.float32) * 0.1,
        b_mask=jax.random.normal(ks[5], (1, 1), jnp.float32) * 0.1,
        w_W=conv_w(ks[6], c_in, c_in),
        b_W=jax.random.normal(ks[7], (c_in, 1), jnp.float32) * 0.1,
        # PyTorch BatchNorm3d default init: weight=1, bias=0
        gamma_inner=jnp.ones((c_inner, 1), jnp.float32),
        beta_inner=jnp.zeros((c_inner, 1), jnp.float32),
        gamma_W=jnp.ones((c_in, 1), jnp.float32),
        beta_W=jnp.zeros((c_in, 1), jnp.float32),
    )


def attention_gate(feature, gate, params):
    """Forward pass of AttentionGate (mode='softmax'), NCDHW in / NCDHW out."""
    B, C, D, H, W = feature.shape
    _, Cg, Dg, Hg, Wg = gate.shape
    assert H == W, "torch.matmul on (H,W)x(H,W) slices requires H == W"
    N = D * H * W
    Ci = params['w_fea'].shape[1]
    eps = 1e-5

    taps = _tap_offsets(D, H, W)
    m6 = jnp.asarray(_mask6(D, H, W))                 # (6, N) f32

    # --- conv_gate (tiny im2col matmul), then separable trilinear upsample ---
    pg = _im2col(gate)                                # (B, 27*Cg, Ng)
    wg_mat = params['w_gate'].transpose(2, 0, 1).reshape(Ci, 27 * Cg)
    gating = conv_flat(pg, wg_mat, params['b_gate'])  # (B, Ci, Ng)
    g5 = gating.reshape(B, Ci, Dg, Hg, Wg)
    Mw = jnp.asarray(interp_matrix_1d(W, Wg))
    Mh = jnp.asarray(interp_matrix_1d(H, Hg))
    Md = jnp.asarray(interp_matrix_1d(D, Dg))
    up = jnp.einsum('bcxyz,wz->bcxyw', g5, Mw)
    up = jnp.einsum('bcxyw,hy->bcxhw', up, Mh)
    up = jnp.einsum('bcxhw,dx->bcdhw', up, Md)
    up = up.reshape(B, Ci, N)

    # --- conv_fea + add(up) + per-batch BN#1 stats (one fused kernel) ---
    x = feature.reshape(B, C, N)                      # free reshape
    s, s_sum, s_m2 = conv3d_stats(x, params['w_fea'], params['b_fea'],
                                  m6, taps, add=up)   # (B, Ci, N)
    scale1, shift1 = _bn_train_scale_shift(s_sum, s_m2, N,
                                           params['gamma_inner'],
                                           params['beta_inner'], eps)

    # --- BN affine + ReLU + conv_mask + global softmax (one fused kernel) ---
    sm = bn_mask_softmax(s, scale1, shift1, params['w_mask'],
                         params['b_mask'], m6, taps)  # (B, 1, N)

    # --- mask.expand_as(feature) @ feature, native layout, (B, C) grid ---
    sm4 = sm.reshape(B, D, H, W)                      # free reshape
    fea_xl = attend(sm4, feature)                     # (B, C, D, H, W)

    # --- conv_W + per-batch BN#2 stats, then affine + ReLU ---
    y, y_sum, y_m2 = conv3d_stats(fea_xl.reshape(B, C, N), params['w_W'],
                                  params['b_W'], m6, taps)
    scale2, shift2 = _bn_train_scale_shift(y_sum, y_m2, N,
                                           params['gamma_W'],
                                           params['beta_W'], eps)
    out = affine_relu(y, scale2, shift2)              # (B, C, N)
    return out.reshape(B, C, D, H, W)


if __name__ == "__main__":
    B, C_in, C_gate, C_inner = 2, 4, 6, 8
    D = H = W = 8
    Dg = Hg = Wg = 4

    key = jax.random.PRNGKey(0)
    kf, kg, kp = jax.random.split(key, 3)
    feature = jax.random.normal(kf, (B, C_in, D, H, W), jnp.float32)
    gate = jax.random.normal(kg, (B, C_gate, Dg, Hg, Wg), jnp.float32)
    params = init_params(kp, C_in, C_gate, C_inner)

    out = jax.jit(attention_gate)(feature, gate, params)
    out = jax.block_until_ready(out)

    assert out.shape == (B, C_in, D, H, W), out.shape
    assert bool(jnp.all(jnp.isfinite(out)))
    print("KERNEL_OK")
</pallas_src>

<mosaic_0001>
module attributes {stable_mosaic.version = 11 : i64} {
  func.func @_conv_flat_kernel(%arg0: i32, %arg1: memref<1x162x64xf32, #tpu.memory_space<vmem>>, %arg2: memref<8x162xf32, #tpu.memory_space<vmem>>, %arg3: memref<8x1xf32, #tpu.memory_space<vmem>>, %arg4: memref<1x8x64xf32, #tpu.memory_space<vmem>>) attributes {dimension_semantics = [#tpu.dimension_semantics<parallel>], iteration_bounds = array<i64: 2>, scalar_prefetch = 0 : i64, scratch_operands = 0 : i64, tpu.core_type = #tpu.core_type<tc>, window_params = [{transform_indices = @transform_0, window_bounds = array<i64: 1, 162, 64>}, {pipeline_mode = #tpu.pipeline_mode<synchronous>, transform_indices = @transform_1, window_bounds = array<i64: 8, 162>}, {pipeline_mode = #tpu.pipeline_mode<synchronous>, transform_indices = @transform_2, window_bounds = array<i64: 8, 1>}, {transform_indices = @transform_3, window_bounds = array<i64: 1, 8, 64>}]} {
    %c0 = arith.constant 0 : index
    %c0_0 = arith.constant 0 : index
    %0 = vector.load %arg2[%c0, %c0_0] : memref<8x162xf32, #tpu.memory_space<vmem>>, vector<8x162xf32>
    %c0_1 = arith.constant 0 : index
    %c0_2 = arith.constant 0 : index
    %c0_3 = arith.constant 0 : index
    %1 = vector.load %arg1[%c0_1, %c0_2, %c0_3] : memref<1x162x64xf32, #tpu.memory_space<vmem>>, vector<1x162x64xf32>
    %2 = vector.shape_cast %1 : vector<1x162x64xf32> to vector<162x64xf32>
    %cst = arith.constant dense<0.000000e+00> : vector<8x64xf32>
    %3 = tpu.matmul %0, %2, %cst {dimension_numbers = #tpu.dot_dimension_numbers<[1], [0], [0], [1], [0, 0, 1, 1], [], []>} : vector<8x162xf32>, vector<162x64xf32>, vector<8x64xf32> -> vector<8x64xf32>
    %c0_4 = arith.constant 0 : index
    %c0_5 = arith.constant 0 : index
    %4 = vector.load %arg3[%c0_4, %c0_5] : memref<8x1xf32, #tpu.memory_space<vmem>>, vector<8x1xf32>
    %5 = vector.broadcast %4 : vector<8x1xf32> to vector<8x64xf32>
    %6 = arith.addf %3, %5 : vector<8x64xf32>
    %c0_6 = arith.constant 0 : index
    %c0_7 = arith.constant 0 : index
    %c0_8 = arith.constant 0 : index
    %7 = vector.load %arg4[%c0_6, %c0_7, %c0_8] : memref<1x8x64xf32, #tpu.memory_space<vmem>>, vector<1x8x64xf32>
    %8 = vector.shape_cast %7 : vector<1x8x64xf32> to vector<8x64xf32>
    %9 = vector.shape_cast %6 : vector<8x64xf32> to vector<1x8x64xf32>
    tpu.vector_store %arg4[%c0_6, %c0_7, %c0_8], %9 {strides = array<i32>} : memref<1x8x64xf32, #tpu.memory_space<vmem>>, vector<1x8x64xf32>,
    return
  }
  func.func @transform_0(%arg0: i32) -> (i32, i32, i32) {
    %c0_i32 = arith.constant 0 : i32
    %c0_i32_0 = arith.constant 0 : i32
    %c0_i32_1 = arith.constant 0 : i32
    return %arg0, %c0_i32, %c0_i32_0 : i32, i32, i32
  }
  func.func @transform_1(%arg0: i32) -> (i32, i32) {
    %c0_i32 = arith.constant 0 : i32
    %c0_i32_0 = arith.constant 0 : i32
    %c0_i32_1 = arith.constant 0 : i32
    return %c0_i32, %c0_i32_0 : i32, i32
  }
  func.func @transform_2(%arg0: i32) -> (i32, i32) {
    %c0_i32 = arith.constant 0 : i32
    %c0_i32_0 = arith.constant 0 : i32
    %c0_i32_1 = arith.constant 0 : i32
    return %c0_i32, %c0_i32_0 : i32, i32
  }
  func.func @transform_3(%arg0: i32) -> (i32, i32, i32) {
    %c0_i32 = arith.constant 0 : i32
    %c0_i32_0 = arith.constant 0 : i32
    %c0_i32_1 = arith.constant 0 : i32
    return %arg0, %c0_i32, %c0_i32_0 : i32, i32, i32
  }
}

module attributes {stable_mosaic.version = 11 : i64} {
  func.func @_conv_stats_kernel(%arg0: i32, %arg1: memref<1x4x512xf32, #tpu.memory_space<vmem>>, %arg2: memref<27x8x4xf32, #tpu.memory_space<vmem>>, %arg3: memref<8x1xf32, #tpu.memory_space<vmem>>, %arg4: memref<6x512xf32, #tpu.memory_space<vmem>>, %arg5: memref<1x8x512xf32, #tpu.memory_space<vmem>>, %arg6: memref<1x8x512xf32, #tpu.memory_space<vmem>>, %arg7: memref<1x8x1xf32, #tpu.memory_space<vmem>>, %arg8: memref<1x8x1xf32, #tpu.memory_space<vmem>>) attributes {dimension_semantics = [#tpu.dimension_semantics<parallel>], iteration_bounds = array<i64: 2>, scalar_prefetch = 0 : i64, scratch_operands = 0 : i64, tpu.core_type = #tpu.core_type<tc>, window_params = [{transform_indices = @transform_0, window_bounds = array<i64: 1, 4, 512>}, {pipeline_mode = #tpu.pipeline_mode<synchronous>, transform_indices = @transform_1, window_bounds = array<i64: 27, 8, 4>}, {pipeline_mode = #tpu.pipeline_mode<synchronous>, transform_indices = @transform_2, window_bounds = array<i64: 8, 1>}, {pipeline_mode = #tpu.pipeline_mode<synchronous>, transform_indices = @transform_3, window_bounds = array<i64: 6, 512>}, {transform_indices = @transform_4, window_bounds = array<i64: 1, 8, 512>}, {transform_indices = @transform_5, window_bounds = array<i64: 1, 8, 512>}, {transform_indices = @transform_6, window_bounds = array<i64: 1, 8, 1>}, {transform_indices = @transform_7, window_bounds = array<i64: 1, 8, 1>}]} {
    %c0 = arith.constant 0 : index
    %c0_0 = arith.constant 0 : index
    %c0_1 = arith.constant 0 : index
    %0 = vector.load %arg1[%c0, %c0_0, %c0_1] : memref<1x4x512xf32, #tpu.memory_space<vmem>>, vector<1x4x512xf32>
    %1 = vector.shape_cast %0 : vector<1x4x512xf32> to vector<4x512xf32>
    %c0_2 = arith.constant 0 : index
    %c0_3 = arith.constant 0 : index
    %2 = vector.load %arg4[%c0_2, %c0_3] : memref<6x512xf32, #tpu.memory_space<vmem>>, vector<6x512xf32>
    %c0_4 = arith.constant 0 : index
    %c0_5 = arith.constant 0 : index
    %c0_6 = arith.constant 0 : index
    %3 = vector.load %arg2[%c0_4, %c0_5, %c0_6] : memref<27x8x4xf32, #tpu.memory_space<vmem>>, vector<27x8x4xf32>
    %cst = arith.constant 0.000000e+00 : f32
    %4 = vector.broadcast %cst : f32 to vector<8x512xf32>
    %5 = vector.extract_strided_slice %3 {offsets = [0, 0, 0], sizes = [1, 8, 4], strides = [1, 1, 1]} : vector<27x8x4xf32> to vector<1x8x4xf32>
    %6 = vector.shape_cast %5 : vector<1x8x4xf32> to vector<8x4xf32>
    %cst_7 = arith.constant dense<0.000000e+00> : vector<8x512xf32>
    %7 = tpu.matmul %6, %1, %cst_7 {dimension_numbers = #tpu.dot_dimension_numbers<[1], [0], [0], [1], [0, 0, 1, 1], [], []>} : vector<8x4xf32>, vector<4x512xf32>, vector<8x512xf32> -> vector<8x512xf32>
    %c73_i32 = arith.constant 73 : i32
    %8 = tpu.dynamic_rotate %7 by %c73_i32 dim 1 : vector<8x512xf32>, i32 -> vector<8x512xf32>
    %9 = vector.extract_strided_slice %2 {offsets = [0, 0], sizes = [1, 512], strides = [1, 1]} : vector<6x512xf32> to vector<1x512xf32>
    %10 = vector.extract_strided_slice %2 {offsets = [2, 0], sizes = [1, 512], strides = [1, 1]} : vector<6x512xf32> to vector<1x512xf32>
    %11 = vector.extract_strided_slice %2 {offsets = [4, 0], sizes = [1, 512], strides = [1, 1]} : vector<6x512xf32> to vector<1x512xf32>
    %12 = arith.mulf %9, %10 : vector<1x512xf32>
    %13 = arith.mulf %12, %11 : vector<1x512xf32>
    %14 = vector.broadcast %13 : vector<1x512xf32> to vector<8x512xf32>
    %15 = arith.mulf %8, %14 : vector<8x512xf32>
    %16 = arith.addf %4, %15 : vector<8x512xf32>
    %17 = vector.extract_strided_slice %3 {offsets = [1, 0, 0], sizes = [1, 8, 4], strides = [1, 1, 1]} : vector<27x8x4xf32> to vector<1x8x4xf32>
    %18 = vector.shape_cast %17 : vector<1x8x4xf32> to vector<8x4xf32>
    %cst_8 = arith.constant dense<0.000000e+00> : vector<8x512xf32>
    %19 = tpu.matmul %18, %1, %cst_8 {dimension_numbers = #tpu.dot_dimension_numbers<[1], [0], [0], [1], [0, 0, 1, 1], [], []>} : vector<8x4xf32>, vector<4x512xf32>, vector<8x512xf32> -> vector<8x512xf32>
    %c72_i32 = arith.constant 72 : i32
    %20 = tpu.dynamic_rotate %19 by %c72_i32 dim 1 : vector<8x512xf32>, i32 -> vector<8x512xf32>
    %21 = vector.extract_strided_slice %2 {offsets = [0, 0], sizes = [1, 512], strides = [1, 1]} : vector<6x512xf32> to vector<1x512xf32>
    %22 = vector.extract_strided_slice %2 {offsets = [2, 0], sizes = [1, 512], strides = [1, 1]} : vector<6x512xf32> to vector<1x512xf32>
    %23 = arith.mulf %21, %22 : vector<1x512xf32>
    %24 = vector.broadcast %23 : vector<1x512xf32> to vector<8x512xf32>
    %25 = arith.mulf %20, %24 : vector<8x512xf32>
    %26 = arith.addf %16, %25 : vector<8x512xf32>
    %27 = vector.extract_strided_slice %3 {offsets = [2, 0, 0], sizes = [1, 8, 4], strides = [1, 1, 1]} : vector<27x8x4xf32> to vector<1x8x4xf32>
    %28 = vector.shape_cast %27 : vector<1x8x4xf32> to vector<8x4xf32>
    %cst_9 = arith.constant dense<0.000000e+00> : vector<8x512xf32>
    %29 = tpu.matmul %28, %1, %cst_9 {dimension_numbers = #tpu.dot_dimension_numbers<[1], [0], [0], [1], [0, 0, 1, 1], [], []>} : vector<8x4xf32>, vector<4x512xf32>, vector<8x512xf32> -> vector<8x512xf32>
    %c71_i32 = arith.constant 71 : i32
    %30 = tpu.dynamic_rotate %29 by %c71_i32 dim 1 : vector<8x512xf32>, i32 -> vector<8x512xf32>
    %31 = vector.extract_strided_slice %2 {offsets = [0, 0], sizes = [1, 512], strides = [1, 1]} : vector<6x512xf32> to vector<1x512xf32>
    %32 = vector.extract_strided_slice %2 {offsets = [2, 0], sizes = [1, 512], strides = [1, 1]} : vector<6x512xf32> to vector<1x512xf32>
    %33 = vector.extract_strided_slice %2 {offsets = [5, 0], sizes = [1, 512], strides = [1, 1]} : vector<6x512xf32> to vector<1x512xf32>
    %34 = arith.mulf %31, %32 : vector<1x512xf32>
    %35 = arith.mulf %34, %33 : vector<1x512xf32>
    %36 = vector.broadcast %35 : vector<1x512xf32> to vector<8x512xf32>
    %37 = arith.mulf %30, %36 : vector<8x512xf32>
    %38 = arith.addf %26, %37 : vector<8x512xf32>
    %39 = vector.extract_strided_slice %3 {offsets = [3, 0, 0], sizes = [1, 8, 4], strides = [1, 1, 1]} : vector<27x8x4xf32> to vector<1x8x4xf32>
    %40 = vector.shape_cast %39 : vector<1x8x4xf32> to vector<8x4xf32>
    %cst_10 = arith.constant dense<0.000000e+00> : vector<8x512xf32>
    %41 = tpu.matmul %40, %1, %cst_10 {dimension_numbers = #tpu.dot_dimension_numbers<[1], [0], [0], [1], [0, 0, 1, 1], [], []>} : vector<8x4xf32>, vector<4x512xf32>, vector<8x512xf32> -> vector<8x512xf32>
    %c65_i32 = arith.constant 65 : i32
    %42 = tpu.dynamic_rotate %41 by %c65_i32 dim 1 : vector<8x512xf32>, i32 -> vector<8x512xf32>
    %43 = vector.extract_strided_slice %2 {offsets = [0, 0], sizes = [1, 512], strides = [1, 1]} : vector<6x512xf32> to vector<1x512xf32>
    %44 = vector.extract_strided_slice %2 {offsets = [4, 0], sizes = [1, 512], strides = [1, 1]} : vector<6x512xf32> to vector<1x512xf32>
    %45 = arith.mulf %43, %44 : vector<1x512xf32>
    %46 = vector.broadcast %45 : vector<1x512xf32> to vector<8x512xf32>
    %47 = arith.mulf %42, %46 : vector<8x512xf32>
    %48 = arith.addf %38, %47 : vector<8x512xf32>
    %49 = vector.extract_strided_slice %3 {offsets = [4, 0, 0], sizes = [1, 8, 4], strides = [1, 1, 1]} : vector<27x8x4xf32> to vector<1x8x4xf32>
    %50 = vector.shape_cast %49 : vector<1x8x4xf32> to vector<8x4xf32>
    %cst_11 = arith.constant dense<0.000000e+00> : vector<8x512xf32>
    %51 = tpu.matmul %50, %1, %cst_11 {dimension_numbers = #tpu.dot_dimension_numbers<[1], [0], [0], [1], [0, 0, 1, 1], [], []>} : vector<8x4xf32>, vector<4x512xf32>, vector<8x512xf32> -> vector<8x512xf32>
    %c64_i32 = arith.constant 64 : i32
    %52 = tpu.dynamic_rotate %51 by %c64_i32 dim 1 : vector<8x512xf32>, i32 -> vector<8x512xf32>
    %53 = vector.extract_strided_slice %2 {offsets = [0, 0], sizes = [1, 512], strides = [1, 1]} : vector<6x512xf32> to vector<1x512xf32>
    %54 = vector.broadcast %53 : vector<1x512xf32> to vector<8x512xf32>
    %55 = arith.mulf %52, %54 : vector<8x512xf32>
    %56 = arith.addf %48, %55 : vector<8x512xf32>
    %57 = vector.extract_strided_slice %3 {offsets = [5, 0, 0], sizes = [1, 8, 4], strides = [1, 1, 1]} : vector<27x8x4xf32> to vector<1x8x4xf32>
    %58 = vector.shape_cast %57 : vector<1x8x4xf32> to vector<8x4xf32>
    %cst_12 = arith.constant dense<0.000000e+00> : vector<8x512xf32>
    %59 = tpu.matmul %58, %1, %cst_12 {dimension_numbers = #tpu.dot_dimension_numbers<[1], [0], [0], [1], [0, 0, 1, 1], [], []>} : vector<8x4xf32>, vector<4x512xf32>, vector<8x512xf32> -> vector<8x512xf32>
    %c63_i32 = arith.constant 63 : i32
    %60 = tpu.dynamic_rotate %59 by %c63_i32 dim 1 : vector<8x512xf32>, i32 -> vector<8x512xf32>
    %61 = vector.extract_strided_slice %2 {offsets = [0, 0], sizes = [1, 512], strides = [1, 1]} : vector<6x512xf32> to vector<1x512xf32>
    %62 = vector.extract_strided_slice %2 {offsets = [5, 0], sizes = [1, 512], strides = [1, 1]} : vector<6x512xf32> to vector<1x512xf32>
    %63 = arith.mulf %61, %62 : vector<1x512xf32>
    %64 = vector.broadcast %63 : vector<1x512xf32> to vector<8x512xf32>
    %65 = arith.mulf %60, %64 : vector<8x512xf32>
    %66 = arith.addf %56, %65 : vector<8x512xf32>
    %67 = vector.extract_strided_slice %3 {offsets = [6, 0, 0], sizes = [1, 8, 4], strides = [1, 1, 1]} : vector<27x8x4xf32> to vector<1x8x4xf32>
    %68 = vector.shape_cast %67 : vector<1x8x4xf32> to vector<8x4xf32>
    %cst_13 = arith.constant dense<0.000000e+00> : vector<8x512xf32>
    %69 = tpu.matmul %68, %1, %cst_13 {dimension_numbers = #tpu.dot_dimension_numbers<[1], [0], [0], [1], [0, 0, 1, 1], [], []>} : vector<8x4xf32>, vector<4x512xf32>, vector<8x512xf32> -> vector<8x512xf32>
    %c57_i32 = arith.constant 57 : i32
    %70 = tpu.dynamic_rotate %69 by %c57_i32 dim 1 : vector<8x512xf32>, i32 -> vector<8x512xf32>
    %71 = vector.extract_strided_slice %2 {offsets = [0, 0], sizes = [1, 512], strides = [1, 1]} : vector<6x512xf32> to vector<1x512xf32>
    %72 = vector.extract_strided_slice %2 {offsets = [3, 0], sizes = [1, 512], strides = [1, 1]} : vector<6x512xf32> to vector<1x512xf32>
    %73 = vector.extract_strided_slice %2 {offsets = [4, 0], sizes = [1, 512], strides = [1, 1]} : vector<6x512xf32> to vector<1x512xf32>
    %74 = arith.mulf %71, %72 : vector<1x512xf32>
    %75 = arith.mulf %74, %73 : vector<1x512xf32>
    %76 = vector.broadcast %75 : vector<1x512xf32> to vector<8x512xf32>
    %77 = arith.mulf %70, %76 : vector<8x512xf32>
    %78 = arith.addf %66, %77 : vector<8x512xf32>
    %79 = vector.extract_strided_slice %3 {offsets = [7, 0, 0], sizes = [1, 8, 4], strides = [1, 1, 1]} : vector<27x8x4xf32> to vector<1x8x4xf32>
    %80 = vector.shape_cast %79 : vector<1x8x4xf32> to vector<8x4xf32>
    %cst_14 = arith.constant dense<0.000000e+00> : vector<8x512xf32>
    %81 = tpu.matmul %80, %1, %cst_14 {dimension_numbers = #tpu.dot_dimension_numbers<[1], [0], [0], [1], [0, 0, 1, 1], [], []>} : vector<8x4xf32>, vector<4x512xf32>, vector<8x512xf32> -> vector<8x512xf32>
    %c56_i32 = arith.constant 56 : i32
    %82 = tpu.dynamic_rotate %81 by %c56_i32 dim 1 : vector<8x512xf32>, i32 -> vector<8x512xf32>
    %83 = vector.extract_strided_slice %2 {offsets = [0, 0], sizes = [1, 512], strides = [1, 1]} : vector<6x512xf32> to vector<1x512xf32>
    %84 = vector.extract_strided_slice %2 {offsets = [3, 0], sizes = [1, 512], strides = [1, 1]} : vector<6x512xf32> to vector<1x512xf32>
    %85 = arith.mulf %83, %84 : vector<1x512xf32>
    %86 = vector.broadcast %85 : vector<1x512xf32> to vector<8x512xf32>
    %87 = arith.mulf %82, %86 : vector<8x512xf32>
    %88 = arith.addf %78, %87 : vector<8x512xf32>
    %89 = vector.extract_strided_slice %3 {offsets = [8, 0, 0], sizes = [1, 8, 4], strides = [1, 1, 1]} : vector<27x8x4xf32> to vector<1x8x4xf32>
    %90 = vector.shape_cast %89 : vector<1x8x4xf32> to vector<8x4xf32>
    %cst_15 = arith.constant dense<0.000000e+00> : vector<8x512xf32>
    %91 = tpu.matmul %90, %1, %cst_15 {dimension_numbers = #tpu.dot_dimension_numbers<[1], [0], [0], [1], [0, 0, 1, 1], [], []>} : vector<8x4xf32>, vector<4x512xf32>, vector<8x512xf32> -> vector<8x512xf32>
    %c55_i32 = arith.constant 55 : i32
    %92 = tpu.dynamic_rotate %91 by %c55_i32 dim 1 : vector<8x512xf32>, i32 -> vector<8x512xf32>
    %93 = vector.extract_strided_slice %2 {offsets = [0, 0], sizes = [1, 512], strides = [1, 1]} : vector<6x512xf32> to vector<1x512xf32>
    %94 = vector.extract_strided_slice %2 {offsets = [3, 0], sizes = [1, 512], strides = [1, 1]} : vector<6x512xf32> to vector<1x512xf32>
    %95 = vector.extract_strided_slice %2 {offsets = [5, 0], sizes = [1, 512], strides = [1, 1]} : vector<6x512xf32> to vector<1x512xf32>
    %96 = arith.mulf %93, %94 : vector<1x512xf32>
    %97 = arith.mulf %96, %95 : vector<1x512xf32>
    %98 = vector.broadcast %97 : vector<1x512xf32> to vector<8x512xf32>
    %99 = arith.mulf %92, %98 : vector<8x512xf32>
    %100 = arith.addf %88, %99 : vector<8x512xf32>
    %101 = vector.extract_strided_slice %3 {offsets = [9, 0, 0], sizes = [1, 8, 4], strides = [1, 1, 1]} : vector<27x8x4xf32> to vector<1x8x4xf32>
    %102 = vector.shape_cast %101 : vector<1x8x4xf32> to vector<8x4xf32>
    %cst_16 = arith.constant dense<0.000000e+00> : vector<8x512xf32>
    %103 = tpu.matmul %102, %1, %cst_16 {dimension_numbers = #tpu.dot_dimension_numbers<[1], [0], [0], [1], [0, 0, 1, 1], [], []>} : vector<8x4xf32>, vector<4x512xf32>, vector<8x512xf32> -> vector<8x512xf32>
    %c9_i32 = arith.constant 9 : i32
    %104 = tpu.dynamic_rotate %103 by %c9_i32 dim 1 : vector<8x512xf32>, i32 -> vector<8x512xf32>
    %105 = vector.extract_strided_slice %2 {offsets = [2, 0], sizes = [1, 512], strides = [1, 1]} : vector<6x512xf32> to vector<1x512xf32>
    %106 = vector.extract_strided_slice %2 {offsets = [4, 0], sizes = [1, 512], strides = [1, 1]} : vector<6x512xf32> to vector<1x512xf32>
    %107 = arith.mulf %105, %106 : vector<1x512xf32>
    %108 = vector.broadcast %107 : vector<1x512xf32> to vector<8x512xf32>
    %109 = arith.mulf %104, %108 : vector<8x512xf32>
    %110 = arith.addf %100, %109 : vector<8x512xf32>
    %111 = vector.extract_strided_slice %3 {offsets = [10, 0, 0], sizes = [1, 8, 4], strides = [1, 1, 1]} : vector<27x8x4xf32> to vector<1x8x4xf32>
    %112 = vector.shape_cast %111 : vector<1x8x4xf32> to vector<8x4xf32>
    %cst_17 = arith.constant dense<0.000000e+00> : vector<8x512xf32>
    %113 = tpu.matmul %112, %1, %cst_17 {dimension_numbers = #tpu.dot_dimension_numbers<[1], [0], [0], [1], [0, 0, 1, 1], [], []>} : vector<8x4xf32>, vector<4x512xf32>, vector<8x512xf32> -> vector<8x512xf32>
    %c8_i32 = arith.constant 8 : i32
    %114 = tpu.dynamic_rotate %113 by %c8_i32 dim 1 : vector<8x512xf32>, i32 -> vector<8x512xf32>
    %115 = vector.extract_strided_slice %2 {offsets = [2, 0], sizes = [1, 512], strides = [1, 1]} : vector<6x512xf32> to vector<1x512xf32>
    %116 = vector.broadcast %115 : vector<1x512xf32> to vector<8x512xf32>
    %117 = arith.mulf %114, %116 : vector<8x512xf32>
    %118 = arith.addf %110, %117 : vector<8x512xf32>
    %119 = vector.extract_strided_slice %3 {offsets = [11, 0, 0], sizes = [1, 8, 4], strides = [1, 1, 1]} : vector<27x8x4xf32> to vector<1x8x4xf32>
    %120 = vector.shape_cast %119 : vector<1x8x4xf32> to vector<8x4xf32>
    %cst_18 = arith.constant dense<0.000000e+00> : vector<8x512xf32>
    %121 = tpu.matmul %120, %1, %cst_18 {dimension_numbers = #tpu.dot_dimension_numbers<[1], [0], [0], [1], [0, 0, 1, 1], [], []>} : vector<8x4xf32>, vector<4x512xf32>, vector<8x512xf32> -> vector<8x512xf32>
    %c7_i32 = arith.constant 7 : i32
    %122 = tpu.dynamic_rotate %121 by %c7_i32 dim 1 : vector<8x512xf32>, i32 -> vector<8x512xf32>
    %123 = vector.extract_strided_slice %2 {offsets = [2, 0], sizes = [1, 512], strides = [1, 1]} : vector<6x512xf32> to vector<1x512xf32>
    %124 = vector.extract_strided_slice %2 {offsets = [5, 0], sizes = [1, 512], strides = [1, 1]} : vector<6x512xf32> to vector<1x512xf32>
    %125 = arith.mulf %123, %124 : vector<1x512xf32>
    %126 = vector.broadcast %125 : vector<1x512xf32> to vector<8x512xf32>
    %127 = arith.mulf %122, %126 : vector<8x512xf32>
    %128 = arith.addf %118, %127 : vector<8x512xf32>
    %129 = vector.extract_strided_slice %3 {offsets = [12, 0, 0], sizes = [1, 8, 4], strides = [1, 1, 1]} : vector<27x8x4xf32> to vector<1x8x4xf32>
    %130 = vector.shape_cast %129 : vector<1x8x4xf32> to vector<8x4xf32>
    %cst_19 = arith.constant dense<0.000000e+00> : vector<8x512xf32>
    %131 = tpu.matmul %130, %1, %cst_19 {dimension_numbers = #tpu.dot_dimension_numbers<[1], [0], [0], [1], [0, 0, 1, 1], [], []>} : vector<8x4xf32>, vector<4x512xf32>, vector<8x512xf32> -> vector<8x512xf32>
    %c1_i32 = arith.constant 1 : i32
    %132 = tpu.dynamic_rotate %131 by %c1_i32 dim 1 : vector<8x512xf32>, i32 -> vector<8x512xf32>
    %133 = vector.extract_strided_slice %2 {offsets = [4, 0], sizes = [1, 512], strides = [1, 1]} : vector<6x512xf32> to vector<1x512xf32>
    %134 = vector.broadcast %133 : vector<1x512xf32> to vector<8x512xf32>
    %135 = arith.mulf %132, %134 : vector<8x512xf32>
    %136 = arith.addf %128, %135 : vector<8x512xf32>
    %137 = vector.extract_strided_slice %3 {offsets = [13, 0, 0], sizes = [1, 8, 4], strides = [1, 1, 1]} : vector<27x8x4xf32> to vector<1x8x4xf32>
    %138 = vector.shape_cast %137 : vector<1x8x4xf32> to vector<8x4xf32>
    %cst_20 = arith.constant dense<0.000000e+00> : vector<8x512xf32>
    %139 = tpu.matmul %138, %1, %cst_20 {dimension_numbers = #tpu.dot_dimension_numbers<[1], [0], [0], [1], [0, 0, 1, 1], [], []>} : vector<8x4xf32>, vector<4x512xf32>, vector<8x512xf32> -> vector<8x512xf32>
    %140 = arith.addf %136, %139 : vector<8x512xf32>
    %141 = vector.extract_strided_slice %3 {offsets = [14, 0, 0], sizes = [1, 8, 4], strides = [1, 1, 1]} : vector<27x8x4xf32> to vector<1x8x4xf32>
    %142 = vector.shape_cast %141 : vector<1x8x4xf32> to vector<8x4xf32>
    %cst_21 = arith.constant dense<0.000000e+00> : vector<8x512xf32>
    %143 = tpu.matmul %142, %1, %cst_21 {dimension_numbers = #tpu.dot_dimension_numbers<[1], [0], [0], [1], [0, 0, 1, 1], [], []>} : vector<8x4xf32>, vector<4x512xf32>, vector<8x512xf32> -> vector<8x512xf32>
    %c511_i32 = arith.constant 511 : i32
    %144 = tpu.dynamic_rotate %143 by %c511_i32 dim 1 : vector<8x512xf32>, i32 -> vector<8x512xf32>
    %145 = vector.extract_strided_slice %2 {offsets = [5, 0], sizes = [1, 512], strides = [1, 1]} : vector<6x512xf32> to vector<1x512xf32>
    %146 = vector.broadcast %145 : vector<1x512xf32> to vector<8x512xf32>
    %147 = arith.mulf %144, %146 : vector<8x512xf32>
    %148 = arith.addf %140, %147 : vector<8x512xf32>
    %149 = vector.extract_strided_slice %3 {offsets = [15, 0, 0], sizes = [1, 8, 4], strides = [1, 1, 1]} : vector<27x8x4xf32> to vector<1x8x4xf32>
    %150 = vector.shape_cast %149 : vector<1x8x4xf32> to vector<8x4xf32>
    %cst_22 = arith.constant dense<0.000000e+00> : vector<8x512xf32>
    %151 = tpu.matmul %150, %1, %cst_22 {dimension_numbers = #tpu.dot_dimension_numbers<[1], [0], [0], [1], [0, 0, 1, 1], [], []>} : vector<8x4xf32>, vector<4x512xf32>, vector<8x512xf32> -> vector<8x512xf32>
    %c505_i32 = arith.constant 505 : i32
    %152 = tpu.dynamic_rotate %151 by %c505_i32 dim 1 : vector<8x512xf32>, i32 -> vector<8x512xf32>
    %153 = vector.extract_strided_slice %2 {offsets = [3, 0], sizes = [1, 512], strides = [1, 1]} : vector<6x512xf32> to vector<1x512xf32>
    %154 = vector.extract_strided_slice %2 {offsets = [4, 0], sizes = [1, 512], strides = [1, 1]} : vector<6x512xf32> to vector<1x512xf32>
    %155 = arith.mulf %153, %154 : vector<1x512xf32>
    %156 = vector.broadcast %155 : vector<1x512xf32> to vector<8x512xf32>
    %157 = arith.mulf %152, %156 : vector<8x512xf32>
    %158 = arith.addf %148, %157 : vector<8x512xf32>
    %159 = vector.extract_strided_slice %3 {offsets = [16, 0, 0], sizes = [1, 8, 4], strides = [1, 1, 1]} : vector<27x8x4xf32> to vector<1x8x4xf32>
    %160 = vector.shape_cast %159 : vector<1x8x4xf32> to vector<8x4xf32>
    %cst_23 = arith.constant dense<0.000000e+00> : vector<8x512xf32>
    %161 = tpu.matmul %160, %1, %cst_23 {dimension_numbers = #tpu.dot_dimension_numbers<[1], [0], [0], [1], [0, 0, 1, 1], [], []>} : vector<8x4xf32>, vector<4x512xf32>, vector<8x512xf32> -> vector<8x512xf32>
    %c504_i32 = arith.constant 504 : i32
    %162 = tpu.dynamic_rotate %161 by %c504_i32 dim 1 : vector<8x512xf32>, i32 -> vector<8x512xf32>
    %163 = vector.extract_strided_slice %2 {offsets = [3, 0], sizes = [1, 512], strides = [1, 1]} : vector<6x512xf32> to vector<1x512xf32>
    %164 = vector.broadcast %163 : vector<1x512xf32> to vector<8x512xf32>
    %165 = arith.mulf %162, %164 : vector<8x512xf32>
    %166 = arith.addf %158, %165 : vector<8x512xf32>
    %167 = vector.extract_strided_slice %3 {offsets = [17, 0, 0], sizes = [1, 8, 4], strides = [1, 1, 1]} : vector<27x8x4xf32> to vector<1x8x4xf32>
    %168 = vector.shape_cast %167 : vector<1x8x4xf32> to vector<8x4xf32>
    %cst_24 = arith.constant dense<0.000000e+00> : vector<8x512xf32>
    %169 = tpu.matmul %168, %1, %cst_24 {dimension_numbers = #tpu.dot_dimension_numbers<[1], [0], [0], [1], [0, 0, 1, 1], [], []>} : vector<8x4xf32>, vector<4x512xf32>, vector<8x512xf32> -> vector<8x512xf32>
    %c503_i32 = arith.constant 503 : i32
    %170 = tpu.dynamic_rotate %169 by %c503_i32 dim 1 : vector<8x512xf32>, i32 -> vector<8x512xf32>
    %171 = vector.extract_strided_slice %2 {offsets = [3, 0], sizes = [1, 512], strides = [1, 1]} : vector<6x512xf32> to vector<1x512xf32>
    %172 = vector.extract_strided_slice %2 {offsets = [5, 0], sizes = [1, 512], strides = [1, 1]} : vector<6x512xf32> to vector<1x512xf32>
    %173 = arith.mulf %171, %172 : vector<1x512xf32>
    %174 = vector.broadcast %173 : vector<1x512xf32> to vector<8x512xf32>
    %175 = arith.mulf %170, %174 : vector<8x512xf32>
    %176 = arith.addf %166, %175 : vector<8x512xf32>
    %177 = vector.extract_strided_slice %3 {offsets = [18, 0, 0], sizes = [1, 8, 4], strides = [1, 1, 1]} : vector<27x8x4xf32> to vector<1x8x4xf32>
    %178 = vector.shape_cast %177 : vector<1x8x4xf32> to vector<8x4xf32>
    %cst_25 = arith.constant dense<0.000000e+00> : vector<8x512xf32>
    %179 = tpu.matmul %178, %1, %cst_25 {dimension_numbers = #tpu.dot_dimension_numbers<[1], [0], [0], [1], [0, 0, 1, 1], [], []>} : vector<8x4xf32>, vector<4x512xf32>, vector<8x512xf32> -> vector<8x512xf32>
    %c457_i32 = arith.constant 457 : i32
    %180 = tpu.dynamic_rotate %179 by %c457_i32 dim 1 : vector<8x512xf32>, i32 -> vector<8x512xf32>
    %181 = vector.extract_strided_slice %2 {offsets = [1, 0], sizes = [1, 512], strides = [1, 1]} : vector<6x512xf32> to vector<1x512xf32>
    %182 = vector.extract_strided_slice %2 {offsets = [2, 0], sizes = [1, 512], strides = [1, 1]} : vector<6x512xf32> to vector<1x512xf32>
    %183 = vector.extract_strided_slice %2 {offsets = [4, 0], sizes = [1, 512], strides = [1, 1]} : vector<6x512xf32> to vector<1x512xf32>
    %184 = arith.mulf %181, %182 : vector<1x512xf32>
    %185 = arith.mulf %184, %183 : vector<1x512xf32>
    %186 = vector.broadcast %185 : vector<1x512xf32> to vector<8x512xf32>
    %187 = arith.mulf %180, %186 : vector<8x512xf32>
    %188 = arith.addf %176, %187 : vector<8x512xf32>
    %189 = vector.extract_strided_slice %3 {offsets = [19, 0, 0], sizes = [1, 8, 4], strides = [1, 1, 1]} : vector<27x8x4xf32> to vector<1x8x4xf32>
    %190 = vector.shape_cast %189 : vector<1x8x4xf32> to vector<8x4xf32>
    %cst_26 = arith.constant dense<0.000000e+00> : vector<8x512xf32>
    %191 = tpu.matmul %190, %1, %cst_26 {dimension_numbers = #tpu.dot_dimension_numbers<[1], [0], [0], [1], [0, 0, 1, 1], [], []>} : vector<8x4xf32>, vector<4x512xf32>, vector<8x512xf32> -> vector<8x512xf32>
    %c456_i32 = arith.constant 456 : i32
    %192 = tpu.dynamic_rotate %191 by %c456_i32 dim 1 : vector<8x512xf32>, i32 -> vector<8x512xf32>
    %193 = vector.extract_strided_slice %2 {offsets = [1, 0], sizes = [1, 512], strides = [1, 1]} : vector<6x512xf32> to vector<1x512xf32>
    %194 = vector.extract_strided_slice %2 {offsets = [2, 0], sizes = [1, 512], strides = [1, 1]} : vector<6x512xf32> to vector<1x512xf32>
    %195 = arith.mulf %193, %194 : vector<1x512xf32>
    %196 = vector.broadcast %195 : vector<1x512xf32> to vector<8x512xf32>
    %197 = arith.mulf %192, %196 : vector<8x512xf32>
    %198 = arith.addf %188, %197 : vector<8x512xf32>
    %199 = vector.extract_strided_slice %3 {offsets = [20, 0, 0], sizes = [1, 8, 4], strides = [1, 1, 1]} : vector<27x8x4xf32> to vector<1x8x4xf32>
    %200 = vector.shape_cast %199 : vector<1x8x4xf32> to vector<8x4xf32>
    %cst_27 = arith.constant dense<0.000000e+00> : vector<8x512xf32>
    %201 = tpu.matmul %200, %1, %cst_27 {dimension_numbers = #tpu.dot_dimension_numbers<[1], [0], [0], [1], [0, 0, 1, 1], [], []>} : vector<8x4xf32>, vector<4x512xf32>, vector<8x512xf32> -> vector<8x512xf32>
    %c455_i32 = arith.constant 455 : i32
    %202 = tpu.dynamic_rotate %201 by %c455_i32 dim 1 : vector<8x512xf32>, i32 -> vector<8x512xf32>
    %203 = vector.extract_strided_slice %2 {offsets = [1, 0], sizes = [1, 512], strides = [1, 1]} : vector<6x512xf32> to vector<1x512xf32>
    %204 = vector.extract_strided_slice %2 {offsets = [2, 0], sizes = [1, 512], strides = [1, 1]} : vector<6x512xf32> to vector<1x512xf32>
    %205 = vector.extract_strided_slice %2 {offsets = [5, 0], sizes = [1, 512], strides = [1, 1]} : vector<6x512xf32> to vector<1x512xf32>
    %206 = arith.mulf %203, %204 : vector<1x512xf32>
    %207 = arith.mulf %206, %205 : vector<1x512xf32>
    %208 = vector.broadcast %207 : vector<1x512xf32> to vector<8x512xf32>
    %209 = arith.mulf %202, %208 : vector<8x512xf32>
    %210 = arith.addf %198, %209 : vector<8x512xf32>
    %211 = vector.extract_strided_slice %3 {offsets = [21, 0, 0], sizes = [1, 8, 4], strides = [1, 1, 1]} : vector<27x8x4xf32> to vector<1x8x4xf32>
    %212 = vector.shape_cast %211 : vector<1x8x4xf32> to vector<8x4xf32>
    %cst_28 = arith.constant dense<0.000000e+00> : vector<8x512xf32>
    %213 = tpu.matmul %212, %1, %cst_28 {dimension_numbers = #tpu.dot_dimension_numbers<[1], [0], [0], [1], [0, 0, 1, 1], [], []>} : vector<8x4xf32>, vector<4x512xf32>, vector<8x512xf32> -> vector<8x512xf32>
    %c449_i32 = arith.constant 449 : i32
    %214 = tpu.dynamic_rotate %213 by %c449_i32 dim 1 : vector<8x512xf32>, i32 -> vector<8x512xf32>
    %215 = vector.extract_strided_slice %2 {offsets = [1, 0], sizes = [1, 512], strides = [1, 1]} : vector<6x512xf32> to vector<1x512xf32>
    %216 = vector.extract_strided_slice %2 {offsets = [4, 0], sizes = [1, 512], strides = [1, 1]} : vector<6x512xf32> to vector<1x512xf32>
    %217 = arith.mulf %215, %216 : vector<1x512xf32>
    %218 = vector.broadcast %217 : vector<1x512xf32> to vector<8x512xf32>
    %219 = arith.mulf %214, %218 : vector<8x512xf32>
    %220 = arith.addf %210, %219 : vector<8x512xf32>
    %221 = vector.extract_strided_slice %3 {offsets = [22, 0, 0], sizes = [1, 8, 4], strides = [1, 1, 1]} : vector<27x8x4xf32> to vector<1x8x4xf32>
    %222 = vector.shape_cast %221 : vector<1x8x4xf32> to vector<8x4xf32>
    %cst_29 = arith.constant dense<0.000000e+00> : vector<8x512xf32>
    %223 = tpu.matmul %222, %1, %cst_29 {dimension_numbers = #tpu.dot_dimension_numbers<[1], [0], [0], [1], [0, 0, 1, 1], [], []>} : vector<8x4xf32>, vector<4x512xf32>, vector<8x512xf32> -> vector<8x512xf32>
    %c448_i32 = arith.constant 448 : i32
    %224 = tpu.dynamic_rotate %223 by %c448_i32 dim 1 : vector<8x512xf32>, i32 -> vector<8x512xf32>
    %225 = vector.extract_strided_slice %2 {offsets = [1, 0], sizes = [1, 512], strides = [1, 1]} : vector<6x512xf32> to vector<1x512xf32>
    %226 = vector.broadcast %225 : vector<1x512xf32> to vector<8x512xf32>
    %227 = arith.mulf %224, %226 : vector<8x512xf32>
    %228 = arith.addf %220, %227 : vector<8x512xf32>
    %229 = vector.extract_strided_slice %3 {offsets = [23, 0, 0], sizes = [1, 8, 4], strides = [1, 1, 1]} : vector<27x8x4xf32> to vector<1x8x4xf32>
    %230 = vector.shape_cast %229 : vector<1x8x4xf32> to vector<8x4xf32>
    %cst_30 = arith.constant dense<0.000000e+00> : vector<8x512xf32>
    %231 = tpu.matmul %230, %1, %cst_30 {dimension_numbers = #tpu.dot_dimension_numbers<[1], [0], [0], [1], [0, 0, 1, 1], [], []>} : vector<8x4xf32>, vector<4x512xf32>, vector<8x512xf32> -> vector<8x512xf32>
    %c447_i32 = arith.constant 447 : i32
    %232 = tpu.dynamic_rotate %231 by %c447_i32 dim 1 : vector<8x512xf32>, i32 -> vector<8x512xf32>
    %233 = vector.extract_strided_slice %2 {offsets = [1, 0], sizes = [1, 512], strides = [1, 1]} : vector<6x512xf32> to vector<1x512xf32>
    %234 = vector.extract_strided_slice %2 {offsets = [5, 0], sizes = [1, 512], strides = [1, 1]} : vector<6x512xf32> to vector<1x512xf32>
    %235 = arith.mulf %233, %234 : vector<1x512xf32>
    %236 = vector.broadcast %235 : vector<1x512xf32> to vector<8x512xf32>
    %237 = arith.mulf %232, %236 : vector<8x512xf32>
    %238 = arith.addf %228, %237 : vector<8x512xf32>
    %239 = vector.extract_strided_slice %3 {offsets = [24, 0, 0], sizes = [1, 8, 4], strides = [1, 1, 1]} : vector<27x8x4xf32> to vector<1x8x4xf32>
    %240 = vector.shape_cast %239 : vector<1x8x4xf32> to vector<8x4xf32>
    %cst_31 = arith.constant dense<0.000000e+00> : vector<8x512xf32>
    %241 = tpu.matmul %240, %1, %cst_31 {dimension_numbers = #tpu.dot_dimension_numbers<[1], [0], [0], [1], [0, 0, 1, 1], [], []>} : vector<8x4xf32>, vector<4x512xf32>, vector<8x512xf32> -> vector<8x512xf32>
    %c441_i32 = arith.constant 441 : i32
    %242 = tpu.dynamic_rotate %241 by %c441_i32 dim 1 : vector<8x512xf32>, i32 -> vector<8x512xf32>
    %243 = vector.extract_strided_slice %2 {offsets = [1, 0], sizes = [1, 512], strides = [1, 1]} : vector<6x512xf32> to vector<1x512xf32>
    %244 = vector.extract_strided_slice %2 {offsets = [3, 0], sizes = [1, 512], strides = [1, 1]} : vector<6x512xf32> to vector<1x512xf32>
    %245 = vector.extract_strided_slice %2 {offsets = [4, 0], sizes = [1, 512], strides = [1, 1]} : vector<6x512xf32> to vector<1x512xf32>
    %246 = arith.mulf %243, %244 : vector<1x512xf32>
    %247 = arith.mulf %246, %245 : vector<1x512xf32>
    %248 = vector.broadcast %247 : vector<1x512xf32> to vector<8x512xf32>
    %249 = arith.mulf %242, %248 : vector<8x512xf32>
    %250 = arith.addf %238, %249 : vector<8x512xf32>
    %251 = vector.extract_strided_slice %3 {offsets = [25, 0, 0], sizes = [1, 8, 4], strides = [1, 1, 1]} : vector<27x8x4xf32> to vector<1x8x4xf32>
    %252 = vector.shape_cast %251 : vector<1x8x4xf32> to vector<8x4xf32>
    %cst_32 = arith.constant dense<0.000000e+00> : vector<8x512xf32>
    %253 = tpu.matmul %252, %1, %cst_32 {dimension_numbers = #tpu.dot_dimension_numbers<[1], [0], [0], [1], [0, 0, 1, 1], [], []>} : vector<8x4xf32>, vector<4x512xf32>, vector<8x512xf32> -> vector<8x512xf32>
    %c440_i32 = arith.constant 440 : i32
    %254 = tpu.dynamic_rotate %253 by %c440_i32 dim 1 : vector<8x512xf32>, i32 -> vector<8x512xf32>
    %255 = vector.extract_strided_slice %2 {offsets = [1, 0], sizes = [1, 512], strides = [1, 1]} : vector<6x512xf32> to vector<1x512xf32>
    %256 = vector.extract_strided_slice %2 {offsets = [3, 0], sizes = [1, 512], strides = [1, 1]} : vector<6x512xf32> to vector<1x512xf32>
    %257 = arith.mulf %255, %256 : vector<1x512xf32>
    %258 = vector.broadcast %257 : vector<1x512xf32> to vector<8x512xf32>
    %259 = arith.mulf %254, %258 : vector<8x512xf32>
    %260 = arith.addf %250, %259 : vector<8x512xf32>
    %261 = vector.extract_strided_slice %3 {offsets = [26, 0, 0], sizes = [1, 8, 4], strides = [1, 1, 1]} : vector<27x8x4xf32> to vector<1x8x4xf32>
    %262 = vector.shape_cast %261 : vector<1x8x4xf32> to vector<8x4xf32>
    %cst_33 = arith.constant dense<0.000000e+00> : vector<8x512xf32>
    %263 = tpu.matmul %262, %1, %cst_33 {dimension_numbers = #tpu.dot_dimension_numbers<[1], [0], [0], [1], [0, 0, 1, 1], [], []>} : vector<8x4xf32>, vector<4x512xf32>, vector<8x512xf32> -> vector<8x512xf32>
    %c439_i32 = arith.constant 439 : i32
    %264 = tpu.dynamic_rotate %263 by %c439_i32 dim 1 : vector<8x512xf32>, i32 -> vector<8x512xf32>
    %265 = vector.extract_strided_slice %2 {offsets = [1, 0], sizes = [1, 512], strides = [1, 1]} : vector<6x512xf32> to vector<1x512xf32>
    %266 = vector.extract_strided_slice %2 {offsets = [3, 0], sizes = [1, 512], strides = [1, 1]} : vector<6x512xf32> to vector<1x512xf32>
    %267 = vector.extract_strided_slice %2 {offsets = [5, 0], sizes = [1, 512], strides = [1, 1]} : vector<6x512xf32> to vector<1x512xf32>
    %268 = arith.mulf %265, %266 : vector<1x512xf32>
    %269 = arith.mulf %268, %267 : vector<1x512xf32>
    %270 = vector.broadcast %269 : vector<1x512xf32> to vector<8x512xf32>
    %271 = arith.mulf %264, %270 : vector<8x512xf32>
    %272 = arith.addf %260, %271 : vector<8x512xf32>
    %c0_34 = arith.constant 0 : index
    %c0_35 = arith.constant 0 : index
    %273 = vector.load %arg3[%c0_34, %c0_35] : memref<8x1xf32, #tpu.memory_space<vmem>>, vector<8x1xf32>
    %274 = vector.broadcast %273 : vector<8x1xf32> to vector<8x512xf32>
    %275 = arith.addf %272, %274 : vector<8x512xf32>
    %c0_36 = arith.constant 0 : index
    %c0_37 = arith.constant 0 : index
    %c0_38 = arith.constant 0 : index
    %276 = vector.load %arg5[%c0_36, %c0_37, %c0_38] : memref<1x8x512xf32, #tpu.memory_space<vmem>>, vector<1x8x512xf32>
    %277 = vector.shape_cast %276 : vector<1x8x512xf32> to vector<8x512xf32>
    %278 = arith.addf %275, %277 : vector<8x512xf32>
    %c0_39 = arith.constant 0 : index
    %c0_40 = arith.constant 0 : index
    %c0_41 = arith.constant 0 : index
    %279 = vector.load %arg6[%c0_39, %c0_40, %c0_41] : memref<1x8x512xf32, #tpu.memory_space<vmem>>, vector<1x8x512xf32>
    %280 = vector.shape_cast %279 : vector<1x8x512xf32> to vector<8x512xf32>
    %281 = vector.shape_cast %278 : vector<8x512xf32> to vector<1x8x512xf32>
    tpu.vector_store %arg6[%c0_39, %c0_40, %c0_41], %281 {strides = array<i32>} : memref<1x8x512xf32, #tpu.memory_space<vmem>>, vector<1x8x512xf32>,
    %cst_42 = arith.constant dense<0.000000e+00> : vector<8xf32>
    %282 = vector.multi_reduction <add>, %278, %cst_42 [1] : vector<8x512xf32> to vector<8xf32>
    %283 = vector.shape_cast %282 : vector<8xf32> to vector<8x1xf32>
    %cst_43 = arith.constant 0.001953125 : f32
    %284 = vector.broadcast %cst_43 : f32 to vector<8x1xf32>
    %285 = arith.mulf %283, %284 : vector<8x1xf32>
    %286 = vector.broadcast %285 : vector<8x1xf32> to vector<8x512xf32>
    %287 = arith.subf %278, %286 : vector<8x512xf32>
    %c0_44 = arith.constant 0 : index
    %c0_45 = arith.constant 0 : index
    %c0_46 = arith.constant 0 : index
    %288 = vector.load %arg7[%c0_44, %c0_45, %c0_46] : memref<1x8x1xf32, #tpu.memory_space<vmem>>, vector<1x8x1xf32>
    %289 = vector.shape_cast %288 : vector<1x8x1xf32> to vector<8x1xf32>
    %290 = vector.shape_cast %283 : vector<8x1xf32> to vector<1x8x1xf32>
    tpu.vector_store %arg7[%c0_44, %c0_45, %c0_46], %290 {strides = array<i32>} : memref<1x8x1xf32, #tpu.memory_space<vmem>>, vector<1x8x1xf32>,
    %291 = arith.mulf %287, %287 : vector<8x512xf32>
    %cst_47 = arith.constant dense<0.000000e+00> : vector<8xf32>
    %292 = vector.multi_reduction <add>, %291, %cst_47 [1] : vector<8x512xf32> to vector<8xf32>
    %293 = vector.shape_cast %292 : vector<8xf32> to vector<8x1xf32>
    %c0_48 = arith.constant 0 : index
    %c0_49 = arith.constant 0 : index
    %c0_50 = arith.constant 0 : index
    %294 = vector.load %arg8[%c0_48, %c0_49, %c0_50] : memref<1x8x1xf32, #tpu.memory_space<vmem>>, vector<1x8x1xf32>
    %295 = vector.shape_cast %294 : vector<1x8x1xf32> to vector<8x1xf32>
    %296 = vector.shape_cast %293 : vector<8x1xf32> to vector<1x8x1xf32>
    tpu.vector_store %arg8[%c0_48, %c0_49, %c0_50], %296 {strides = array<i32>} : memref<1x8x1xf32, #tpu.memory_space<vmem>>, vector<1x8x1xf32>,
    return
  }
  func.func @transform_0(%arg0: i32) -> (i32, i32, i32) {
    %c0_i32 = arith.constant 0 : i32
    %c0_i32_0 = arith.constant 0 : i32
    %c0_i32_1 = arith.constant 0 : i32
    return %arg0, %c0_i32, %c0_i32_0 : i32, i32, i32
  }
  func.func @transform_1(%arg0: i32) -> (i32, i32, i32) {
    %c0_i32 = arith.constant 0 : i32
    %c0_i32_0 = arith.constant 0 : i32
    %c0_i32_1 = arith.constant 0 : i32
    %c0_i32_2 = arith.constant 0 : i32
    return %c0_i32, %c0_i32_0, %c0_i32_1 : i32, i32, i32
  }
  func.func @transform_2(%arg0: i32) -> (i32, i32) {
    %c0_i32 = arith.constant 0 : i32
    %c0_i32_0 = arith.constant 0 : i32
    %c0_i32_1 = arith.constant 0 : i32
    return %c0_i32, %c0_i32_0 : i32, i32
  }
  func.func @transform_3(%arg0: i32) -> (i32, i32) {
    %c0_i32 = arith.constant 0 : i32
    %c0_i32_0 = arith.constant 0 : i32
    %c0_i32_1 = arith.constant 0 : i32
    return %c0_i32, %c0_i32_0 : i32, i32
  }
  func.func @transform_4(%arg0: i32) -> (i32, i32, i32) {
    %c0_i32 = arith.constant 0 : i32
    %c0_i32_0 = arith.constant 0 : i32
    %c0_i32_1 = arith.constant 0 : i32
    return %arg0, %c0_i32, %c0_i32_0 : i32, i32, i32
  }
  func.func @transform_5(%arg0: i32) -> (i32, i32, i32) {
    %c0_i32 = arith.constant 0 : i32
    %c0_i32_0 = arith.constant 0 : i32
    %c0_i32_1 = arith.constant 0 : i32
    return %arg0, %c0_i32, %c0_i32_0 : i32, i32, i32
  }
  func.func @transform_6(%arg0: i32) -> (i32, i32, i32) {
    %c0_i32 = arith.constant 0 : i32
    %c0_i32_0 = arith.constant 0 : i32
    %c0_i32_1 = arith.constant 0 : i32
    return %arg0, %c0_i32, %c0_i32_0 : i32, i32, i32
  }
  func.func @transform_7(%arg0: i32) -> (i32, i32, i32) {
    %c0_i32 = arith.constant 0 : i32
    %c0_i32_0 = arith.constant 0 : i32
    %c0_i32_1 = arith.constant 0 : i32
    return %arg0, %c0_i32, %c0_i32_0 : i32, i32, i32
  }
}

module attributes {stable_mosaic.version = 11 : i64} {
  func.func @_bn_mask_softmax_kernel(%arg0: i32, %arg1: memref<1x8x512xf32, #tpu.memory_space<vmem>>, %arg2: memref<8x1xf32, #tpu.memory_space<vmem>>, %arg3: memref<8x1xf32, #tpu.memory_space<vmem>>, %arg4: memref<27x8xf32, #tpu.memory_space<vmem>>, %arg5: memref<1x1xf32, #tpu.memory_space<vmem>>, %arg6: memref<6x512xf32, #tpu.memory_space<vmem>>, %arg7: memref<1x1x512xf32, #tpu.memory_space<vmem>>) attributes {dimension_semantics = [#tpu.dimension_semantics<parallel>], iteration_bounds = array<i64: 2>, scalar_prefetch = 0 : i64, scratch_operands = 0 : i64, tpu.core_type = #tpu.core_type<tc>, window_params = [{transform_indices = @transform_0, window_bounds = array<i64: 1, 8, 512>}, {pipeline_mode = #tpu.pipeline_mode<synchronous>, transform_indices = @transform_1, window_bounds = array<i64: 8, 1>}, {pipeline_mode = #tpu.pipeline_mode<synchronous>, transform_indices = @transform_2, window_bounds = array<i64: 8, 1>}, {pipeline_mode = #tpu.pipeline_mode<synchronous>, transform_indices = @transform_3, window_bounds = array<i64: 27, 8>}, {pipeline_mode = #tpu.pipeline_mode<synchronous>, transform_indices = @transform_4, window_bounds = array<i64: 1, 1>}, {pipeline_mode = #tpu.pipeline_mode<synchronous>, transform_indices = @transform_5, window_bounds = array<i64: 6, 512>}, {transform_indices = @transform_6, window_bounds = array<i64: 1, 1, 512>}]} {
    %c0 = arith.constant 0 : index
    %c0_0 = arith.constant 0 : index
    %c0_1 = arith.constant 0 : index
    %0 = vector.load %arg1[%c0, %c0_0, %c0_1] : memref<1x8x512xf32, #tpu.memory_space<vmem>>, vector<1x8x512xf32>
    %1 = vector.shape_cast %0 : vector<1x8x512xf32> to vector<8x512xf32>
    %c0_2 = arith.constant 0 : index
    %c0_3 = arith.constant 0 : index
    %2 = vector.load %arg2[%c0_2, %c0_3] : memref<8x1xf32, #tpu.memory_space<vmem>>, vector<8x1xf32>
    %3 = vector.broadcast %2 : vector<8x1xf32> to vector<8x512xf32>
    %4 = arith.mulf %1, %3 : vector<8x512xf32>
    %c0_4 = arith.constant 0 : index
    %c0_5 = arith.constant 0 : index
    %5 = vector.load %arg3[%c0_4, %c0_5] : memref<8x1xf32, #tpu.memory_space<vmem>>, vector<8x1xf32>
    %6 = vector.broadcast %5 : vector<8x1xf32> to vector<8x512xf32>
    %7 = arith.addf %4, %6 : vector<8x512xf32>
    %cst = arith.constant 0.000000e+00 : f32
    %8 = vector.broadcast %cst : f32 to vector<8x512xf32>
    %9 = arith.maximumf %7, %8 : vector<8x512xf32>
    %c0_6 = arith.constant 0 : index
    %c0_7 = arith.constant 0 : index
    %10 = vector.load %arg4[%c0_6, %c0_7] : memref<27x8xf32, #tpu.memory_space<vmem>>, vector<27x8xf32>
    %cst_8 = arith.constant dense<0.000000e+00> : vector<27x512xf32>
    %11 = tpu.matmul %10, %9, %cst_8 {dimension_numbers = #tpu.dot_dimension_numbers<[1], [0], [0], [1], [0, 0, 1, 1], [], []>} : vector<27x8xf32>, vector<8x512xf32>, vector<27x512xf32> -> vector<27x512xf32>
    %c0_9 = arith.constant 0 : index
    %c0_10 = arith.constant 0 : index
    %12 = vector.load %arg6[%c0_9, %c0_10] : memref<6x512xf32, #tpu.memory_space<vmem>>, vector<6x512xf32>
    %cst_11 = arith.constant 0.000000e+00 : f32
    %13 = vector.broadcast %cst_11 : f32 to vector<1x512xf32>
    %c0_12 = arith.constant 0 : index
    %c0_13 = arith.constant 0 : index
    %14 = vector.load %arg5[%c0_12, %c0_13] : memref<1x1xf32, #tpu.memory_space<vmem>>, vector<1x1xf32>
    %15 = vector.broadcast %14 : vector<1x1xf32> to vector<1x512xf32>
    %16 = arith.addf %13, %15 : vector<1x512xf32>
    %17 = vector.extract_strided_slice %11 {offsets = [0, 0], sizes = [1, 512], strides = [1, 1]} : vector<27x512xf32> to vector<1x512xf32>
    %c73_i32 = arith.constant 73 : i32
    %18 = tpu.dynamic_rotate %17 by %c73_i32 dim 1 : vector<1x512xf32>, i32 -> vector<1x512xf32>
    %19 = vector.extract_strided_slice %12 {offsets = [0, 0], sizes = [1, 512], strides = [1, 1]} : vector<6x512xf32> to vector<1x512xf32>
    %20 = vector.extract_strided_slice %12 {offsets = [2, 0], sizes = [1, 512], strides = [1, 1]} : vector<6x512xf32> to vector<1x512xf32>
    %21 = vector.extract_strided_slice %12 {offsets = [4, 0], sizes = [1, 512], strides = [1, 1]} : vector<6x512xf32> to vector<1x512xf32>
    %22 = arith.mulf %19, %20 : vector<1x512xf32>
    %23 = arith.mulf %22, %21 : vector<1x512xf32>
    %24 = arith.mulf %18, %23 : vector<1x512xf32>
    %25 = arith.addf %16, %24 : vector<1x512xf32>
    %26 = vector.extract_strided_slice %11 {offsets = [1, 0], sizes = [1, 512], strides = [1, 1]} : vector<27x512xf32> to vector<1x512xf32>
    %c72_i32 = arith.constant 72 : i32
    %27 = tpu.dynamic_rotate %26 by %c72_i32 dim 1 : vector<1x512xf32>, i32 -> vector<1x512xf32>
    %28 = vector.extract_strided_slice %12 {offsets = [0, 0], sizes = [1, 512], strides = [1, 1]} : vector<6x512xf32> to vector<1x512xf32>
    %29 = vector.extract_strided_slice %12 {offsets = [2, 0], sizes = [1, 512], strides = [1, 1]} : vector<6x512xf32> to vector<1x512xf32>
    %30 = arith.mulf %28, %29 : vector<1x512xf32>
    %31 = arith.mulf %27, %30 : vector<1x512xf32>
    %32 = arith.addf %25, %31 : vector<1x512xf32>
    %33 = vector.extract_strided_slice %11 {offsets = [2, 0], sizes = [1, 512], strides = [1, 1]} : vector<27x512xf32> to vector<1x512xf32>
    %c71_i32 = arith.constant 71 : i32
    %34 = tpu.dynamic_rotate %33 by %c71_i32 dim 1 : vector<1x512xf32>, i32 -> vector<1x512xf32>
    %35 = vector.extract_strided_slice %12 {offsets = [0, 0], sizes = [1, 512], strides = [1, 1]} : vector<6x512xf32> to vector<1x512xf32>
    %36 = vector.extract_strided_slice %12 {offsets = [2, 0], sizes = [1, 512], strides = [1, 1]} : vector<6x512xf32> to vector<1x512xf32>
    %37 = vector.extract_strided_slice %12 {offsets = [5, 0], sizes = [1, 512], strides = [1, 1]} : vector<6x512xf32> to vector<1x512xf32>
    %38 = arith.mulf %35, %36 : vector<1x512xf32>
    %39 = arith.mulf %38, %37 : vector<1x512xf32>
    %40 = arith.mulf %34, %39 : vector<1x512xf32>
    %41 = arith.addf %32, %40 : vector<1x512xf32>
    %42 = vector.extract_strided_slice %11 {offsets = [3, 0], sizes = [1, 512], strides = [1, 1]} : vector<27x512xf32> to vector<1x512xf32>
    %c65_i32 = arith.constant 65 : i32
    %43 = tpu.dynamic_rotate %42 by %c65_i32 dim 1 : vector<1x512xf32>, i32 -> vector<1x512xf32>
    %44 = vector.extract_strided_slice %12 {offsets = [0, 0], sizes = [1, 512], strides = [1, 1]} : vector<6x512xf32> to vector<1x512xf32>
    %45 = vector.extract_strided_slice %12 {offsets = [4, 0], sizes = [1, 512], strides = [1, 1]} : vector<6x512xf32> to vector<1x512xf32>
    %46 = arith.mulf %44, %45 : vector<1x512xf32>
    %47 = arith.mulf %43, %46 : vector<1x512xf32>
    %48 = arith.addf %41, %47 : vector<1x512xf32>
    %49 = vector.extract_strided_slice %11 {offsets = [4, 0], sizes = [1, 512], strides = [1, 1]} : vector<27x512xf32> to vector<1x512xf32>
    %c64_i32 = arith.constant 64 : i32
    %50 = tpu.dynamic_rotate %49 by %c64_i32 dim 1 : vector<1x512xf32>, i32 -> vector<1x512xf32>
    %51 = vector.extract_strided_slice %12 {offsets = [0, 0], sizes = [1, 512], strides = [1, 1]} : vector<6x512xf32> to vector<1x512xf32>
    %52 = arith.mulf %50, %51 : vector<1x512xf32>
    %53 = arith.addf %48, %52 : vector<1x512xf32>
    %54 = vector.extract_strided_slice %11 {offsets = [5, 0], sizes = [1, 512], strides = [1, 1]} : vector<27x512xf32> to vector<1x512xf32>
    %c63_i32 = arith.constant 63 : i32
    %55 = tpu.dynamic_rotate %54 by %c63_i32 dim 1 : vector<1x512xf32>, i32 -> vector<1x512xf32>
    %56 = vector.extract_strided_slice %12 {offsets = [0, 0], sizes = [1, 512], strides = [1, 1]} : vector<6x512xf32> to vector<1x512xf32>
    %57 = vector.extract_strided_slice %12 {offsets = [5, 0], sizes = [1, 512], strides = [1, 1]} : vector<6x512xf32> to vector<1x512xf32>
    %58 = arith.mulf %56, %57 : vector<1x512xf32>
    %59 = arith.mulf %55, %58 : vector<1x512xf32>
    %60 = arith.addf %53, %59 : vector<1x512xf32>
    %61 = vector.extract_strided_slice %11 {offsets = [6, 0], sizes = [1, 512], strides = [1, 1]} : vector<27x512xf32> to vector<1x512xf32>
    %c57_i32 = arith.constant 57 : i32
    %62 = tpu.dynamic_rotate %61 by %c57_i32 dim 1 : vector<1x512xf32>, i32 -> vector<1x512xf32>
    %63 = vector.extract_strided_slice %12 {offsets = [0, 0], sizes = [1, 512], strides = [1, 1]} : vector<6x512xf32> to vector<1x512xf32>
    %64 = vector.extract_strided_slice %12 {offsets = [3, 0], sizes = [1, 512], strides = [1, 1]} : vector<6x512xf32> to vector<1x512xf32>
    %65 = vector.extract_strided_slice %12 {offsets = [4, 0], sizes = [1, 512], strides = [1, 1]} : vector<6x512xf32> to vector<1x512xf32>
    %66 = arith.mulf %63, %64 : vector<1x512xf32>
    %67 = arith.mulf %66, %65 : vector<1x512xf32>
    %68 = arith.mulf %62, %67 : vector<1x512xf32>
    %69 = arith.addf %60, %68 : vector<1x512xf32>
    %70 = vector.extract_strided_slice %11 {offsets = [7, 0], sizes = [1, 512], strides = [1, 1]} : vector<27x512xf32> to vector<1x512xf32>
    %c56_i32 = arith.constant 56 : i32
    %71 = tpu.dynamic_rotate %70 by %c56_i32 dim 1 : vector<1x512xf32>, i32 -> vector<1x512xf32>
    %72 = vector.extract_strided_slice %12 {offsets = [0, 0], sizes = [1, 512], strides = [1, 1]} : vector<6x512xf32> to vector<1x512xf32>
    %73 = vector.extract_strided_slice %12 {offsets = [3, 0], sizes = [1, 512], strides = [1, 1]} : vector<6x512xf32> to vector<1x512xf32>
    %74 = arith.mulf %72, %73 : vector<1x512xf32>
    %75 = arith.mulf %71, %74 : vector<1x512xf32>
    %76 = arith.addf %69, %75 : vector<1x512xf32>
    %77 = vector.extract_strided_slice %11 {offsets = [8, 0], sizes = [1, 512], strides = [1, 1]} : vector<27x512xf32> to vector<1x512xf32>
    %c55_i32 = arith.constant 55 : i32
    %78 = tpu.dynamic_rotate %77 by %c55_i32 dim 1 : vector<1x512xf32>, i32 -> vector<1x512xf32>
    %79 = vector.extract_strided_slice %12 {offsets = [0, 0], sizes = [1, 512], strides = [1, 1]} : vector<6x512xf32> to vector<1x512xf32>
    %80 = vector.extract_strided_slice %12 {offsets = [3, 0], sizes = [1, 512], strides = [1, 1]} : vector<6x512xf32> to vector<1x512xf32>
    %81 = vector.extract_strided_slice %12 {offsets = [5, 0], sizes = [1, 512], strides = [1, 1]} : vector<6x512xf32> to vector<1x512xf32>
    %82 = arith.mulf %79, %80 : vector<1x512xf32>
    %83 = arith.mulf %82, %81 : vector<1x512xf32>
    %84 = arith.mulf %78, %83 : vector<1x512xf32>
    %85 = arith.addf %76, %84 : vector<1x512xf32>
    %86 = vector.extract_strided_slice %11 {offsets = [9, 0], sizes = [1, 512], strides = [1, 1]} : vector<27x512xf32> to vector<1x512xf32>
    %c9_i32 = arith.constant 9 : i32
    %87 = tpu.dynamic_rotate %86 by %c9_i32 dim 1 : vector<1x512xf32>, i32 -> vector<1x512xf32>
    %88 = vector.extract_strided_slice %12 {offsets = [2, 0], sizes = [1, 512], strides = [1, 1]} : vector<6x512xf32> to vector<1x512xf32>
    %89 = vector.extract_strided_slice %12 {offsets = [4, 0], sizes = [1, 512], strides = [1, 1]} : vector<6x512xf32> to vector<1x512xf32>
    %90 = arith.mulf %88, %89 : vector<1x512xf32>
    %91 = arith.mulf %87, %90 : vector<1x512xf32>
    %92 = arith.addf %85, %91 : vector<1x512xf32>
    %93 = vector.extract_strided_slice %11 {offsets = [10, 0], sizes = [1, 512], strides = [1, 1]} : vector<27x512xf32> to vector<1x512xf32>
    %c8_i32 = arith.constant 8 : i32
    %94 = tpu.dynamic_rotate %93 by %c8_i32 dim 1 : vector<1x512xf32>, i32 -> vector<1x512xf32>
    %95 = vector.extract_strided_slice %12 {offsets = [2, 0], sizes = [1, 512], strides = [1, 1]} : vector<6x512xf32> to vector<1x512xf32>
    %96 = arith.mulf %94, %95 : vector<1x512xf32>
    %97 = arith.addf %92, %96 : vector<1x512xf32>
    %98 = vector.extract_strided_slice %11 {offsets = [11, 0], sizes = [1, 512], strides = [1, 1]} : vector<27x512xf32> to vector<1x512xf32>
    %c7_i32 = arith.constant 7 : i32
    %99 = tpu.dynamic_rotate %98 by %c7_i32 dim 1 : vector<1x512xf32>, i32 -> vector<1x512xf32>
    %100 = vector.extract_strided_slice %12 {offsets = [2, 0], sizes = [1, 512], strides = [1, 1]} : vector<6x512xf32> to vector<1x512xf32>
    %101 = vector.extract_strided_slice %12 {offsets = [5, 0], sizes = [1, 512], strides = [1, 1]} : vector<6x512xf32> to vector<1x512xf32>
    %102 = arith.mulf %100, %101 : vector<1x512xf32>
    %103 = arith.mulf %99, %102 : vector<1x512xf32>
    %104 = arith.addf %97, %103 : vector<1x512xf32>
    %105 = vector.extract_strided_slice %11 {offsets = [12, 0], sizes = [1, 512], strides = [1, 1]} : vector<27x512xf32> to vector<1x512xf32>
    %c1_i32 = arith.constant 1 : i32
    %106 = tpu.dynamic_rotate %105 by %c1_i32 dim 1 : vector<1x512xf32>, i32 -> vector<1x512xf32>
    %107 = vector.extract_strided_slice %12 {offsets = [4, 0], sizes = [1, 512], strides = [1, 1]} : vector<6x512xf32> to vector<1x512xf32>
    %108 = arith.mulf %106, %107 : vector<1x512xf32>
    %109 = arith.addf %104, %108 : vector<1x512xf32>
    %110 = vector.extract_strided_slice %11 {offsets = [13, 0], sizes = [1, 512], strides = [1, 1]} : vector<27x512xf32> to vector<1x512xf32>
    %111 = arith.addf %109, %110 : vector<1x512xf32>
    %112 = vector.extract_strided_slice %11 {offsets = [14, 0], sizes = [1, 512], strides = [1, 1]} : vector<27x512xf32> to vector<1x512xf32>
    %c511_i32 = arith.constant 511 : i32
    %113 = tpu.dynamic_rotate %112 by %c511_i32 dim 1 : vector<1x512xf32>, i32 -> vector<1x512xf32>
    %114 = vector.extract_strided_slice %12 {offsets = [5, 0], sizes = [1, 512], strides = [1, 1]} : vector<6x512xf32> to vector<1x512xf32>
    %115 = arith.mulf %113, %114 : vector<1x512xf32>
    %116 = arith.addf %111, %115 : vector<1x512xf32>
    %117 = vector.extract_strided_slice %11 {offsets = [15, 0], sizes = [1, 512], strides = [1, 1]} : vector<27x512xf32> to vector<1x512xf32>
    %c505_i32 = arith.constant 505 : i32
    %118 = tpu.dynamic_rotate %117 by %c505_i32 dim 1 : vector<1x512xf32>, i32 -> vector<1x512xf32>
    %119 = vector.extract_strided_slice %12 {offsets = [3, 0], sizes = [1, 512], strides = [1, 1]} : vector<6x512xf32> to vector<1x512xf32>
    %120 = vector.extract_strided_slice %12 {offsets = [4, 0], sizes = [1, 512], strides = [1, 1]} : vector<6x512xf32> to vector<1x512xf32>
    %121 = arith.mulf %119, %120 : vector<1x512xf32>
    %122 = arith.mulf %118, %121 : vector<1x512xf32>
    %123 = arith.addf %116, %122 : vector<1x512xf32>
    %124 = vector.extract_strided_slice %11 {offsets = [16, 0], sizes = [1, 512], strides = [1, 1]} : vector<27x512xf32> to vector<1x512xf32>
    %c504_i32 = arith.constant 504 : i32
    %125 = tpu.dynamic_rotate %124 by %c504_i32 dim 1 : vector<1x512xf32>, i32 -> vector<1x512xf32>
    %126 = vector.extract_strided_slice %12 {offsets = [3, 0], sizes = [1, 512], strides = [1, 1]} : vector<6x512xf32> to vector<1x512xf32>
    %127 = arith.mulf %125, %126 : vector<1x512xf32>
    %128 = arith.addf %123, %127 : vector<1x512xf32>
    %129 = vector.extract_strided_slice %11 {offsets = [17, 0], sizes = [1, 512], strides = [1, 1]} : vector<27x512xf32> to vector<1x512xf32>
    %c503_i32 = arith.constant 503 : i32
    %130 = tpu.dynamic_rotate %129 by %c503_i32 dim 1 : vector<1x512xf32>, i32 -> vector<1x512xf32>
    %131 = vector.extract_strided_slice %12 {offsets = [3, 0], sizes = [1, 512], strides = [1, 1]} : vector<6x512xf32> to vector<1x512xf32>
    %132 = vector.extract_strided_slice %12 {offsets = [5, 0], sizes = [1, 512], strides = [1, 1]} : vector<6x512xf32> to vector<1x512xf32>
    %133 = arith.mulf %131, %132 : vector<1x512xf32>
    %134 = arith.mulf %130, %133 : vector<1x512xf32>
    %135 = arith.addf %128, %134 : vector<1x512xf32>
    %136 = vector.extract_strided_slice %11 {offsets = [18, 0], sizes = [1, 512], strides = [1, 1]} : vector<27x512xf32> to vector<1x512xf32>
    %c457_i32 = arith.constant 457 : i32
    %137 = tpu.dynamic_rotate %136 by %c457_i32 dim 1 : vector<1x512xf32>, i32 -> vector<1x512xf32>
    %138 = vector.extract_strided_slice %12 {offsets = [1, 0], sizes = [1, 512], strides = [1, 1]} : vector<6x512xf32> to vector<1x512xf32>
    %139 = vector.extract_strided_slice %12 {offsets = [2, 0], sizes = [1, 512], strides = [1, 1]} : vector<6x512xf32> to vector<1x512xf32>
    %140 = vector.extract_strided_slice %12 {offsets = [4, 0], sizes = [1, 512], strides = [1, 1]} : vector<6x512xf32> to vector<1x512xf32>
    %141 = arith.mulf %138, %139 : vector<1x512xf32>
    %142 = arith.mulf %141, %140 : vector<1x512xf32>
    %143 = arith.mulf %137, %142 : vector<1x512xf32>
    %144 = arith.addf %135, %143 : vector<1x512xf32>
    %145 = vector.extract_strided_slice %11 {offsets = [19, 0], sizes = [1, 512], strides = [1, 1]} : vector<27x512xf32> to vector<1x512xf32>
    %c456_i32 = arith.constant 456 : i32
    %146 = tpu.dynamic_rotate %145 by %c456_i32 dim 1 : vector<1x512xf32>, i32 -> vector<1x512xf32>
    %147 = vector.extract_strided_slice %12 {offsets = [1, 0], sizes = [1, 512], strides = [1, 1]} : vector<6x512xf32> to vector<1x512xf32>
    %148 = vector.extract_strided_slice %12 {offsets = [2, 0], sizes = [1, 512], strides = [1, 1]} : vector<6x512xf32> to vector<1x512xf32>
    %149 = arith.mulf %147, %148 : vector<1x512xf32>
    %150 = arith.mulf %146, %149 : vector<1x512xf32>
    %151 = arith.addf %144, %150 : vector<1x512xf32>
    %152 = vector.extract_strided_slice %11 {offsets = [20, 0], sizes = [1, 512], strides = [1, 1]} : vector<27x512xf32> to vector<1x512xf32>
    %c455_i32 = arith.constant 455 : i32
    %153 = tpu.dynamic_rotate %152 by %c455_i32 dim 1 : vector<1x512xf32>, i32 -> vector<1x512xf32>
    %154 = vector.extract_strided_slice %12 {offsets = [1, 0], sizes = [1, 512], strides = [1, 1]} : vector<6x512xf32> to vector<1x512xf32>
    %155 = vector.extract_strided_slice %12 {offsets = [2, 0], sizes = [1, 512], strides = [1, 1]} : vector<6x512xf32> to vector<1x512xf32>
    %156 = vector.extract_strided_slice %12 {offsets = [5, 0], sizes = [1, 512], strides = [1, 1]} : vector<6x512xf32> to vector<1x512xf32>
    %157 = arith.mulf %154, %155 : vector<1x512xf32>
    %158 = arith.mulf %157, %156 : vector<1x512xf32>
    %159 = arith.mulf %153, %158 : vector<1x512xf32>
    %160 = arith.addf %151, %159 : vector<1x512xf32>
    %161 = vector.extract_strided_slice %11 {offsets = [21, 0], sizes = [1, 512], strides = [1, 1]} : vector<27x512xf32> to vector<1x512xf32>
    %c449_i32 = arith.constant 449 : i32
    %162 = tpu.dynamic_rotate %161 by %c449_i32 dim 1 : vector<1x512xf32>, i32 -> vector<1x512xf32>
    %163 = vector.extract_strided_slice %12 {offsets = [1, 0], sizes = [1, 512], strides = [1, 1]} : vector<6x512xf32> to vector<1x512xf32>
    %164 = vector.extract_strided_slice %12 {offsets = [4, 0], sizes = [1, 512], strides = [1, 1]} : vector<6x512xf32> to vector<1x512xf32>
    %165 = arith.mulf %163, %164 : vector<1x512xf32>
    %166 = arith.mulf %162, %165 : vector<1x512xf32>
    %167 = arith.addf %160, %166 : vector<1x512xf32>
    %168 = vector.extract_strided_slice %11 {offsets = [22, 0], sizes = [1, 512], strides = [1, 1]} : vector<27x512xf32> to vector<1x512xf32>
    %c448_i32 = arith.constant 448 : i32
    %169 = tpu.dynamic_rotate %168 by %c448_i32 dim 1 : vector<1x512xf32>, i32 -> vector<1x512xf32>
    %170 = vector.extract_strided_slice %12 {offsets = [1, 0], sizes = [1, 512], strides = [1, 1]} : vector<6x512xf32> to vector<1x512xf32>
    %171 = arith.mulf %169, %170 : vector<1x512xf32>
    %172 = arith.addf %167, %171 : vector<1x512xf32>
    %173 = vector.extract_strided_slice %11 {offsets = [23, 0], sizes = [1, 512], strides = [1, 1]} : vector<27x512xf32> to vector<1x512xf32>
    %c447_i32 = arith.constant 447 : i32
    %174 = tpu.dynamic_rotate %173 by %c447_i32 dim 1 : vector<1x512xf32>, i32 -> vector<1x512xf32>
    %175 = vector.extract_strided_slice %12 {offsets = [1, 0], sizes = [1, 512], strides = [1, 1]} : vector<6x512xf32> to vector<1x512xf32>
    %176 = vector.extract_strided_slice %12 {offsets = [5, 0], sizes = [1, 512], strides = [1, 1]} : vector<6x512xf32> to vector<1x512xf32>
    %177 = arith.mulf %175, %176 : vector<1x512xf32>
    %178 = arith.mulf %174, %177 : vector<1x512xf32>
    %179 = arith.addf %172, %178 : vector<1x512xf32>
    %180 = vector.extract_strided_slice %11 {offsets = [24, 0], sizes = [1, 512], strides = [1, 1]} : vector<27x512xf32> to vector<1x512xf32>
    %c441_i32 = arith.constant 441 : i32
    %181 = tpu.dynamic_rotate %180 by %c441_i32 dim 1 : vector<1x512xf32>, i32 -> vector<1x512xf32>
    %182 = vector.extract_strided_slice %12 {offsets = [1, 0], sizes = [1, 512], strides = [1, 1]} : vector<6x512xf32> to vector<1x512xf32>
    %183 = vector.extract_strided_slice %12 {offsets = [3, 0], sizes = [1, 512], strides = [1, 1]} : vector<6x512xf32> to vector<1x512xf32>
    %184 = vector.extract_strided_slice %12 {offsets = [4, 0], sizes = [1, 512], strides = [1, 1]} : vector<6x512xf32> to vector<1x512xf32>
    %185 = arith.mulf %182, %183 : vector<1x512xf32>
    %186 = arith.mulf %185, %184 : vector<1x512xf32>
    %187 = arith.mulf %181, %186 : vector<1x512xf32>
    %188 = arith.addf %179, %187 : vector<1x512xf32>
    %189 = vector.extract_strided_slice %11 {offsets = [25, 0], sizes = [1, 512], strides = [1, 1]} : vector<27x512xf32> to vector<1x512xf32>
    %c440_i32 = arith.constant 440 : i32
    %190 = tpu.dynamic_rotate %189 by %c440_i32 dim 1 : vector<1x512xf32>, i32 -> vector<1x512xf32>
    %191 = vector.extract_strided_slice %12 {offsets = [1, 0], sizes = [1, 512], strides = [1, 1]} : vector<6x512xf32> to vector<1x512xf32>
    %192 = vector.extract_strided_slice %12 {offsets = [3, 0], sizes = [1, 512], strides = [1, 1]} : vector<6x512xf32> to vector<1x512xf32>
    %193 = arith.mulf %191, %192 : vector<1x512xf32>
    %194 = arith.mulf %190, %193 : vector<1x512xf32>
    %195 = arith.addf %188, %194 : vector<1x512xf32>
    %196 = vector.extract_strided_slice %11 {offsets = [26, 0], sizes = [1, 512], strides = [1, 1]} : vector<27x512xf32> to vector<1x512xf32>
    %c439_i32 = arith.constant 439 : i32
    %197 = tpu.dynamic_rotate %196 by %c439_i32 dim 1 : vector<1x512xf32>, i32 -> vector<1x512xf32>
    %198 = vector.extract_strided_slice %12 {offsets = [1, 0], sizes = [1, 512], strides = [1, 1]} : vector<6x512xf32> to vector<1x512xf32>
    %199 = vector.extract_strided_slice %12 {offsets = [3, 0], sizes = [1, 512], strides = [1, 1]} : vector<6x512xf32> to vector<1x512xf32>
    %200 = vector.extract_strided_slice %12 {offsets = [5, 0], sizes = [1, 512], strides = [1, 1]} : vector<6x512xf32> to vector<1x512xf32>
    %201 = arith.mulf %198, %199 : vector<1x512xf32>
    %202 = arith.mulf %201, %200 : vector<1x512xf32>
    %203 = arith.mulf %197, %202 : vector<1x512xf32>
    %204 = arith.addf %195, %203 : vector<1x512xf32>
    %cst_14 = arith.constant dense<0xFF800000> : vector<1xf32>
    %205 = vector.multi_reduction <maximumf>, %204, %cst_14 [1] : vector<1x512xf32> to vector<1xf32>
    %206 = vector.shape_cast %205 : vector<1xf32> to vector<1x1xf32>
    %207 = vector.broadcast %206 : vector<1x1xf32> to vector<1x512xf32>
    %208 = arith.subf %204, %207 : vector<1x512xf32>
    %209 = math.exp %208 : vector<1x512xf32>
    %cst_15 = arith.constant dense<0.000000e+00> : vector<1xf32>
    %210 = vector.multi_reduction <add>, %209, %cst_15 [1] : vector<1x512xf32> to vector<1xf32>
    %211 = vector.shape_cast %210 : vector<1xf32> to vector<1x1xf32>
    %212 = tpu.reciprocal %211 {approx = true} : vector<1x1xf32> -> vector<1x1xf32>
    %213 = vector.broadcast %212 : vector<1x1xf32> to vector<1x512xf32>
    %214 = arith.mulf %209, %213 : vector<1x512xf32>
    %c0_16 = arith.constant 0 : index
    %c0_17 = arith.constant 0 : index
    %c0_18 = arith.constant 0 : index
    %215 = vector.load %arg7[%c0_16, %c0_17, %c0_18] : memref<1x1x512xf32, #tpu.memory_space<vmem>>, vector<1x1x512xf32>
    %216 = vector.shape_cast %215 : vector<1x1x512xf32> to vector<1x512xf32>
    %217 = vector.shape_cast %214 : vector<1x512xf32> to vector<1x1x512xf32>
    tpu.vector_store %arg7[%c0_16, %c0_17, %c0_18], %217 {strides = array<i32>} : memref<1x1x512xf32, #tpu.memory_space<vmem>>, vector<1x1x512xf32>,
    return
  }
  func.func @transform_0(%arg0: i32) -> (i32, i32, i32) {
    %c0_i32 = arith.constant 0 : i32
    %c0_i32_0 = arith.constant 0 : i32
    %c0_i32_1 = arith.constant 0 : i32
    return %arg0, %c0_i32, %c0_i32_0 : i32, i32, i32
  }
  func.func @transform_1(%arg0: i32) -> (i32, i32) {
    %c0_i32 = arith.constant 0 : i32
    %c0_i32_0 = arith.constant 0 : i32
    %c0_i32_1 = arith.constant 0 : i32
    return %c0_i32, %c0_i32_0 : i32, i32
  }
  func.func @transform_2(%arg0: i32) -> (i32, i32) {
    %c0_i32 = arith.constant 0 : i32
    %c0_i32_0 = arith.constant 0 : i32
    %c0_i32_1 = arith.constant 0 : i32
    return %c0_i32, %c0_i32_0 : i32, i32
  }
  func.func @transform_3(%arg0: i32) -> (i32, i32) {
    %c0_i32 = arith.constant 0 : i32
    %c0_i32_0 = arith.constant 0 : i32
    %c0_i32_1 = arith.constant 0 : i32
    return %c0_i32, %c0_i32_0 : i32, i32
  }
  func.func @transform_4(%arg0: i32) -> (i32, i32) {
    %c0_i32 = arith.constant 0 : i32
    %c0_i32_0 = arith.constant 0 : i32
    %c0_i32_1 = arith.constant 0 : i32
    return %c0_i32, %c0_i32_0 : i32, i32
  }
  func.func @transform_5(%arg0: i32) -> (i32, i32) {
    %c0_i32 = arith.constant 0 : i32
    %c0_i32_0 = arith.constant 0 : i32
    %c0_i32_1 = arith.constant 0 : i32
    return %c0_i32, %c0_i32_0 : i32, i32
  }
  func.func @transform_6(%arg0: i32) -> (i32, i32, i32) {
    %c0_i32 = arith.constant 0 : i32
    %c0_i32_0 = arith.constant 0 : i32
    %c0_i32_1 = arith.constant 0 : i32
    return %arg0, %c0_i32, %c0_i32_0 : i32, i32, i32
  }
}

module attributes {stable_mosaic.version = 11 : i64} {
  func.func @_attend_kernel(%arg0: i32, %arg1: i32, %arg2: memref<1x8x8x8xf32, #tpu.memory_space<vmem>>, %arg3: memref<1x8x8x8xf32, #tpu.memory_space<vmem>>, %arg4: memref<1x8x8x8xf32, #tpu.memory_space<vmem>>) attributes {dimension_semantics = [#tpu.dimension_semantics<parallel>, #tpu.dimension_semantics<parallel>], iteration_bounds = array<i64: 2, 4>, scalar_prefetch = 0 : i64, scratch_operands = 0 : i64, tpu.core_type = #tpu.core_type<tc>, window_params = [{transform_indices = @transform_0, window_bounds = array<i64: 1, 8, 8, 8>}, {transform_indices = @transform_1, window_bounds = array<i64: 1, 8, 8, 8>}, {transform_indices = @transform_2, window_bounds = array<i64: 1, 8, 8, 8>}]} {
    %c0 = arith.constant 0 : index
    %c0_0 = arith.constant 0 : index
    %c0_1 = arith.constant 0 : index
    %c0_2 = arith.constant 0 : index
    %0 = vector.load %arg2[%c0, %c0_0, %c0_1, %c0_2] : memref<1x8x8x8xf32, #tpu.memory_space<vmem>>, vector<1x8x8x8xf32>
    %1 = vector.shape_cast %0 : vector<1x8x8x8xf32> to vector<8x8x8xf32>
    %c0_3 = arith.constant 0 : index
    %c0_4 = arith.constant 0 : index
    %c0_5 = arith.constant 0 : index
    %c0_6 = arith.constant 0 : index
    %2 = vector.load %arg3[%c0_3, %c0_4, %c0_5, %c0_6] : memref<1x8x8x8xf32, #tpu.memory_space<vmem>>, vector<1x8x8x8xf32>
    %3 = vector.shape_cast %2 : vector<1x8x8x8xf32> to vector<8x8x8xf32>
    "tpu.trace_start"() <{level = 10 : i32, message = "dhk,dkw->dhw"}> : () -> ()
    %cst = arith.constant dense<0.000000e+00> : vector<8x8x8xf32>
    %4 = tpu.matmul %1, %3, %cst {dimension_numbers = #tpu.dot_dimension_numbers<[2], [1], [1], [2], [0, 0, 0, 1, 1, 2], [0], [0]>} : vector<8x8x8xf32>, vector<8x8x8xf32>, vector<8x8x8xf32> -> vector<8x8x8xf32>
    "tpu.trace_stop"() : () -> ()
    %c0_7 = arith.constant 0 : index
    %c0_8 = arith.constant 0 : index
    %c0_9 = arith.constant 0 : index
    %c0_10 = arith.constant 0 : index
    %5 = vector.load %arg4[%c0_7, %c0_8, %c0_9, %c0_10] : memref<1x8x8x8xf32, #tpu.memory_space<vmem>>, vector<1x8x8x8xf32>
    %6 = vector.shape_cast %5 : vector<1x8x8x8xf32> to vector<8x8x8xf32>
    %7 = vector.shape_cast %4 : vector<8x8x8xf32> to vector<1x8x8x8xf32>
    tpu.vector_store %arg4[%c0_7, %c0_8, %c0_9, %c0_10], %7 {strides = array<i32>} : memref<1x8x8x8xf32, #tpu.memory_space<vmem>>, vector<1x8x8x8xf32>,
    return
  }
  func.func @transform_0(%arg0: i32, %arg1: i32) -> (i32, i32, i32, i32) {
    %c0_i32 = arith.constant 0 : i32
    %c0_i32_0 = arith.constant 0 : i32
    %c0_i32_1 = arith.constant 0 : i32
    %c0_i32_2 = arith.constant 0 : i32
    return %arg0, %c0_i32, %c0_i32_0, %c0_i32_1 : i32, i32, i32, i32
  }
  func.func @transform_1(%arg0: i32, %arg1: i32) -> (i32, i32, i32, i32) {
    %c4_i32 = arith.constant 4 : i32
    %0 = arith.muli %arg0, %c4_i32 : i32
    %1 = arith.addi %0, %arg1 : i32
    %c0_i32 = arith.constant 0 : i32
    %c0_i32_0 = arith.constant 0 : i32
    %c0_i32_1 = arith.constant 0 : i32
    %c0_i32_2 = arith.constant 0 : i32
    return %1, %c0_i32, %c0_i32_0, %c0_i32_1 : i32, i32, i32, i32
  }
  func.func @transform_2(%arg0: i32, %arg1: i32) -> (i32, i32, i32, i32) {
    %c4_i32 = arith.constant 4 : i32
    %0 = arith.muli %arg0, %c4_i32 : i32
    %1 = arith.addi %0, %arg1 : i32
    %c0_i32 = arith.constant 0 : i32
    %c0_i32_0 = arith.constant 0 : i32
    %c0_i32_1 = arith.constant 0 : i32
    %c0_i32_2 = arith.constant 0 : i32
    return %1, %c0_i32, %c0_i32_0, %c0_i32_1 : i32, i32, i32, i32
  }
}

module attributes {stable_mosaic.version = 11 : i64} {
  func.func @_affine_relu_kernel(%arg0: i32, %arg1: memref<1x4x512xf32, #tpu.memory_space<vmem>>, %arg2: memref<4x1xf32, #tpu.memory_space<vmem>>, %arg3: memref<4x1xf32, #tpu.memory_space<vmem>>, %arg4: memref<1x4x512xf32, #tpu.memory_space<vmem>>) attributes {dimension_semantics = [#tpu.dimension_semantics<parallel>], iteration_bounds = array<i64: 2>, scalar_prefetch = 0 : i64, scratch_operands = 0 : i64, tpu.core_type = #tpu.core_type<tc>, window_params = [{transform_indices = @transform_0, window_bounds = array<i64: 1, 4, 512>}, {pipeline_mode = #tpu.pipeline_mode<synchronous>, transform_indices = @transform_1, window_bounds = array<i64: 4, 1>}, {pipeline_mode = #tpu.pipeline_mode<synchronous>, transform_indices = @transform_2, window_bounds = array<i64: 4, 1>}, {transform_indices = @transform_3, window_bounds = array<i64: 1, 4, 512>}]} {
    %c0 = arith.constant 0 : index
    %c0_0 = arith.constant 0 : index
    %c0_1 = arith.constant 0 : index
    %0 = vector.load %arg1[%c0, %c0_0, %c0_1] : memref<1x4x512xf32, #tpu.memory_space<vmem>>, vector<1x4x512xf32>
    %1 = vector.shape_cast %0 : vector<1x4x512xf32> to vector<4x512xf32>
    %c0_2 = arith.constant 0 : index
    %c0_3 = arith.constant 0 : index
    %2 = vector.load %arg2[%c0_2, %c0_3] : memref<4x1xf32, #tpu.memory_space<vmem>>, vector<4x1xf32>
    %3 = vector.broadcast %2 : vector<4x1xf32> to vector<4x512xf32>
    %4 = arith.mulf %1, %3 : vector<4x512xf32>
    %c0_4 = arith.constant 0 : index
    %c0_5 = arith.constant 0 : index
    %5 = vector.load %arg3[%c0_4, %c0_5] : memref<4x1xf32, #tpu.memory_space<vmem>>, vector<4x1xf32>
    %6 = vector.broadcast %5 : vector<4x1xf32> to vector<4x512xf32>
    %7 = arith.addf %4, %6 : vector<4x512xf32>
    %cst = arith.constant 0.000000e+00 : f32
    %8 = vector.broadcast %cst : f32 to vector<4x512xf32>
    %9 = arith.maximumf %7, %8 : vector<4x512xf32>
    %c0_6 = arith.constant 0 : index
    %c0_7 = arith.constant 0 : index
    %c0_8 = arith.constant 0 : index
    %10 = vector.load %arg4[%c0_6, %c0_7, %c0_8] : memref<1x4x512xf32, #tpu.memory_space<vmem>>, vector<1x4x512xf32>
    %11 = vector.shape_cast %10 : vector<1x4x512xf32> to vector<4x512xf32>
    %12 = vector.shape_cast %9 : vector<4x512xf32> to vector<1x4x512xf32>
    tpu.vector_store %arg4[%c0_6, %c0_7, %c0_8], %12 {strides = array<i32>} : memref<1x4x512xf32, #tpu.memory_space<vmem>>, vector<1x4x512xf32>,
    return
  }
  func.func @transform_0(%arg0: i32) -> (i32, i32, i32) {
    %c0_i32 = arith.constant 0 : i32
    %c0_i32_0 = arith.constant 0 : i32
    %c0_i32_1 = arith.constant 0 : i32
    return %arg0, %c0_i32, %c0_i32_0 : i32, i32, i32
  }
  func.func @transform_1(%arg0: i32) -> (i32, i32) {
    %c0_i32 = arith.constant 0 : i32
    %c0_i32_0 = arith.constant 0 : i32
    %c0_i32_1 = arith.constant 0 : i32
    return %c0_i32, %c0_i32_0 : i32, i32
  }
  func.func @transform_2(%arg0: i32) -> (i32, i32) {
    %c0_i32 = arith.constant 0 : i32
    %c0_i32_0 = arith.constant 0 : i32
    %c0_i32_1 = arith.constant 0 : i32
    return %c0_i32, %c0_i32_0 : i32, i32
  }
  func.func @transform_3(%arg0: i32) -> (i32, i32, i32) {
    %c0_i32 = arith.constant 0 : i32
    %c0_i32_0 = arith.constant 0 : i32
    %c0_i32_1 = arith.constant 0 : i32
    return %arg0, %c0_i32, %c0_i32_0 : i32, i32, i32
  }
}

module attributes {stable_mosaic.version = 11 : i64} {
  func.func @_conv_stats_kernel(%arg0: i32, %arg1: memref<1x4x512xf32, #tpu.memory_space<vmem>>, %arg2: memref<27x4x4xf32, #tpu.memory_space<vmem>>, %arg3: memref<4x1xf32, #tpu.memory_space<vmem>>, %arg4: memref<6x512xf32, #tpu.memory_space<vmem>>, %arg5: memref<1x4x512xf32, #tpu.memory_space<vmem>>, %arg6: memref<1x4x1xf32, #tpu.memory_space<vmem>>, %arg7: memref<1x4x1xf32, #tpu.memory_space<vmem>>) attributes {dimension_semantics = [#tpu.dimension_semantics<parallel>], iteration_bounds = array<i64: 2>, scalar_prefetch = 0 : i64, scratch_operands = 0 : i64, tpu.core_type = #tpu.core_type<tc>, window_params = [{transform_indices = @transform_0, window_bounds = array<i64: 1, 4, 512>}, {pipeline_mode = #tpu.pipeline_mode<synchronous>, transform_indices = @transform_1, window_bounds = array<i64: 27, 4, 4>}, {pipeline_mode = #tpu.pipeline_mode<synchronous>, transform_indices = @transform_2, window_bounds = array<i64: 4, 1>}, {pipeline_mode = #tpu.pipeline_mode<synchronous>, transform_indices = @transform_3, window_bounds = array<i64: 6, 512>}, {transform_indices = @transform_4, window_bounds = array<i64: 1, 4, 512>}, {transform_indices = @transform_5, window_bounds = array<i64: 1, 4, 1>}, {transform_indices = @transform_6, window_bounds = array<i64: 1, 4, 1>}]} {
    %c0 = arith.constant 0 : index
    %c0_0 = arith.constant 0 : index
    %c0_1 = arith.constant 0 : index
    %0 = vector.load %arg1[%c0, %c0_0, %c0_1] : memref<1x4x512xf32, #tpu.memory_space<vmem>>, vector<1x4x512xf32>
    %1 = vector.shape_cast %0 : vector<1x4x512xf32> to vector<4x512xf32>
    %c0_2 = arith.constant 0 : index
    %c0_3 = arith.constant 0 : index
    %2 = vector.load %arg4[%c0_2, %c0_3] : memref<6x512xf32, #tpu.memory_space<vmem>>, vector<6x512xf32>
    %c0_4 = arith.constant 0 : index
    %c0_5 = arith.constant 0 : index
    %c0_6 = arith.constant 0 : index
    %3 = vector.load %arg2[%c0_4, %c0_5, %c0_6] : memref<27x4x4xf32, #tpu.memory_space<vmem>>, vector<27x4x4xf32>
    %cst = arith.constant 0.000000e+00 : f32
    %4 = vector.broadcast %cst : f32 to vector<4x512xf32>
    %5 = vector.extract_strided_slice %3 {offsets = [0, 0, 0], sizes = [1, 4, 4], strides = [1, 1, 1]} : vector<27x4x4xf32> to vector<1x4x4xf32>
    %6 = vector.shape_cast %5 : vector<1x4x4xf32> to vector<4x4xf32>
    %cst_7 = arith.constant dense<0.000000e+00> : vector<4x512xf32>
    %7 = tpu.matmul %6, %1, %cst_7 {dimension_numbers = #tpu.dot_dimension_numbers<[1], [0], [0], [1], [0, 0, 1, 1], [], []>} : vector<4x4xf32>, vector<4x512xf32>, vector<4x512xf32> -> vector<4x512xf32>
    %c73_i32 = arith.constant 73 : i32
    %8 = tpu.dynamic_rotate %7 by %c73_i32 dim 1 : vector<4x512xf32>, i32 -> vector<4x512xf32>
    %9 = vector.extract_strided_slice %2 {offsets = [0, 0], sizes = [1, 512], strides = [1, 1]} : vector<6x512xf32> to vector<1x512xf32>
    %10 = vector.extract_strided_slice %2 {offsets = [2, 0], sizes = [1, 512], strides = [1, 1]} : vector<6x512xf32> to vector<1x512xf32>
    %11 = vector.extract_strided_slice %2 {offsets = [4, 0], sizes = [1, 512], strides = [1, 1]} : vector<6x512xf32> to vector<1x512xf32>
    %12 = arith.mulf %9, %10 : vector<1x512xf32>
    %13 = arith.mulf %12, %11 : vector<1x512xf32>
    %14 = vector.broadcast %13 : vector<1x512xf32> to vector<4x512xf32>
    %15 = arith.mulf %8, %14 : vector<4x512xf32>
    %16 = arith.addf %4, %15 : vector<4x512xf32>
    %17 = vector.extract_strided_slice %3 {offsets = [1, 0, 0], sizes = [1, 4, 4], strides = [1, 1, 1]} : vector<27x4x4xf32> to vector<1x4x4xf32>
    %18 = vector.shape_cast %17 : vector<1x4x4xf32> to vector<4x4xf32>
    %cst_8 = arith.constant dense<0.000000e+00> : vector<4x512xf32>
    %19 = tpu.matmul %18, %1, %cst_8 {dimension_numbers = #tpu.dot_dimension_numbers<[1], [0], [0], [1], [0, 0, 1, 1], [], []>} : vector<4x4xf32>, vector<4x512xf32>, vector<4x512xf32> -> vector<4x512xf32>
    %c72_i32 = arith.constant 72 : i32
    %20 = tpu.dynamic_rotate %19 by %c72_i32 dim 1 : vector<4x512xf32>, i32 -> vector<4x512xf32>
    %21 = vector.extract_strided_slice %2 {offsets = [0, 0], sizes = [1, 512], strides = [1, 1]} : vector<6x512xf32> to vector<1x512xf32>
    %22 = vector.extract_strided_slice %2 {offsets = [2, 0], sizes = [1, 512], strides = [1, 1]} : vector<6x512xf32> to vector<1x512xf32>
    %23 = arith.mulf %21, %22 : vector<1x512xf32>
    %24 = vector.broadcast %23 : vector<1x512xf32> to vector<4x512xf32>
    %25 = arith.mulf %20, %24 : vector<4x512xf32>
    %26 = arith.addf %16, %25 : vector<4x512xf32>
    %27 = vector.extract_strided_slice %3 {offsets = [2, 0, 0], sizes = [1, 4, 4], strides = [1, 1, 1]} : vector<27x4x4xf32> to vector<1x4x4xf32>
    %28 = vector.shape_cast %27 : vector<1x4x4xf32> to vector<4x4xf32>
    %cst_9 = arith.constant dense<0.000000e+00> : vector<4x512xf32>
    %29 = tpu.matmul %28, %1, %cst_9 {dimension_numbers = #tpu.dot_dimension_numbers<[1], [0], [0], [1], [0, 0, 1, 1], [], []>} : vector<4x4xf32>, vector<4x512xf32>, vector<4x512xf32> -> vector<4x512xf32>
    %c71_i32 = arith.constant 71 : i32
    %30 = tpu.dynamic_rotate %29 by %c71_i32 dim 1 : vector<4x512xf32>, i32 -> vector<4x512xf32>
    %31 = vector.extract_strided_slice %2 {offsets = [0, 0], sizes = [1, 512], strides = [1, 1]} : vector<6x512xf32> to vector<1x512xf32>
    %32 = vector.extract_strided_slice %2 {offsets = [2, 0], sizes = [1, 512], strides = [1, 1]} : vector<6x512xf32> to vector<1x512xf32>
    %33 = vector.extract_strided_slice %2 {offsets = [5, 0], sizes = [1, 512], strides = [1, 1]} : vector<6x512xf32> to vector<1x512xf32>
    %34 = arith.mulf %31, %32 : vector<1x512xf32>
    %35 = arith.mulf %34, %33 : vector<1x512xf32>
    %36 = vector.broadcast %35 : vector<1x512xf32> to vector<4x512xf32>
    %37 = arith.mulf %30, %36 : vector<4x512xf32>
    %38 = arith.addf %26, %37 : vector<4x512xf32>
    %39 = vector.extract_strided_slice %3 {offsets = [3, 0, 0], sizes = [1, 4, 4], strides = [1, 1, 1]} : vector<27x4x4xf32> to vector<1x4x4xf32>
    %40 = vector.shape_cast %39 : vector<1x4x4xf32> to vector<4x4xf32>
    %cst_10 = arith.constant dense<0.000000e+00> : vector<4x512xf32>
    %41 = tpu.matmul %40, %1, %cst_10 {dimension_numbers = #tpu.dot_dimension_numbers<[1], [0], [0], [1], [0, 0, 1, 1], [], []>} : vector<4x4xf32>, vector<4x512xf32>, vector<4x512xf32> -> vector<4x512xf32>
    %c65_i32 = arith.constant 65 : i32
    %42 = tpu.dynamic_rotate %41 by %c65_i32 dim 1 : vector<4x512xf32>, i32 -> vector<4x512xf32>
    %43 = vector.extract_strided_slice %2 {offsets = [0, 0], sizes = [1, 512], strides = [1, 1]} : vector<6x512xf32> to vector<1x512xf32>
    %44 = vector.extract_strided_slice %2 {offsets = [4, 0], sizes = [1, 512], strides = [1, 1]} : vector<6x512xf32> to vector<1x512xf32>
    %45 = arith.mulf %43, %44 : vector<1x512xf32>
    %46 = vector.broadcast %45 : vector<1x512xf32> to vector<4x512xf32>
    %47 = arith.mulf %42, %46 : vector<4x512xf32>
    %48 = arith.addf %38, %47 : vector<4x512xf32>
    %49 = vector.extract_strided_slice %3 {offsets = [4, 0, 0], sizes = [1, 4, 4], strides = [1, 1, 1]} : vector<27x4x4xf32> to vector<1x4x4xf32>
    %50 = vector.shape_cast %49 : vector<1x4x4xf32> to vector<4x4xf32>
    %cst_11 = arith.constant dense<0.000000e+00> : vector<4x512xf32>
    %51 = tpu.matmul %50, %1, %cst_11 {dimension_numbers = #tpu.dot_dimension_numbers<[1], [0], [0], [1], [0, 0, 1, 1], [], []>} : vector<4x4xf32>, vector<4x512xf32>, vector<4x512xf32> -> vector<4x512xf32>
    %c64_i32 = arith.constant 64 : i32
    %52 = tpu.dynamic_rotate %51 by %c64_i32 dim 1 : vector<4x512xf32>, i32 -> vector<4x512xf32>
    %53 = vector.extract_strided_slice %2 {offsets = [0, 0], sizes = [1, 512], strides = [1, 1]} : vector<6x512xf32> to vector<1x512xf32>
    %54 = vector.broadcast %53 : vector<1x512xf32> to vector<4x512xf32>
    %55 = arith.mulf %52, %54 : vector<4x512xf32>
    %56 = arith.addf %48, %55 : vector<4x512xf32>
    %57 = vector.extract_strided_slice %3 {offsets = [5, 0, 0], sizes = [1, 4, 4], strides = [1, 1, 1]} : vector<27x4x4xf32> to vector<1x4x4xf32>
    %58 = vector.shape_cast %57 : vector<1x4x4xf32> to vector<4x4xf32>
    %cst_12 = arith.constant dense<0.000000e+00> : vector<4x512xf32>
    %59 = tpu.matmul %58, %1, %cst_12 {dimension_numbers = #tpu.dot_dimension_numbers<[1], [0], [0], [1], [0, 0, 1, 1], [], []>} : vector<4x4xf32>, vector<4x512xf32>, vector<4x512xf32> -> vector<4x512xf32>
    %c63_i32 = arith.constant 63 : i32
    %60 = tpu.dynamic_rotate %59 by %c63_i32 dim 1 : vector<4x512xf32>, i32 -> vector<4x512xf32>
    %61 = vector.extract_strided_slice %2 {offsets = [0, 0], sizes = [1, 512], strides = [1, 1]} : vector<6x512xf32> to vector<1x512xf32>
    %62 = vector.extract_strided_slice %2 {offsets = [5, 0], sizes = [1, 512], strides = [1, 1]} : vector<6x512xf32> to vector<1x512xf32>
    %63 = arith.mulf %61, %62 : vector<1x512xf32>
    %64 = vector.broadcast %63 : vector<1x512xf32> to vector<4x512xf32>
    %65 = arith.mulf %60, %64 : vector<4x512xf32>
    %66 = arith.addf %56, %65 : vector<4x512xf32>
    %67 = vector.extract_strided_slice %3 {offsets = [6, 0, 0], sizes = [1, 4, 4], strides = [1, 1, 1]} : vector<27x4x4xf32> to vector<1x4x4xf32>
    %68 = vector.shape_cast %67 : vector<1x4x4xf32> to vector<4x4xf32>
    %cst_13 = arith.constant dense<0.000000e+00> : vector<4x512xf32>
    %69 = tpu.matmul %68, %1, %cst_13 {dimension_numbers = #tpu.dot_dimension_numbers<[1], [0], [0], [1], [0, 0, 1, 1], [], []>} : vector<4x4xf32>, vector<4x512xf32>, vector<4x512xf32> -> vector<4x512xf32>
    %c57_i32 = arith.constant 57 : i32
    %70 = tpu.dynamic_rotate %69 by %c57_i32 dim 1 : vector<4x512xf32>, i32 -> vector<4x512xf32>
    %71 = vector.extract_strided_slice %2 {offsets = [0, 0], sizes = [1, 512], strides = [1, 1]} : vector<6x512xf32> to vector<1x512xf32>
    %72 = vector.extract_strided_slice %2 {offsets = [3, 0], sizes = [1, 512], strides = [1, 1]} : vector<6x512xf32> to vector<1x512xf32>
    %73 = vector.extract_strided_slice %2 {offsets = [4, 0], sizes = [1, 512], strides = [1, 1]} : vector<6x512xf32> to vector<1x512xf32>
    %74 = arith.mulf %71, %72 : vector<1x512xf32>
    %75 = arith.mulf %74, %73 : vector<1x512xf32>
    %76 = vector.broadcast %75 : vector<1x512xf32> to vector<4x512xf32>
    %77 = arith.mulf %70, %76 : vector<4x512xf32>
    %78 = arith.addf %66, %77 : vector<4x512xf32>
    %79 = vector.extract_strided_slice %3 {offsets = [7, 0, 0], sizes = [1, 4, 4], strides = [1, 1, 1]} : vector<27x4x4xf32> to vector<1x4x4xf32>
    %80 = vector.shape_cast %79 : vector<1x4x4xf32> to vector<4x4xf32>
    %cst_14 = arith.constant dense<0.000000e+00> : vector<4x512xf32>
    %81 = tpu.matmul %80, %1, %cst_14 {dimension_numbers = #tpu.dot_dimension_numbers<[1], [0], [0], [1], [0, 0, 1, 1], [], []>} : vector<4x4xf32>, vector<4x512xf32>, vector<4x512xf32> -> vector<4x512xf32>
    %c56_i32 = arith.constant 56 : i32
    %82 = tpu.dynamic_rotate %81 by %c56_i32 dim 1 : vector<4x512xf32>, i32 -> vector<4x512xf32>
    %83 = vector.extract_strided_slice %2 {offsets = [0, 0], sizes = [1, 512], strides = [1, 1]} : vector<6x512xf32> to vector<1x512xf32>
    %84 = vector.extract_strided_slice %2 {offsets = [3, 0], sizes = [1, 512], strides = [1, 1]} : vector<6x512xf32> to vector<1x512xf32>
    %85 = arith.mulf %83, %84 : vector<1x512xf32>
    %86 = vector.broadcast %85 : vector<1x512xf32> to vector<4x512xf32>
    %87 = arith.mulf %82, %86 : vector<4x512xf32>
    %88 = arith.addf %78, %87 : vector<4x512xf32>
    %89 = vector.extract_strided_slice %3 {offsets = [8, 0, 0], sizes = [1, 4, 4], strides = [1, 1, 1]} : vector<27x4x4xf32> to vector<1x4x4xf32>
    %90 = vector.shape_cast %89 : vector<1x4x4xf32> to vector<4x4xf32>
    %cst_15 = arith.constant dense<0.000000e+00> : vector<4x512xf32>
    %91 = tpu.matmul %90, %1, %cst_15 {dimension_numbers = #tpu.dot_dimension_numbers<[1], [0], [0], [1], [0, 0, 1, 1], [], []>} : vector<4x4xf32>, vector<4x512xf32>, vector<4x512xf32> -> vector<4x512xf32>
    %c55_i32 = arith.constant 55 : i32
    %92 = tpu.dynamic_rotate %91 by %c55_i32 dim 1 : vector<4x512xf32>, i32 -> vector<4x512xf32>
    %93 = vector.extract_strided_slice %2 {offsets = [0, 0], sizes = [1, 512], strides = [1, 1]} : vector<6x512xf32> to vector<1x512xf32>
    %94 = vector.extract_strided_slice %2 {offsets = [3, 0], sizes = [1, 512], strides = [1, 1]} : vector<6x512xf32> to vector<1x512xf32>
    %95 = vector.extract_strided_slice %2 {offsets = [5, 0], sizes = [1, 512], strides = [1, 1]} : vector<6x512xf32> to vector<1x512xf32>
    %96 = arith.mulf %93, %94 : vector<1x512xf32>
    %97 = arith.mulf %96, %95 : vector<1x512xf32>
    %98 = vector.broadcast %97 : vector<1x512xf32> to vector<4x512xf32>
    %99 = arith.mulf %92, %98 : vector<4x512xf32>
    %100 = arith.addf %88, %99 : vector<4x512xf32>
    %101 = vector.extract_strided_slice %3 {offsets = [9, 0, 0], sizes = [1, 4, 4], strides = [1, 1, 1]} : vector<27x4x4xf32> to vector<1x4x4xf32>
    %102 = vector.shape_cast %101 : vector<1x4x4xf32> to vector<4x4xf32>
    %cst_16 = arith.constant dense<0.000000e+00> : vector<4x512xf32>
    %103 = tpu.matmul %102, %1, %cst_16 {dimension_numbers = #tpu.dot_dimension_numbers<[1], [0], [0], [1], [0, 0, 1, 1], [], []>} : vector<4x4xf32>, vector<4x512xf32>, vector<4x512xf32> -> vector<4x512xf32>
    %c9_i32 = arith.constant 9 : i32
    %104 = tpu.dynamic_rotate %103 by %c9_i32 dim 1 : vector<4x512xf32>, i32 -> vector<4x512xf32>
    %105 = vector.extract_strided_slice %2 {offsets = [2, 0], sizes = [1, 512], strides = [1, 1]} : vector<6x512xf32> to vector<1x512xf32>
    %106 = vector.extract_strided_slice %2 {offsets = [4, 0], sizes = [1, 512], strides = [1, 1]} : vector<6x512xf32> to vector<1x512xf32>
    %107 = arith.mulf %105, %106 : vector<1x512xf32>
    %108 = vector.broadcast %107 : vector<1x512xf32> to vector<4x512xf32>
    %109 = arith.mulf %104, %108 : vector<4x512xf32>
    %110 = arith.addf %100, %109 : vector<4x512xf32>
    %111 = vector.extract_strided_slice %3 {offsets = [10, 0, 0], sizes = [1, 4, 4], strides = [1, 1, 1]} : vector<27x4x4xf32> to vector<1x4x4xf32>
    %112 = vector.shape_cast %111 : vector<1x4x4xf32> to vector<4x4xf32>
    %cst_17 = arith.constant dense<0.000000e+00> : vector<4x512xf32>
    %113 = tpu.matmul %112, %1, %cst_17 {dimension_numbers = #tpu.dot_dimension_numbers<[1], [0], [0], [1], [0, 0, 1, 1], [], []>} : vector<4x4xf32>, vector<4x512xf32>, vector<4x512xf32> -> vector<4x512xf32>
    %c8_i32 = arith.constant 8 : i32
    %114 = tpu.dynamic_rotate %113 by %c8_i32 dim 1 : vector<4x512xf32>, i32 -> vector<4x512xf32>
    %115 = vector.extract_strided_slice %2 {offsets = [2, 0], sizes = [1, 512], strides = [1, 1]} : vector<6x512xf32> to vector<1x512xf32>
    %116 = vector.broadcast %115 : vector<1x512xf32> to vector<4x512xf32>
    %117 = arith.mulf %114, %116 : vector<4x512xf32>
    %118 = arith.addf %110, %117 : vector<4x512xf32>
    %119 = vector.extract_strided_slice %3 {offsets = [11, 0, 0], sizes = [1, 4, 4], strides = [1, 1, 1]} : vector<27x4x4xf32> to vector<1x4x4xf32>
    %120 = vector.shape_cast %119 : vector<1x4x4xf32> to vector<4x4xf32>
    %cst_18 = arith.constant dense<0.000000e+00> : vector<4x512xf32>
    %121 = tpu.matmul %120, %1, %cst_18 {dimension_numbers = #tpu.dot_dimension_numbers<[1], [0], [0], [1], [0, 0, 1, 1], [], []>} : vector<4x4xf32>, vector<4x512xf32>, vector<4x512xf32> -> vector<4x512xf32>
    %c7_i32 = arith.constant 7 : i32
    %122 = tpu.dynamic_rotate %121 by %c7_i32 dim 1 : vector<4x512xf32>, i32 -> vector<4x512xf32>
    %123 = vector.extract_strided_slice %2 {offsets = [2, 0], sizes = [1, 512], strides = [1, 1]} : vector<6x512xf32> to vector<1x512xf32>
    %124 = vector.extract_strided_slice %2 {offsets = [5, 0], sizes = [1, 512], strides = [1, 1]} : vector<6x512xf32> to vector<1x512xf32>
    %125 = arith.mulf %123, %124 : vector<1x512xf32>
    %126 = vector.broadcast %125 : vector<1x512xf32> to vector<4x512xf32>
    %127 = arith.mulf %122, %126 : vector<4x512xf32>
    %128 = arith.addf %118, %127 : vector<4x512xf32>
    %129 = vector.extract_strided_slice %3 {offsets = [12, 0, 0], sizes = [1, 4, 4], strides = [1, 1, 1]} : vector<27x4x4xf32> to vector<1x4x4xf32>
    %130 = vector.shape_cast %129 : vector<1x4x4xf32> to vector<4x4xf32>
    %cst_19 = arith.constant dense<0.000000e+00> : vector<4x512xf32>
    %131 = tpu.matmul %130, %1, %cst_19 {dimension_numbers = #tpu.dot_dimension_numbers<[1], [0], [0], [1], [0, 0, 1, 1], [], []>} : vector<4x4xf32>, vector<4x512xf32>, vector<4x512xf32> -> vector<4x512xf32>
    %c1_i32 = arith.constant 1 : i32
    %132 = tpu.dynamic_rotate %131 by %c1_i32 dim 1 : vector<4x512xf32>, i32 -> vector<4x512xf32>
    %133 = vector.extract_strided_slice %2 {offsets = [4, 0], sizes = [1, 512], strides = [1, 1]} : vector<6x512xf32> to vector<1x512xf32>
    %134 = vector.broadcast %133 : vector<1x512xf32> to vector<4x512xf32>
    %135 = arith.mulf %132, %134 : vector<4x512xf32>
    %136 = arith.addf %128, %135 : vector<4x512xf32>
    %137 = vector.extract_strided_slice %3 {offsets = [13, 0, 0], sizes = [1, 4, 4], strides = [1, 1, 1]} : vector<27x4x4xf32> to vector<1x4x4xf32>
    %138 = vector.shape_cast %137 : vector<1x4x4xf32> to vector<4x4xf32>
    %cst_20 = arith.constant dense<0.000000e+00> : vector<4x512xf32>
    %139 = tpu.matmul %138, %1, %cst_20 {dimension_numbers = #tpu.dot_dimension_numbers<[1], [0], [0], [1], [0, 0, 1, 1], [], []>} : vector<4x4xf32>, vector<4x512xf32>, vector<4x512xf32> -> vector<4x512xf32>
    %140 = arith.addf %136, %139 : vector<4x512xf32>
    %141 = vector.extract_strided_slice %3 {offsets = [14, 0, 0], sizes = [1, 4, 4], strides = [1, 1, 1]} : vector<27x4x4xf32> to vector<1x4x4xf32>
    %142 = vector.shape_cast %141 : vector<1x4x4xf32> to vector<4x4xf32>
    %cst_21 = arith.constant dense<0.000000e+00> : vector<4x512xf32>
    %143 = tpu.matmul %142, %1, %cst_21 {dimension_numbers = #tpu.dot_dimension_numbers<[1], [0], [0], [1], [0, 0, 1, 1], [], []>} : vector<4x4xf32>, vector<4x512xf32>, vector<4x512xf32> -> vector<4x512xf32>
    %c511_i32 = arith.constant 511 : i32
    %144 = tpu.dynamic_rotate %143 by %c511_i32 dim 1 : vector<4x512xf32>, i32 -> vector<4x512xf32>
    %145 = vector.extract_strided_slice %2 {offsets = [5, 0], sizes = [1, 512], strides = [1, 1]} : vector<6x512xf32> to vector<1x512xf32>
    %146 = vector.broadcast %145 : vector<1x512xf32> to vector<4x512xf32>
    %147 = arith.mulf %144, %146 : vector<4x512xf32>
    %148 = arith.addf %140, %147 : vector<4x512xf32>
    %149 = vector.extract_strided_slice %3 {offsets = [15, 0, 0], sizes = [1, 4, 4], strides = [1, 1, 1]} : vector<27x4x4xf32> to vector<1x4x4xf32>
    %150 = vector.shape_cast %149 : vector<1x4x4xf32> to vector<4x4xf32>
    %cst_22 = arith.constant dense<0.000000e+00> : vector<4x512xf32>
    %151 = tpu.matmul %150, %1, %cst_22 {dimension_numbers = #tpu.dot_dimension_numbers<[1], [0], [0], [1], [0, 0, 1, 1], [], []>} : vector<4x4xf32>, vector<4x512xf32>, vector<4x512xf32> -> vector<4x512xf32>
    %c505_i32 = arith.constant 505 : i32
    %152 = tpu.dynamic_rotate %151 by %c505_i32 dim 1 : vector<4x512xf32>, i32 -> vector<4x512xf32>
    %153 = vector.extract_strided_slice %2 {offsets = [3, 0], sizes = [1, 512], strides = [1, 1]} : vector<6x512xf32> to vector<1x512xf32>
    %154 = vector.extract_strided_slice %2 {offsets = [4, 0], sizes = [1, 512], strides = [1, 1]} : vector<6x512xf32> to vector<1x512xf32>
    %155 = arith.mulf %153, %154 : vector<1x512xf32>
    %156 = vector.broadcast %155 : vector<1x512xf32> to vector<4x512xf32>
    %157 = arith.mulf %152, %156 : vector<4x512xf32>
    %158 = arith.addf %148, %157 : vector<4x512xf32>
    %159 = vector.extract_strided_slice %3 {offsets = [16, 0, 0], sizes = [1, 4, 4], strides = [1, 1, 1]} : vector<27x4x4xf32> to vector<1x4x4xf32>
    %160 = vector.shape_cast %159 : vector<1x4x4xf32> to vector<4x4xf32>
    %cst_23 = arith.constant dense<0.000000e+00> : vector<4x512xf32>
    %161 = tpu.matmul %160, %1, %cst_23 {dimension_numbers = #tpu.dot_dimension_numbers<[1], [0], [0], [1], [0, 0, 1, 1], [], []>} : vector<4x4xf32>, vector<4x512xf32>, vector<4x512xf32> -> vector<4x512xf32>
    %c504_i32 = arith.constant 504 : i32
    %162 = tpu.dynamic_rotate %161 by %c504_i32 dim 1 : vector<4x512xf32>, i32 -> vector<4x512xf32>
    %163 = vector.extract_strided_slice %2 {offsets = [3, 0], sizes = [1, 512], strides = [1, 1]} : vector<6x512xf32> to vector<1x512xf32>
    %164 = vector.broadcast %163 : vector<1x512xf32> to vector<4x512xf32>
    %165 = arith.mulf %162, %164 : vector<4x512xf32>
    %166 = arith.addf %158, %165 : vector<4x512xf32>
    %167 = vector.extract_strided_slice %3 {offsets = [17, 0, 0], sizes = [1, 4, 4], strides = [1, 1, 1]} : vector<27x4x4xf32> to vector<1x4x4xf32>
    %168 = vector.shape_cast %167 : vector<1x4x4xf32> to vector<4x4xf32>
    %cst_24 = arith.constant dense<0.000000e+00> : vector<4x512xf32>
    %169 = tpu.matmul %168, %1, %cst_24 {dimension_numbers = #tpu.dot_dimension_numbers<[1], [0], [0], [1], [0, 0, 1, 1], [], []>} : vector<4x4xf32>, vector<4x512xf32>, vector<4x512xf32> -> vector<4x512xf32>
    %c503_i32 = arith.constant 503 : i32
    %170 = tpu.dynamic_rotate %169 by %c503_i32 dim 1 : vector<4x512xf32>, i32 -> vector<4x512xf32>
    %171 = vector.extract_strided_slice %2 {offsets = [3, 0], sizes = [1, 512], strides = [1, 1]} : vector<6x512xf32> to vector<1x512xf32>
    %172 = vector.extract_strided_slice %2 {offsets = [5, 0], sizes = [1, 512], strides = [1, 1]} : vector<6x512xf32> to vector<1x512xf32>
    %173 = arith.mulf %171, %172 : vector<1x512xf32>
    %174 = vector.broadcast %173 : vector<1x512xf32> to vector<4x512xf32>
    %175 = arith.mulf %170, %174 : vector<4x512xf32>
    %176 = arith.addf %166, %175 : vector<4x512xf32>
    %177 = vector.extract_strided_slice %3 {offsets = [18, 0, 0], sizes = [1, 4, 4], strides = [1, 1, 1]} : vector<27x4x4xf32> to vector<1x4x4xf32>
    %178 = vector.shape_cast %177 : vector<1x4x4xf32> to vector<4x4xf32>
    %cst_25 = arith.constant dense<0.000000e+00> : vector<4x512xf32>
    %179 = tpu.matmul %178, %1, %cst_25 {dimension_numbers = #tpu.dot_dimension_numbers<[1], [0], [0], [1], [0, 0, 1, 1], [], []>} : vector<4x4xf32>, vector<4x512xf32>, vector<4x512xf32> -> vector<4x512xf32>
    %c457_i32 = arith.constant 457 : i32
    %180 = tpu.dynamic_rotate %179 by %c457_i32 dim 1 : vector<4x512xf32>, i32 -> vector<4x512xf32>
    %181 = vector.extract_strided_slice %2 {offsets = [1, 0], sizes = [1, 512], strides = [1, 1]} : vector<6x512xf32> to vector<1x512xf32>
    %182 = vector.extract_strided_slice %2 {offsets = [2, 0], sizes = [1, 512], strides = [1, 1]} : vector<6x512xf32> to vector<1x512xf32>
    %183 = vector.extract_strided_slice %2 {offsets = [4, 0], sizes = [1, 512], strides = [1, 1]} : vector<6x512xf32> to vector<1x512xf32>
    %184 = arith.mulf %181, %182 : vector<1x512xf32>
    %185 = arith.mulf %184, %183 : vector<1x512xf32>
    %186 = vector.broadcast %185 : vector<1x512xf32> to vector<4x512xf32>
    %187 = arith.mulf %180, %186 : vector<4x512xf32>
    %188 = arith.addf %176, %187 : vector<4x512xf32>
    %189 = vector.extract_strided_slice %3 {offsets = [19, 0, 0], sizes = [1, 4, 4], strides = [1, 1, 1]} : vector<27x4x4xf32> to vector<1x4x4xf32>
    %190 = vector.shape_cast %189 : vector<1x4x4xf32> to vector<4x4xf32>
    %cst_26 = arith.constant dense<0.000000e+00> : vector<4x512xf32>
    %191 = tpu.matmul %190, %1, %cst_26 {dimension_numbers = #tpu.dot_dimension_numbers<[1], [0], [0], [1], [0, 0, 1, 1], [], []>} : vector<4x4xf32>, vector<4x512xf32>, vector<4x512xf32> -> vector<4x512xf32>
    %c456_i32 = arith.constant 456 : i32
    %192 = tpu.dynamic_rotate %191 by %c456_i32 dim 1 : vector<4x512xf32>, i32 -> vector<4x512xf32>
    %193 = vector.extract_strided_slice %2 {offsets = [1, 0], sizes = [1, 512], strides = [1, 1]} : vector<6x512xf32> to vector<1x512xf32>
    %194 = vector.extract_strided_slice %2 {offsets = [2, 0], sizes = [1, 512], strides = [1, 1]} : vector<6x512xf32> to vector<1x512xf32>
    %195 = arith.mulf %193, %194 : vector<1x512xf32>
    %196 = vector.broadcast %195 : vector<1x512xf32> to vector<4x512xf32>
    %197 = arith.mulf %192, %196 : vector<4x512xf32>
    %198 = arith.addf %188, %197 : vector<4x512xf32>
    %199 = vector.extract_strided_slice %3 {offsets = [20, 0, 0], sizes = [1, 4, 4], strides = [1, 1, 1]} : vector<27x4x4xf32> to vector<1x4x4xf32>
    %200 = vector.shape_cast %199 : vector<1x4x4xf32> to vector<4x4xf32>
    %cst_27 = arith.constant dense<0.000000e+00> : vector<4x512xf32>
    %201 = tpu.matmul %200, %1, %cst_27 {dimension_numbers = #tpu.dot_dimension_numbers<[1], [0], [0], [1], [0, 0, 1, 1], [], []>} : vector<4x4xf32>, vector<4x512xf32>, vector<4x512xf32> -> vector<4x512xf32>
    %c455_i32 = arith.constant 455 : i32
    %202 = tpu.dynamic_rotate %201 by %c455_i32 dim 1 : vector<4x512xf32>, i32 -> vector<4x512xf32>
    %203 = vector.extract_strided_slice %2 {offsets = [1, 0], sizes = [1, 512], strides = [1, 1]} : vector<6x512xf32> to vector<1x512xf32>
    %204 = vector.extract_strided_slice %2 {offsets = [2, 0], sizes = [1, 512], strides = [1, 1]} : vector<6x512xf32> to vector<1x512xf32>
    %205 = vector.extract_strided_slice %2 {offsets = [5, 0], sizes = [1, 512], strides = [1, 1]} : vector<6x512xf32> to vector<1x512xf32>
    %206 = arith.mulf %203, %204 : vector<1x512xf32>
    %207 = arith.mulf %206, %205 : vector<1x512xf32>
    %208 = vector.broadcast %207 : vector<1x512xf32> to vector<4x512xf32>
    %209 = arith.mulf %202, %208 : vector<4x512xf32>
    %210 = arith.addf %198, %209 : vector<4x512xf32>
    %211 = vector.extract_strided_slice %3 {offsets = [21, 0, 0], sizes = [1, 4, 4], strides = [1, 1, 1]} : vector<27x4x4xf32> to vector<1x4x4xf32>
    %212 = vector.shape_cast %211 : vector<1x4x4xf32> to vector<4x4xf32>
    %cst_28 = arith.constant dense<0.000000e+00> : vector<4x512xf32>
    %213 = tpu.matmul %212, %1, %cst_28 {dimension_numbers = #tpu.dot_dimension_numbers<[1], [0], [0], [1], [0, 0, 1, 1], [], []>} : vector<4x4xf32>, vector<4x512xf32>, vector<4x512xf32> -> vector<4x512xf32>
    %c449_i32 = arith.constant 449 : i32
    %214 = tpu.dynamic_rotate %213 by %c449_i32 dim 1 : vector<4x512xf32>, i32 -> vector<4x512xf32>
    %215 = vector.extract_strided_slice %2 {offsets = [1, 0], sizes = [1, 512], strides = [1, 1]} : vector<6x512xf32> to vector<1x512xf32>
    %216 = vector.extract_strided_slice %2 {offsets = [4, 0], sizes = [1, 512], strides = [1, 1]} : vector<6x512xf32> to vector<1x512xf32>
    %217 = arith.mulf %215, %216 : vector<1x512xf32>
    %218 = vector.broadcast %217 : vector<1x512xf32> to vector<4x512xf32>
    %219 = arith.mulf %214, %218 : vector<4x512xf32>
    %220 = arith.addf %210, %219 : vector<4x512xf32>
    %221 = vector.extract_strided_slice %3 {offsets = [22, 0, 0], sizes = [1, 4, 4], strides = [1, 1, 1]} : vector<27x4x4xf32> to vector<1x4x4xf32>
    %222 = vector.shape_cast %221 : vector<1x4x4xf32> to vector<4x4xf32>
    %cst_29 = arith.constant dense<0.000000e+00> : vector<4x512xf32>
    %223 = tpu.matmul %222, %1, %cst_29 {dimension_numbers = #tpu.dot_dimension_numbers<[1], [0], [0], [1], [0, 0, 1, 1], [], []>} : vector<4x4xf32>, vector<4x512xf32>, vector<4x512xf32> -> vector<4x512xf32>
    %c448_i32 = arith.constant 448 : i32
    %224 = tpu.dynamic_rotate %223 by %c448_i32 dim 1 : vector<4x512xf32>, i32 -> vector<4x512xf32>
    %225 = vector.extract_strided_slice %2 {offsets = [1, 0], sizes = [1, 512], strides = [1, 1]} : vector<6x512xf32> to vector<1x512xf32>
    %226 = vector.broadcast %225 : vector<1x512xf32> to vector<4x512xf32>
    %227 = arith.mulf %224, %226 : vector<4x512xf32>
    %228 = arith.addf %220, %227 : vector<4x512xf32>
    %229 = vector.extract_strided_slice %3 {offsets = [23, 0, 0], sizes = [1, 4, 4], strides = [1, 1, 1]} : vector<27x4x4xf32> to vector<1x4x4xf32>
    %230 = vector.shape_cast %229 : vector<1x4x4xf32> to vector<4x4xf32>
    %cst_30 = arith.constant dense<0.000000e+00> : vector<4x512xf32>
    %231 = tpu.matmul %230, %1, %cst_30 {dimension_numbers = #tpu.dot_dimension_numbers<[1], [0], [0], [1], [0, 0, 1, 1], [], []>} : vector<4x4xf32>, vector<4x512xf32>, vector<4x512xf32> -> vector<4x512xf32>
    %c447_i32 = arith.constant 447 : i32
    %232 = tpu.dynamic_rotate %231 by %c447_i32 dim 1 : vector<4x512xf32>, i32 -> vector<4x512xf32>
    %233 = vector.extract_strided_slice %2 {offsets = [1, 0], sizes = [1, 512], strides = [1, 1]} : vector<6x512xf32> to vector<1x512xf32>
    %234 = vector.extract_strided_slice %2 {offsets = [5, 0], sizes = [1, 512], strides = [1, 1]} : vector<6x512xf32> to vector<1x512xf32>
    %235 = arith.mulf %233, %234 : vector<1x512xf32>
    %236 = vector.broadcast %235 : vector<1x512xf32> to vector<4x512xf32>
    %237 = arith.mulf %232, %236 : vector<4x512xf32>
    %238 = arith.addf %228, %237 : vector<4x512xf32>
    %239 = vector.extract_strided_slice %3 {offsets = [24, 0, 0], sizes = [1, 4, 4], strides = [1, 1, 1]} : vector<27x4x4xf32> to vector<1x4x4xf32>
    %240 = vector.shape_cast %239 : vector<1x4x4xf32> to vector<4x4xf32>
    %cst_31 = arith.constant dense<0.000000e+00> : vector<4x512xf32>
    %241 = tpu.matmul %240, %1, %cst_31 {dimension_numbers = #tpu.dot_dimension_numbers<[1], [0], [0], [1], [0, 0, 1, 1], [], []>} : vector<4x4xf32>, vector<4x512xf32>, vector<4x512xf32> -> vector<4x512xf32>
    %c441_i32 = arith.constant 441 : i32
    %242 = tpu.dynamic_rotate %241 by %c441_i32 dim 1 : vector<4x512xf32>, i32 -> vector<4x512xf32>
    %243 = vector.extract_strided_slice %2 {offsets = [1, 0], sizes = [1, 512], strides = [1, 1]} : vector<6x512xf32> to vector<1x512xf32>
    %244 = vector.extract_strided_slice %2 {offsets = [3, 0], sizes = [1, 512], strides = [1, 1]} : vector<6x512xf32> to vector<1x512xf32>
    %245 = vector.extract_strided_slice %2 {offsets = [4, 0], sizes = [1, 512], strides = [1, 1]} : vector<6x512xf32> to vector<1x512xf32>
    %246 = arith.mulf %243, %244 : vector<1x512xf32>
    %247 = arith.mulf %246, %245 : vector<1x512xf32>
    %248 = vector.broadcast %247 : vector<1x512xf32> to vector<4x512xf32>
    %249 = arith.mulf %242, %248 : vector<4x512xf32>
    %250 = arith.addf %238, %249 : vector<4x512xf32>
    %251 = vector.extract_strided_slice %3 {offsets = [25, 0, 0], sizes = [1, 4, 4], strides = [1, 1, 1]} : vector<27x4x4xf32> to vector<1x4x4xf32>
    %252 = vector.shape_cast %251 : vector<1x4x4xf32> to vector<4x4xf32>
    %cst_32 = arith.constant dense<0.000000e+00> : vector<4x512xf32>
    %253 = tpu.matmul %252, %1, %cst_32 {dimension_numbers = #tpu.dot_dimension_numbers<[1], [0], [0], [1], [0, 0, 1, 1], [], []>} : vector<4x4xf32>, vector<4x512xf32>, vector<4x512xf32> -> vector<4x512xf32>
    %c440_i32 = arith.constant 440 : i32
    %254 = tpu.dynamic_rotate %253 by %c440_i32 dim 1 : vector<4x512xf32>, i32 -> vector<4x512xf32>
    %255 = vector.extract_strided_slice %2 {offsets = [1, 0], sizes = [1, 512], strides = [1, 1]} : vector<6x512xf32> to vector<1x512xf32>
    %256 = vector.extract_strided_slice %2 {offsets = [3, 0], sizes = [1, 512], strides = [1, 1]} : vector<6x512xf32> to vector<1x512xf32>
    %257 = arith.mulf %255, %256 : vector<1x512xf32>
    %258 = vector.broadcast %257 : vector<1x512xf32> to vector<4x512xf32>
    %259 = arith.mulf %254, %258 : vector<4x512xf32>
    %260 = arith.addf %250, %259 : vector<4x512xf32>
    %261 = vector.extract_strided_slice %3 {offsets = [26, 0, 0], sizes = [1, 4, 4], strides = [1, 1, 1]} : vector<27x4x4xf32> to vector<1x4x4xf32>
    %262 = vector.shape_cast %261 : vector<1x4x4xf32> to vector<4x4xf32>
    %cst_33 = arith.constant dense<0.000000e+00> : vector<4x512xf32>
    %263 = tpu.matmul %262, %1, %cst_33 {dimension_numbers = #tpu.dot_dimension_numbers<[1], [0], [0], [1], [0, 0, 1, 1], [], []>} : vector<4x4xf32>, vector<4x512xf32>, vector<4x512xf32> -> vector<4x512xf32>
    %c439_i32 = arith.constant 439 : i32
    %264 = tpu.dynamic_rotate %263 by %c439_i32 dim 1 : vector<4x512xf32>, i32 -> vector<4x512xf32>
    %265 = vector.extract_strided_slice %2 {offsets = [1, 0], sizes = [1, 512], strides = [1, 1]} : vector<6x512xf32> to vector<1x512xf32>
    %266 = vector.extract_strided_slice %2 {offsets = [3, 0], sizes = [1, 512], strides = [1, 1]} : vector<6x512xf32> to vector<1x512xf32>
    %267 = vector.extract_strided_slice %2 {offsets = [5, 0], sizes = [1, 512], strides = [1, 1]} : vector<6x512xf32> to vector<1x512xf32>
    %268 = arith.mulf %265, %266 : vector<1x512xf32>
    %269 = arith.mulf %268, %267 : vector<1x512xf32>
    %270 = vector.broadcast %269 : vector<1x512xf32> to vector<4x512xf32>
    %271 = arith.mulf %264, %270 : vector<4x512xf32>
    %272 = arith.addf %260, %271 : vector<4x512xf32>
    %c0_34 = arith.constant 0 : index
    %c0_35 = arith.constant 0 : index
    %273 = vector.load %arg3[%c0_34, %c0_35] : memref<4x1xf32, #tpu.memory_space<vmem>>, vector<4x1xf32>
    %274 = vector.broadcast %273 : vector<4x1xf32> to vector<4x512xf32>
    %275 = arith.addf %272, %274 : vector<4x512xf32>
    %c0_36 = arith.constant 0 : index
    %c0_37 = arith.constant 0 : index
    %c0_38 = arith.constant 0 : index
    %276 = vector.load %arg5[%c0_36, %c0_37, %c0_38] : memref<1x4x512xf32, #tpu.memory_space<vmem>>, vector<1x4x512xf32>
    %277 = vector.shape_cast %276 : vector<1x4x512xf32> to vector<4x512xf32>
    %278 = vector.shape_cast %275 : vector<4x512xf32> to vector<1x4x512xf32>
    tpu.vector_store %arg5[%c0_36, %c0_37, %c0_38], %278 {strides = array<i32>} : memref<1x4x512xf32, #tpu.memory_space<vmem>>, vector<1x4x512xf32>,
    %cst_39 = arith.constant dense<0.000000e+00> : vector<4xf32>
    %279 = vector.multi_reduction <add>, %275, %cst_39 [1] : vector<4x512xf32> to vector<4xf32>
    %280 = vector.shape_cast %279 : vector<4xf32> to vector<4x1xf32>
    %cst_40 = arith.constant 0.001953125 : f32
    %281 = vector.broadcast %cst_40 : f32 to vector<4x1xf32>
    %282 = arith.mulf %280, %281 : vector<4x1xf32>
    %283 = vector.broadcast %282 : vector<4x1xf32> to vector<4x512xf32>
    %284 = arith.subf %275, %283 : vector<4x512xf32>
    %c0_41 = arith.constant 0 : index
    %c0_42 = arith.constant 0 : index
    %c0_43 = arith.constant 0 : index
    %285 = vector.load %arg6[%c0_41, %c0_42, %c0_43] : memref<1x4x1xf32, #tpu.memory_space<vmem>>, vector<1x4x1xf32>
    %286 = vector.shape_cast %285 : vector<1x4x1xf32> to vector<4x1xf32>
    %287 = vector.shape_cast %280 : vector<4x1xf32> to vector<1x4x1xf32>
    tpu.vector_store %arg6[%c0_41, %c0_42, %c0_43], %287 {strides = array<i32>} : memref<1x4x1xf32, #tpu.memory_space<vmem>>, vector<1x4x1xf32>,
    %288 = arith.mulf %284, %284 : vector<4x512xf32>
    %cst_44 = arith.constant dense<0.000000e+00> : vector<4xf32>
    %289 = vector.multi_reduction <add>, %288, %cst_44 [1] : vector<4x512xf32> to vector<4xf32>
    %290 = vector.shape_cast %289 : vector<4xf32> to vector<4x1xf32>
    %c0_45 = arith.constant 0 : index
    %c0_46 = arith.constant 0 : index
    %c0_47 = arith.constant 0 : index
    %291 = vector.load %arg7[%c0_45, %c0_46, %c0_47] : memref<1x4x1xf32, #tpu.memory_space<vmem>>, vector<1x4x1xf32>
    %292 = vector.shape_cast %291 : vector<1x4x1xf32> to vector<4x1xf32>
    %293 = vector.shape_cast %290 : vector<4x1xf32> to vector<1x4x1xf32>
    tpu.vector_store %arg7[%c0_45, %c0_46, %c0_47], %293 {strides = array<i32>} : memref<1x4x1xf32, #tpu.memory_space<vmem>>, vector<1x4x1xf32>,
    return
  }
  func.func @transform_0(%arg0: i32) -> (i32, i32, i32) {
    %c0_i32 = arith.constant 0 : i32
    %c0_i32_0 = arith.constant 0 : i32
    %c0_i32_1 = arith.constant 0 : i32
    return %arg0, %c0_i32, %c0_i32_0 : i32, i32, i32
  }
  func.func @transform_1(%arg0: i32) -> (i32, i32, i32) {
    %c0_i32 = arith.constant 0 : i32
    %c0_i32_0 = arith.constant 0 : i32
    %c0_i32_1 = arith.constant 0 : i32
    %c0_i32_2 = arith.constant 0 : i32
    return %c0_i32, %c0_i32_0, %c0_i32_1 : i32, i32, i32
  }
  func.func @transform_2(%arg0: i32) -> (i32, i32) {
    %c0_i32 = arith.constant 0 : i32
    %c0_i32_0 = arith.constant 0 : i32
    %c0_i32_1 = arith.constant 0 : i32
    return %c0_i32, %c0_i32_0 : i32, i32
  }
  func.func @transform_3(%arg0: i32) -> (i32, i32) {
    %c0_i32 = arith.constant 0 : i32
    %c0_i32_0 = arith.constant 0 : i32
    %c0_i32_1 = arith.constant 0 : i32
    return %c0_i32, %c0_i32_0 : i32, i32
  }
  func.func @transform_4(%arg0: i32) -> (i32, i32, i32) {
    %c0_i32 = arith.constant 0 : i32
    %c0_i32_0 = arith.constant 0 : i32
    %c0_i32_1 = arith.constant 0 : i32
    return %arg0, %c0_i32, %c0_i32_0 : i32, i32, i32
  }
  func.func @transform_5(%arg0: i32) -> (i32, i32, i32) {
    %c0_i32 = arith.constant 0 : i32
    %c0_i32_0 = arith.constant 0 : i32
    %c0_i32_1 = arith.constant 0 : i32
    return %arg0, %c0_i32, %c0_i32_0 : i32, i32, i32
  }
  func.func @transform_6(%arg0: i32) -> (i32, i32, i32) {
    %c0_i32 = arith.constant 0 : i32
    %c0_i32_0 = arith.constant 0 : i32
    %c0_i32_1 = arith.constant 0 : i32
    return %arg0, %c0_i32, %c0_i32_0 : i32, i32, i32
  }
}

</mosaic_0001>

<bundles_post_ra>
// kernel: attention_gate.6
= control target key start
LH: loop header
LB: loop body
LE: loop exit
PB: predicated region body
PF: predicated region fallthrough
CT: control target
= control target key end

     0   :  { %s416_s12 = smov 0   ;;  %s469_s0 = inlined_call_operand.vmem [shape: f32[2,162,64], index: 0, kind: input, shape index: {}]   ;;  %s470_s1 = inlined_call_operand.vmem [shape: f32[8,162], index: 1, kind: input, shape index: {}]   ;;  %s471_s2 = inlined_call_operand.vmem [shape: f32[8,1], index: 2, kind: input, shape index: {}]   ;;  %s472_s3 = inlined_call_operand.vmem [shape: f32[2,8,64], index: 3, kind: output, shape index: {}]  }
   0x1 LB: > { %s331_s13 = sadd.s32 4294967295, %s391_s12   ;;  %p335_p0 = scmp.ge.s32.totalorder %s391_s12, 1  ;;  %s391_s12 = sphi %s416_s12, %s13_s12  }
   0x2   : > { %p137_p1 = scmp.lt.s32.totalorder %s391_s12, 3 }
   0x4   : > { %p138_p2 = pnand %p335_p0, %p137_p1 }
   0x5   : > { %p160_p3 = scmp.lt.s32.totalorder (!%p138_p2), %s331_s13, 1  ;;  %v170_v0 = vld [vmem:[%s470_s1 + $0x8] sm:$0xff] (!%p138_p2)  ;;  %vm198_vm0 = vcmask (!%p138_p2), 277504   ;;  %v393_v1 = vmov (!%p138_p2), 0.0|0.0   ;;  %v192_v2 = vld [vmem:[%s471_s2] sm:$0xff] (!%p138_p2)  ;;  %v394_v3 = vmov (!%p138_p2), 0  }
   0x6   : > { %141 = sbr.rel (%p138_p2) target bundleno = 276 (0x114), region = 32  ;;  %342 = vmatprep.subr.bf16.mxu0 (!%p138_p2), %v393_v1  ;;  %339 = vmatprep.mubr.msk.f32.mxu0 (!%p138_p2), %vm198_vm0, %v170_v0  ;;  %v395_v34 = vmov (!%p138_p2), 0.0   ;;  %vm202_vm1 = vcmask (!%p138_p2), 1041408   ;;  %v169_v36 = vld [vmem:[%s470_s1] sm:$0xff] (!%p138_p2)  ;;  %vm276_vm2 = vcmask (!%p138_p2), 523264  }
   0x7   : > { %384 = vset.pattern.permute.xlu0 (!%p138_p2), %v394_v3 }
   0x8   : > { %195 = vperm.xlu0 (!%p138_p2), %384, %v192_v2  }
   0xd   : > { %s474_s13 = smov (!%p160_p3, %s331_s13), 1 }
   0xe   : > { %s372_s18 = smul.u32 168, %s474_s13  ;;  %s337_s24 = sshll.u32 %s474_s13, 3 }
   0xf   : > { %s168_s27 = scalar_lea.vmem %s472_s3, %s337_s24 }
  0x10   : > { %s436_s21 = scalar_lea.vmem %s469_s0, %s372_s18 }
  0x11   : > { %v171_v4 = vld [vmem:[%s436_s21] sm:$0xff]  ;;  %v172_v5 = vld [vmem:[%s436_s21 + $0x8] sm:$0xff]  ;;  %v173_v6 = vld [vmem:[%s436_s21 + $0x10] sm:$0xff] }
  0x12   : > { %v343_v7 = vpack.c.bf16 %v172_v5, %v171_v4  ;;  %v174_v8 = vld [vmem:[%s436_s21 + $0x18] sm:$0xff]  ;;  %v175_v10 = vld [vmem:[%s436_s21 + $0x20] sm:$0xff]  ;;  %v176_v11 = vld [vmem:[%s436_s21 + $0x28] sm:$0xff] }
  0x13   : > { %v346_v9 = vpack.c.bf16 %v174_v8, %v173_v6  ;;  %v349_v12 = vpack.c.bf16 %v176_v11, %v175_v10  ;;  %v177_v13 = vld [vmem:[%s436_s21 + $0x30] sm:$0xff]  ;;  %v178_v14 = vld [vmem:[%s436_s21 + $0x38] sm:$0xff]  ;;  %v179_v16 = vld [vmem:[%s436_s21 + $0x40] sm:$0xff] }
  0x14   : > { %344 = vmatpush1.bf16.msra.mxu0 %v343_v7  ;;  %v352_v15 = vpack.c.bf16 %v178_v14, %v177_v13  ;;  %v180_v17 = vld [vmem:[%s436_s21 + $0x48] sm:$0xff]  ;;  %v181_v19 = vld [vmem:[%s436_s21 + $0x50] sm:$0xff]  ;;  %v182_v20 = vld [vmem:[%s436_s21 + $0x58] sm:$0xff] }
  0x15   : > { %345 = vmatprep.subr.bf16.mxu0 %v393_v1  ;;  %v355_v18 = vpack.c.bf16 %v180_v17, %v179_v16  ;;  %v358_v21 = vpack.c.bf16 %v182_v20, %v181_v19  ;;  %v183_v22 = vld [vmem:[%s436_s21 + $0x60] sm:$0xff]  ;;  %v184_v23 = vld [vmem:[%s436_s21 + $0x68] sm:$0xff]  ;;  %v185_v25 = vld [vmem:[%s436_s21 + $0x70] sm:$0xff] }
  0x16   : > { %v361_v24 = vpack.c.bf16 %v184_v23, %v183_v22  ;;  %v186_v26 = vld [vmem:[%s436_s21 + $0x78] sm:$0xff]  ;;  %v187_v28 = vld [vmem:[%s436_s21 + $0x80] sm:$0xff]  ;;  %v188_v29 = vld [vmem:[%s436_s21 + $0x88] sm:$0xff] }
  0x17   : > { %v364_v27 = vpack.c.bf16 %v186_v26, %v185_v25  ;;  %v367_v30 = vpack.c.bf16 %v188_v29, %v187_v28  ;;  %v189_v31 = vld [vmem:[%s436_s21 + $0x90] sm:$0xff]  ;;  %v190_v32 = vld [vmem:[%s436_s21 + $0x98] sm:$0xff]  ;;  %v191_v35 = vld [vmem:[%s436_s21 + $0xa0] sm:$0x3] }
  0x18   : > { %347 = vmatpush1.bf16.msra.mxu0 %v346_v9  ;;  %v370_v33 = vpack.c.bf16 %v190_v32, %v189_v31 }
  0x19   : > { %348 = vmatprep.subr.bf16.mxu0 %v393_v1 }
  0x1c   : > { %350 = vmatpush1.bf16.msra.mxu0 %v349_v12 }
  0x1d   : > { %351 = vmatprep.subr.bf16.mxu0 %v393_v1 }
  0x20   : > { %353 = vmatpush1.bf16.msra.mxu0 %v352_v15 }
  0x21   : > { %354 = vmatprep.subr.bf16.mxu0 %v393_v1 }
  0x24   : > { %356 = vmatpush1.bf16.msra.mxu0 %v355_v18 }
  0x25   : > { %357 = vmatprep.subr.bf16.mxu0 %v393_v1 }
  0x28   : > { %359 = vmatpush1.bf16.msra.mxu0 %v358_v21 }
  0x29   : > { %360 = vmatprep.subr.bf16.mxu0 %v393_v1 }
  0x2c   : > { %362 = vmatpush1.bf16.msra.mxu0 %v361_v24 }
  0x2d   : > { %363 = vmatprep.subr.bf16.mxu0 %v393_v1 }
  0x30   : > { %365 = vmatpush1.bf16.msra.mxu0 %v364_v27 }
  0x31   : > { %366 = vmatprep.subr.bf16.mxu0 %v393_v1 }
  0x34   : > { %368 = vmatpush1.bf16.msra.mxu0 %v367_v30 }
  0x35   : > { %369 = vmatprep.subr.bf16.mxu0 %v393_v1 }
  0x38   : > { %371 = vmatpush1.bf16.msra.mxu0 %v370_v33 }
  0x39   : > { %246 = vmatprep.subr.mxu0 %v395_v34 }
  0x3c   : > { %338 = vmatpush1.msk.msra.mxu0 %vm202_vm1, %v191_v35 }
  0x3d   : > { %271 = vmatmul.mubr.f32.vlgmr.msra.gmra.mrb[0].mxu0 %v169_v36 }
  0x87   : > { %v196_v37 = vpop.permute.xlu0 %195 }
 0x110   : > { %v272_v38 = vpop.f32.mrb[0].mxu0 }
 0x111   : > { %v273_v39 = vadd.f32 %v272_v38, %v196_v37  ;;  %v274_v40 = vpop.f32.mrb[1].mxu0 }
 0x113   : > { %277 = vst.msk [vmem:[%s168_s27] sm:$0xff] %vm276_vm2, %v273_v39 }
 0x114 PF: > { %s13_s12 = sadd.s32 1, %s391_s12  }
 0x115   : > { %p10_p4 = scmp.ge.s32.totalorder %s13_s12, 4  }
 0x117   :  { %12 = sbr.rel (!%p10_p4) target bundleno = 1 (0x1), region = 62 }

// kernel: attention_gate.7
= control target key start
LH: loop header
LB: loop body
LE: loop exit
PB: predicated region body
PF: predicated region fallthrough
CT: control target
= control target key end

     0   :  { %s5784_s24 = smov 0   ;;  %s7385_s0 = inlined_call_operand.vmem [shape: f32[2,4,512], index: 0, kind: input, shape index: {}]   ;;  %s7386_s1 = inlined_call_operand.vmem [shape: f32[27,8,4], index: 1, kind: input, shape index: {}]   ;;  %s7387_s2 = inlined_call_operand.vmem [shape: f32[8,1], index: 2, kind: input, shape index: {}]   ;;  %s7388_s3 = inlined_call_operand.vmem [shape: f32[6,512], index: 3, kind: input, shape index: {}]   ;;  %s7389_s4 = inlined_call_operand.vmem [shape: f32[2,8,512], index: 4, kind: input, shape index: {}]   ;;  %s7390_s5 = inlined_call_operand.vmem [shape: f32[2,8,512], index: 5, kind: output, shape index: {0}]   ;;  %s7391_s6 = inlined_call_operand.vmem [shape: f32[2,8,1], index: 6, kind: output, shape index: {1}]   ;;  %s7392_s7 = inlined_call_operand.vmem [shape: f32[2,8,1], index: 7, kind: output, shape index: {2}]  }
   0x1 LB: > { %s5506_s25 = sadd.s32 4294967295, %s5723_s24   ;;  %p5510_p0 = scmp.ge.s32.totalorder %s5723_s24, 1  ;;  %s5723_s24 = sphi %s5784_s24, %s18_s24  }
   0x2   : > { %p252_p1 = scmp.lt.s32.totalorder %s5723_s24, 3 }
   0x4   : > { %p253_p2 = pnand %p5510_p0, %p252_p1 }
   0x6   : > { %256 = sbr.rel (%p253_p2) target bundleno = 868 (0x364), region = 40 }
   0xd   : > { %p297_p3 = scmp.lt.s32.totalorder %s5506_s25, 1  ;;  %v5725_v0 = vmov 0.0   ;;  %v5726_v1 = vmov 0   ;;  %vm361_vm0 = vcmask 1043456   ;;  %v326_v6 = vld [vmem:[%s7386_s1] sm:$0xff]  ;;  %vm357_vm1 = vcmask 31744  }
   0xe   : > { %434 = vmatprep.mubr.f32.mxu0 %v5725_v0  ;;  %505 = vmatprep.mubr.f32.mxu1 %v5725_v0  ;;  %v327_v7 = vld [vmem:[%s7386_s1 + $0x8] sm:$0xff]  ;;  %v328_v8 = vld [vmem:[%s7386_s1 + $0x10] sm:$0xff]  ;;  %v329_v9 = vld [vmem:[%s7386_s1 + $0x18] sm:$0xff]  ;;  %s5727_s21 = smov 73   ;;  %s5728_s22 = smov 72  }
   0xf   : > { %s7548_s25 = smov (!%p297_p3, %s5506_s25), 1  ;;  %5713 = vset.pattern.permute.xlu1 %v5726_v1  ;;  %5714 = vset.pattern.permute.xlu0 %v5726_v1  ;;  %v330_v10 = vld [vmem:[%s7386_s1 + $0x20] sm:$0xff]  ;;  %v331_v11 = vld [vmem:[%s7386_s1 + $0x28] sm:$0xff]  ;;  %v332_v12 = vld [vmem:[%s7386_s1 + $0x30] sm:$0xff]  ;;  %s5729_s23 = smov 71  }
  0x10   : > { %s5683_s26 = sshll.u32 %s7548_s25, 4  ;;  %v333_v13 = vld [vmem:[%s7386_s1 + $0x38] sm:$0xff]  ;;  %v334_v14 = vld [vmem:[%s7386_s1 + $0x40] sm:$0xff]  ;;  %v335_v15 = vld [vmem:[%s7386_s1 + $0x48] sm:$0xff]  ;;  %s5731_s27 = smov 64  }
  0x11   : > { %s301_s29 = scalar_lea.vmem %s7385_s0, %s5683_s26  ;;  %v336_v16 = vld [vmem:[%s7386_s1 + $0x50] sm:$0xff]  ;;  %v337_v17 = vld [vmem:[%s7386_s1 + $0x58] sm:$0xff]  ;;  %v338_v18 = vld [vmem:[%s7386_s1 + $0x60] sm:$0xff]  ;;  %s5730_s26 = smov 65  }
  0x12   : > { %v5800_v2 = vld [vmem:[%s301_s29] sm:$0xff]  ;;  %v5802_v3 = vld [vmem:[%s301_s29 + $0x8] sm:$0xff]  ;;  %v340_v20 = vld [vmem:[%s7386_s1 + $0x70] sm:$0xff]  ;;  %s5732_s28 = smov 63   ;;  %s5733_s29 = smov 57  }
  0x13   : > { %v5806_v4 = vcombine.high %v5800_v2, %v5800_v2  ;;  %v5810_v5 = vcombine.high %v5802_v3, %v5802_v3  ;;  %v339_v19 = vld [vmem:[%s7386_s1 + $0x68] sm:$0xff]  ;;  %v341_v21 = vld [vmem:[%s7386_s1 + $0x78] sm:$0xff]  ;;  %v342_v22 = vld [vmem:[%s7386_s1 + $0x80] sm:$0xff]  ;;  %s5734_s30 = smov 56   ;;  %s5735_s8 = smov 55  }
  0x14   : > { %v343_v23 = vld [vmem:[%s7386_s1 + $0x88] sm:$0xff]  ;;  %v344_v24 = vld [vmem:[%s7386_s1 + $0x90] sm:$0xff]  ;;  %v345_v25 = vld [vmem:[%s7386_s1 + $0x98] sm:$0xff]  ;;  %s5736_s9 = smov 9   ;;  %s5737_s10 = smov 8  }
  0x15   : > { %5519 = vmatprep.subr.msk.mxu0 %vm361_vm0, %v5806_v4  ;;  %5522 = vmatprep.subr.msk.mxu1 %vm361_vm0, %v5810_v5  ;;  %v346_v26 = vld [vmem:[%s7386_s1 + $0xa0] sm:$0xff]  ;;  %v347_v27 = vld [vmem:[%s7386_s1 + $0xa8] sm:$0xff]  ;;  %v348_v28 = vld [vmem:[%s7386_s1 + $0xb0] sm:$0xff]  ;;  %s5738_s11 = smov 7   ;;  %s5739_s12 = smov 1  }
  0x16   : > { %5520 = vmatpush1.msk.msra.mxu0 %vm361_vm0, %v5800_v2  ;;  %5523 = vmatpush1.msk.msra.mxu1 %vm361_vm0, %v5802_v3  ;;  %v349_v29 = vld [vmem:[%s7386_s1 + $0xb8] sm:$0xff]  ;;  %v350_v30 = vld [vmem:[%s7386_s1 + $0xc0] sm:$0xff]  ;;  %v351_v31 = vld [vmem:[%s7386_s1 + $0xc8] sm:$0xff]  ;;  %s5740_s13 = smov 127   ;;  %s5741_s14 = smov 121  }
  0x17   : > { %5521 = vmatmul.mubr.msk.f32.vlgmr.msra.gmra.mrb[0].mxu0 %vm357_vm1, %v326_v6  ;;  %5524 = vmatmul.mubr.msk.f32.vlgmr.msra.gmra.mrb[0].mxu1 %vm357_vm1, %v326_v6  ;;  %v5333_v32 = vld [vmem:[%s7387_s2] sm:$0xff]  ;;  %v352_v33 = vld [vmem:[%s7386_s1 + $0xd0] sm:$0xff] }
  0x18   : > { %5525 = vmatprep.subr.msk.mxu0 %vm361_vm0, %v5806_v4  ;;  %646 = vmatprep.mubr.f32.mxu0 %v5725_v0 }
  0x19   : > { %5526 = vmatpush1.msk.msra.mxu0 %vm361_vm0, %v5800_v2  ;;  %5528 = vmatprep.subr.msk.mxu1 %vm361_vm0, %v5810_v5 }
  0x1a   : > { %5529 = vmatpush1.msk.msra.mxu1 %vm361_vm0, %v5802_v3  ;;  %717 = vmatprep.mubr.f32.mxu1 %v5725_v0 }
  0x1b   : > { %5527 = vmatmul.mubr.msk.f32.vlgmr.msra.gmra.mrb[2].mxu0 %vm357_vm1, %v327_v7  ;;  %5530 = vmatmul.mubr.msk.f32.vlgmr.msra.gmra.mrb[2].mxu1 %vm357_vm1, %v327_v7 }
  0x1c   : > { %5531 = vmatprep.subr.msk.mxu0 %vm361_vm0, %v5806_v4  ;;  %828 = vmatprep.mubr.f32.mxu0 %v5725_v0 }
  0x1d   : > { %5532 = vmatpush1.msk.msra.mxu0 %vm361_vm0, %v5800_v2  ;;  %5534 = vmatprep.subr.msk.mxu1 %vm361_vm0, %v5810_v5 }
  0x1e   : > { %5535 = vmatpush1.msk.msra.mxu1 %vm361_vm0, %v5802_v3  ;;  %899 = vmatprep.mubr.f32.mxu1 %v5725_v0 }
  0x1f   : > { %5533 = vmatmul.mubr.msk.f32.vlgmr.msra.gmra.mrb[4].mxu0 %vm357_vm1, %v328_v8  ;;  %5536 = vmatmul.mubr.msk.f32.vlgmr.msra.gmra.mrb[4].mxu1 %vm357_vm1, %v328_v8 }
  0x20   : > { %5537 = vmatprep.subr.msk.mxu0 %vm361_vm0, %v5806_v4  ;;  %1022 = vmatprep.mubr.f32.mxu0 %v5725_v0 }
  0x21   : > { %5538 = vmatpush1.msk.msra.mxu0 %vm361_vm0, %v5800_v2  ;;  %5540 = vmatprep.subr.msk.mxu1 %vm361_vm0, %v5810_v5 }
  0x22   : > { %5541 = vmatpush1.msk.msra.mxu1 %vm361_vm0, %v5802_v3  ;;  %1093 = vmatprep.mubr.f32.mxu1 %v5725_v0 }
  0x23   : > { %5539 = vmatmul.mubr.msk.f32.vlgmr.msra.gmra.mrb[6].mxu0 %vm357_vm1, %v329_v9  ;;  %5542 = vmatmul.mubr.msk.f32.vlgmr.msra.gmra.mrb[6].mxu1 %vm357_vm1, %v329_v9 }
  0x24   : > { %5543 = vmatprep.subr.msk.mxu0 %vm361_vm0, %v5806_v4  ;;  %1208 = vmatprep.mubr.f32.mxu0 %v5725_v0 }
  0x25   : > { %5544 = vmatpush1.msk.msra.mxu0 %vm361_vm0, %v5800_v2  ;;  %5546 = vmatprep.subr.msk.mxu1 %vm361_vm0, %v5810_v5 }
  0x26   : > { %5547 = vmatpush1.msk.msra.mxu1 %vm361_vm0, %v5802_v3  ;;  %1279 = vmatprep.mubr.f32.mxu1 %v5725_v0 }
  0x27   : > { %5545 = vmatmul.mubr.msk.f32.vlgmr.msra.gmra.mrb[8].mxu0 %vm357_vm1, %v330_v10  ;;  %5548 = vmatmul.mubr.msk.f32.vlgmr.msra.gmra.mrb[8].mxu1 %vm357_vm1, %v330_v10 }
  0x28   : > { %5549 = vmatprep.subr.msk.mxu0 %vm361_vm0, %v5806_v4  ;;  %1390 = vmatprep.mubr.f32.mxu0 %v5725_v0 }
  0x29   : > { %5550 = vmatpush1.msk.msra.mxu0 %vm361_vm0, %v5800_v2  ;;  %5552 = vmatprep.subr.msk.mxu1 %vm361_vm0, %v5810_v5 }
  0x2a   : > { %5553 = vmatpush1.msk.msra.mxu1 %vm361_vm0, %v5802_v3  ;;  %1461 = vmatprep.mubr.f32.mxu1 %v5725_v0 }
  0x2b   : > { %5551 = vmatmul.mubr.msk.f32.vlgmr.msra.gmra.mrb[10].mxu0 %vm357_vm1, %v331_v11  ;;  %5554 = vmatmul.mubr.msk.f32.vlgmr.msra.gmra.mrb[10].mxu1 %vm357_vm1, %v331_v11 }
  0x2c   : > { %5555 = vmatprep.subr.msk.mxu0 %vm361_vm0, %v5806_v4  ;;  %1576 = vmatprep.mubr.f32.mxu0 %v5725_v0 }
  0x2d   : > { %5556 = vmatpush1.msk.msra.mxu0 %vm361_vm0, %v5800_v2  ;;  %5558 = vmatprep.subr.msk.mxu1 %vm361_vm0, %v5810_v5 }
  0x2e   : > { %5559 = vmatpush1.msk.msra.mxu1 %vm361_vm0, %v5802_v3  ;;  %1647 = vmatprep.mubr.f32.mxu1 %v5725_v0 }
  0x2f   : > { %5557 = vmatmul.mubr.msk.f32.vlgmr.msra.gmra.mrb[12].mxu0 %vm357_vm1, %v332_v12  ;;  %5560 = vmatmul.mubr.msk.f32.vlgmr.msra.gmra.mrb[12].mxu1 %vm357_vm1, %v332_v12 }
  0x30   : > { %5561 = vmatprep.subr.msk.mxu0 %vm361_vm0, %v5806_v4  ;;  %1774 = vmatprep.mubr.f32.mxu0 %v5725_v0 }
  0x31   : > { %5562 = vmatpush1.msk.msra.mxu0 %vm361_vm0, %v5800_v2  ;;  %5564 = vmatprep.subr.msk.mxu1 %vm361_vm0, %v5810_v5 }
  0x32   : > { %5565 = vmatpush1.msk.msra.mxu1 %vm361_vm0, %v5802_v3  ;;  %1845 = vmatprep.mubr.f32.mxu1 %v5725_v0 }
  0x33   : > { %5563 = vmatmul.mubr.msk.f32.vlgmr.msra.gmra.mrb[14].mxu0 %vm357_vm1, %v333_v13  ;;  %5566 = vmatmul.mubr.msk.f32.vlgmr.msra.gmra.mrb[14].mxu1 %vm357_vm1, %v333_v13 }
  0x34   : > { %5567 = vmatprep.subr.msk.mxu0 %vm361_vm0, %v5806_v4  ;;  %1956 = vmatprep.mubr.f32.mxu0 %v5725_v0 }
  0x35   : > { %5568 = vmatpush1.msk.msra.mxu0 %vm361_vm0, %v5800_v2  ;;  %5570 = vmatprep.subr.msk.mxu1 %vm361_vm0, %v5810_v5 }
  0x36   : > { %5571 = vmatpush1.msk.msra.mxu1 %vm361_vm0, %v5802_v3  ;;  %2027 = vmatprep.mubr.f32.mxu1 %v5725_v0 }
  0x37   : > { %5569 = vmatmul.mubr.msk.f32.vlgmr.msra.gmra.mrb[16].mxu0 %vm357_vm1, %v334_v14  ;;  %5572 = vmatmul.mubr.msk.f32.vlgmr.msra.gmra.mrb[16].mxu1 %vm357_vm1, %v334_v14 }
  0x38   : > { %5573 = vmatprep.subr.msk.mxu0 %vm361_vm0, %v5806_v4  ;;  %2142 = vmatprep.mubr.f32.mxu0 %v5725_v0 }
  0x39   : > { %5574 = vmatpush1.msk.msra.mxu0 %vm361_vm0, %v5800_v2  ;;  %5576 = vmatprep.subr.msk.mxu1 %vm361_vm0, %v5810_v5 }
  0x3a   : > { %5577 = vmatpush1.msk.msra.mxu1 %vm361_vm0, %v5802_v3  ;;  %2213 = vmatprep.mubr.f32.mxu1 %v5725_v0 }
  0x3b   : > { %5575 = vmatmul.mubr.msk.f32.vlgmr.msra.gmra.mrb[18].mxu0 %vm357_vm1, %v335_v15  ;;  %5578 = vmatmul.mubr.msk.f32.vlgmr.msra.gmra.mrb[18].mxu1 %vm357_vm1, %v335_v15 }
  0x3c   : > { %5579 = vmatprep.subr.msk.mxu0 %vm361_vm0, %v5806_v4  ;;  %2324 = vmatprep.mubr.f32.mxu0 %v5725_v0 }
  0x3d   : > { %5580 = vmatpush1.msk.msra.mxu0 %vm361_vm0, %v5800_v2  ;;  %5582 = vmatprep.subr.msk.mxu1 %vm361_vm0, %v5810_v5 }
  0x3e   : > { %5583 = vmatpush1.msk.msra.mxu1 %vm361_vm0, %v5802_v3  ;;  %2395 = vmatprep.mubr.f32.mxu1 %v5725_v0 }
  0x3f   : > { %5581 = vmatmul.mubr.msk.f32.vlgmr.msra.gmra.mrb[20].mxu0 %vm357_vm1, %v336_v16  ;;  %5584 = vmatmul.mubr.msk.f32.vlgmr.msra.gmra.mrb[20].mxu1 %vm357_vm1, %v336_v16 }
  0x40   : > { %5585 = vmatprep.subr.msk.mxu0 %vm361_vm0, %v5806_v4  ;;  %2506 = vmatprep.mubr.f32.mxu0 %v5725_v0 }
  0x41   : > { %5586 = vmatpush1.msk.msra.mxu0 %vm361_vm0, %v5800_v2  ;;  %5588 = vmatprep.subr.msk.mxu1 %vm361_vm0, %v5810_v5 }
  0x42   : > { %5589 = vmatpush1.msk.msra.mxu1 %vm361_vm0, %v5802_v3  ;;  %2577 = vmatprep.mubr.f32.mxu1 %v5725_v0 }
  0x43   : > { %5587 = vmatmul.mubr.msk.f32.vlgmr.msra.gmra.mrb[22].mxu0 %vm357_vm1, %v337_v17  ;;  %5590 = vmatmul.mubr.msk.f32.vlgmr.msra.gmra.mrb[22].mxu1 %vm357_vm1, %v337_v17 }
  0x44   : > { %5591 = vmatprep.subr.msk.mxu0 %vm361_vm0, %v5806_v4  ;;  %2688 = vmatprep.mubr.f32.mxu0 %v5725_v0 }
  0x45   : > { %5592 = vmatpush1.msk.msra.mxu0 %vm361_vm0, %v5800_v2  ;;  %5594 = vmatprep.subr.msk.mxu1 %vm361_vm0, %v5810_v5 }
  0x46   : > { %5595 = vmatpush1.msk.msra.mxu1 %vm361_vm0, %v5802_v3  ;;  %5597 = vmatprep.subr.msk.mxu0 %vm361_vm0, %v5806_v4 }
  0x47   : > { %5593 = vmatmul.mubr.msk.f32.vlgmr.msra.gmra.mrb[24].mxu0 %vm357_vm1, %v338_v18  ;;  %2759 = vmatprep.mubr.f32.mxu1 %v5725_v0 }
  0x48   : > { %5598 = vmatpush1.msk.msra.mxu0 %vm361_vm0, %v5800_v2  ;;  %5596 = vmatmul.mubr.msk.f32.vlgmr.msra.gmra.mrb[24].mxu1 %vm357_vm1, %v338_v18 }
  0x49   : > { %2870 = vmatprep.mubr.f32.mxu0 %v5725_v0  ;;  %5600 = vmatprep.subr.msk.mxu1 %vm361_vm0, %v5810_v5 }
  0x4a   : > { %5603 = vmatprep.subr.msk.mxu0 %vm361_vm0, %v5806_v4  ;;  %5601 = vmatpush1.msk.msra.mxu1 %vm361_vm0, %v5802_v3 }
  0x4b   : > { %5599 = vmatmul.mubr.msk.f32.vlgmr.msra.gmra.mrb[26].mxu0 %vm357_vm1, %v339_v19  ;;  %2941 = vmatprep.mubr.f32.mxu1 %v5725_v0 }
  0x4c   : > { %5604 = vmatpush1.msk.msra.mxu0 %vm361_vm0, %v5800_v2  ;;  %3019 = vmatprep.mubr.f32.mxu0 %v5725_v0 }
  0x4d   : > { %5602 = vmatmul.mubr.msk.f32.vlgmr.msra.gmra.mrb[26].mxu1 %vm357_vm1, %v339_v19  ;;  %5606 = vmatprep.subr.msk.mxu1 %vm361_vm0, %v5810_v5 }
  0x4e   : > { %5607 = vmatpush1.msk.msra.mxu1 %vm361_vm0, %v5802_v3  ;;  %3090 = vmatprep.mubr.f32.mxu1 %v5725_v0 }
  0x4f   : > { %5605 = vmatmul.mubr.msk.f32.vlgmr.msra.gmra.mrb[28].mxu0 %vm357_vm1, %v340_v20  ;;  %5609 = vmatprep.subr.msk.mxu0 %vm361_vm0, %v5806_v4 }
  0x50   : > { %5610 = vmatpush1.msk.msra.mxu0 %vm361_vm0, %v5800_v2  ;;  %3201 = vmatprep.mubr.f32.mxu0 %v5725_v0 }
  0x51   : > { %5608 = vmatmul.mubr.msk.f32.vlgmr.msra.gmra.mrb[28].mxu1 %vm357_vm1, %v340_v20  ;;  %5612 = vmatprep.subr.msk.mxu1 %vm361_vm0, %v5810_v5 }
  0x52   : > { %5613 = vmatpush1.msk.msra.mxu1 %vm361_vm0, %v5802_v3  ;;  %3272 = vmatprep.mubr.f32.mxu1 %v5725_v0 }
  0x53   : > { %5611 = vmatmul.mubr.msk.f32.vlgmr.msra.gmra.mrb[30].mxu0 %vm357_vm1, %v341_v21  ;;  %5615 = vmatprep.subr.msk.mxu0 %vm361_vm0, %v5806_v4 }
  0x54   : > { %5616 = vmatpush1.msk.msra.mxu0 %vm361_vm0, %v5800_v2  ;;  %3395 = vmatprep.mubr.f32.mxu0 %v5725_v0 }
  0x55   : > { %5614 = vmatmul.mubr.msk.f32.vlgmr.msra.gmra.mrb[30].mxu1 %vm357_vm1, %v341_v21  ;;  %5618 = vmatprep.subr.msk.mxu1 %vm361_vm0, %v5810_v5 }
  0x56   : > { %5619 = vmatpush1.msk.msra.mxu1 %vm361_vm0, %v5802_v3  ;;  %3466 = vmatprep.mubr.f32.mxu1 %v5725_v0 }
  0x57   : > { %5617 = vmatmul.mubr.msk.f32.vlgmr.msra.gmra.mrb[32].mxu0 %vm357_vm1, %v342_v22  ;;  %5621 = vmatprep.subr.msk.mxu0 %vm361_vm0, %v5806_v4 }
  0x58   : > { %5622 = vmatpush1.msk.msra.mxu0 %vm361_vm0, %v5800_v2  ;;  %3577 = vmatprep.mubr.f32.mxu0 %v5725_v0 }
  0x59   : > { %5620 = vmatmul.mubr.msk.f32.vlgmr.msra.gmra.mrb[32].mxu1 %vm357_vm1, %v342_v22  ;;  %5624 = vmatprep.subr.msk.mxu1 %vm361_vm0, %v5810_v5 }
  0x5a   : > { %5625 = vmatpush1.msk.msra.mxu1 %vm361_vm0, %v5802_v3  ;;  %3648 = vmatprep.mubr.f32.mxu1 %v5725_v0 }
  0x5b   : > { %5623 = vmatmul.mubr.msk.f32.vlgmr.msra.gmra.mrb[34].mxu0 %vm357_vm1, %v343_v23  ;;  %5627 = vmatprep.subr.msk.mxu0 %vm361_vm0, %v5806_v4 }
  0x5c   : > { %5628 = vmatpush1.msk.msra.mxu0 %vm361_vm0, %v5800_v2  ;;  %3759 = vmatprep.mubr.f32.mxu0 %v5725_v0 }
  0x5d   : > { %5626 = vmatmul.mubr.msk.f32.vlgmr.msra.gmra.mrb[34].mxu1 %vm357_vm1, %v343_v23  ;;  %5630 = vmatprep.subr.msk.mxu1 %vm361_vm0, %v5810_v5 }
  0x5e   : > { %5631 = vmatpush1.msk.msra.mxu1 %vm361_vm0, %v5802_v3  ;;  %3830 = vmatprep.mubr.f32.mxu1 %v5725_v0 }
  0x5f   : > { %5629 = vmatmul.mubr.msk.f32.vlgmr.msra.gmra.mrb[36].mxu0 %vm357_vm1, %v344_v24  ;;  %5633 = vmatprep.subr.msk.mxu0 %vm361_vm0, %v5806_v4 }
  0x60   : > { %5634 = vmatpush1.msk.msra.mxu0 %vm361_vm0, %v5800_v2  ;;  %3944 = vmatprep.mubr.f32.mxu0 %v5725_v0 }
  0x61   : > { %5632 = vmatmul.mubr.msk.f32.vlgmr.msra.gmra.mrb[36].mxu1 %vm357_vm1, %v344_v24  ;;  %5636 = vmatprep.subr.msk.mxu1 %vm361_vm0, %v5810_v5 }
  0x62   : > { %5637 = vmatpush1.msk.msra.mxu1 %vm361_vm0, %v5802_v3  ;;  %4015 = vmatprep.mubr.f32.mxu1 %v5725_v0 }
  0x63   : > { %5635 = vmatmul.mubr.msk.f32.vlgmr.msra.gmra.mrb[38].mxu0 %vm357_vm1, %v345_v25  ;;  %5639 = vmatprep.subr.msk.mxu0 %vm361_vm0, %v5806_v4 }
  0x64   : > { %5640 = vmatpush1.msk.msra.mxu0 %vm361_vm0, %v5800_v2  ;;  %4125 = vmatprep.mubr.f32.mxu0 %v5725_v0 }
  0x65   : > { %5638 = vmatmul.mubr.msk.f32.vlgmr.msra.gmra.mrb[38].mxu1 %vm357_vm1, %v345_v25  ;;  %5642 = vmatprep.subr.msk.mxu1 %vm361_vm0, %v5810_v5 }
  0x66   : > { %5643 = vmatpush1.msk.msra.mxu1 %vm361_vm0, %v5802_v3  ;;  %4196 = vmatprep.mubr.f32.mxu1 %v5725_v0 }
  0x67   : > { %5641 = vmatmul.mubr.msk.f32.vlgmr.msra.gmra.mrb[40].mxu0 %vm357_vm1, %v346_v26  ;;  %5645 = vmatprep.subr.msk.mxu0 %vm361_vm0, %v5806_v4 }
  0x68   : > { %5646 = vmatpush1.msk.msra.mxu0 %vm361_vm0, %v5800_v2  ;;  %4310 = vmatprep.mubr.f32.mxu0 %v5725_v0 }
  0x69   : > { %5644 = vmatmul.mubr.msk.f32.vlgmr.msra.gmra.mrb[40].mxu1 %vm357_vm1, %v346_v26  ;;  %5648 = vmatprep.subr.msk.mxu1 %vm361_vm0, %v5810_v5 }
  0x6a   : > { %5649 = vmatpush1.msk.msra.mxu1 %vm361_vm0, %v5802_v3  ;;  %4381 = vmatprep.mubr.f32.mxu1 %v5725_v0 }
  0x6b   : > { %5647 = vmatmul.mubr.msk.f32.vlgmr.msra.gmra.mrb[42].mxu0 %vm357_vm1, %v347_v27  ;;  %5651 = vmatprep.subr.msk.mxu0 %vm361_vm0, %v5806_v4 }
  0x6c   : > { %5652 = vmatpush1.msk.msra.mxu0 %vm361_vm0, %v5800_v2  ;;  %4491 = vmatprep.mubr.f32.mxu0 %v5725_v0 }
  0x6d   : > { %5650 = vmatmul.mubr.msk.f32.vlgmr.msra.gmra.mrb[42].mxu1 %vm357_vm1, %v347_v27  ;;  %5654 = vmatprep.subr.msk.mxu1 %vm361_vm0, %v5810_v5 }
  0x6e   : > { %5655 = vmatpush1.msk.msra.mxu1 %vm361_vm0, %v5802_v3  ;;  %4562 = vmatprep.mubr.f32.mxu1 %v5725_v0 }
  0x6f   : > { %5653 = vmatmul.mubr.msk.f32.vlgmr.msra.gmra.mrb[44].mxu0 %vm357_vm1, %v348_v28  ;;  %5657 = vmatprep.subr.msk.mxu0 %vm361_vm0, %v5806_v4 }
  0x70   : > { %5658 = vmatpush1.msk.msra.mxu0 %vm361_vm0, %v5800_v2  ;;  %4672 = vmatprep.mubr.f32.mxu0 %v5725_v0 }
  0x71   : > { %5656 = vmatmul.mubr.msk.f32.vlgmr.msra.gmra.mrb[44].mxu1 %vm357_vm1, %v348_v28  ;;  %5660 = vmatprep.subr.msk.mxu1 %vm361_vm0, %v5810_v5 }
  0x72   : > { %5661 = vmatpush1.msk.msra.mxu1 %vm361_vm0, %v5802_v3  ;;  %4743 = vmatprep.mubr.f32.mxu1 %v5725_v0 }
  0x73   : > { %5659 = vmatmul.mubr.msk.f32.vlgmr.msra.gmra.mrb[46].mxu0 %vm357_vm1, %v349_v29  ;;  %5663 = vmatprep.subr.msk.mxu0 %vm361_vm0, %v5806_v4 }
  0x74   : > { %5664 = vmatpush1.msk.msra.mxu0 %vm361_vm0, %v5800_v2  ;;  %4853 = vmatprep.mubr.f32.mxu0 %v5725_v0 }
  0x75   : > { %5662 = vmatmul.mubr.msk.f32.vlgmr.msra.gmra.mrb[46].mxu1 %vm357_vm1, %v349_v29  ;;  %5666 = vmatprep.subr.msk.mxu1 %vm361_vm0, %v5810_v5 }
  0x76   : > { %5667 = vmatpush1.msk.msra.mxu1 %vm361_vm0, %v5802_v3  ;;  %4924 = vmatprep.mubr.f32.mxu1 %v5725_v0 }
  0x77   : > { %5665 = vmatmul.mubr.msk.f32.vlgmr.msra.gmra.mrb[48].mxu0 %vm357_vm1, %v350_v30  ;;  %5669 = vmatprep.subr.msk.mxu0 %vm361_vm0, %v5806_v4 }
  0x78   : > { %5670 = vmatpush1.msk.msra.mxu0 %vm361_vm0, %v5800_v2  ;;  %5038 = vmatprep.mubr.f32.mxu0 %v5725_v0 }
  0x79   : > { %5668 = vmatmul.mubr.msk.f32.vlgmr.msra.gmra.mrb[48].mxu1 %vm357_vm1, %v350_v30  ;;  %5672 = vmatprep.subr.msk.mxu1 %vm361_vm0, %v5810_v5 }
  0x7a   : > { %5673 = vmatpush1.msk.msra.mxu1 %vm361_vm0, %v5802_v3  ;;  %5109 = vmatprep.mubr.f32.mxu1 %v5725_v0 }
  0x7b   : > { %5671 = vmatmul.mubr.msk.f32.vlgmr.msra.gmra.mrb[50].mxu0 %vm357_vm1, %v351_v31  ;;  %5336 = vperm.xlu1 %5713, %v5333_v32  }
  0x7c   : > { %5675 = vmatprep.subr.msk.mxu0 %vm361_vm0, %v5806_v4  ;;  %5219 = vmatprep.mubr.f32.mxu0 %v5725_v0 }
  0x7d   : > { %5674 = vmatmul.mubr.msk.f32.vlgmr.msra.gmra.mrb[50].mxu1 %vm357_vm1, %v351_v31  ;;  %5676 = vmatpush1.msk.msra.mxu0 %vm361_vm0, %v5800_v2 }
  0x7e   : > { %5678 = vmatprep.subr.msk.mxu1 %vm361_vm0, %v5810_v5  ;;  %5290 = vmatprep.mubr.f32.mxu1 %v5725_v0 }
  0x7f   : > { %5677 = vmatmul.mubr.msk.f32.vlgmr.msra.gmra.mrb[52].mxu0 %vm357_vm1, %v352_v33  ;;  %5679 = vmatpush1.msk.msra.mxu1 %vm361_vm0, %v5802_v3 }
  0x81   : > { %5680 = vmatmul.mubr.msk.f32.vlgmr.msra.gmra.mrb[52].mxu1 %vm357_vm1, %v352_v33 }
  0xea   : > { %v436_v34 = vpop.f32.mrb[0].mxu0  ;;  %v507_v35 = vpop.f32.mrb[0].mxu1 }
  0xeb   : > { %v509_v36 = vpop.f32.mrb[1].mxu1  ;;  %512 = vrot.lane.b32.xlu0 %v436_v34, %s5727_s21  ;;  %v438_v37 = vpop.f32.mrb[1].mxu0 }
  0xec   : > { %518 = vrot.lane.b32.xlu1 %v509_v36, %s5727_s21 }
  0xee   : > { %v648_v38 = vpop.f32.mrb[2].mxu0  ;;  %v719_v39 = vpop.f32.mrb[2].mxu1 }
  0xef   : > { %516 = vrot.lane.b32.xlu0 %v507_v35, %s5727_s21  ;;  %v650_v40 = vpop.f32.mrb[3].mxu0  ;;  %v721_v41 = vpop.f32.mrb[3].mxu1 }
  0xf0   : > { %724 = vrot.lane.b32.xlu1 %v648_v38, %s5728_s22 }
  0xf2   : > { %v830_v42 = vpop.f32.mrb[4].mxu0  ;;  %v901_v43 = vpop.f32.mrb[4].mxu1 }
  0xf3   : > { %514 = vrot.lane.b32.xlu0 %v438_v37, %s5727_s21  ;;  %v832_v44 = vpop.f32.mrb[5].mxu0  ;;  %v903_v45 = vpop.f32.mrb[5].mxu1 }
  0xf4   : > { %728 = vrot.lane.b32.xlu1 %v719_v39, %s5728_s22 }
  0xf6   : > { %v1024_v46 = vpop.f32.mrb[6].mxu0  ;;  %v1095_v47 = vpop.f32.mrb[6].mxu1 }
  0xf7   : > { %726 = vrot.lane.b32.xlu0 %v650_v40, %s5728_s22  ;;  %v1026_v48 = vpop.f32.mrb[7].mxu0  ;;  %v1097_v49 = vpop.f32.mrb[7].mxu1 }
  0xf8   : > { %730 = vrot.lane.b32.xlu1 %v721_v41, %s5728_s22 }
  0xfa   : > { %v1210_v50 = vpop.f32.mrb[8].mxu0  ;;  %v1281_v51 = vpop.f32.mrb[8].mxu1 }
  0xfb   : > { %906 = vrot.lane.b32.xlu0 %v830_v42, %s5729_s23  ;;  %v1212_v52 = vpop.f32.mrb[9].mxu0  ;;  %v1283_v53 = vpop.f32.mrb[9].mxu1 }
  0xfc   : > { %910 = vrot.lane.b32.xlu1 %v901_v43, %s5729_s23 }
  0xfe   : > { %v1392_v54 = vpop.f32.mrb[10].mxu0  ;;  %v1463_v55 = vpop.f32.mrb[10].mxu1 }
  0xff   : > { %912 = vrot.lane.b32.xlu0 %v903_v45, %s5729_s23  ;;  %v1394_v56 = vpop.f32.mrb[11].mxu0  ;;  %v1465_v57 = vpop.f32.mrb[11].mxu1 }
 0x100   : > { %908 = vrot.lane.b32.xlu1 %v832_v44, %s5729_s23 }
 0x102   : > { %v1578_v58 = vpop.f32.mrb[12].mxu0  ;;  %v1649_v59 = vpop.f32.mrb[12].mxu1 }
 0x103   : > { %1100 = vrot.lane.b32.xlu0 %v1024_v46, %s5730_s26  ;;  %v1580_v60 = vpop.f32.mrb[13].mxu0  ;;  %v1651_v61 = vpop.f32.mrb[13].mxu1 }
 0x104   : > { %1104 = vrot.lane.b32.xlu1 %v1095_v47, %s5730_s26 }
 0x106   : > { %v1776_v62 = vpop.f32.mrb[14].mxu0  ;;  %v1847_v63 = vpop.f32.mrb[14].mxu1 }
 0x107   : > { %1106 = vrot.lane.b32.xlu0 %v1097_v49, %s5730_s26  ;;  %v1778_v0 = vpop.f32.mrb[15].mxu0  ;;  %v1849_v1 = vpop.f32.mrb[15].mxu1 }
 0x108   : > { %1102 = vrot.lane.b32.xlu1 %v1026_v48, %s5730_s26 }
 0x10a   : > { %v1958_v2 = vpop.f32.mrb[16].mxu0  ;;  %v2029_v3 = vpop.f32.mrb[16].mxu1 }
 0x10b   : > { %1286 = vrot.lane.b32.xlu0 %v1210_v50, %s5731_s27  ;;  %v1960_v4 = vpop.f32.mrb[17].mxu0  ;;  %v2031_v5 = vpop.f32.mrb[17].mxu1 }
 0x10c   : > { %1290 = vrot.lane.b32.xlu1 %v1281_v51, %s5731_s27 }
 0x10e   : > { %v2144_v6 = vpop.f32.mrb[18].mxu0  ;;  %v2215_v7 = vpop.f32.mrb[18].mxu1 }
 0x10f   : > { %1292 = vrot.lane.b32.xlu0 %v1283_v53, %s5731_s27  ;;  %v6237_v8 = vpop.f32.mrb[19].mxu0  ;;  %v2217_v9 = vpop.f32.mrb[19].mxu1 }
 0x110   : > { %1288 = vrot.lane.b32.xlu1 %v1212_v52, %s5731_s27 }
 0x112   : > { %v6240_v10 = vpop.f32.mrb[20].mxu0  ;;  %v6242_v11 = vpop.f32.mrb[20].mxu1 }
 0x113   : > { %1468 = vrot.lane.b32.xlu0 %v1392_v54, %s5732_s28  ;;  %v6245_v12 = vpop.f32.mrb[21].mxu0  ;;  %v6247_v13 = vpop.f32.mrb[21].mxu1 }
 0x114   : > { %1472 = vrot.lane.b32.xlu1 %v1463_v55, %s5732_s28 }
 0x116   : > { %v6250_v14 = vpop.f32.mrb[22].mxu0  ;;  %v6252_v15 = vpop.f32.mrb[22].mxu1 }
 0x117   : > { %1474 = vrot.lane.b32.xlu0 %v1465_v57, %s5732_s28  ;;  %v6255_v16 = vpop.f32.mrb[23].mxu0  ;;  %v6257_v17 = vpop.f32.mrb[23].mxu1 }
 0x118   : > { %1470 = vrot.lane.b32.xlu1 %v1394_v56, %s5732_s28 }
 0x11a   : > { %v6260_v18 = vpop.f32.mrb[24].mxu0 }
 0x11b   : > { %1654 = vrot.lane.b32.xlu0 %v1578_v58, %s5733_s29  ;;  %v6263_v19 = vpop.f32.mrb[25].mxu0  ;;  %v6265_v20 = vpop.f32.mrb[24].mxu1 }
 0x11c   : > { %1658 = vrot.lane.b32.xlu1 %v1649_v59, %s5733_s29  ;;  %v6268_v21 = vpop.f32.mrb[25].mxu1 }
 0x11e   : > { %v6270_v22 = vpop.f32.mrb[26].mxu0 }
 0x11f   : > { %7421 = vst [vmem:[#allocation2_spill] sm:$0xff] %v6270_v22  ;;  %1660 = vrot.lane.b32.xlu0 %v1651_v61, %s5733_s29  ;;  %v6273_v23 = vpop.f32.mrb[27].mxu0 }
 0x120   : > { %7422 = vst [vmem:[#allocation3_spill] sm:$0xff] %v6273_v23  ;;  %1656 = vrot.lane.b32.xlu1 %v1580_v60, %s5733_s29  ;;  %v6276_v24 = vpop.f32.mrb[26].mxu1 }
 0x121   : > { %7423 = vst [vmem:[#allocation4_spill] sm:$0xff] %v6276_v24  ;;  %v6278_v25 = vpop.f32.mrb[27].mxu1 }
 0x122   : > { %7424 = vst [vmem:[#allocation5_spill] sm:$0xff] %v6278_v25  ;;  %v6280_v26 = vpop.f32.mrb[28].mxu0 }
 0x123   : > { %1852 = vrot.lane.b32.xlu0 %v1776_v62, %s5734_s30  ;;  %v6283_v27 = vpop.f32.mrb[29].mxu0 }
 0x124   : > { %1856 = vrot.lane.b32.xlu1 %v1847_v63, %s5734_s30  ;;  %v6286_v28 = vpop.f32.mrb[28].mxu1 }
 0x125   : > { %v6288_v29 = vpop.f32.mrb[29].mxu1 }
 0x126   : > { %v6290_v30 = vpop.f32.mrb[30].mxu0 }
 0x127   : > { %1858 = vrot.lane.b32.xlu0 %v1849_v1, %s5734_s30  ;;  %v6293_v31 = vpop.f32.mrb[31].mxu0 }
 0x128   : > { %1854 = vrot.lane.b32.xlu1 %v1778_v0, %s5734_s30  ;;  %v6296_v32 = vpop.f32.mrb[30].mxu1 }
 0x129   : > { %v6298_v33 = vpop.f32.mrb[31].mxu1 }
 0x12a   : > { %v6300_v34 = vpop.f32.mrb[32].mxu0 }
 0x12b   : > { %2034 = vrot.lane.b32.xlu0 %v1958_v2, %s5735_s8  ;;  %v6303_v35 = vpop.f32.mrb[33].mxu0 }
 0x12c   : > { %2038 = vrot.lane.b32.xlu1 %v2029_v3, %s5735_s8  ;;  %v6306_v36 = vpop.f32.mrb[32].mxu1 }
 0x12d   : > { %v6308_v37 = vpop.f32.mrb[33].mxu1 }
 0x12e   : > { %v6310_v38 = vpop.f32.mrb[34].mxu0 }
 0x12f   : > { %2040 = vrot.lane.b32.xlu0 %v2031_v5, %s5735_s8  ;;  %v6313_v39 = vpop.f32.mrb[35].mxu0 }
 0x130   : > { %2036 = vrot.lane.b32.xlu1 %v1960_v4, %s5735_s8  ;;  %v6316_v40 = vpop.f32.mrb[34].mxu1 }
 0x131   : > { %v6318_v41 = vpop.f32.mrb[35].mxu1 }
 0x132   : > { %v6320_v42 = vpop.f32.mrb[36].mxu0 }
 0x133   : > { %2220 = vrot.lane.b32.xlu0 %v2144_v6, %s5736_s9  ;;  %v6322_v43 = vpop.f32.mrb[37].mxu0 }
 0x134   : > { %2224 = vrot.lane.b32.xlu1 %v2215_v7, %s5736_s9  ;;  %v6324_v44 = vpop.f32.mrb[36].mxu1 }
 0x135   : > { %v6326_v45 = vpop.f32.mrb[37].mxu1 }
 0x136   : > { %v6328_v46 = vpop.f32.mrb[38].mxu0 }
 0x137   : > { %2226 = vrot.lane.b32.xlu0 %v2217_v9, %s5736_s9  ;;  %v6330_v47 = vpop.f32.mrb[39].mxu0 }
 0x138   : > { %2222 = vrot.lane.b32.xlu1 %v6237_v8, %s5736_s9  ;;  %v6333_v48 = vpop.f32.mrb[38].mxu1 }
 0x139   : > { %v6335_v49 = vpop.f32.mrb[39].mxu1 }
 0x13a   : > { %v6337_v50 = vpop.f32.mrb[40].mxu0 }
 0x13b   : > { %2402 = vrot.lane.b32.xlu0 %v6240_v10, %s5737_s10  ;;  %v6340_v51 = vpop.f32.mrb[41].mxu0 }
 0x13c   : > { %2406 = vrot.lane.b32.xlu1 %v6242_v11, %s5737_s10  ;;  %v6343_v52 = vpop.f32.mrb[40].mxu1 }
 0x13d   : > { %v6345_v53 = vpop.f32.mrb[41].mxu1 }
 0x13e   : > { %v6347_v54 = vpop.f32.mrb[42].mxu0 }
 0x13f   : > { %2408 = vrot.lane.b32.xlu0 %v6247_v13, %s5737_s10  ;;  %v6350_v55 = vpop.f32.mrb[43].mxu0 }
 0x140   : > { %2404 = vrot.lane.b32.xlu1 %v6245_v12, %s5737_s10  ;;  %v6353_v56 = vpop.f32.mrb[42].mxu1 }
 0x141   : > { %v6355_v57 = vpop.f32.mrb[43].mxu1 }
 0x142   : > { %v6357_v58 = vpop.f32.mrb[44].mxu0 }
 0x143   : > { %7425 = vst [vmem:[#allocation6_spill] sm:$0xff] %v6357_v58  ;;  %2584 = vrot.lane.b32.xlu0 %v6250_v14, %s5738_s11  ;;  %v6360_v59 = vpop.f32.mrb[45].mxu0  ;;  %v6409_v14 = vpop.permute.xlu1 %5336 }
 0x144   : > { %7426 = vst [vmem:[#allocation7_spill] sm:$0xff] %v6360_v59  ;;  %2588 = vrot.lane.b32.xlu1 %v6252_v15, %s5738_s11  ;;  %v6363_v60 = vpop.f32.mrb[44].mxu1  ;;  %7445 = vst [vmem:[#allocation26_spill] sm:$0xff] %v6409_v14  ;;  %v6416_v15 = vld [vmem:[%s7388_s3] sm:$0x3f] }
 0x145   : > { %7427 = vst [vmem:[#allocation8_spill] sm:$0xff] %v6363_v60  ;;  %v6365_v61 = vpop.f32.mrb[45].mxu1 }
 0x146   : > { %7428 = vst [vmem:[#allocation9_spill] sm:$0xff] %v6365_v61  ;;  %v6367_v62 = vpop.f32.mrb[46].mxu0 }
 0x147   : > { %7429 = vst [vmem:[#allocation10_spill] sm:$0xff] %v6367_v62  ;;  %2590 = vrot.lane.b32.xlu0 %v6257_v17, %s5738_s11  ;;  %v6370_v63 = vpop.f32.mrb[47].mxu0  ;;  %v6423_v17 = vld [vmem:[%s7388_s3 + $0x18] sm:$0x3f] }
 0x148   : > { %7430 = vst [vmem:[#allocation11_spill] sm:$0xff] %v6370_v63  ;;  %2586 = vrot.lane.b32.xlu1 %v6255_v16, %s5738_s11  ;;  %v6373_v0 = vpop.f32.mrb[46].mxu1  ;;  %s5742_s11 = smov 120   ;;  %v6457_v24 = vrot.slane %v6423_v17, 4 }
 0x149   : > { %7431 = vst [vmem:[#allocation12_spill] sm:$0xff] %v6373_v0  ;;  %v6375_v1 = vpop.f32.mrb[47].mxu1 }
 0x14a   : > { %7432 = vst [vmem:[#allocation13_spill] sm:$0xff] %v6375_v1  ;;  %v6377_v2 = vpop.f32.mrb[48].mxu0 }
 0x14b   : > { %7433 = vst [vmem:[#allocation14_spill] sm:$0xff] %v6377_v2  ;;  %2766 = vrot.lane.b32.xlu0 %v6260_v18, %s5739_s12  ;;  %v6380_v3 = vpop.f32.mrb[49].mxu0 }
 0x14c   : > { %7434 = vst [vmem:[#allocation15_spill] sm:$0xff] %v6380_v3  ;;  %2770 = vrot.lane.b32.xlu1 %v6265_v20, %s5739_s12  ;;  %v6383_v4 = vpop.f32.mrb[48].mxu1  ;;  %v531_v20 = vrot.slane %v6416_v15, 2 }
 0x14d   : > { %7435 = vst [vmem:[#allocation16_spill] sm:$0xff] %v6383_v4  ;;  %v6385_v5 = vpop.f32.mrb[49].mxu1 }
 0x14e   : > { %7436 = vst [vmem:[#allocation17_spill] sm:$0xff] %v6385_v5  ;;  %v6387_v6 = vpop.f32.mrb[50].mxu0 }
 0x14f   : > { %7437 = vst [vmem:[#allocation18_spill] sm:$0xff] %v6387_v6  ;;  %2772 = vrot.lane.b32.xlu0 %v6268_v21, %s5739_s12  ;;  %v6390_v7 = vpop.f32.mrb[51].mxu0  ;;  %v520_v21 = vlaneseq }
 0x150   : > { %7438 = vst [vmem:[#allocation19_spill] sm:$0xff] %v6390_v7  ;;  %2768 = vrot.lane.b32.xlu1 %v6263_v19, %s5739_s12  ;;  %v6393_v8 = vpop.f32.mrb[50].mxu1  ;;  %v6428_v19 = vld [vmem:[%s7388_s3 + $0x8] sm:$0x3f]  ;;  %s5743_s12 = smov 119  }
 0x151   : > { %7439 = vst [vmem:[#allocation20_spill] sm:$0xff] %v6393_v8  ;;  %v6395_v9 = vpop.f32.mrb[51].mxu1  ;;  %v6469_v22 = vand.u32 127, %v520_v21  ;;  %v6515_v4 = vrot.slane %v6428_v19, 5 }
 0x152   : > { %7440 = vst [vmem:[#allocation21_spill] sm:$0xff] %v6395_v9  ;;  %v6397_v10 = vpop.f32.mrb[52].mxu0 }
 0x153   : > { %7441 = vst [vmem:[#allocation22_spill] sm:$0xff] %v6397_v10  ;;  %3097 = vrot.lane.b32.xlu0 %v6280_v26, %s5740_s13  ;;  %v6400_v11 = vpop.f32.mrb[53].mxu0  ;;  %v534_v26 = vrot.slane %v6423_v17, 2  ;;  %vm732_vm2 = vcmp.lt.s32.totalorder %v6469_v22, 72  ;;  %vm522_vm3 = vcmp.lt.s32.totalorder %v6469_v22, 73  ;;  %vm914_vm4 = vcmp.lt.s32.totalorder %v6469_v22, 71 }
 0x154   : > { %7442 = vst [vmem:[#allocation23_spill] sm:$0xff] %v6400_v11  ;;  %3099 = vrot.lane.b32.xlu1 %v6283_v27, %s5740_s13  ;;  %v6403_v12 = vpop.f32.mrb[52].mxu1  ;;  %vm1108_vm5 = vcmp.lt.s32.totalorder %v6469_v22, 65  ;;  %vm1294_vm6 = vcmp.lt.s32.totalorder %v6469_v22, 64  ;;  %vm1476_vm7 = vcmp.lt.s32.totalorder %v6469_v22, 63  ;;  %vm1662_vm8 = vcmp.lt.s32.totalorder %v6469_v22, 57 }
 0x155   : > { %7443 = vst [vmem:[#allocation24_spill] sm:$0xff] %v6403_v12  ;;  %v6405_v13 = vpop.f32.mrb[53].mxu1  ;;  %v6454_v14 = vmul.f32 %v534_v26, %v6423_v17  ;;  %v6473_v26 = vrot.slane %v6416_v15, 5  ;;  %vm1860_vm9 = vcmp.lt.s32.totalorder %v6469_v22, 56  ;;  %vm2042_vm10 = vcmp.lt.s32.totalorder %v6469_v22, 55 }
 0x156   : > { %7444 = vst [vmem:[#allocation25_spill] sm:$0xff] %v6405_v13  ;;  %vm2228_vm11 = vcmp.lt.s32.totalorder %v6469_v22, 9  ;;  %vm2410_vm12 = vcmp.lt.s32.totalorder %v6469_v22, 8  ;;  %vm2592_vm13 = vcmp.lt.s32.totalorder %v6469_v22, 7  ;;  %vm2774_vm14 = vcmp.lt.s32.totalorder %v6469_v22, 1 }
 0x157   : > { %3101 = vrot.lane.b32.xlu0 %v6286_v28, %s5740_s13  ;;  %v532_v28 = vrot.slane %v6428_v19, 2  ;;  %7448 = vst [vmem:[#allocation29_spill] sm:$0xff] %v6454_v14  ;;  %vm3105_vm15 = vcmp.lt.s32.totalorder %v6469_v22, 127  ;;  %vm3287_vm0 = vcmp.lt.s32.totalorder %v6469_v22, 121  ;;  %vm3481_vm1 = vcmp.lt.s32.totalorder %v6469_v22, 120 }
 0x158   : > { %3103 = vrot.lane.b32.xlu1 %v6288_v29, %s5740_s13 }
 0x15b   : > { %3279 = vrot.lane.b32.xlu0 %v6290_v30, %s5741_s14  ;;  %v6442_v30 = vld [vmem:[%s7388_s3 + $0x10] sm:$0x3f] }
 0x15c   : > { %3281 = vrot.lane.b32.xlu1 %v6293_v31, %s5741_s14  ;;  %v6445_v31 = vmul.f32 %v531_v20, %v6416_v15  ;;  %v533_v23 = vrot.slane %v6442_v30, 2  ;;  %v6462_v20 = vmul.f32 %v532_v28, %v6428_v19  ;;  %v6495_v12 = vrot.slane %v6442_v30, 4 }
 0x15d   : > { %v6418_v16 = vpop.permute.xlu0 %512 }
 0x15e   : > { %v519_v18 = vpop.permute.xlu1 %518  ;;  %7446 = vst [vmem:[#allocation27_spill] sm:$0xff] %v6445_v31  ;;  %7449 = vst [vmem:[#allocation30_spill] sm:$0xff] %v6462_v20  ;;  %v927_v6 = vmul.f32 %v6473_v26, %v6445_v31  ;;  %v928_v60 = vmul.f32 %v6515_v4, %v6462_v20 }
 0x15f   : > { %3283 = vrot.lane.b32.xlu0 %v6296_v32, %s5741_s14  ;;  %v6449_v32 = vrot.slane %v6416_v15, 4 }
 0x160   : > { %3285 = vrot.lane.b32.xlu1 %v6298_v33, %s5741_s14  ;;  %v6451_v33 = vshrl.u32 %v520_v21, 7  ;;  %v6487_v21 = vmul.f32 %v6457_v24, %v6454_v14 }
 0x161   : > { %v6434_v27 = vpop.permute.xlu0 %516  ;;  %v6480_v28 = vmul.f32 %v6449_v32, %v6445_v31 }
 0x162   : > { %v6437_v29 = vpop.permute.xlu1 %724  ;;  %7447 = vst [vmem:[#allocation28_spill] sm:$0xff] %v6451_v33  ;;  %v6483_v11 = vsub.s32 0, %v6451_v33  ;;  %7451 = vst [vmem:[#allocation32_spill] sm:$0xff] %v6487_v21 }
 0x163   : > { %3473 = vrot.lane.b32.xlu0 %v6300_v34, %s5742_s11  ;;  %v6465_v34 = vrot.slane %v6428_v19, 4  ;;  %7450 = vst [vmem:[#allocation31_spill] sm:$0xff] %v6480_v28 }
 0x164   : > { %3475 = vrot.lane.b32.xlu1 %v6303_v35, %s5742_s11  ;;  %v6476_v35 = vrot.slane %v6423_v17, 5  ;;  %v740_v8 = vrot.slane %v6445_v31, %v6483_v11  ;;  %v558_v3 = vrot.slane %v6480_v28, %v6483_v11  ;;  %v570_v2 = vrot.slane %v6487_v21, %v6483_v11 }
 0x165   : > { %v6467_v25 = vpop.permute.xlu0 %514  ;;  %v6499_v9 = vmul.f32 %v6465_v34, %v6462_v20  ;;  %v744_v21 = vrot.slane %v6462_v20, %v6483_v11 }
 0x166   : > { %v729_v13 = vpop.permute.xlu1 %728  ;;  %v930_v5 = vmul.f32 %v6476_v35, %v6454_v14 }
 0x167   : > { %3477 = vrot.lane.b32.xlu0 %v6306_v36, %s5742_s11  ;;  %v6492_v36 = vmul.f32 %v533_v23, %v6442_v30  ;;  %7453 = vst [vmem:[#allocation34_spill] sm:$0xff] %v6499_v9  ;;  %v562_v28 = vrot.slane %v6499_v9, %v6483_v11  ;;  %v934_v9 = vrot.slane %v927_v6, %v6483_v11 }
 0x168   : > { %3479 = vrot.lane.b32.xlu1 %v6308_v37, %s5742_s11  ;;  %v752_v37 = vrot.slane %v6454_v14, %v6483_v11  ;;  %v526_v14 = vsel %vm522_vm3, %v519_v18, %v6418_v16  ;;  %v946_v61 = vrot.slane %v930_v5, %v6483_v11 }
 0x169   : > { %7452 = vst [vmem:[#allocation33_spill] sm:$0xff] %v6492_v36  ;;  %v727_v10 = vpop.permute.xlu0 %726  ;;  %v6532_v31 = vmul.f32 %v6495_v12, %v6492_v36  ;;  %v748_v1 = vrot.slane %v6492_v36, %v6483_v11  ;;  %v571_v59 = vmul.f32 %v558_v3, %v526_v14  ;;  %v6564_v3 = vmul.f32 %v6465_v34, %v6428_v19 }
 0x16a   : > { %v731_v7 = vpop.permute.xlu1 %730  ;;  %v734_v5 = vsel %vm732_vm2, %v727_v10, %v729_v13  ;;  %v735_v14 = vsel %vm732_vm2, %v6437_v29, %v727_v10 }
 0x16b   : > { %v736_v23 = vsel %vm732_vm2, %v731_v7, %v6437_v29  ;;  %3655 = vrot.lane.b32.xlu0 %v6310_v38, %s5743_s12  ;;  %v733_v33 = vsel %vm732_vm2, %v729_v13, %v731_v7  ;;  %v6525_v38 = vrot.slane %v6442_v30, 5  ;;  %7454 = vst [vmem:[#allocation35_spill] sm:$0xff] %v6532_v31  ;;  %7455 = vst [vmem:[#allocation36_spill] sm:$0xff] %v6564_v3 }
 0x16c   : > { %3657 = vrot.lane.b32.xlu1 %v6313_v39, %s5743_s12  ;;  %v523_v39 = vsel %vm522_vm3, %v6434_v27, %v519_v18  ;;  %v753_v0 = vmul.f32 %v740_v8, %v736_v23  ;;  %v756_v62 = vmul.f32 %v752_v37, %v733_v33  ;;  %v6554_v8 = vmul.f32 %v6449_v32, %v6416_v15 }
 0x16d   : > { %v907_v7 = vpop.permute.xlu0 %906  ;;  %v929_v18 = vmul.f32 %v6525_v38, %v6492_v36  ;;  %v574_v6 = vmul.f32 %v570_v2, %v523_v39  ;;  %v566_v10 = vrot.slane %v6532_v31, %v6483_v11 }
 0x16e   : > { %v911_v63 = vpop.permute.xlu1 %910  ;;  %v757_v37 = vadd.f32 %v753_v0, %v571_v59  ;;  %v524_v59 = vsel %vm522_vm3, %v6467_v25, %v6434_v27  ;;  %v938_v0 = vrot.slane %v928_v60, %v6483_v11  ;;  %v755_v27 = vmul.f32 %v748_v1, %v734_v5 }
 0x16f   : > { %3659 = vrot.lane.b32.xlu0 %v6316_v40, %s5743_s12  ;;  %v6558_v40 = vmul.f32 %v6457_v24, %v6423_v17  ;;  %v760_v39 = vadd.f32 %v756_v62, %v574_v6  ;;  %v942_v62 = vrot.slane %v929_v18, %v6483_v11  ;;  %v754_v6 = vmul.f32 %v744_v21, %v735_v14 }
 0x170   : > { %3661 = vrot.lane.b32.xlu1 %v6318_v41, %s5743_s12  ;;  %v6568_v41 = vmul.f32 %v6495_v12, %v6442_v30  ;;  %v1124_v60 = vrot.slane %v6564_v3, %v6483_v11  ;;  %v573_v1 = vmul.f32 %v566_v10, %v524_v59 }
 0x171   : > { %v913_v33 = vpop.permute.xlu0 %912 }
 0x172   : > { %v915_v2 = vsel %vm914_vm4, %v911_v63, %v913_v33  ;;  %v918_v13 = vsel %vm914_vm4, %v913_v33, %v907_v7  ;;  %v909_v23 = vpop.permute.xlu1 %908  ;;  %v759_v18 = vadd.f32 %v755_v27, %v573_v1  ;;  %v1484_v27 = vmul.f32 %v6476_v35, %v6423_v17 }
 0x173   : > { %v947_v36 = vmul.f32 %v934_v9, %v918_v13  ;;  %v950_v20 = vmul.f32 %v946_v61, %v915_v2  ;;  %v916_v58 = vsel %vm914_vm4, %v909_v23, %v911_v63  ;;  %3837 = vrot.lane.b32.xlu0 %v6320_v42, %s5727_s21  ;;  %v525_v42 = vsel %vm522_vm3, %v6418_v16, %v6467_v25 }
 0x174   : > { %3839 = vrot.lane.b32.xlu1 %v6322_v43, %s5727_s21  ;;  %v917_v9 = vsel %vm914_vm4, %v907_v7, %v909_v23  ;;  %v1120_v43 = vrot.slane %v6554_v8, %v6483_v11  ;;  %v1132_v25 = vrot.slane %v6558_v40, %v6483_v11  ;;  %v1128_v16 = vrot.slane %v6568_v41, %v6483_v11 }
 0x175   : > { %v951_v61 = vadd.f32 %v947_v36, %v757_v37  ;;  %v954_v63 = vadd.f32 %v950_v20, %v760_v39  ;;  %v1101_v29 = vpop.permute.xlu0 %1100  ;;  %v572_v20 = vmul.f32 %v562_v28, %v525_v42  ;;  %v948_v21 = vmul.f32 %v938_v0, %v917_v9 }
 0x176   : > { %v1105_v33 = vpop.permute.xlu1 %1104  ;;  %v949_v36 = vmul.f32 %v942_v62, %v916_v58 }
 0x177   : > { %3841 = vrot.lane.b32.xlu0 %v6324_v44, %s5727_s21  ;;  %v758_v7 = vadd.f32 %v754_v6, %v572_v20  ;;  %v6651_v20 = vrot.slane %v6423_v17, 3 }
 0x178   : > { %3843 = vrot.lane.b32.xlu1 %v6326_v45, %s5727_s21  ;;  %v953_v23 = vadd.f32 %v949_v36, %v759_v18  ;;  %s5684_s21 = sshll.u32 %s7548_s25, 5 }
 0x179   : > { %v1107_v44 = vpop.permute.xlu0 %1106  ;;  %v952_v45 = vadd.f32 %v948_v21, %v758_v7 }
 0x17a   : > { %v1109_v5 = vsel %vm1108_vm5, %v1105_v33, %v1107_v44  ;;  %v1112_v14 = vsel %vm1108_vm5, %v1107_v44, %v1101_v29  ;;  %v1103_v37 = vpop.permute.xlu1 %1102 }
 0x17b   : > { %v1133_v2 = vmul.f32 %v1120_v43, %v1112_v14  ;;  %v1136_v13 = vmul.f32 %v1132_v25, %v1109_v5  ;;  %v1110_v28 = vsel %vm1108_vm5, %v1103_v37, %v1105_v33  ;;  %v1111_v58 = vsel %vm1108_vm5, %v1101_v29, %v1103_v37  ;;  %4022 = vrot.lane.b32.xlu0 %v6328_v46, %s5728_s22 }
 0x17c   : > { %v1134_v39 = vmul.f32 %v1124_v60, %v1111_v58  ;;  %v1135_v10 = vmul.f32 %v1128_v16, %v1110_v28  ;;  %4024 = vrot.lane.b32.xlu1 %v6330_v47, %s5728_s22  ;;  %v1302_v46 = vrot.slane %v6416_v15, %v6483_v11  ;;  %v1314_v29 = vrot.slane %v6423_v17, %v6483_v11 }
 0x17d   : > { %v1137_v59 = vadd.f32 %v1133_v2, %v951_v61  ;;  %v1140_v0 = vadd.f32 %v1136_v13, %v954_v63  ;;  %v1287_v62 = vpop.permute.xlu0 %1286  ;;  %v1306_v47 = vrot.slane %v6428_v19, %v6483_v11  ;;  %v1310_v61 = vrot.slane %v6442_v30, %v6483_v11 }
 0x17e   : > { %v1138_v42 = vadd.f32 %v1134_v39, %v952_v45  ;;  %v1139_v9 = vadd.f32 %v1135_v10, %v953_v23  ;;  %v1291_v6 = vpop.permute.xlu1 %1290  ;;  %v1482_v33 = vmul.f32 %v6515_v4, %v6428_v19  ;;  %v1483_v43 = vmul.f32 %v6525_v38, %v6442_v30 }
 0x17f   : > { %4026 = vrot.lane.b32.xlu0 %v6333_v48, %s5728_s22  ;;  %v1481_v48 = vmul.f32 %v6473_v26, %v6416_v15  ;;  %v6648_v16 = vrot.slane %v6416_v15, 3  ;;  %v6662_v5 = vrot.slane %v6428_v19, 3  ;;  %v6665_v14 = vrot.slane %v6442_v30, 3 }
 0x180   : > { %4028 = vrot.lane.b32.xlu1 %v6335_v49, %s5728_s22  ;;  %v6673_v23 = vmul.f32 %v6651_v20, %v6423_v17  ;;  %v1500_v39 = vrot.slane %v1484_v27, %v6483_v11  ;;  %v1492_v10 = vrot.slane %v1482_v33, %v6483_v11 }
 0x181   : > { %v1293_v63 = vpop.permute.xlu0 %1292 }
 0x182   : > { %v1295_v49 = vsel %vm1294_vm6, %v1291_v6, %v1293_v63  ;;  %v1298_v25 = vsel %vm1294_vm6, %v1293_v63, %v1287_v62  ;;  %v1289_v60 = vpop.permute.xlu1 %1288 }
 0x183   : > { %v1315_v1 = vmul.f32 %v1302_v46, %v1298_v25  ;;  %v1318_v21 = vmul.f32 %v1314_v29, %v1295_v49  ;;  %v1296_v36 = vsel %vm1294_vm6, %v1289_v60, %v1291_v6  ;;  %v1297_v44 = vsel %vm1294_vm6, %v1287_v62, %v1289_v60  ;;  %4203 = vrot.lane.b32.xlu0 %v6337_v50, %s5729_s23 }
 0x184   : > { %v1316_v7 = vmul.f32 %v1306_v47, %v1297_v44  ;;  %v1317_v18 = vmul.f32 %v1310_v61, %v1296_v36  ;;  %4205 = vrot.lane.b32.xlu1 %v6340_v51, %s5729_s23  ;;  %v6669_v50 = vmul.f32 %v6648_v16, %v6416_v15  ;;  %v1488_v51 = vrot.slane %v1481_v48, %v6483_v11 }
 0x185   : > { %v1319_v37 = vadd.f32 %v1315_v1, %v1137_v59  ;;  %v1322_v2 = vadd.f32 %v1318_v21, %v1140_v0  ;;  %v1469_v13 = vpop.permute.xlu0 %1468  ;;  %v1496_v59 = vrot.slane %v1483_v43, %v6483_v11  ;;  %v6686_v0 = vmul.f32 %v6662_v5, %v6428_v19 }
 0x186   : > { %v1320_v28 = vadd.f32 %v1316_v7, %v1138_v42  ;;  %v1321_v58 = vadd.f32 %v1317_v18, %v1139_v9  ;;  %v1473_v45 = vpop.permute.xlu1 %1472  ;;  %v1679_v6 = vmul.f32 %v6669_v50, %v6449_v32  ;;  %v1682_v46 = vmul.f32 %v6673_v23, %v6457_v24 }
 0x187   : > { %4207 = vrot.lane.b32.xlu0 %v6343_v52, %s5729_s23  ;;  %v6690_v52 = vmul.f32 %v6665_v14, %v6442_v30  ;;  %v1680_v33 = vmul.f32 %v6686_v0, %v6465_v34 }
 0x188   : > { %4209 = vrot.lane.b32.xlu1 %v6345_v53, %s5729_s23 }
 0x189   : > { %v1475_v62 = vpop.permute.xlu0 %1474  ;;  %v1681_v43 = vmul.f32 %v6690_v52, %v6495_v12  ;;  %v1690_v44 = vrot.slane %v1680_v33, %v6483_v11 }
 0x18a   : > { %v1477_v42 = vsel %vm1476_vm7, %v1473_v45, %v1475_v62  ;;  %v1480_v9 = vsel %vm1476_vm7, %v1475_v62, %v1469_v13  ;;  %v1471_v53 = vpop.permute.xlu1 %1470 }
 0x18b   : > { %v1501_v29 = vmul.f32 %v1488_v51, %v1480_v9  ;;  %v1504_v47 = vmul.f32 %v1500_v39, %v1477_v42  ;;  %v1478_v61 = vsel %vm1476_vm7, %v1471_v53, %v1473_v45  ;;  %v1479_v63 = vsel %vm1476_vm7, %v1469_v13, %v1471_v53  ;;  %4388 = vrot.lane.b32.xlu0 %v6347_v54, %s5730_s26  ;;  %v7456_v45 = vld [vmem:[#allocation6_spill] sm:$0xff] }
 0x18c   : > { %v1502_v48 = vmul.f32 %v1492_v10, %v1479_v63  ;;  %v1503_v27 = vmul.f32 %v1496_v59, %v1478_v61  ;;  %4390 = vrot.lane.b32.xlu1 %v6350_v55, %s5730_s26  ;;  %v1686_v54 = vrot.slane %v1679_v6, %v6483_v11  ;;  %v1698_v55 = vrot.slane %v1682_v46, %v6483_v11  ;;  %v7457_v10 = vld [vmem:[#allocation7_spill] sm:$0xff]  ;;  %v7458_v46 = vld [vmem:[#allocation8_spill] sm:$0xff]  ;;  %v7459_v61 = vld [vmem:[#allocation9_spill] sm:$0xff] }
 0x18d   : > { %v1505_v49 = vadd.f32 %v1501_v29, %v1319_v37  ;;  %v1508_v25 = vadd.f32 %v1504_v47, %v1322_v2  ;;  %v1655_v60 = vpop.permute.xlu0 %1654  ;;  %v1694_v7 = vrot.slane %v1681_v43, %v6483_v11  ;;  %v1868_v29 = vrot.slane %v6669_v50, %v6483_v11 }
 0x18e   : > { %v1506_v1 = vadd.f32 %v1502_v48, %v1320_v28  ;;  %v1507_v21 = vadd.f32 %v1503_v27, %v1321_v58  ;;  %v1659_v36 = vpop.permute.xlu1 %1658  ;;  %v1880_v47 = vrot.slane %v6673_v23, %v6483_v11  ;;  %v1872_v63 = vrot.slane %v6686_v0, %v6483_v11 }
 0x18f   : > { %4392 = vrot.lane.b32.xlu0 %v6353_v56, %s5730_s26  ;;  %v1876_v48 = vrot.slane %v6690_v52, %v6483_v11 }
 0x190   : > { %4394 = vrot.lane.b32.xlu1 %v6355_v57, %s5730_s26  ;;  %s306_s26 = scalar_lea.vmem %s7389_s4, %s5684_s21 }
 0x191   : > { %v1661_v18 = vpop.permute.xlu0 %1660 }
 0x192   : > { %v1663_v37 = vsel %vm1662_vm8, %v1659_v36, %v1661_v18  ;;  %v1666_v56 = vsel %vm1662_vm8, %v1661_v18, %v1655_v60  ;;  %v1657_v2 = vpop.permute.xlu1 %1656  ;;  %v7461_v18 = vld [vmem:[#allocation11_spill] sm:$0xff] }
 0x193   : > { %v1699_v13 = vmul.f32 %v1686_v54, %v1666_v56  ;;  %v1702_v28 = vmul.f32 %v1698_v55, %v1663_v37  ;;  %v1664_v58 = vsel %vm1662_vm8, %v1657_v2, %v1659_v36  ;;  %v1665_v57 = vsel %vm1662_vm8, %v1655_v60, %v1657_v2  ;;  %4569 = vrot.lane.b32.xlu0 %v7456_v45, %s5731_s27  ;;  %v7460_v55 = vld [vmem:[#allocation10_spill] sm:$0xff] }
 0x194   : > { %v1700_v51 = vmul.f32 %v1690_v44, %v1665_v57  ;;  %v1701_v39 = vmul.f32 %v1694_v7, %v1664_v58  ;;  %4571 = vrot.lane.b32.xlu1 %v7457_v10, %s5731_s27  ;;  %v2050_v60 = vmul.f32 %v6673_v23, %v6476_v35  ;;  %v2049_v35 = vmul.f32 %v6690_v52, %v6525_v38  ;;  %v7462_v57 = vld [vmem:[#allocation12_spill] sm:$0xff] }
 0x195   : > { %v1703_v59 = vadd.f32 %v1699_v13, %v1505_v49  ;;  %v1706_v62 = vadd.f32 %v1702_v28, %v1508_v25  ;;  %v1853_v42 = vpop.permute.xlu0 %1852  ;;  %v2047_v25 = vmul.f32 %v6669_v50, %v6473_v26  ;;  %v2048_v26 = vmul.f32 %v6686_v0, %v6515_v4  ;;  %v7463_v4 = vld [vmem:[#allocation13_spill] sm:$0xff] }
 0x196   : > { %v1704_v9 = vadd.f32 %v1700_v51, %v1506_v1  ;;  %v1705_v53 = vadd.f32 %v1701_v39, %v1507_v21  ;;  %v1857_v6 = vpop.permute.xlu1 %1856  ;;  %v2066_v51 = vrot.slane %v2050_v60, %v6483_v11  ;;  %v2062_v39 = vrot.slane %v2049_v35, %v6483_v11 }
 0x197   : > { %4573 = vrot.lane.b32.xlu0 %v7458_v46, %s5731_s27  ;;  %v2054_v45 = vrot.slane %v2047_v25, %v6483_v11  ;;  %v2058_v38 = vrot.slane %v2048_v26, %v6483_v11  ;;  %v7465_v11 = vld [vmem:[#allocation14_spill] sm:$0xff]  ;;  %v7472_v26 = vld [vmem:[#allocation33_spill] sm:$0xff] }
 0x198   : > { %4575 = vrot.lane.b32.xlu1 %v7459_v61, %s5731_s27 }
 0x199   : > { %v1859_v27 = vpop.permute.xlu0 %1858 }
 0x19a   : > { %v1861_v33 = vsel %vm1860_vm9, %v1857_v6, %v1859_v27  ;;  %v1864_v43 = vsel %vm1860_vm9, %v1859_v27, %v1853_v42  ;;  %v1855_v49 = vpop.permute.xlu1 %1854 }
 0x19b   : > { %v1881_v1 = vmul.f32 %v1868_v29, %v1864_v43  ;;  %v1884_v21 = vmul.f32 %v1880_v47, %v1861_v33  ;;  %v1862_v36 = vsel %vm1860_vm9, %v1855_v49, %v1857_v6  ;;  %v1863_v54 = vsel %vm1860_vm9, %v1853_v42, %v1855_v49  ;;  %4750 = vrot.lane.b32.xlu0 %v7460_v55, %s5732_s28 }
 0x19c   : > { %v1882_v44 = vmul.f32 %v1872_v63, %v1863_v54  ;;  %v1883_v7 = vmul.f32 %v1876_v48, %v1862_v36  ;;  %4752 = vrot.lane.b32.xlu1 %v7461_v18, %s5732_s28  ;;  %v7466_v48 = vld [vmem:[#allocation15_spill] sm:$0xff]  ;;  %v7469_v54 = vld [vmem:[#allocation29_spill] sm:$0xff] }
 0x19d   : > { %v1885_v37 = vadd.f32 %v1881_v1, %v1703_v59  ;;  %v1888_v56 = vadd.f32 %v1884_v21, %v1706_v62  ;;  %v2035_v2 = vpop.permute.xlu0 %2034  ;;  %v7467_v1 = vld [vmem:[#allocation16_spill] sm:$0xff]  ;;  %v7468_v21 = vld [vmem:[#allocation27_spill] sm:$0xff] }
 0x19e   : > { %v1886_v13 = vadd.f32 %v1882_v44, %v1704_v9  ;;  %v1887_v28 = vadd.f32 %v1883_v7, %v1705_v53  ;;  %v2039_v58 = vpop.permute.xlu1 %2038  ;;  %v7464_v9 = vld [vmem:[#allocation28_spill] sm:$0xff]  ;;  %v7470_v44 = vld [vmem:[#allocation17_spill] sm:$0xff]  ;;  %v7471_v7 = vld [vmem:[#allocation30_spill] sm:$0xff] }
 0x19f   : > { %4754 = vrot.lane.b32.xlu0 %v7462_v57, %s5732_s28  ;;  %v6780_v53 = vsub.s32 2, %v7464_v9 }
 0x1a0   : > { %4756 = vrot.lane.b32.xlu1 %v7463_v4, %s5732_s28 }
 0x1a1   : > { %v2041_v10 = vpop.permute.xlu0 %2040  ;;  %v2236_v36 = vrot.slane %v7468_v21, %v6780_v53  ;;  %v2248_v55 = vrot.slane %v7469_v54, %v6780_v53  ;;  %v2240_v18 = vrot.slane %v7471_v7, %v6780_v53  ;;  %v2244_v35 = vrot.slane %v7472_v26, %v6780_v53 }
 0x1a2   : > { %v2043_v59 = vsel %vm2042_vm10, %v2039_v58, %v2041_v10  ;;  %v2046_v62 = vsel %vm2042_vm10, %v2041_v10, %v2035_v2  ;;  %v2037_v42 = vpop.permute.xlu1 %2036 }
 0x1a3   : > { %v2067_v6 = vmul.f32 %v2054_v45, %v2046_v62  ;;  %v2070_v46 = vmul.f32 %v2066_v51, %v2043_v59  ;;  %v2044_v29 = vsel %vm2042_vm10, %v2037_v42, %v2039_v58  ;;  %v2045_v47 = vsel %vm2042_vm10, %v2035_v2, %v2037_v42  ;;  %4931 = vrot.lane.b32.xlu0 %v7465_v11, %s5733_s29  ;;  %v7473_v51 = vld [vmem:[#allocation18_spill] sm:$0xff] }
 0x1a4   : > { %v2068_v61 = vmul.f32 %v2058_v38, %v2045_v47  ;;  %v2069_v63 = vmul.f32 %v2062_v39, %v2044_v29  ;;  %4933 = vrot.lane.b32.xlu1 %v7466_v48, %s5733_s29  ;;  %v7474_v39 = vld [vmem:[#allocation19_spill] sm:$0xff]  ;;  %v7475_v29 = vld [vmem:[#allocation20_spill] sm:$0xff]  ;;  %v2418_v47 = vrot.slane %v6416_v15, %v6780_v53  ;;  %v2430_v11 = vrot.slane %v6423_v17, %v6780_v53  ;;  %v7476_v48 = vld [vmem:[#allocation22_spill] sm:$0xff] }
 0x1a5   : > { %v2071_v27 = vadd.f32 %v2067_v6, %v1885_v37  ;;  %v2074_v33 = vadd.f32 %v2070_v46, %v1888_v56  ;;  %v2221_v43 = vpop.permute.xlu0 %2220 }
 0x1a6   : > { %v2072_v49 = vadd.f32 %v2068_v61, %v1886_v13  ;;  %v2073_v25 = vadd.f32 %v2069_v63, %v1887_v28  ;;  %v2225_v60 = vpop.permute.xlu1 %2224  ;;  %v2422_v61 = vrot.slane %v6428_v19, %v6780_v53  ;;  %v2426_v63 = vrot.slane %v6442_v30, %v6780_v53 }
 0x1a7   : > { %4935 = vrot.lane.b32.xlu0 %v7467_v1, %s5733_s29 }
 0x1a8   : > { %4937 = vrot.lane.b32.xlu1 %v7470_v44, %s5733_s29  ;;  %s311_s29 = scalar_lea.vmem %s7390_s5, %s5684_s21 }
 0x1a9   : > { %v2227_v37 = vpop.permute.xlu0 %2226 }
 0x1aa   : > { %v2229_v56 = vsel %vm2228_vm11, %v2225_v60, %v2227_v37  ;;  %v2232_v2 = vsel %vm2228_vm11, %v2227_v37, %v2221_v43  ;;  %v2223_v13 = vpop.permute.xlu1 %2222 }
 0x1ab   : > { %v2249_v28 = vmul.f32 %v2236_v36, %v2232_v2  ;;  %v2252_v58 = vmul.f32 %v2248_v55, %v2229_v56  ;;  %v2230_v57 = vsel %vm2228_vm11, %v2223_v13, %v2225_v60  ;;  %v2231_v45 = vsel %vm2228_vm11, %v2221_v43, %v2223_v13  ;;  %5116 = vrot.lane.b32.xlu0 %v7473_v51, %s5734_s30  ;;  %v7477_v55 = vld [vmem:[#allocation21_spill] sm:$0xff] }
 0x1ac   : > { %v2250_v4 = vmul.f32 %v2240_v18, %v2231_v45  ;;  %v2251_v38 = vmul.f32 %v2244_v35, %v2230_v57  ;;  %5118 = vrot.lane.b32.xlu1 %v7474_v39, %s5734_s30  ;;  %v7478_v35 = vld [vmem:[#allocation24_spill] sm:$0xff]  ;;  %v7479_v57 = vld [vmem:[#allocation23_spill] sm:$0xff]  ;;  %v2600_v45 = vrot.slane %v6669_v50, %v6780_v53  ;;  %v2612_v51 = vrot.slane %v6673_v23, %v6780_v53 }
 0x1ad   : > { %v2253_v10 = vadd.f32 %v2249_v28, %v2071_v27  ;;  %v2256_v59 = vadd.f32 %v2252_v58, %v2074_v33  ;;  %v2403_v62 = vpop.permute.xlu0 %2402  ;;  %vm3663_vm11 = vcmp.lt.s32.totalorder %v6469_v22, 119 }
 0x1ae   : > { %v2254_v42 = vadd.f32 %v2250_v4, %v2072_v49  ;;  %v2255_v6 = vadd.f32 %v2251_v38, %v2073_v25  ;;  %v2407_v46 = vpop.permute.xlu1 %2406  ;;  %v2604_v4 = vrot.slane %v6686_v0, %v6780_v53  ;;  %v2608_v38 = vrot.slane %v6690_v52, %v6780_v53 }
 0x1af   : > { %5120 = vrot.lane.b32.xlu0 %v7475_v29, %s5734_s30 }
 0x1b0   : > { %5297 = vrot.lane.b32.xlu1 %v7476_v48, %s5735_s8 }
 0x1b1   : > { %v2409_v27 = vpop.permute.xlu0 %2408 }
 0x1b2   : > { %v2411_v33 = vsel %vm2410_vm12, %v2407_v46, %v2409_v27  ;;  %v2414_v43 = vsel %vm2410_vm12, %v2409_v27, %v2403_v62  ;;  %v2405_v49 = vpop.permute.xlu1 %2404 }
 0x1b3   : > { %v2431_v25 = vmul.f32 %v2418_v47, %v2414_v43  ;;  %v2434_v60 = vmul.f32 %v2430_v11, %v2411_v33  ;;  %v2412_v1 = vsel %vm2410_vm12, %v2405_v49, %v2407_v46  ;;  %v2413_v36 = vsel %vm2410_vm12, %v2403_v62, %v2405_v49  ;;  %5122 = vrot.lane.b32.xlu0 %v7477_v55, %s5734_s30  ;;  %v7480_v11 = vld [vmem:[#allocation25_spill] sm:$0xff]  ;;  %s5517_s30 = sshll.u32 %s7548_s25, 3 }
 0x1b4   : > { %v2432_v44 = vmul.f32 %v2422_v61, %v2413_v36  ;;  %v2433_v18 = vmul.f32 %v2426_v63, %v2412_v1  ;;  %5301 = vrot.lane.b32.xlu1 %v7478_v35, %s5735_s8  ;;  %s315_s14 = scalar_lea.vmem %s7391_s6, %s5517_s30  ;;  %s319_s16 = scalar_lea.vmem %s7392_s7, %s5517_s30 }
 0x1b5   : > { %v2435_v37 = vadd.f32 %v2431_v25, %v2253_v10  ;;  %v2438_v56 = vadd.f32 %v2434_v60, %v2256_v59  ;;  %v2585_v2 = vpop.permute.xlu0 %2584  ;;  %v3112_v25 = vsub.s32 5, %v7464_v9 }
 0x1b6   : > { %v2436_v13 = vadd.f32 %v2432_v44, %v2254_v42  ;;  %v2437_v28 = vadd.f32 %v2433_v18, %v2255_v6  ;;  %v2589_v58 = vpop.permute.xlu1 %2588  ;;  %v2781_v42 = vsub.s32 4, %v7464_v9  ;;  %v3292_v18 = vrot.slane %v6416_v15, 1 }
 0x1b7   : > { %5299 = vrot.lane.b32.xlu0 %v7479_v57, %s5735_s8 }
 0x1b8   : > { %v2782_v60 = vrot.slane %v6416_v15, %v2781_v42  ;;  %v2794_v1 = vrot.slane %v6423_v17, %v2781_v42  ;;  %v2786_v36 = vrot.slane %v6428_v19, %v2781_v42  ;;  %v2790_v55 = vrot.slane %v6442_v30, %v2781_v42 }
 0x1b9   : > { %v2591_v39 = vpop.permute.xlu0 %2590  ;;  %v6851_v42 = vmul.f32 %v3292_v18, %v6416_v15 }
 0x1ba   : > { %v2593_v10 = vsel %vm2592_vm13, %v2589_v58, %v2591_v39  ;;  %v2596_v59 = vsel %vm2592_vm13, %v2591_v39, %v2585_v2  ;;  %v2587_v62 = vpop.permute.xlu1 %2586 }
 0x1bb   : > { %v2613_v6 = vmul.f32 %v2600_v45, %v2596_v59  ;;  %v2616_v46 = vmul.f32 %v2612_v51, %v2593_v10  ;;  %v2594_v29 = vsel %vm2592_vm13, %v2587_v62, %v2589_v58  ;;  %v2595_v47 = vsel %vm2592_vm13, %v2585_v2, %v2587_v62  ;;  %5303 = vrot.lane.b32.xlu0 %v7480_v11, %s5735_s8 }
 0x1bc   : > { %v2614_v61 = vmul.f32 %v2604_v4, %v2595_v47  ;;  %v2615_v63 = vmul.f32 %v2608_v38, %v2594_v29  ;;  %v3113_v2 = vrot.slane %v6416_v15, %v3112_v25  ;;  %v3117_v4 = vrot.slane %v6428_v19, %v3112_v25 }
 0x1bd   : > { %v2617_v48 = vadd.f32 %v2613_v6, %v2435_v37  ;;  %v2620_v27 = vadd.f32 %v2616_v46, %v2438_v56  ;;  %v2767_v33 = vpop.permute.xlu0 %2766  ;;  %v3121_v38 = vrot.slane %v6442_v30, %v3112_v25  ;;  %v3125_v62 = vrot.slane %v6423_v17, %v3112_v25 }
 0x1be   : > { %v2618_v43 = vadd.f32 %v2614_v61, %v2436_v13  ;;  %v2619_v53 = vadd.f32 %v2615_v63, %v2437_v28  ;;  %v2771_v49 = vpop.permute.xlu1 %2770  ;;  %v6854_v47 = vsub.s32 3, %v7464_v9  ;;  %v3293_v11 = vrot.slane %v6428_v19, 1  ;;  %v7481_v61 = vld [vmem:[#allocation2_spill] sm:$0xff] }
 0x1c1   : > { %v2773_v44 = vpop.permute.xlu0 %2772 }
 0x1c2   : > { %v2775_v35 = vsel %vm2774_vm14, %v2771_v49, %v2773_v44  ;;  %v2778_v37 = vsel %vm2774_vm14, %v2773_v44, %v2767_v33  ;;  %v2769_v56 = vpop.permute.xlu1 %2768 }
 0x1c3   : > { %v2795_v13 = vmul.f32 %v2782_v60, %v2778_v37  ;;  %v2798_v28 = vmul.f32 %v2794_v1, %v2775_v35  ;;  %v2776_v58 = vsel %vm2774_vm14, %v2769_v56, %v2771_v49  ;;  %v2777_v57 = vsel %vm2774_vm14, %v2767_v33, %v2769_v56  ;;  %v7483_v60 = vld [vmem:[#allocation3_spill] sm:$0xff] }
 0x1c4   : > { %v2796_v45 = vmul.f32 %v2786_v36, %v2777_v57  ;;  %v2797_v51 = vmul.f32 %v2790_v55, %v2776_v58  ;;  %v3294_v49 = vrot.slane %v6442_v30, 1  ;;  %v3295_v36 = vrot.slane %v6423_v17, 1 }
 0x1c5   : > { %v2799_v39 = vadd.f32 %v2795_v13, %v2617_v48  ;;  %v2802_v10 = vadd.f32 %v2798_v28, %v2620_v27  ;;  %v3098_v59 = vpop.permute.xlu0 %3097  ;;  %v7482_v27 = vld [vmem:[#allocation5_spill] sm:$0xff]  ;;  %v3307_v37 = vrot.slane %v6851_v42, %v6854_v47  ;;  %v6875_v28 = vmul.f32 %v3293_v11, %v6428_v19 }
 0x1c6   : > { %v2800_v6 = vadd.f32 %v2796_v45, %v2618_v43  ;;  %v2801_v46 = vadd.f32 %v2797_v51, %v2619_v53  ;;  %v3100_v29 = vpop.permute.xlu1 %3099  ;;  %v7484_v43 = vld [vmem:[#allocation4_spill] sm:$0xff]  ;;  %v6878_v45 = vmul.f32 %v3294_v49, %v6442_v30  ;;  %v6881_v51 = vmul.f32 %v3295_v36, %v6423_v17 }
 0x1c7   : > { %v2948_v63 = vadd.f32 %v7481_v61, %v2799_v39  ;;  %v3108_v48 = vsel %vm3105_vm15, %v3098_v59, %v3100_v29  ;;  %v2951_v33 = vadd.f32 %v7482_v27, %v2802_v10  ;;  %v6992_v31 = vmul.f32 %v6875_v28, %v6465_v34 }
 0x1c8   : > { %v3126_v25 = vmul.f32 %v3113_v2, %v3108_v48  ;;  %v2949_v1 = vadd.f32 %v7483_v60, %v2800_v6  ;;  %v2950_v53 = vadd.f32 %v7484_v43, %v2801_v46  ;;  %7485 = vst [vmem:[#allocation6_spill] sm:$0xff] %v6881_v51  ;;  %v3489_v43 = vrot.slane %v6416_v15, %v6854_v47 }
 0x1c9   : > { %v3102_v55 = vpop.permute.xlu0 %3101  ;;  %v3683_v34 = vrot.slane %v7469_v54, %v6854_v47 }
 0x1ca   : > { %v3130_v44 = vadd.f32 %v3126_v25, %v2948_v63  ;;  %v3107_v18 = vsel %vm3105_vm15, %v3100_v29, %v3102_v55  ;;  %v3104_v35 = vpop.permute.xlu1 %3103 }
 0x1cb   : > { %v3127_v56 = vmul.f32 %v3117_v4, %v3107_v18  ;;  %v3106_v2 = vsel %vm3105_vm15, %v3102_v55, %v3104_v35  ;;  %v3109_v13 = vsel %vm3105_vm15, %v3104_v35, %v3098_v59  ;;  %v3311_v59 = vrot.slane %v6875_v28, %v6854_v47 }
 0x1cc   : > { %v3128_v58 = vmul.f32 %v3121_v38, %v3106_v2  ;;  %v3129_v57 = vmul.f32 %v3125_v62, %v3109_v13  ;;  %v3315_v38 = vrot.slane %v6878_v45, %v6854_v47  ;;  %v3319_v62 = vrot.slane %v6881_v51, %v6854_v47 }
 0x1cd   : > { %v3131_v39 = vadd.f32 %v3127_v56, %v2949_v1  ;;  %v3280_v10 = vpop.permute.xlu0 %3279  ;;  %v3497_v56 = vrot.slane %v6442_v30, %v6854_v47  ;;  %v3501_v2 = vrot.slane %v6423_v17, %v6854_v47 }
 0x1ce   : > { %v3132_v4 = vadd.f32 %v3128_v58, %v2950_v53  ;;  %v3133_v6 = vadd.f32 %v3129_v57, %v2951_v33  ;;  %v3282_v46 = vpop.permute.xlu1 %3281 }
 0x1cf   : > { %v3290_v29 = vsel %vm3287_vm0, %v3280_v10, %v3282_v46 }
 0x1d0   : > { %v3320_v11 = vmul.f32 %v3307_v37, %v3290_v29 }
 0x1d1   : > { %v3284_v61 = vpop.permute.xlu0 %3283 }
 0x1d2   : > { %v3324_v63 = vadd.f32 %v3320_v11, %v3130_v44  ;;  %v3289_v48 = vsel %vm3287_vm0, %v3282_v46, %v3284_v61  ;;  %v3286_v27 = vpop.permute.xlu1 %3285 }
 0x1d3   : > { %v3321_v33 = vmul.f32 %v3311_v59, %v3289_v48  ;;  %v3288_v49 = vsel %vm3287_vm0, %v3284_v61, %v3286_v27  ;;  %v3291_v25 = vsel %vm3287_vm0, %v3286_v27, %v3280_v10 }
 0x1d4   : > { %v3322_v60 = vmul.f32 %v3315_v38, %v3288_v49  ;;  %v3323_v1 = vmul.f32 %v3319_v62, %v3291_v25 }
 0x1d5   : > { %v6900_v53 = vadd.f32 %v3321_v33, %v3131_v39  ;;  %v3474_v36 = vpop.permute.xlu0 %3473 }
 0x1d6   : > { %v3326_v55 = vadd.f32 %v3322_v60, %v3132_v4  ;;  %v3327_v44 = vadd.f32 %v3323_v1, %v3133_v6  ;;  %v6902_v18 = vpop.permute.xlu1 %3475 }
 0x1d7   : > { %v3484_v35 = vsel %vm3481_vm1, %v3474_v36, %v6902_v18 }
 0x1d8   : > { %v3502_v37 = vmul.f32 %v3489_v43, %v3484_v35 }
 0x1d9   : > { %v6911_v13 = vpop.permute.xlu0 %3477 }
 0x1da   : > { %v6913_v58 = vadd.f32 %v3502_v37, %v3324_v63  ;;  %v3480_v57 = vpop.permute.xlu1 %3479 }
 0x1db   : > { %v3482_v39 = vsel %vm3481_vm1, %v6911_v13, %v3480_v57  ;;  %v3485_v10 = vsel %vm3481_vm1, %v3480_v57, %v3474_v36  ;;  %v6971_v57 = vmul.f32 %v6875_v28, %v6662_v5 }
 0x1dc   : > { %v3504_v4 = vmul.f32 %v3497_v56, %v3482_v39  ;;  %v3505_v6 = vmul.f32 %v3501_v2, %v3485_v10  ;;  %v6963_v56 = vsub.s32 1, %v7464_v9  ;;  %v6967_v2 = vmul.f32 %v6851_v42, %v6648_v16 }
 0x1dd   : > { %v6920_v46 = vpop.permute.xlu0 %3655  ;;  %v6975_v39 = vmul.f32 %v6878_v45, %v6665_v14  ;;  %v6983_v9 = vmul.f32 %v6881_v51, %v6651_v20 }
 0x1de   : > { %v6922_v29 = vadd.f32 %v3504_v4, %v3326_v55  ;;  %v6924_v59 = vadd.f32 %v3505_v6, %v3327_v44  ;;  %v6926_v11 = vpop.permute.xlu1 %3657  ;;  %v3493_v4 = vrot.slane %v6428_v19, %v6854_v47  ;;  %v6988_v6 = vmul.f32 %v6851_v42, %v6449_v32 }
 0x1df   : > { %v7006_v32 = vmul.f32 %v6881_v51, %v6457_v24 }
 0x1e0   : > { %7486 = vst [vmem:[#allocation7_spill] sm:$0xff] %v6922_v29  ;;  %7487 = vst [vmem:[#allocation8_spill] sm:$0xff] %v6924_v59  ;;  %v3860_v59 = vrot.slane %v6971_v57, %v6963_v56  ;;  %v7062_v57 = vmul.f32 %v6665_v14, %v7472_v26 }
 0x1e1   : > { %v6928_v38 = vpop.permute.xlu0 %3659 }
 0x1e2   : > { %v6930_v62 = vpop.permute.xlu1 %3661 }
 0x1e3   : > { %v3667_v14 = vsel %vm3663_vm11, %v6930_v62, %v6920_v46 }
 0x1e5   : > { %v6932_v61 = vpop.permute.xlu0 %3837 }
 0x1e6   : > { %v6934_v63 = vpop.permute.xlu1 %3839 }
 0x1e7   : > { %v3847_v3 = vsel %vm522_vm3, %v6932_v61, %v6934_v63 }
 0x1e9   : > { %v6936_v48 = vpop.permute.xlu0 %3841 }
 0x1ea   : > { %v6938_v27 = vpop.permute.xlu1 %3843 }
 0x1ed   : > { %v6940_v33 = vpop.permute.xlu0 %4022 }
 0x1ee   : > { %v6942_v49 = vpop.permute.xlu1 %4024 }
 0x1f1   : > { %v6944_v25 = vpop.permute.xlu0 %4026 }
 0x1f2   : > { %v6946_v60 = vpop.permute.xlu1 %4028 }
 0x1f5   : > { %v6948_v1 = vpop.permute.xlu0 %4203 }
 0x1f6   : > { %v6950_v43 = vpop.permute.xlu1 %4205 }
 0x1f9   : > { %v6952_v36 = vpop.permute.xlu0 %4207 }
 0x1fa   : > { %7488 = vst [vmem:[#allocation9_spill] sm:$0xff] %v6952_v36  ;;  %v6954_v55 = vpop.permute.xlu1 %4209 }
 0x1fb   : > { %7489 = vst [vmem:[#allocation10_spill] sm:$0xff] %v6954_v55 }
 0x1fd   : > { %v6956_v44 = vpop.permute.xlu0 %4388 }
 0x1fe   : > { %7490 = vst [vmem:[#allocation11_spill] sm:$0xff] %v6956_v44  ;;  %v6958_v35 = vpop.permute.xlu1 %4390  ;;  %v3675_v44 = vrot.slane %v7471_v7, %v6854_v47 }
 0x1ff   : > { %7491 = vst [vmem:[#allocation12_spill] sm:$0xff] %v6958_v35  ;;  %v3679_v35 = vrot.slane %v7472_v26, %v6854_v47 }
 0x201   : > { %v6960_v37 = vpop.permute.xlu0 %4392 }
 0x202   : > { %7492 = vst [vmem:[#allocation13_spill] sm:$0xff] %v6960_v37  ;;  %v6977_v10 = vpop.permute.xlu1 %4394  ;;  %v3671_v37 = vrot.slane %v7468_v21, %v6854_v47  ;;  %v7058_v47 = vmul.f32 %v6662_v5, %v7471_v7 }
 0x203   : > { %7493 = vst [vmem:[#allocation28_spill] sm:$0xff] %v6977_v10  ;;  %v6996_v10 = vmul.f32 %v6878_v45, %v6495_v12  ;;  %v3856_v12 = vrot.slane %v6967_v2, %v6963_v56 }
 0x204   : > { %7496 = vst [vmem:[#allocation16_spill] sm:$0xff] %v7058_v47 }
 0x205   : > { %v7008_v55 = vpop.permute.xlu0 %4569 }
 0x206   : > { %7494 = vst [vmem:[#allocation14_spill] sm:$0xff] %v7008_v55  ;;  %v7018_v36 = vpop.permute.xlu1 %4571  ;;  %v7054_v55 = vmul.f32 %v6648_v16, %v7468_v21  ;;  %v7072_v16 = vmul.f32 %v6651_v20, %v7469_v54  ;;  %v3665_v20 = vsel %vm3663_vm11, %v6926_v11, %v6928_v38 }
 0x207   : > { %7495 = vst [vmem:[#allocation15_spill] sm:$0xff] %v7018_v36  ;;  %v3483_v36 = vsel %vm3481_vm1, %v6902_v18, %v6911_v13  ;;  %v3666_v13 = vsel %vm3663_vm11, %v6920_v46, %v6926_v11  ;;  %v3664_v11 = vsel %vm3663_vm11, %v6928_v38, %v6930_v62  ;;  %v3685_v47 = vmul.f32 %v3675_v44, %v3665_v20  ;;  %v7509_v44 = vld [vmem:[#allocation10_spill] sm:$0xff] }
 0x208   : > { %v3503_v18 = vmul.f32 %v3493_v4, %v3483_v36  ;;  %v3684_v2 = vmul.f32 %v3671_v37, %v3666_v13  ;;  %v3846_v38 = vsel %vm522_vm3, %v6934_v63, %v6936_v48  ;;  %v3686_v13 = vmul.f32 %v3679_v35, %v3664_v11  ;;  %v7497_v11 = vld [vmem:[#allocation31_spill] sm:$0xff] }
 0x209   : > { %v7044_v51 = vpop.permute.xlu0 %4573  ;;  %v3687_v20 = vmul.f32 %v3683_v34, %v3667_v14  ;;  %v3845_v63 = vsel %vm522_vm3, %v6936_v48, %v6938_v27  ;;  %v3869_v36 = vmul.f32 %v3856_v12, %v3847_v3  ;;  %v3870_v4 = vmul.f32 %v3860_v59, %v3846_v38 }
 0x20a   : > { %v7050_v24 = vpop.permute.xlu1 %4575  ;;  %v3507_v46 = vadd.f32 %v3503_v18, %v6900_v53  ;;  %v3848_v53 = vsel %vm522_vm3, %v6938_v27, %v6932_v61  ;;  %v4032_v35 = vsel %vm732_vm2, %v6940_v33, %v6942_v49  ;;  %v4031_v34 = vsel %vm732_vm2, %v6942_v49, %v6944_v25  ;;  %v7498_v27 = vld [vmem:[#allocation34_spill] sm:$0xff] }
 0x20b   : > { %v3688_v48 = vadd.f32 %v3684_v2, %v6913_v58  ;;  %v7499_v59 = vrot.slane %v6975_v39, %v6963_v56  ;;  %v7500_v38 = vrot.slane %v6983_v9, %v6963_v56  ;;  %v4030_v58 = vsel %vm732_vm2, %v6944_v25, %v6946_v60 }
 0x20c   : > { %v3689_v14 = vadd.f32 %v3685_v47, %v3507_v46  ;;  %v4033_v49 = vsel %vm732_vm2, %v6946_v60, %v6940_v33  ;;  %v7501_v39 = vrot.slane %v6851_v42, %v6963_v56  ;;  %v7502_v9 = vrot.slane %v6875_v28, %v6963_v56 }
 0x20d   : > { %v7090_v5 = vpop.permute.xlu0 %4750  ;;  %v3871_v12 = vmul.f32 %v7499_v59, %v3845_v63  ;;  %v3872_v37 = vmul.f32 %v7500_v38, %v3848_v53  ;;  %v4213_v25 = vsel %vm914_vm4, %v6948_v1, %v6950_v43  ;;  %v7503_v63 = vld [vmem:[#allocation9_spill] sm:$0xff]  ;;  %v7504_v53 = vld [vmem:[#allocation7_spill] sm:$0xff]  ;;  %v7505_v38 = vld [vmem:[#allocation8_spill] sm:$0xff]  ;;  %v7506_v28 = vrot.slane %v6878_v45, %v6963_v56 }
 0x20e   : > { %v7094_v29 = vpop.permute.xlu1 %4752  ;;  %v4050_v2 = vmul.f32 %v7501_v39, %v4032_v35  ;;  %v4051_v46 = vmul.f32 %v7502_v9, %v4031_v34  ;;  %v4212_v33 = vsel %vm914_vm4, %v6950_v43, %v7503_v63  ;;  %v3690_v59 = vadd.f32 %v3686_v13, %v7504_v53  ;;  %v7507_v9 = vld [vmem:[#allocation6_spill] sm:$0xff] }
 0x20f   : > { %v3691_v42 = vadd.f32 %v3687_v20, %v7505_v38  ;;  %v3873_v35 = vadd.f32 %v3869_v36, %v3688_v48  ;;  %v3874_v39 = vadd.f32 %v3870_v4, %v3689_v14  ;;  %v4052_v34 = vmul.f32 %v7506_v28, %v4030_v58  ;;  %v7512_v48 = vld [vmem:[#allocation12_spill] sm:$0xff]  ;;  %v7513_v14 = vld [vmem:[#allocation11_spill] sm:$0xff]  ;;  %v7514_v58 = vld [vmem:[#allocation13_spill] sm:$0xff] }
 0x210   : > { %v7508_v3 = vrot.slane %v7507_v9, %v6963_v56  ;;  %v4211_v43 = vsel %vm914_vm4, %v7503_v63, %v7509_v44  ;;  %v4214_v13 = vsel %vm914_vm4, %v7509_v44, %v6948_v1  ;;  %v7510_v36 = vrot.slane %v6988_v6, %v6963_v56  ;;  %v7517_v9 = vld [vmem:[#allocation28_spill] sm:$0xff] }
 0x211   : > { %v7125_v62 = vpop.permute.xlu0 %4754  ;;  %v7511_v45 = vrot.slane %v6992_v31, %v6963_v56  ;;  %v3875_v1 = vadd.f32 %v3871_v12, %v3690_v59  ;;  %v3876_v44 = vadd.f32 %v3872_v37, %v3691_v42  ;;  %v4054_v53 = vadd.f32 %v4050_v2, %v3873_v35  ;;  %v7521_v59 = vld [vmem:[#allocation14_spill] sm:$0xff] }
 0x212   : > { %v7141_v18 = vpop.permute.xlu1 %4756  ;;  %v4053_v61 = vmul.f32 %v7508_v3, %v4033_v49  ;;  %v4235_v4 = vmul.f32 %v7510_v36, %v4213_v25  ;;  %v4398_v3 = vsel %vm1108_vm5, %v7513_v14, %v7512_v48  ;;  %v4397_v49 = vsel %vm1108_vm5, %v7512_v48, %v7514_v58 }
 0x213   : > { %v4236_v20 = vmul.f32 %v7511_v45, %v4212_v33  ;;  %v4055_v6 = vadd.f32 %v4051_v46, %v3874_v39  ;;  %v7515_v31 = vrot.slane %v6996_v10, %v6963_v56  ;;  %v7516_v38 = vrot.slane %v7006_v32, %v6963_v56  ;;  %v7520_v32 = vld [vmem:[#allocation15_spill] sm:$0xff] }
 0x214   : > { %v4396_v36 = vsel %vm1108_vm5, %v7514_v58, %v7517_v9  ;;  %v4399_v37 = vsel %vm1108_vm5, %v7517_v9, %v7513_v14  ;;  %v7518_v12 = vrot.slane %v6669_v50, %v6963_v56  ;;  %v7519_v10 = vrot.slane %v6686_v0, %v6963_v56  ;;  %v7529_v9 = vld [vmem:[#allocation36_spill] sm:$0xff] }
 0x215   : > { %v7170_v47 = vpop.permute.xlu0 %4931  ;;  %v4237_v33 = vmul.f32 %v7515_v31, %v4211_v43  ;;  %v4238_v28 = vmul.f32 %v7516_v38, %v4214_v13  ;;  %v4579_v42 = vsel %vm1294_vm6, %v7521_v59, %v7520_v32  ;;  %v4578_v35 = vsel %vm1294_vm6, %v7520_v32, %v7044_v51 }
 0x216   : > { %v4934_v60 = vpop.permute.xlu1 %4933  ;;  %v4416_v2 = vmul.f32 %v7518_v12, %v4398_v3  ;;  %v4417_v46 = vmul.f32 %v7519_v10, %v4397_v49  ;;  %v4056_v39 = vadd.f32 %v4052_v34, %v3875_v1  ;;  %v4057_v43 = vadd.f32 %v4053_v61, %v3876_v44 }
 0x217   : > { %v4239_v13 = vadd.f32 %v4235_v4, %v4054_v53  ;;  %v4240_v45 = vadd.f32 %v4236_v20, %v4055_v6  ;;  %v7522_v48 = vrot.slane %v6690_v52, %v6963_v56  ;;  %v7523_v14 = vrot.slane %v6673_v23, %v6963_v56 }
 0x218   : > { %v4577_v58 = vsel %vm1294_vm6, %v7044_v51, %v7050_v24  ;;  %v4580_v61 = vsel %vm1294_vm6, %v7050_v24, %v7521_v59  ;;  %v7524_v4 = vrot.slane %v6416_v15, %v6963_v56  ;;  %v7525_v20 = vrot.slane %v6428_v19, %v6963_v56 }
 0x219   : > { %v4936_v63 = vpop.permute.xlu0 %4935  ;;  %v4418_v0 = vmul.f32 %v7522_v48, %v4396_v36  ;;  %v4419_v3 = vmul.f32 %v7523_v14, %v4399_v37  ;;  %v4760_v49 = vsel %vm1476_vm7, %v7090_v5, %v7094_v29  ;;  %v4759_v51 = vsel %vm1476_vm7, %v7094_v29, %v7125_v62 }
 0x21a   : > { %v4938_v25 = vpop.permute.xlu1 %4937  ;;  %v4597_v52 = vmul.f32 %v7524_v4, %v4579_v42  ;;  %v4598_v23 = vmul.f32 %v7525_v20, %v4578_v35  ;;  %v4241_v24 = vadd.f32 %v4237_v33, %v4056_v39  ;;  %v4242_v1 = vadd.f32 %v4238_v28, %v4057_v43  ;;  %v7534_v43 = vld [vmem:[#allocation16_spill] sm:$0xff] }
 0x21b   : > { %v4420_v44 = vadd.f32 %v4416_v2, %v4239_v13  ;;  %v4421_v53 = vadd.f32 %v4417_v46, %v4240_v45  ;;  %v7526_v15 = vrot.slane %v6442_v30, %v6963_v56  ;;  %v7527_v19 = vrot.slane %v6423_v17, %v6963_v56 }
 0x21c   : > { %v4758_v38 = vsel %vm1476_vm7, %v7125_v62, %v7141_v18  ;;  %v4761_v29 = vsel %vm1476_vm7, %v7141_v18, %v7090_v5  ;;  %v7528_v28 = vrot.slane %v6554_v8, %v6963_v56  ;;  %v7530_v36 = vrot.slane %v7529_v9, %v6963_v56 }
 0x21d   : > { %v5117_v50 = vpop.permute.xlu0 %5116  ;;  %v4599_v6 = vmul.f32 %v7526_v15, %v4577_v58  ;;  %v4600_v31 = vmul.f32 %v7527_v19, %v4580_v61  ;;  %v4941_v37 = vsel %vm1662_vm8, %v7170_v47, %v4934_v60  ;;  %v4940_v62 = vsel %vm1662_vm8, %v4934_v60, %v4936_v63 }
 0x21e   : > { %v5119_v34 = vpop.permute.xlu1 %5118  ;;  %v4778_v30 = vmul.f32 %v7528_v28, %v4760_v49  ;;  %v4779_v17 = vmul.f32 %v7530_v36, %v4759_v51  ;;  %v4422_v2 = vadd.f32 %v4418_v0, %v4241_v24  ;;  %v4423_v10 = vadd.f32 %v4419_v3, %v4242_v1  ;;  %v7541_v51 = vld [vmem:[#allocation32_spill] sm:$0xff] }
 0x21f   : > { %v4601_v5 = vadd.f32 %v4597_v52, %v4420_v44  ;;  %v4602_v18 = vadd.f32 %v4598_v23, %v4421_v53  ;;  %v7531_v8 = vrot.slane %v6568_v41, %v6963_v56  ;;  %v7532_v32 = vrot.slane %v6558_v40, %v6963_v56 }
 0x220   : > { %v5126_v42 = vsel %vm1860_vm9, %v5117_v50, %v5119_v34  ;;  %v7533_v60 = vrot.slane %v7054_v55, %v6963_v56  ;;  %v7535_v13 = vrot.slane %v7534_v43, %v6963_v56  ;;  %v4939_v45 = vsel %vm1662_vm8, %v4936_v63, %v4938_v25  ;;  %v5345_v43 = vld [vmem:[%s306_s26 + $0x10] sm:$0xff] }
 0x221   : > { %v5121_v33 = vpop.permute.xlu0 %5120  ;;  %v4780_v46 = vmul.f32 %v7531_v8, %v4758_v38  ;;  %v4781_v59 = vmul.f32 %v7532_v32, %v4761_v29  ;;  %v4942_v40 = vsel %vm1662_vm8, %v4938_v25, %v7170_v47  ;;  %v4603_v0 = vadd.f32 %v4599_v6, %v4422_v2 }
 0x222   : > { %v5298_v12 = vpop.permute.xlu1 %5297  ;;  %v5125_v35 = vsel %vm1860_vm9, %v5119_v34, %v5121_v33  ;;  %v4963_v39 = vmul.f32 %v7533_v60, %v4941_v37  ;;  %v4964_v41 = vmul.f32 %v7535_v13, %v4940_v62  ;;  %v4604_v14 = vadd.f32 %v4600_v31, %v4423_v10  ;;  %v5346_v13 = vld [vmem:[%s306_s26 + $0x18] sm:$0xff] }
 0x223   : > { %v4782_v3 = vadd.f32 %v4778_v30, %v4601_v5  ;;  %v4783_v58 = vadd.f32 %v4779_v17, %v4602_v18  ;;  %v7536_v55 = vrot.slane %v7468_v21, %v6963_v56  ;;  %v7537_v34 = vrot.slane %v7471_v7, %v6963_v56  ;;  %v7540_v7 = vld [vmem:[#allocation35_spill] sm:$0xff]  ;;  %v5343_v5 = vld [vmem:[%s306_s26] sm:$0xff] }
 0x224   : > { %v7538_v25 = vrot.slane %v7062_v57, %v6963_v56  ;;  %v7539_v23 = vrot.slane %v7072_v16, %v6963_v56  ;;  %v5320_v49 = vrot.slane %v7540_v7, %v6963_v56  ;;  %v5324_v24 = vrot.slane %v7541_v51, %v6963_v56  ;;  %v5344_v18 = vld [vmem:[%s306_s26 + $0x8] sm:$0xff] }
 0x225   : > { %v5123_v48 = vpop.permute.xlu0 %5122  ;;  %v5144_v61 = vmul.f32 %v7536_v55, %v5126_v42  ;;  %v5145_v4 = vmul.f32 %v7537_v34, %v5125_v35  ;;  %v4784_v1 = vadd.f32 %v4780_v46, %v4603_v0  ;;  %v4785_v44 = vadd.f32 %v4781_v59, %v4604_v14  ;;  %v7546_v46 = vld [vmem:[#allocation26_spill] sm:$0xff] }
 0x226   : > { %v5124_v63 = vsel %vm1860_vm9, %v5121_v33, %v5123_v48  ;;  %v5127_v52 = vsel %vm1860_vm9, %v5123_v48, %v5117_v50  ;;  %v5302_v47 = vpop.permute.xlu1 %5301  ;;  %v4965_v20 = vmul.f32 %v7538_v25, %v4939_v45  ;;  %v4966_v21 = vmul.f32 %v7539_v23, %v4942_v40 }
 0x227   : > { %v4967_v50 = vadd.f32 %v4963_v39, %v4782_v3  ;;  %v4968_v53 = vadd.f32 %v4964_v41, %v4783_v58  ;;  %v7542_v57 = vrot.slane %v7472_v26, %v6963_v56  ;;  %v7543_v16 = vrot.slane %v7469_v54, %v6963_v56 }
 0x228   : > { %v7544_v26 = vrot.slane %v7497_v11, %v6963_v56  ;;  %v7545_v54 = vrot.slane %v7498_v27, %v6963_v56  ;;  %v4969_v9 = vadd.f32 %v4965_v20, %v4784_v1  ;;  %v4970_v36 = vadd.f32 %v4966_v21, %v4785_v44 }
 0x229   : > { %v5300_v15 = vpop.permute.xlu0 %5299  ;;  %v5146_v6 = vmul.f32 %v7542_v57, %v5124_v63  ;;  %v5147_v19 = vmul.f32 %v7543_v16, %v5127_v52  ;;  %v5148_v29 = vadd.f32 %v5144_v61, %v4967_v50  ;;  %v5149_v33 = vadd.f32 %v5145_v4, %v4968_v53 }
 0x22a   : > { %v5306_v31 = vsel %vm2042_vm10, %v5300_v15, %v5302_v47  ;;  %v5307_v38 = vsel %vm2042_vm10, %v5298_v12, %v5300_v15  ;;  %vm5365_vm2 = vcmask 7168  }
 0x22b   : > { %v5325_v28 = vmul.f32 %v7544_v26, %v5307_v38  ;;  %v5326_v30 = vmul.f32 %v7545_v54, %v5306_v31  ;;  %v5150_v2 = vadd.f32 %v5146_v6, %v4969_v9  ;;  %v5151_v10 = vadd.f32 %v5147_v19, %v4970_v36 }
 0x22d   : > { %v5329_v17 = vadd.f32 %v5325_v28, %v5148_v29  ;;  %v5330_v37 = vadd.f32 %v5326_v30, %v5149_v33  ;;  %v5304_v62 = vpop.permute.xlu0 %5303 }
 0x22e   : > { %v5305_v8 = vsel %vm2042_vm10, %v5302_v47, %v5304_v62  ;;  %v5308_v11 = vsel %vm2042_vm10, %v5304_v62, %v5298_v12 }
 0x22f   : > { %v5339_v32 = vadd.f32 %v7546_v46, %v5329_v17  ;;  %v5340_v56 = vadd.f32 %v7546_v46, %v5330_v37  ;;  %v5327_v27 = vmul.f32 %v5320_v49, %v5305_v8  ;;  %v5328_v59 = vmul.f32 %v5324_v24, %v5308_v11 }
 0x231   : > { %v5347_v42 = vadd.f32 %v5343_v5, %v5339_v32  ;;  %v5348_v35 = vadd.f32 %v5344_v18, %v5340_v56  ;;  %v5331_v60 = vadd.f32 %v5327_v27, %v5150_v2  ;;  %v5332_v39 = vadd.f32 %v5328_v59, %v5151_v10 }
 0x233   : > { %5351 = vst [vmem:[%s311_s29] sm:$0xff] %v5347_v42  ;;  %5352 = vst [vmem:[%s311_s29 + $0x8] sm:$0xff] %v5348_v35  ;;  %v5341_v22 = vadd.f32 %v7546_v46, %v5331_v60  ;;  %v5342_v12 = vadd.f32 %v7546_v46, %v5332_v39  ;;  %v5355_v40 = vadd.f32 %v5348_v35, %v5347_v42 }
 0x235   : > { %v5349_v41 = vadd.f32 %v5345_v43, %v5341_v22  ;;  %v5350_v45 = vadd.f32 %v5346_v13, %v5342_v12 }
 0x237   : > { %5353 = vst [vmem:[%s311_s29 + $0x10] sm:$0xff] %v5349_v41  ;;  %5354 = vst [vmem:[%s311_s29 + $0x18] sm:$0xff] %v5350_v45  ;;  %v5356_v48 = vadd.f32 %v5355_v40, %v5349_v41 }
 0x239   : > { %v5357_v0 = vadd.f32 %v5356_v48, %v5350_v45 }
 0x23b   : > { %5358 = vadd.xlane.f32.xlu1 %v5357_v0 }
 0x2c8   : > { %v5359_v14 = vpop.xlane.xlu1 %5358 }
 0x2c9   : > { %v5360_v3 = vmul.f32 0.001953125, %v5359_v14  ;;  %5366 = vst.msk [vmem:[%s315_s14] sm:$0xff] %vm5365_vm2, %v5359_v14 }
 0x2cb   : > { %v5361_v58 = vsub.f32 %v5347_v42, %v5360_v3  ;;  %v5362_v55 = vsub.f32 %v5348_v35, %v5360_v3  ;;  %v5363_v61 = vsub.f32 %v5349_v41, %v5360_v3  ;;  %v5364_v63 = vsub.f32 %v5350_v45, %v5360_v3 }
 0x2cd   : > { %v5367_v34 = vmul.f32 %v5361_v58, %v5361_v58  ;;  %v5368_v4 = vmul.f32 %v5362_v55, %v5362_v55  ;;  %v5369_v52 = vmul.f32 %v5363_v61, %v5363_v61  ;;  %v5370_v25 = vmul.f32 %v5364_v63, %v5364_v63 }
 0x2cf   : > { %v5371_v47 = vadd.f32 %v5368_v4, %v5367_v34 }
 0x2d1   : > { %v5372_v20 = vadd.f32 %v5371_v47, %v5369_v52 }
 0x2d3   : > { %v5373_v23 = vadd.f32 %v5372_v20, %v5370_v25 }
 0x2d5   : > { %5374 = vadd.xlane.f32.xlu0 %v5373_v23 }
 0x362   : > { %v5375_v21 = vpop.xlane.xlu0 %5374 }
 0x363   : > { %5376 = vst.msk [vmem:[%s319_s16] sm:$0xff] %vm5365_vm2, %v5375_v21 }
 0x364 PF: > { %s18_s24 = sadd.s32 1, %s5723_s24  }
 0x365   : > { %p15_p4 = scmp.ge.s32.totalorder %s18_s24, 4  }
 0x367   :  { %17 = sbr.rel (!%p15_p4) target bundleno = 1 (0x1), region = 97 }

// kernel: attention_gate.8
= control target key start
LH: loop header
LB: loop body
LE: loop exit
PB: predicated region body
PF: predicated region fallthrough
CT: control target
= control target key end

     0   :  { %s1701_s23 = smov 0   ;;  %s2720_s0 = inlined_call_operand.vmem [shape: f32[2,8,512], index: 0, kind: input, shape index: {}]   ;;  %s2721_s1 = inlined_call_operand.vmem [shape: f32[8,1], index: 1, kind: input, shape index: {}]   ;;  %s2722_s2 = inlined_call_operand.vmem [shape: f32[8,1], index: 2, kind: input, shape index: {}]   ;;  %s2723_s3 = inlined_call_operand.vmem [shape: f32[27,8], index: 3, kind: input, shape index: {}]   ;;  %s2724_s4 = inlined_call_operand.<no memory space> [shape: f32[1,1], index: 4, kind: input, shape index: {}]   ;;  %s2725_s5 = inlined_call_operand.vmem [shape: f32[6,512], index: 5, kind: input, shape index: {}]   ;;  %s2726_s6 = inlined_call_operand.vmem [shape: f32[2,1,512], index: 6, kind: output, shape index: {}]  }
   0x1   :  { %v11_v0 = vstv %s2724_s4 }
   0x2   :  { %12 = vst [vmem:[#allocation2] sm:$0x1] %v11_v0 }
   0x3 LB: > { %s1576_s24 = sadd.s32 4294967295, %s1641_s23   ;;  %p1580_p0 = scmp.ge.s32.totalorder %s1641_s23, 1  ;;  %s1641_s23 = sphi %s1701_s23, %s18_s23  }
   0x4   : > { %p214_p1 = scmp.lt.s32.totalorder %s1641_s23, 3 }
   0x6   : > { %p215_p2 = pnand %p1580_p0, %p214_p1 }
   0x8   : > { %218 = sbr.rel (%p215_p2) target bundleno = 1026 (0x402), region = 44 }
   0xf   : > { %v256_v1 = vld [vmem:[%s2721_s1] sm:$0xff]  ;;  %v1643_v2 = vmov 0   ;;  %v1644_v4 = vmov 0.0   ;;  %p243_p3 = scmp.lt.s32.totalorder %s1576_s24, 1  ;;  %vm284_vm0 = vcmask 64512   ;;  %v281_v25 = vld [vmem:[%s2723_s3 + $0x8] sm:$0xff] }
  0x10   : > { %1623 = vset.pattern.permute.xlu0 %v1643_v2  ;;  %1624 = vset.pattern.permute.xlu1 %v1643_v2  ;;  %v266_v3 = vld [vmem:[%s2722_s2] sm:$0xff]  ;;  %v282_v26 = vld [vmem:[%s2723_s3 + $0x10] sm:$0xff]  ;;  %v283_v27 = vld [vmem:[%s2723_s3 + $0x18] sm:$0x7]  ;;  %s1645_s16 = smov 73   ;;  %s1646_s17 = smov 72  }
  0x11   : > { %259 = vperm.xlu0 %1623, %v256_v1   ;;  %361 = vmatprep.mubr.f32.mxu0 %v1644_v4  ;;  %v479_v5 = vld [vmem:[#allocation2] sm:$0x1]  ;;  %s2831_s24 = smov (!%p243_p3, %s1576_s24), 1  ;;  %s1647_s18 = smov 71  }
  0x12   : > { %450 = vmatprep.mubr.f32.mxu1 %v1644_v4  ;;  %482 = vperm.xlu1 %1624, %v479_v5   ;;  %s1594_s28 = sshll.u32 %s2831_s24, 5  ;;  %v280_v24 = vld [vmem:[%s2723_s3] sm:$0xff]  ;;  %s1648_s19 = smov 65  }
  0x13   : > { %s247_s7 = scalar_lea.vmem %s2720_s0, %s1594_s28  ;;  %s1649_s20 = smov 64  }
  0x14   : > { %v253_v6 = vld [vmem:[%s247_s7 + $0x8] sm:$0xff]  ;;  %v255_v8 = vld [vmem:[%s247_s7 + $0x18] sm:$0xff]  ;;  %v252_v9 = vld [vmem:[%s247_s7] sm:$0xff]  ;;  %s1650_s21 = smov 63   ;;  %s1651_s22 = smov 57  }
  0x15   : > { %269 = vperm.xlu0 %1623, %v266_v3   ;;  %v254_v10 = vld [vmem:[%s247_s7 + $0x10] sm:$0xff]  ;;  %s1652_s25 = smov 56   ;;  %s1653_s26 = smov 55  }
  0x16   : > { %s1654_s4 = smov 9   ;;  %s1655_s27 = smov 8  }
  0x17   : > { %s1656_s28 = smov 7   ;;  %s1657_s29 = smov 1  }
  0x18   : > { %s1658_s30 = smov 127   ;;  %s1659_s7 = smov 121  }
  0x90   : > { %v260_v7 = vpop.permute.xlu0 %259 }
  0x91   : > { %v263_v11 = vmul.f32 %v260_v7, %v253_v6  ;;  %v265_v12 = vmul.f32 %v260_v7, %v255_v8  ;;  %v262_v13 = vmul.f32 %v260_v7, %v252_v9  ;;  %v264_v14 = vmul.f32 %v260_v7, %v254_v10 }
  0x94   : > { %v270_v15 = vpop.permute.xlu0 %269 }
  0x95   : > { %v273_v16 = vadd.f32 %v270_v15, %v263_v11  ;;  %v275_v17 = vadd.f32 %v270_v15, %v265_v12  ;;  %v272_v18 = vadd.f32 %v270_v15, %v262_v13  ;;  %v274_v19 = vadd.f32 %v270_v15, %v264_v14 }
  0x97   : > { %v277_v20 = vmax.f32 %v273_v16, 0.0  ;;  %v279_v21 = vmax.f32 %v275_v17, 0.0  ;;  %v276_v22 = vmax.f32 %v272_v18, 0.0  ;;  %v278_v23 = vmax.f32 %v274_v19, 0.0 }
  0x99   : > { %297 = vmatprep.subr.mxu0 %v277_v20  ;;  %386 = vmatprep.subr.mxu1 %v279_v21 }
  0x9a   : > { %298 = vmatpush1.msra.mxu0 %v276_v22  ;;  %387 = vmatpush1.msra.mxu1 %v278_v23 }
  0x9b   : > { %1584 = vmatmul.mubr.msk.f32.vlgmr.msra.gmra.mrb[0].mxu0 %vm284_vm0, %v280_v24  ;;  %1588 = vmatmul.mubr.msk.f32.vlgmr.msra.gmra.mrb[0].mxu1 %vm284_vm0, %v280_v24 }
  0x9c   : > { %367 = vmatprep.mubr.f32.mxu0 %v1644_v4  ;;  %456 = vmatprep.mubr.f32.mxu1 %v1644_v4 }
  0x9f   : > { %1585 = vmatmul.mubr.msk.f32.gmra.mrb[2].mxu0 %vm284_vm0, %v281_v25  ;;  %1589 = vmatmul.mubr.msk.f32.gmra.mrb[2].mxu1 %vm284_vm0, %v281_v25 }
  0xa0   : > { %373 = vmatprep.mubr.f32.mxu0 %v1644_v4  ;;  %462 = vmatprep.mubr.f32.mxu1 %v1644_v4 }
  0xa3   : > { %1586 = vmatmul.mubr.msk.f32.gmra.mrb[4].mxu0 %vm284_vm0, %v282_v26  ;;  %1590 = vmatmul.mubr.msk.f32.gmra.mrb[4].mxu1 %vm284_vm0, %v282_v26 }
  0xa4   : > { %379 = vmatprep.mubr.f32.mxu0 %v1644_v4  ;;  %468 = vmatprep.mubr.f32.mxu1 %v1644_v4 }
  0xa7   : > { %1587 = vmatmul.mubr.msk.f32.gmra.mrb[6].mxu0 %vm284_vm0, %v283_v27  ;;  %1591 = vmatmul.mubr.msk.f32.gmra.mrb[6].mxu1 %vm284_vm0, %v283_v27 }
 0x16e   : > { %v1741_v28 = vpop.f32.mrb[0].mxu0  ;;  %v1743_v29 = vpop.f32.mrb[0].mxu1 }
 0x16f   : > { %490 = vrot.lane.b32.xlu1 %v1741_v28, %s1645_s16  ;;  %v1747_v30 = vpop.f32.mrb[1].mxu0  ;;  %v1749_v31 = vpop.f32.mrb[1].mxu1  ;;  %v545_v36 = vrot.slane %v1741_v28, 1  ;;  %v547_v42 = vrot.slane %v1743_v29, 1  ;;  %v574_v44 = vrot.slane %v1741_v28, 2  ;;  %v576_v46 = vrot.slane %v1743_v29, 2 }
 0x170   : > { %492 = vrot.lane.b32.xlu0 %v1747_v30, %s1645_s16  ;;  %v546_v37 = vrot.slane %v1747_v30, 1  ;;  %v548_v43 = vrot.slane %v1749_v31, 1  ;;  %v575_v45 = vrot.slane %v1747_v30, 2  ;;  %v577_v47 = vrot.slane %v1749_v31, 2 }
 0x171   : > { %v615_v48 = vrot.slane %v1741_v28, 3  ;;  %v616_v49 = vrot.slane %v1747_v30, 3  ;;  %v617_v50 = vrot.slane %v1743_v29, 3  ;;  %v618_v51 = vrot.slane %v1749_v31, 3 }
 0x172   : > { %v1753_v32 = vpop.f32.mrb[2].mxu0  ;;  %v1755_v33 = vpop.f32.mrb[2].mxu1  ;;  %v648_v52 = vrot.slane %v1741_v28, 4  ;;  %v649_v53 = vrot.slane %v1747_v30, 4  ;;  %v650_v54 = vrot.slane %v1743_v29, 4  ;;  %v651_v55 = vrot.slane %v1749_v31, 4 }
 0x173   : > { %494 = vrot.lane.b32.xlu1 %v1743_v29, %s1645_s16  ;;  %v1759_v34 = vpop.f32.mrb[3].mxu0  ;;  %v1761_v35 = vpop.f32.mrb[3].mxu1  ;;  %v677_v56 = vrot.slane %v1741_v28, 5  ;;  %v678_v57 = vrot.slane %v1747_v30, 5  ;;  %v679_v58 = vrot.slane %v1743_v29, 5  ;;  %v680_v59 = vrot.slane %v1749_v31, 5 }
 0x174   : > { %496 = vrot.lane.b32.xlu0 %v1749_v31, %s1645_s16  ;;  %v710_v60 = vrot.slane %v1741_v28, 6  ;;  %v711_v61 = vrot.slane %v1747_v30, 6  ;;  %v712_v62 = vrot.slane %v1743_v29, 6  ;;  %v713_v63 = vrot.slane %v1749_v31, 6 }
 0x175   : > { %v755_v0 = vrot.slane %v1741_v28, 7  ;;  %v756_v1 = vrot.slane %v1747_v30, 7  ;;  %v757_v2 = vrot.slane %v1743_v29, 7  ;;  %v758_v4 = vrot.slane %v1749_v31, 7  ;;  %v483_v28 = vpop.permute.xlu1 %482 }
 0x176   : > { %v1767_v38 = vpop.f32.mrb[4].mxu0  ;;  %v1769_v39 = vpop.f32.mrb[4].mxu1  ;;  %v813_v8 = vrot.slane %v1753_v32, 1  ;;  %v814_v9 = vrot.slane %v1759_v34, 1  ;;  %v815_v10 = vrot.slane %v1755_v33, 1  ;;  %v816_v11 = vrot.slane %v1761_v35, 1 }
 0x177   : > { %553 = vrot.lane.b32.xlu1 %v545_v36, %s1646_s17  ;;  %v1772_v40 = vpop.f32.mrb[5].mxu0  ;;  %v1774_v41 = vpop.f32.mrb[5].mxu1  ;;  %v854_v12 = vrot.slane %v1753_v32, 2  ;;  %v855_v13 = vrot.slane %v1759_v34, 2  ;;  %v856_v14 = vrot.slane %v1755_v33, 2  ;;  %v857_v15 = vrot.slane %v1761_v35, 2 }
 0x178   : > { %555 = vrot.lane.b32.xlu0 %v546_v37, %s1646_s17  ;;  %v883_v16 = vrot.slane %v1753_v32, 3  ;;  %v884_v17 = vrot.slane %v1759_v34, 3  ;;  %v885_v18 = vrot.slane %v1755_v33, 3  ;;  %v886_v19 = vrot.slane %v1761_v35, 3 }
 0x179   : > { %v924_v20 = vrot.slane %v1753_v32, 4  ;;  %v925_v21 = vrot.slane %v1759_v34, 4  ;;  %v926_v22 = vrot.slane %v1755_v33, 4  ;;  %v927_v23 = vrot.slane %v1761_v35, 4 }
 0x17a   : > { %v1826_v3 = vpop.f32.mrb[6].mxu0  ;;  %v1831_v6 = vpop.f32.mrb[6].mxu1  ;;  %v965_v24 = vrot.slane %v1753_v32, 6  ;;  %v966_v25 = vrot.slane %v1759_v34, 6  ;;  %v967_v26 = vrot.slane %v1755_v33, 6  ;;  %v968_v27 = vrot.slane %v1761_v35, 6 }
 0x17b   : > { %557 = vrot.lane.b32.xlu1 %v547_v42, %s1646_s17  ;;  %v1829_v5 = vpop.f32.mrb[7].mxu0  ;;  %v1834_v7 = vpop.f32.mrb[7].mxu1  ;;  %v994_v29 = vrot.slane %v1753_v32, 7  ;;  %v995_v30 = vrot.slane %v1759_v34, 7  ;;  %v996_v36 = vrot.slane %v1755_v33, 7  ;;  %v2727_v37 = vlaneseq }
 0x17c   : > { %559 = vrot.lane.b32.xlu0 %v548_v43, %s1646_s17  ;;  %v997_v43 = vrot.slane %v1761_v35, 7 }
 0x17f   : > { %582 = vrot.lane.b32.xlu1 %v574_v44, %s1647_s18  ;;  %v1872_v44 = vld [vmem:[%s2725_s5 + $0x8] sm:$0x3f] }
 0x180   : > { %584 = vrot.lane.b32.xlu0 %v575_v45, %s1647_s18  ;;  %2759 = vst [vmem:[#allocation3_spill] sm:$0xff] %v1872_v44  ;;  %v1877_v45 = vld [vmem:[%s2725_s5 + $0x10] sm:$0x3f] }
 0x181   : > { %2760 = vst [vmem:[#allocation4_spill] sm:$0xff] %v1877_v45 }
 0x183   : > { %586 = vrot.lane.b32.xlu1 %v576_v46, %s1647_s18  ;;  %v1882_v46 = vld [vmem:[%s2725_s5] sm:$0x3f] }
 0x184   : > { %588 = vrot.lane.b32.xlu0 %v577_v47, %s1647_s18  ;;  %2761 = vst [vmem:[#allocation5_spill] sm:$0xff] %v1882_v46 }
 0x187   : > { %623 = vrot.lane.b32.xlu1 %v615_v48, %s1648_s19  ;;  %v1887_v48 = vld [vmem:[%s2725_s5 + $0x18] sm:$0x3f] }
 0x188   : > { %625 = vrot.lane.b32.xlu0 %v616_v49, %s1648_s19  ;;  %2762 = vst [vmem:[#allocation6_spill] sm:$0xff] %v1887_v48  ;;  %v1890_v49 = vshrl.u32 %v2727_v37, 7 }
 0x18a   : > { %2763 = vst [vmem:[#allocation7_spill] sm:$0xff] %v1890_v49 }
 0x18b   : > { %627 = vrot.lane.b32.xlu1 %v617_v50, %s1648_s19  ;;  %v2731_v50 = vrot.slane %v1872_v44, 2 }
 0x18c   : > { %629 = vrot.lane.b32.xlu0 %v618_v51, %s1648_s19 }
 0x18f   : > { %656 = vrot.lane.b32.xlu1 %v648_v52, %s1649_s20  ;;  %v2730_v52 = vrot.slane %v1877_v45, 2 }
 0x190   : > { %658 = vrot.lane.b32.xlu0 %v649_v53, %s1649_s20  ;;  %v2729_v53 = vrot.slane %v1882_v46, 2 }
 0x193   : > { %660 = vrot.lane.b32.xlu1 %v650_v54, %s1649_s20  ;;  %v2728_v54 = vrot.slane %v1887_v48, 2 }
 0x194   : > { %662 = vrot.lane.b32.xlu0 %v651_v55, %s1649_s20 }
 0x197   : > { %685 = vrot.lane.b32.xlu1 %v677_v56, %s1650_s21  ;;  %v487_v56 = vsub.s32 0, %v1890_v49 }
 0x198   : > { %687 = vrot.lane.b32.xlu0 %v678_v57, %s1650_s21  ;;  %v1902_v57 = vand.u32 127, %v2727_v37 }
 0x19a   : > { %vm500_vm1 = vcmp.lt.s32.totalorder %v1902_v57, 73  ;;  %vm561_vm2 = vcmp.lt.s32.totalorder %v1902_v57, 72  ;;  %vm590_vm3 = vcmp.lt.s32.totalorder %v1902_v57, 71  ;;  %vm631_vm4 = vcmp.lt.s32.totalorder %v1902_v57, 65 }
 0x19b   : > { %689 = vrot.lane.b32.xlu1 %v679_v58, %s1650_s21  ;;  %v1907_v58 = vmul.f32 %v2731_v50, %v1872_v44  ;;  %vm664_vm5 = vcmp.lt.s32.totalorder %v1902_v57, 64  ;;  %vm693_vm6 = vcmp.lt.s32.totalorder %v1902_v57, 63  ;;  %vm726_vm7 = vcmp.lt.s32.totalorder %v1902_v57, 57 }
 0x19c   : > { %691 = vrot.lane.b32.xlu0 %v680_v59, %s1650_s21  ;;  %v1910_v59 = vrot.slane %v1872_v44, 4  ;;  %vm771_vm8 = vcmp.lt.s32.totalorder %v1902_v57, 56  ;;  %vm792_vm9 = vcmp.lt.s32.totalorder %v1902_v57, 55  ;;  %vm829_vm10 = vcmp.lt.s32.totalorder %v1902_v57, 9 }
 0x19d   : > { %vm870_vm11 = vcmp.lt.s32.totalorder %v1902_v57, 8  ;;  %vm899_vm12 = vcmp.lt.s32.totalorder %v1902_v57, 7  ;;  %vm940_vm13 = vcmp.lt.s32.totalorder %v1902_v57, 1  ;;  %vm981_vm14 = vcmp.lt.s32.totalorder %v1902_v57, 127 }
 0x19e   : > { %vm1010_vm15 = vcmp.lt.s32.totalorder %v1902_v57, 121  ;;  %vm1055_vm0 = vcmp.lt.s32.totalorder %v1902_v57, 120 }
 0x19f   : > { %718 = vrot.lane.b32.xlu1 %v710_v60, %s1651_s22 }
 0x1a0   : > { %720 = vrot.lane.b32.xlu0 %v711_v61, %s1651_s22  ;;  %v1915_v61 = vmul.f32 %v2730_v52, %v1877_v45 }
 0x1a3   : > { %722 = vrot.lane.b32.xlu1 %v712_v62, %s1651_s22  ;;  %v1918_v62 = vrot.slane %v1877_v45, 4 }
 0x1a4   : > { %724 = vrot.lane.b32.xlu0 %v713_v63, %s1651_s22  ;;  %v1923_v63 = vmul.f32 %v2729_v53, %v1882_v46 }
 0x1a7   : > { %763 = vrot.lane.b32.xlu1 %v755_v0, %s1652_s25  ;;  %v1926_v0 = vrot.slane %v1882_v46, 4 }
 0x1a8   : > { %765 = vrot.lane.b32.xlu0 %v756_v1, %s1652_s25  ;;  %v1932_v1 = vmul.f32 %v2728_v54, %v1887_v48 }
 0x1ab   : > { %767 = vrot.lane.b32.xlu1 %v757_v2, %s1652_s25  ;;  %v1935_v2 = vrot.slane %v1887_v48, 4 }
 0x1ac   : > { %769 = vrot.lane.b32.xlu0 %v758_v4, %s1652_s25 }
 0x1af   : > { %784 = vrot.lane.b32.xlu1 %v1753_v32, %s1653_s26 }
 0x1b0   : > { %786 = vrot.lane.b32.xlu0 %v1759_v34, %s1653_s26 }
 0x1b3   : > { %788 = vrot.lane.b32.xlu1 %v1755_v33, %s1653_s26 }
 0x1b4   : > { %790 = vrot.lane.b32.xlu0 %v1761_v35, %s1653_s26 }
 0x1b7   : > { %821 = vrot.lane.b32.xlu1 %v813_v8, %s1654_s4  ;;  %v1072_v8 = vrot.slane %v1767_v38, 1 }
 0x1b8   : > { %823 = vrot.lane.b32.xlu0 %v814_v9, %s1654_s4  ;;  %v1939_v9 = vrot.slane %v483_v28, %v487_v56  ;;  %v1109_v28 = vrot.slane %v1767_v38, 2 }
 0x1bb   : > { %825 = vrot.lane.b32.xlu1 %v815_v10, %s1654_s4 }
 0x1bc   : > { %827 = vrot.lane.b32.xlu0 %v816_v11, %s1654_s4  ;;  %s1660_s4 = smov 120   ;;  %v1073_v11 = vrot.slane %v1772_v40, 1 }
 0x1bf   : > { %862 = vrot.lane.b32.xlu1 %v854_v12, %s1655_s27  ;;  %v1944_v12 = vrot.slane %v1872_v44, 5 }
 0x1c0   : > { %864 = vrot.lane.b32.xlu0 %v855_v13, %s1655_s27  ;;  %v1948_v13 = vmul.f32 %v1910_v59, %v1907_v58 }
 0x1c2   : > { %2764 = vst [vmem:[#allocation8_spill] sm:$0xff] %v1948_v13 }
 0x1c3   : > { %866 = vrot.lane.b32.xlu1 %v856_v14, %s1655_s27  ;;  %v1952_v14 = vmul.f32 %v1918_v62, %v1915_v61 }
 0x1c4   : > { %868 = vrot.lane.b32.xlu0 %v857_v15, %s1655_s27  ;;  %v1956_v15 = vmul.f32 %v1926_v0, %v1923_v63  ;;  %s1661_s27 = smov 119  }
 0x1c5   : > { %2765 = vst [vmem:[#allocation9_spill] sm:$0xff] %v1952_v14 }
 0x1c6   : > { %2766 = vst [vmem:[#allocation10_spill] sm:$0xff] %v1956_v15 }
 0x1c7   : > { %891 = vrot.lane.b32.xlu1 %v883_v16, %s1656_s28  ;;  %v1961_v16 = vmul.f32 %v1935_v2, %v1932_v1 }
 0x1c8   : > { %893 = vrot.lane.b32.xlu0 %v884_v17, %s1656_s28  ;;  %v1965_v17 = vrot.slane %v1877_v45, 5 }
 0x1c9   : > { %2767 = vst [vmem:[#allocation11_spill] sm:$0xff] %v1961_v16 }
 0x1cb   : > { %895 = vrot.lane.b32.xlu1 %v885_v18, %s1656_s28  ;;  %v1968_v18 = vrot.slane %v1882_v46, 5 }
 0x1cc   : > { %897 = vrot.lane.b32.xlu0 %v886_v19, %s1656_s28 }
 0x1cd   : > { %v603_v56 = vmul.f32 %v1968_v18, %v1923_v63 }
 0x1cf   : > { %932 = vrot.lane.b32.xlu1 %v924_v20, %s1657_s29 }
 0x1d0   : > { %934 = vrot.lane.b32.xlu0 %v925_v21, %s1657_s29  ;;  %v1074_v21 = vrot.slane %v1769_v39, 1 }
 0x1d3   : > { %936 = vrot.lane.b32.xlu1 %v926_v22, %s1657_s29  ;;  %v1075_v22 = vrot.slane %v1774_v41, 1 }
 0x1d4   : > { %938 = vrot.lane.b32.xlu0 %v927_v23, %s1657_s29  ;;  %v1975_v23 = vrot.slane %v1887_v48, 5 }
 0x1d7   : > { %973 = vrot.lane.b32.xlu1 %v965_v24, %s1658_s30 }
 0x1d8   : > { %975 = vrot.lane.b32.xlu0 %v966_v25, %s1658_s30 }
 0x1db   : > { %977 = vrot.lane.b32.xlu1 %v967_v26, %s1658_s30  ;;  %v604_v26 = vmul.f32 %v1944_v12, %v1907_v58 }
 0x1dc   : > { %979 = vrot.lane.b32.xlu0 %v968_v27, %s1658_s30 }
 0x1df   : > { %1002 = vrot.lane.b32.xlu1 %v994_v29, %s1659_s7 }
 0x1e0   : > { %1004 = vrot.lane.b32.xlu0 %v995_v30, %s1659_s7 }
 0x1e1   : > { %v491_v31 = vpop.permute.xlu1 %490 }
 0x1e2   : > { %v493_v42 = vpop.permute.xlu0 %492 }
 0x1e3   : > { %1006 = vrot.lane.b32.xlu1 %v996_v36, %s1659_s7  ;;  %v503_v19 = vsel %vm500_vm1, %v491_v31, %v493_v42 }
 0x1e4   : > { %1008 = vrot.lane.b32.xlu0 %v997_v43, %s1659_s7  ;;  %v605_v43 = vmul.f32 %v1965_v17, %v1915_v61 }
 0x1e5   : > { %v495_v47 = vpop.permute.xlu1 %494 }
 0x1e6   : > { %v497_v51 = vpop.permute.xlu0 %496  ;;  %v502_v24 = vsel %vm500_vm1, %v493_v42, %v495_v47  ;;  %v1110_v42 = vrot.slane %v1772_v40, 2 }
 0x1e7   : > { %1047 = vrot.lane.b32.xlu1 %v1767_v38, %s1660_s4  ;;  %v504_v25 = vsel %vm500_vm1, %v497_v51, %v491_v31  ;;  %v501_v29 = vsel %vm500_vm1, %v495_v47, %v497_v51  ;;  %v534_v31 = vmul.f32 %v1948_v13, %v503_v19  ;;  %v535_v47 = vmul.f32 %v1952_v14, %v502_v24 }
 0x1e8   : > { %1049 = vrot.lane.b32.xlu0 %v1772_v40, %s1660_s4  ;;  %v533_v51 = vmul.f32 %v1956_v15, %v504_v25  ;;  %v2004_v19 = vmul.f32 %v1910_v59, %v1872_v44 }
 0x1e9   : > { %v1898_v55 = vpop.permute.xlu1 %553 }
 0x1ea   : > { %v556_v60 = vpop.permute.xlu0 %555  ;;  %2768 = vst [vmem:[#allocation12_spill] sm:$0xff] %v2004_v19 }
 0x1eb   : > { %1051 = vrot.lane.b32.xlu1 %v1769_v39, %s1660_s4  ;;  %v564_v30 = vsel %vm561_vm2, %v1898_v55, %v556_v60 }
 0x1ec   : > { %1053 = vrot.lane.b32.xlu0 %v1774_v41, %s1660_s4 }
 0x1ed   : > { %v558_v4 = vpop.permute.xlu1 %557 }
 0x1ee   : > { %v560_v10 = vpop.permute.xlu0 %559  ;;  %v563_v37 = vsel %vm561_vm2, %v556_v60, %v558_v4  ;;  %v538_v60 = vadd.f32 %v534_v31, %v1939_v9  ;;  %v537_v31 = vadd.f32 %v533_v51, %v1939_v9  ;;  %v1154_v51 = vrot.slane %v1772_v40, 3 }
 0x1ef   : > { %1080 = vrot.lane.b32.xlu1 %v1072_v8, %s1661_s27  ;;  %v562_v25 = vsel %vm561_vm2, %v558_v4, %v560_v10  ;;  %v565_v53 = vsel %vm561_vm2, %v560_v10, %v1898_v55  ;;  %v1112_v4 = vrot.slane %v1774_v41, 2  ;;  %v568_v50 = vmul.f32 %v563_v37, %v1915_v61 }
 0x1f0   : > { %1082 = vrot.lane.b32.xlu0 %v1073_v11, %s1661_s27  ;;  %v606_v11 = vmul.f32 %v1975_v23, %v1932_v1  ;;  %v2029_v10 = vmul.f32 %v1918_v62, %v1877_v45  ;;  %v569_v37 = vmul.f32 %v562_v25, %v1932_v1  ;;  %v1153_v25 = vrot.slane %v1767_v38, 3 }
 0x1f1   : > { %v583_v20 = vpop.permute.xlu1 %582 }
 0x1f2   : > { %v585_v27 = vpop.permute.xlu0 %584  ;;  %2769 = vst [vmem:[#allocation13_spill] sm:$0xff] %v2029_v10 }
 0x1f3   : > { %v593_v36 = vsel %vm590_vm3, %v583_v20, %v585_v27  ;;  %1084 = vrot.lane.b32.xlu1 %v1074_v21, %s1661_s27  ;;  %v536_v21 = vmul.f32 %v1961_v16, %v501_v29 }
 0x1f4   : > { %1086 = vrot.lane.b32.xlu0 %v1075_v22, %s1661_s27  ;;  %v567_v22 = vmul.f32 %v564_v30, %v1907_v58  ;;  %v608_v30 = vmul.f32 %v604_v26, %v593_v36  ;;  %v539_v26 = vadd.f32 %v535_v47, %v1939_v9  ;;  %v566_v36 = vmul.f32 %v565_v53, %v1923_v63 }
 0x1f5   : > { %v587_v8 = vpop.permute.xlu1 %586 }
 0x1f6   : > { %v592_v24 = vsel %vm590_vm3, %v585_v27, %v587_v8  ;;  %v589_v54 = vpop.permute.xlu0 %588  ;;  %v1111_v27 = vrot.slane %v1769_v39, 2  ;;  %v572_v53 = vadd.f32 %v568_v50, %v539_v26 }
 0x1f7   : > { %v591_v52 = vsel %vm590_vm3, %v587_v8, %v589_v54  ;;  %v594_v29 = vsel %vm590_vm3, %v589_v54, %v583_v20  ;;  %1117 = vrot.lane.b32.xlu1 %v1109_v28, %s1645_s16  ;;  %v2033_v54 = vmul.f32 %v1926_v0, %v1882_v46  ;;  %v2037_v20 = vmul.f32 %v1935_v2, %v1887_v48 }
 0x1f8   : > { %1119 = vrot.lane.b32.xlu0 %v1110_v42, %s1645_s16  ;;  %v571_v28 = vadd.f32 %v567_v22, %v538_v60  ;;  %v540_v8 = vadd.f32 %v536_v21, %v1939_v9  ;;  %v609_v49 = vmul.f32 %v605_v43, %v592_v24  ;;  %v607_v13 = vmul.f32 %v603_v56, %v594_v29 }
 0x1f9   : > { %v624_v55 = vpop.permute.xlu1 %623  ;;  %2770 = vst [vmem:[#allocation14_spill] sm:$0xff] %v2037_v20  ;;  %v610_v15 = vmul.f32 %v606_v11, %v591_v52  ;;  %v570_v9 = vadd.f32 %v566_v36, %v537_v31 }
 0x1fa   : > { %v626_v42 = vpop.permute.xlu0 %625  ;;  %v612_v14 = vadd.f32 %v608_v30, %v571_v28  ;;  %v573_v43 = vadd.f32 %v569_v37, %v540_v8  ;;  %v613_v52 = vadd.f32 %v609_v49, %v572_v53  ;;  %v1156_v37 = vrot.slane %v1774_v41, 3 }
 0x1fb   : > { %v634_v16 = vsel %vm631_vm4, %v624_v55, %v626_v42  ;;  %1121 = vrot.lane.b32.xlu1 %v1111_v27, %s1645_s16  ;;  %v611_v29 = vadd.f32 %v607_v13, %v570_v9  ;;  %v1190_v53 = vrot.slane %v1772_v40, 4 }
 0x1fc   : > { %v641_v47 = vmul.f32 %v2004_v19, %v634_v16  ;;  %1123 = vrot.lane.b32.xlu0 %v1112_v4, %s1645_s16  ;;  %v614_v60 = vadd.f32 %v610_v15, %v573_v43  ;;  %v1155_v4 = vrot.slane %v1769_v39, 3  ;;  %s1583_s16 = sshll.u32 %s2831_s24, 2 }
 0x1fd   : > { %v628_v22 = vpop.permute.xlu1 %627 }
 0x1fe   : > { %v645_v21 = vadd.f32 %v641_v47, %v612_v14  ;;  %v633_v24 = vsel %vm631_vm4, %v626_v42, %v628_v22  ;;  %v630_v56 = vpop.permute.xlu0 %629  ;;  %v1189_v42 = vrot.slane %v1767_v38, 4 }
 0x1ff   : > { %v642_v16 = vmul.f32 %v2029_v10, %v633_v24  ;;  %v632_v50 = vsel %vm631_vm4, %v628_v22, %v630_v56  ;;  %v635_v11 = vsel %vm631_vm4, %v630_v56, %v624_v55  ;;  %1161 = vrot.lane.b32.xlu1 %v1153_v25, %s1646_s17  ;;  %v2075_v22 = vrot.slane %v1872_v44, 3 }
 0x200   : > { %v640_v30 = vmul.f32 %v2033_v54, %v635_v11  ;;  %v643_v14 = vmul.f32 %v2037_v20, %v632_v50  ;;  %1163 = vrot.lane.b32.xlu0 %v1154_v51, %s1646_s17  ;;  %v699_v24 = vmul.f32 %v1944_v12, %v1872_v44 }
 0x201   : > { %v646_v27 = vadd.f32 %v642_v16, %v613_v52  ;;  %v657_v49 = vpop.permute.xlu1 %656  ;;  %v1191_v16 = vrot.slane %v1769_v39, 4 }
 0x202   : > { %v644_v26 = vadd.f32 %v640_v30, %v611_v29  ;;  %v647_v28 = vadd.f32 %v643_v14, %v614_v60  ;;  %v659_v36 = vpop.permute.xlu0 %658  ;;  %v1192_v60 = vrot.slane %v1774_v41, 4  ;;  %v2093_v30 = vmul.f32 %v2075_v22, %v1872_v44 }
 0x203   : > { %v667_v55 = vsel %vm664_vm5, %v657_v49, %v659_v36  ;;  %1165 = vrot.lane.b32.xlu1 %v1155_v4, %s1646_s17  ;;  %v2103_v4 = vrot.slane %v1877_v45, 3 }
 0x204   : > { %v670_v13 = vmul.f32 %v667_v55, %v1872_v44  ;;  %1167 = vrot.lane.b32.xlu0 %v1156_v37, %s1646_s17  ;;  %v2112_v37 = vrot.slane %v1887_v48, 3 }
 0x205   : > { %v661_v15 = vpop.permute.xlu1 %660 }
 0x206   : > { %v674_v31 = vadd.f32 %v670_v13, %v645_v21  ;;  %v666_v8 = vsel %vm664_vm5, %v659_v36, %v661_v15  ;;  %v663_v47 = vpop.permute.xlu0 %662  ;;  %v2109_v36 = vrot.slane %v1882_v46, 3  ;;  %v1233_v13 = vrot.slane %v1767_v38, 5 }
 0x207   : > { %v671_v25 = vmul.f32 %v666_v8, %v1877_v45  ;;  %v665_v51 = vsel %vm664_vm5, %v661_v15, %v663_v47  ;;  %v668_v9 = vsel %vm664_vm5, %v663_v47, %v657_v49  ;;  %1197 = vrot.lane.b32.xlu1 %v1189_v42, %s1647_s18  ;;  %v698_v49 = vmul.f32 %v1968_v18, %v1882_v46 }
 0x208   : > { %v669_v43 = vmul.f32 %v668_v9, %v1882_v46  ;;  %v672_v21 = vmul.f32 %v665_v51, %v1887_v48  ;;  %1199 = vrot.lane.b32.xlu0 %v1190_v53, %s1647_s18  ;;  %v1234_v15 = vrot.slane %v1772_v40, 5  ;;  %v744_v53 = vmul.f32 %v2093_v30, %v1910_v59 }
 0x209   : > { %v675_v56 = vadd.f32 %v671_v25, %v646_v27  ;;  %v686_v52 = vpop.permute.xlu1 %685  ;;  %v700_v27 = vmul.f32 %v1965_v17, %v1877_v45 }
 0x20a   : > { %v673_v50 = vadd.f32 %v669_v43, %v644_v26  ;;  %v676_v11 = vadd.f32 %v672_v21, %v647_v28  ;;  %v688_v29 = vpop.permute.xlu0 %687  ;;  %v701_v28 = vmul.f32 %v1975_v23, %v1887_v48 }
 0x20b   : > { %v696_v14 = vsel %vm693_vm6, %v686_v52, %v688_v29  ;;  %1201 = vrot.lane.b32.xlu1 %v1191_v16, %s1647_s18  ;;  %v2137_v16 = vmul.f32 %v2112_v37, %v1887_v48 }
 0x20c   : > { %v703_v26 = vmul.f32 %v699_v24, %v696_v14  ;;  %1203 = vrot.lane.b32.xlu0 %v1192_v60, %s1647_s18  ;;  %v2133_v24 = vmul.f32 %v2109_v36, %v1882_v46  ;;  %v1235_v60 = vrot.slane %v1769_v39, 5 }
 0x20d   : > { %v690_v55 = vpop.permute.xlu1 %689 }
 0x20e   : > { %v707_v42 = vadd.f32 %v703_v26, %v674_v31  ;;  %v695_v8 = vsel %vm693_vm6, %v688_v29, %v690_v55  ;;  %v692_v47 = vpop.permute.xlu0 %691  ;;  %v2128_v31 = vmul.f32 %v2103_v4, %v1877_v45 }
 0x20f   : > { %v704_v25 = vmul.f32 %v700_v27, %v695_v8  ;;  %v694_v51 = vsel %vm693_vm6, %v690_v55, %v692_v47  ;;  %v697_v9 = vsel %vm693_vm6, %v692_v47, %v686_v52  ;;  %1241 = vrot.lane.b32.xlu1 %v1233_v13, %s1648_s19 }
 0x210   : > { %v702_v43 = vmul.f32 %v698_v49, %v697_v9  ;;  %v705_v21 = vmul.f32 %v701_v28, %v694_v51  ;;  %1243 = vrot.lane.b32.xlu0 %v1234_v15, %s1648_s19  ;;  %v1236_v49 = vrot.slane %v1774_v41, 5  ;;  %v745_v55 = vmul.f32 %v2128_v31, %v1918_v62 }
 0x211   : > { %v708_v29 = vadd.f32 %v704_v25, %v675_v56  ;;  %v719_v52 = vpop.permute.xlu1 %718  ;;  %v743_v56 = vmul.f32 %v2133_v24, %v1926_v0  ;;  %v1269_v15 = vrot.slane %v1767_v38, 6  ;;  %v1270_v51 = vrot.slane %v1772_v40, 6 }
 0x212   : > { %v706_v14 = vadd.f32 %v702_v43, %v673_v50  ;;  %v709_v27 = vadd.f32 %v705_v21, %v676_v11  ;;  %v721_v26 = vpop.permute.xlu0 %720  ;;  %v746_v50 = vmul.f32 %v2137_v16, %v1935_v2 }
 0x213   : > { %v729_v28 = vsel %vm726_vm7, %v719_v52, %v721_v26  ;;  %1245 = vrot.lane.b32.xlu1 %v1235_v60, %s1648_s19 }
 0x214   : > { %v748_v13 = vmul.f32 %v744_v53, %v729_v28  ;;  %1247 = vrot.lane.b32.xlu0 %v1236_v49, %s1648_s19  ;;  %v1271_v49 = vrot.slane %v1769_v39, 6  ;;  %s251_s19 = scalar_lea.vmem %s2726_s6, %s1583_s16 }
 0x215   : > { %v723_v11 = vpop.permute.xlu1 %722 }
 0x216   : > { %v752_v8 = vadd.f32 %v748_v13, %v707_v42  ;;  %v728_v47 = vsel %vm726_vm7, %v721_v26, %v723_v11  ;;  %v725_v25 = vpop.permute.xlu0 %724 }
 0x217   : > { %v749_v9 = vmul.f32 %v745_v55, %v728_v47  ;;  %v727_v53 = vsel %vm726_vm7, %v723_v11, %v725_v25  ;;  %v730_v43 = vsel %vm726_vm7, %v725_v25, %v719_v52  ;;  %1277 = vrot.lane.b32.xlu1 %v1269_v15, %s1649_s20  ;;  %v1272_v11 = vrot.slane %v1774_v41, 6 }
 0x218   : > { %v747_v21 = vmul.f32 %v743_v56, %v730_v43  ;;  %v750_v60 = vmul.f32 %v746_v50, %v727_v53  ;;  %1279 = vrot.lane.b32.xlu0 %v1270_v51, %s1649_s20  ;;  %v1298_v47 = vrot.slane %v1772_v40, 7  ;;  %v798_v40 = vmul.f32 %v2093_v30, %v1944_v12 }
 0x219   : > { %v753_v42 = vadd.f32 %v749_v9, %v708_v29  ;;  %v764_v26 = vpop.permute.xlu1 %763  ;;  %v1297_v29 = vrot.slane %v1767_v38, 7 }
 0x21a   : > { %v751_v28 = vadd.f32 %v747_v21, %v706_v14  ;;  %v754_v55 = vadd.f32 %v750_v60, %v709_v27  ;;  %v766_v13 = vpop.permute.xlu0 %765  ;;  %v1299_v21 = vrot.slane %v1769_v39, 7  ;;  %v800_v39 = vmul.f32 %v2137_v16, %v1975_v23 }
 0x21b   : > { %v774_v52 = vsel %vm771_vm8, %v764_v26, %v766_v13  ;;  %1281 = vrot.lane.b32.xlu1 %v1271_v49, %s1649_s20 }
 0x21c   : > { %v777_v56 = vmul.f32 %v774_v52, %v2093_v30  ;;  %1283 = vrot.lane.b32.xlu0 %v1272_v11, %s1649_s20  ;;  %v799_v52 = vmul.f32 %v2128_v31, %v1965_v17 }
 0x21d   : > { %v768_v50 = vpop.permute.xlu1 %767 }
 0x21e   : > { %v781_v15 = vadd.f32 %v777_v56, %v752_v8  ;;  %v773_v14 = vsel %vm771_vm8, %v766_v13, %v768_v50  ;;  %v770_v27 = vpop.permute.xlu0 %769  ;;  %v1300_v13 = vrot.slane %v1774_v41, 7 }
 0x21f   : > { %v778_v25 = vmul.f32 %v773_v14, %v2128_v31  ;;  %v772_v51 = vsel %vm771_vm8, %v768_v50, %v770_v27  ;;  %v775_v9 = vsel %vm771_vm8, %v770_v27, %v764_v26  ;;  %1305 = vrot.lane.b32.xlu1 %v1297_v29, %s1650_s21 }
 0x220   : > { %v776_v53 = vmul.f32 %v775_v9, %v2133_v24  ;;  %v779_v38 = vmul.f32 %v772_v51, %v2137_v16  ;;  %1307 = vrot.lane.b32.xlu0 %v1298_v47, %s1650_s21 }
 0x221   : > { %v782_v8 = vadd.f32 %v778_v25, %v753_v42  ;;  %v785_v43 = vpop.permute.xlu1 %784  ;;  %v797_v42 = vmul.f32 %v2133_v24, %v1968_v18 }
 0x222   : > { %v780_v60 = vadd.f32 %v776_v53, %v751_v28  ;;  %v783_v49 = vadd.f32 %v779_v38, %v754_v55  ;;  %v787_v26 = vpop.permute.xlu0 %786 }
 0x223   : > { %v795_v11 = vsel %vm792_vm9, %v785_v43, %v787_v26  ;;  %1309 = vrot.lane.b32.xlu1 %v1299_v21, %s1650_s21  ;;  %v840_v21 = vrot.slane %v1915_v61, 2 }
 0x224   : > { %v802_v56 = vmul.f32 %v798_v40, %v795_v11  ;;  %1311 = vrot.lane.b32.xlu0 %v1300_v13, %s1650_s21  ;;  %v838_v13 = vrot.slane %v1923_v63, 2  ;;  %v1378_v11 = vrot.slane %v1829_v5, 1 }
 0x225   : > { %v789_v28 = vpop.permute.xlu1 %788 }
 0x226   : > { %v806_v55 = vadd.f32 %v802_v56, %v781_v15  ;;  %v794_v41 = vsel %vm792_vm9, %v787_v26, %v789_v28  ;;  %v791_v50 = vpop.permute.xlu0 %790  ;;  %v839_v15 = vrot.slane %v1907_v58, 2 }
 0x227   : > { %v803_v29 = vmul.f32 %v799_v52, %v794_v41  ;;  %v793_v14 = vsel %vm792_vm9, %v789_v28, %v791_v50  ;;  %v796_v27 = vsel %vm792_vm9, %v791_v50, %v785_v43  ;;  %1337 = vrot.lane.b32.xlu1 %v1826_v3, %s1651_s22 }
 0x228   : > { %v801_v47 = vmul.f32 %v797_v42, %v796_v27  ;;  %v804_v25 = vmul.f32 %v800_v39, %v793_v14  ;;  %1339 = vrot.lane.b32.xlu0 %v1829_v5, %s1651_s22 }
 0x229   : > { %v807_v51 = vadd.f32 %v803_v29, %v782_v8  ;;  %v822_v9 = vpop.permute.xlu1 %821  ;;  %v841_v8 = vrot.slane %v1932_v1, 2 }
 0x22a   : > { %v805_v53 = vadd.f32 %v801_v47, %v780_v60  ;;  %v808_v38 = vadd.f32 %v804_v25, %v783_v49  ;;  %v824_v40 = vpop.permute.xlu0 %823  ;;  %v1377_v60 = vrot.slane %v1826_v3, 1  ;;  %v1380_v47 = vrot.slane %v1834_v7, 1 }
 0x22b   : > { %v832_v43 = vsel %vm829_vm10, %v822_v9, %v824_v40  ;;  %1341 = vrot.lane.b32.xlu1 %v1831_v6, %s1651_s22 }
 0x22c   : > { %v847_v26 = vmul.f32 %v839_v15, %v832_v43  ;;  %1343 = vrot.lane.b32.xlu0 %v1834_v7, %s1651_s22  ;;  %v2771_v43 = vrot.slane %v1872_v44, 2 }
 0x22d   : > { %v826_v49 = vpop.permute.xlu1 %825 }
 0x22e   : > { %v851_v52 = vadd.f32 %v847_v26, %v806_v55  ;;  %v831_v56 = vsel %vm829_vm10, %v824_v40, %v826_v49  ;;  %v828_v42 = vpop.permute.xlu0 %827  ;;  %v1379_v55 = vrot.slane %v1831_v6, 1  ;;  %v1413_v26 = vrot.slane %v1826_v3, 2 }
 0x22f   : > { %v848_v39 = vmul.f32 %v840_v21, %v831_v56  ;;  %v830_v28 = vsel %vm829_vm10, %v826_v49, %v828_v42  ;;  %v833_v41 = vsel %vm829_vm10, %v828_v42, %v822_v9  ;;  %1385 = vrot.lane.b32.xlu1 %v1377_v60, %s1652_s25  ;;  %v2772_v60 = vrot.slane %v1877_v45, 2 }
 0x230   : > { %v846_v50 = vmul.f32 %v838_v13, %v833_v41  ;;  %v849_v29 = vmul.f32 %v841_v8, %v830_v28  ;;  %1387 = vrot.lane.b32.xlu0 %v1378_v11, %s1652_s25  ;;  %v2773_v3 = vrot.slane %v1882_v46, 2  ;;  %v1415_v28 = vrot.slane %v1831_v6, 2 }
 0x231   : > { %v852_v14 = vadd.f32 %v848_v39, %v807_v51  ;;  %v863_v27 = vpop.permute.xlu1 %862  ;;  %v1414_v51 = vrot.slane %v1829_v5, 2  ;;  %v2774_v5 = vrot.slane %v1887_v48, 2  ;;  %v909_v39 = vrot.slane %v2093_v30, 2 }
 0x232   : > { %v850_v25 = vadd.f32 %v846_v50, %v805_v53  ;;  %v853_v15 = vadd.f32 %v849_v29, %v808_v38  ;;  %v865_v40 = vpop.permute.xlu0 %864  ;;  %v1416_v29 = vrot.slane %v1834_v7, 2  ;;  %v911_v6 = vrot.slane %v2137_v16, 2 }
 0x233   : > { %v873_v9 = vsel %vm870_vm11, %v863_v27, %v865_v40  ;;  %1389 = vrot.lane.b32.xlu1 %v1379_v55, %s1652_s25  ;;  %vm1088_vm10 = vcmp.lt.s32.totalorder %v1902_v57, 119 }
 0x234   : > { %v876_v21 = vmul.f32 %v873_v9, %v2771_v43  ;;  %1391 = vrot.lane.b32.xlu0 %v1380_v47, %s1652_s25  ;;  %v910_v9 = vrot.slane %v2128_v31, 2 }
 0x235   : > { %v867_v13 = vpop.permute.xlu1 %866 }
 0x236   : > { %v880_v8 = vadd.f32 %v876_v21, %v851_v52  ;;  %v872_v53 = vsel %vm870_vm11, %v865_v40, %v867_v13  ;;  %v869_v38 = vpop.permute.xlu0 %868  ;;  %v908_v21 = vrot.slane %v2133_v24, 2 }
 0x237   : > { %v877_v49 = vmul.f32 %v872_v53, %v2772_v60  ;;  %v871_v11 = vsel %vm870_vm11, %v867_v13, %v869_v38  ;;  %v874_v56 = vsel %vm870_vm11, %v869_v38, %v863_v27  ;;  %1421 = vrot.lane.b32.xlu1 %v1413_v26, %s1653_s26 }
 0x238   : > { %v875_v42 = vmul.f32 %v874_v56, %v2773_v3  ;;  %v878_v52 = vmul.f32 %v871_v11, %v2774_v5  ;;  %1423 = vrot.lane.b32.xlu0 %v1414_v51, %s1653_s26 }
 0x239   : > { %v881_v41 = vadd.f32 %v877_v49, %v852_v14  ;;  %v892_v50 = vpop.permute.xlu1 %891 }
 0x23a   : > { %v879_v55 = vadd.f32 %v875_v42, %v850_v25  ;;  %v882_v27 = vadd.f32 %v878_v52, %v853_v15  ;;  %v894_v47 = vpop.permute.xlu0 %893 }
 0x23b   : > { %v902_v40 = vsel %vm899_vm12, %v892_v50, %v894_v47  ;;  %1425 = vrot.lane.b32.xlu1 %v1415_v28, %s1653_s26 }
 0x23c   : > { %v917_v43 = vmul.f32 %v909_v39, %v902_v40  ;;  %1427 = vrot.lane.b32.xlu0 %v1416_v29, %s1653_s26  ;;  %v2744_v29 = vrot.slane %v1882_v46, 1 }
 0x23d   : > { %v896_v14 = vpop.permute.xlu1 %895 }
 0x23e   : > { %v921_v26 = vadd.f32 %v917_v43, %v880_v8  ;;  %v901_v7 = vsel %vm899_vm12, %v894_v47, %v896_v14  ;;  %v898_v25 = vpop.permute.xlu0 %897 }
 0x23f   : > { %v918_v15 = vmul.f32 %v910_v9, %v901_v7  ;;  %v900_v13 = vsel %vm899_vm12, %v896_v14, %v898_v25  ;;  %v903_v51 = vsel %vm899_vm12, %v898_v25, %v892_v50  ;;  %v954_v50 = vrot.slane %v1759_v34, 5 }
 0x240   : > { %v916_v53 = vmul.f32 %v908_v21, %v903_v51  ;;  %v919_v38 = vmul.f32 %v911_v6, %v900_v13  ;;  %v953_v34 = vrot.slane %v1753_v32, 5  ;;  %v955_v6 = vrot.slane %v1755_v33, 5 }
 0x241   : > { %v922_v60 = vadd.f32 %v918_v15, %v881_v41  ;;  %v933_v49 = vpop.permute.xlu1 %932  ;;  %v956_v25 = vrot.slane %v1761_v35, 5  ;;  %v2292_v15 = vmul.f32 %v2744_v29, %v1882_v46  ;;  %v2742_v32 = vrot.slane %v1877_v45, 1 }
 0x242   : > { %v920_v11 = vadd.f32 %v916_v53, %v879_v55  ;;  %v923_v56 = vadd.f32 %v919_v38, %v882_v27  ;;  %v935_v8 = vpop.permute.xlu0 %934  ;;  %v2743_v53 = vrot.slane %v1872_v44, 1  ;;  %v1095_v29 = vrot.slane %v1915_v61, 3 }
 0x243   : > { %v943_v3 = vsel %vm940_vm13, %v933_v49, %v935_v8 }
 0x244   : > { %v946_v42 = vmul.f32 %v943_v3, %v1910_v59  ;;  %v1031_v3 = vrot.slane %v2292_v15, 3 }
 0x245   : > { %v937_v5 = vpop.permute.xlu1 %936 }
 0x246   : > { %v950_v52 = vadd.f32 %v946_v42, %v921_v26  ;;  %v942_v39 = vsel %vm940_vm13, %v935_v8, %v937_v5  ;;  %v939_v28 = vpop.permute.xlu0 %938 }
 0x247   : > { %v947_v41 = vmul.f32 %v942_v39, %v1918_v62  ;;  %v941_v55 = vsel %vm940_vm13, %v937_v5, %v939_v28  ;;  %v944_v27 = vsel %vm940_vm13, %v939_v28, %v933_v49  ;;  %v2741_v49 = vrot.slane %v1887_v48, 1 }
 0x248   : > { %v945_v47 = vmul.f32 %v944_v27, %v1926_v0  ;;  %v948_v40 = vmul.f32 %v941_v55, %v1935_v2  ;;  %v962_v9 = vadd.f32 %v954_v50, %v950_v52  ;;  %v2312_v52 = vmul.f32 %v2743_v53, %v1872_v44 }
 0x249   : > { %v951_v43 = vadd.f32 %v947_v41, %v922_v60  ;;  %v974_v21 = vpop.permute.xlu1 %973  ;;  %v2319_v50 = vmul.f32 %v2742_v32, %v1877_v45  ;;  %v1094_v53 = vrot.slane %v1907_v58, 3  ;;  %v1096_v44 = vrot.slane %v1932_v1, 3 }
 0x24a   : > { %v949_v14 = vadd.f32 %v945_v47, %v920_v11  ;;  %v952_v26 = vadd.f32 %v948_v40, %v923_v56  ;;  %v976_v7 = vpop.permute.xlu0 %975  ;;  %v2420_v32 = vmul.f32 %v2312_v52, %v1910_v59  ;;  %v2464_v59 = vmul.f32 %v2103_v4, %v1915_v61 }
 0x24b   : > { %v984_v13 = vsel %vm981_vm14, %v974_v21, %v976_v7  ;;  %v963_v51 = vadd.f32 %v955_v6, %v951_v43 }
 0x24c   : > { %v961_v38 = vadd.f32 %v953_v34, %v949_v14  ;;  %v986_v33 = vmul.f32 %v984_v13, %v1968_v18  ;;  %v964_v60 = vadd.f32 %v956_v25, %v952_v26 }
 0x24d   : > { %v978_v35 = vpop.permute.xlu1 %977 }
 0x24e   : > { %v990_v11 = vadd.f32 %v986_v33, %v961_v38  ;;  %v983_v56 = vsel %vm981_vm14, %v976_v7, %v978_v35  ;;  %v980_v8 = vpop.permute.xlu0 %979 }
 0x24f   : > { %v987_v42 = vmul.f32 %v983_v56, %v1944_v12  ;;  %v982_v5 = vsel %vm981_vm14, %v978_v35, %v980_v8  ;;  %v985_v18 = vsel %vm981_vm14, %v980_v8, %v974_v21  ;;  %v2324_v12 = vmul.f32 %v2741_v49, %v1887_v48 }
 0x250   : > { %v988_v39 = vmul.f32 %v982_v5, %v1965_v17  ;;  %v989_v28 = vmul.f32 %v985_v18, %v1975_v23  ;;  %v1032_v23 = vrot.slane %v2312_v52, 3  ;;  %v1033_v21 = vrot.slane %v2319_v50, 3 }
 0x251   : > { %v991_v41 = vadd.f32 %v987_v42, %v962_v9  ;;  %v1003_v55 = vpop.permute.xlu1 %1002  ;;  %v1034_v34 = vrot.slane %v2324_v12, 3  ;;  %v2416_v49 = vmul.f32 %v2292_v15, %v1926_v0  ;;  %v2426_v48 = vmul.f32 %v2319_v50, %v1918_v62 }
 0x252   : > { %v992_v27 = vadd.f32 %v988_v39, %v963_v51  ;;  %v993_v47 = vadd.f32 %v989_v28, %v964_v60  ;;  %v1005_v40 = vpop.permute.xlu0 %1004  ;;  %v2430_v45 = vmul.f32 %v2324_v12, %v1935_v2 }
 0x253   : > { %v1013_v17 = vsel %vm1010_vm15, %v1003_v55, %v1005_v40 }
 0x254   : > { %v1039_v43 = vmul.f32 %v1031_v3, %v1013_v17 }
 0x255   : > { %v1007_v6 = vpop.permute.xlu1 %1006 }
 0x256   : > { %v1043_v14 = vadd.f32 %v1039_v43, %v990_v11  ;;  %v1012_v26 = vsel %vm1010_vm15, %v1005_v40, %v1007_v6  ;;  %v1009_v9 = vpop.permute.xlu0 %1008 }
 0x257   : > { %v1040_v7 = vmul.f32 %v1032_v23, %v1012_v26  ;;  %v1011_v25 = vsel %vm1010_vm15, %v1007_v6, %v1009_v9  ;;  %v1014_v13 = vsel %vm1010_vm15, %v1009_v9, %v1003_v55 }
 0x258   : > { %v1041_v51 = vmul.f32 %v1033_v21, %v1011_v25  ;;  %v1042_v38 = vmul.f32 %v1034_v34, %v1014_v13 }
 0x259   : > { %v1044_v33 = vadd.f32 %v1040_v7, %v991_v41  ;;  %v1048_v60 = vpop.permute.xlu1 %1047 }
 0x25a   : > { %v2338_v35 = vadd.f32 %v1041_v51, %v992_v27  ;;  %v1046_v11 = vadd.f32 %v1042_v38, %v993_v47  ;;  %v1050_v56 = vpop.permute.xlu0 %1049 }
 0x25b   : > { %v1058_v8 = vsel %vm1055_vm0, %v1048_v60, %v1050_v56 }
 0x25c   : > { %v1060_v3 = vmul.f32 %v1058_v8, %v2109_v36  ;;  %v2398_v8 = vmul.f32 %v2312_v52, %v2075_v22 }
 0x25d   : > { %v2343_v42 = vpop.permute.xlu1 %1051 }
 0x25e   : > { %v2345_v5 = vadd.f32 %v1060_v3, %v1043_v14  ;;  %v1057_v18 = vsel %vm1055_vm0, %v1050_v56, %v2343_v42  ;;  %v1054_v39 = vpop.permute.xlu0 %1053  ;;  %v2394_v56 = vmul.f32 %v2292_v15, %v2109_v36  ;;  %v1138_v46 = vrot.slane %v2398_v8, 1 }
 0x25f   : > { %v1061_v28 = vmul.f32 %v1057_v18, %v2075_v22  ;;  %v1059_v41 = vsel %vm1055_vm0, %v1054_v39, %v1048_v60  ;;  %v2404_v18 = vmul.f32 %v2319_v50, %v2103_v4 }
 0x260   : > { %v1063_v55 = vmul.f32 %v1059_v41, %v2112_v37  ;;  %v1137_v0 = vrot.slane %v2394_v56, 1 }
 0x261   : > { %v2354_v27 = vadd.f32 %v1061_v28, %v1044_v33  ;;  %v2356_v47 = vpop.permute.xlu1 %1080  ;;  %v2408_v28 = vmul.f32 %v2324_v12, %v2112_v37 }
 0x262   : > { %v2358_v40 = vadd.f32 %v1063_v55, %v1046_v11  ;;  %v1083_v17 = vpop.permute.xlu0 %1082  ;;  %v1093_v55 = vrot.slane %v1923_v63, 3 }
 0x263   : > { %v1091_v8 = vsel %vm1088_vm10, %v2356_v47, %v1083_v17 }
 0x265   : > { %v2360_v23 = vpop.permute.xlu1 %1084 }
 0x266   : > { %v2362_v43 = vpop.permute.xlu0 %1086 }
 0x269   : > { %v2364_v21 = vpop.permute.xlu1 %1117 }
 0x26a   : > { %v2366_v34 = vpop.permute.xlu0 %1119 }
 0x26d   : > { %v2368_v6 = vpop.permute.xlu1 %1121 }
 0x26e   : > { %v2370_v14 = vpop.permute.xlu0 %1123 }
 0x271   : > { %v2372_v26 = vpop.permute.xlu1 %1161 }
 0x272   : > { %v2374_v9 = vpop.permute.xlu0 %1163 }
 0x275   : > { %v2376_v7 = vpop.permute.xlu1 %1165 }
 0x276   : > { %v2378_v25 = vpop.permute.xlu0 %1167 }
 0x279   : > { %v2380_v13 = vpop.permute.xlu1 %1197 }
 0x27a   : > { %v2382_v51 = vpop.permute.xlu0 %1199 }
 0x27d   : > { %v2384_v38 = vpop.permute.xlu1 %1201 }
 0x27e   : > { %v2386_v33 = vpop.permute.xlu0 %1203 }
 0x27f   : > { %2775 = vst [vmem:[#allocation15_spill] sm:$0xff] %v2386_v33 }
 0x281   : > { %v2388_v60 = vpop.permute.xlu1 %1241 }
 0x282   : > { %2776 = vst [vmem:[#allocation16_spill] sm:$0xff] %v2388_v60  ;;  %v2390_v11 = vpop.permute.xlu0 %1243  ;;  %v1140_v60 = vrot.slane %v2408_v28, 1  ;;  %v2452_v28 = vmul.f32 %v2109_v36, %v1923_v63  ;;  %v1056_v36 = vsel %vm1055_vm0, %v2343_v42, %v1054_v39  ;;  %v1089_v39 = vsel %vm1088_vm10, %v2360_v23, %v2362_v43 }
 0x283   : > { %2777 = vst [vmem:[#allocation17_spill] sm:$0xff] %v2390_v11  ;;  %v2456_v11 = vmul.f32 %v2075_v22, %v1907_v58  ;;  %v1062_v19 = vmul.f32 %v1056_v36, %v2103_v4  ;;  %v1127_v22 = vsel %vm500_vm1, %v2364_v21, %v2366_v34  ;;  %v1103_v36 = vmul.f32 %v1095_v29, %v1089_v39 }
 0x284   : > { %v1357_v56 = vrot.slane %v2452_v28, 1  ;;  %v2784_v42 = vrot.slane %v2292_v15, 1  ;;  %v1206_v15 = vsel %vm590_vm3, %v2382_v51, %v2384_v38  ;;  %v2821_v28 = vrot.slane %v1923_v63, 1 }
 0x285   : > { %v2400_v3 = vpop.permute.xlu1 %1245  ;;  %v1066_v4 = vadd.f32 %v1062_v19, %v2338_v35  ;;  %v1169_v19 = vsel %vm561_vm2, %v2376_v7, %v2378_v25 }
 0x286   : > { %2778 = vst [vmem:[#allocation18_spill] sm:$0xff] %v2400_v3  ;;  %v2410_v41 = vpop.permute.xlu0 %1247  ;;  %v1139_v3 = vrot.slane %v2404_v18, 1  ;;  %v2468_v18 = vmul.f32 %v2112_v37, %v1932_v1  ;;  %v1090_v37 = vsel %vm1088_vm10, %v1083_v17, %v2360_v23  ;;  %v1092_v17 = vsel %vm1088_vm10, %v2362_v43, %v2356_v47 }
 0x287   : > { %2779 = vst [vmem:[#allocation19_spill] sm:$0xff] %v2410_v41  ;;  %v1101_v23 = vmul.f32 %v1093_v55, %v1091_v8  ;;  %v1102_v10 = vmul.f32 %v1094_v53, %v1090_v37  ;;  %v1126_v47 = vsel %vm500_vm1, %v2366_v34, %v2368_v6  ;;  %v1125_v53 = vsel %vm500_vm1, %v2368_v6, %v2370_v14  ;;  %v2782_v37 = vld [vmem:[#allocation10_spill] sm:$0xff]  ;;  %v2783_v8 = vld [vmem:[#allocation8_spill] sm:$0xff] }
 0x288   : > { %v1128_v43 = vsel %vm500_vm1, %v2370_v14, %v2364_v21  ;;  %v1104_v55 = vmul.f32 %v1096_v44, %v1092_v17  ;;  %v1145_v34 = vmul.f32 %v1137_v0, %v1127_v22  ;;  %v1171_v6 = vsel %vm561_vm2, %v2372_v26, %v2374_v9 }
 0x289   : > { %v2436_v41 = vpop.permute.xlu1 %1277  ;;  %v1170_v21 = vsel %vm561_vm2, %v2374_v9, %v2376_v7  ;;  %v1146_v14 = vmul.f32 %v1138_v46, %v1126_v47  ;;  %v1147_v17 = vmul.f32 %v1139_v3, %v1125_v53  ;;  %v1148_v29 = vmul.f32 %v1140_v60, %v1128_v43  ;;  %v2790_v43 = vld [vmem:[#allocation16_spill] sm:$0xff] }
 0x28a   : > { %2780 = vst [vmem:[#allocation20_spill] sm:$0xff] %v2436_v41  ;;  %v2442_v2 = vpop.permute.xlu0 %1279  ;;  %v1105_v0 = vadd.f32 %v1101_v23, %v2345_v5  ;;  %v1106_v22 = vadd.f32 %v1102_v10, %v2354_v27  ;;  %v1107_v39 = vadd.f32 %v1103_v36, %v1066_v4  ;;  %v1438_v20 = vrot.slane %v2783_v8, 1  ;;  %v2789_v53 = vld [vmem:[#allocation17_spill] sm:$0xff] }
 0x28b   : > { %v1108_v9 = vadd.f32 %v1104_v55, %v2358_v40  ;;  %v1181_v46 = vmul.f32 %v2784_v42, %v1171_v6  ;;  %v2785_v60 = vrot.slane %v2312_v52, 1  ;;  %v1172_v7 = vsel %vm561_vm2, %v2378_v25, %v2372_v26  ;;  %v2787_v52 = vld [vmem:[#allocation15_spill] sm:$0xff] }
 0x28c   : > { %v2786_v5 = vrot.slane %v2319_v50, 1  ;;  %v1207_v10 = vsel %vm590_vm3, %v2380_v13, %v2382_v51  ;;  %v1205_v27 = vsel %vm590_vm3, %v2384_v38, %v2787_v52  ;;  %v1149_v26 = vadd.f32 %v1145_v34, %v1105_v0 }
 0x28d   : > { %v2460_v62 = vpop.permute.xlu1 %1281  ;;  %v1182_v3 = vmul.f32 %v2785_v60, %v1170_v21  ;;  %v1150_v50 = vadd.f32 %v1146_v14, %v1106_v22  ;;  %v1151_v25 = vadd.f32 %v1147_v17, %v1107_v39  ;;  %v1152_v42 = vadd.f32 %v1148_v29, %v1108_v9  ;;  %v2791_v55 = vld [vmem:[#allocation18_spill] sm:$0xff] }
 0x28e   : > { %2781 = vst [vmem:[#allocation21_spill] sm:$0xff] %v2460_v62  ;;  %v2474_v41 = vpop.permute.xlu0 %1283  ;;  %v1183_v23 = vmul.f32 %v2786_v5, %v1169_v19  ;;  %v2788_v36 = vrot.slane %v2324_v12, 1  ;;  %v1208_v51 = vsel %vm590_vm3, %v2787_v52, %v2380_v13  ;;  %v1251_v38 = vsel %vm631_vm4, %v2790_v43, %v2789_v53  ;;  %v2795_v13 = vld [vmem:[#allocation19_spill] sm:$0xff] }
 0x28f   : > { %v1250_v39 = vsel %vm631_vm4, %v2789_v53, %v2791_v55  ;;  %v2792_v29 = vrot.slane %v2416_v49, 1  ;;  %v2793_v12 = vrot.slane %v2420_v32, 1  ;;  %v2794_v21 = vrot.slane %v2426_v48, 1 }
 0x290   : > { %v1184_v47 = vmul.f32 %v2788_v36, %v1172_v7  ;;  %v1249_v17 = vsel %vm631_vm4, %v2791_v55, %v2795_v13  ;;  %v1185_v19 = vadd.f32 %v1181_v46, %v1149_v26  ;;  %v1186_v0 = vadd.f32 %v1182_v3, %v1150_v50  ;;  %v2801_v26 = vld [vmem:[#allocation9_spill] sm:$0xff] }
 0x291   : > { %v2498_v62 = vpop.permute.xlu1 %1305  ;;  %v1225_v34 = vmul.f32 %v2792_v29, %v1207_v10  ;;  %v1226_v6 = vmul.f32 %v2793_v12, %v1206_v15  ;;  %v1227_v14 = vmul.f32 %v2794_v21, %v1205_v27  ;;  %v1187_v22 = vadd.f32 %v1183_v23, %v1151_v25  ;;  %v2799_v15 = vld [vmem:[#allocation20_spill] sm:$0xff] }
 0x292   : > { %v2506_v33 = vpop.permute.xlu0 %1307  ;;  %v1252_v49 = vsel %vm631_vm4, %v2795_v13, %v2790_v43  ;;  %v2796_v32 = vrot.slane %v2430_v45, 1  ;;  %v2797_v48 = vrot.slane %v2133_v24, 1  ;;  %v2798_v5 = vrot.slane %v2093_v30, 1  ;;  %v2802_v45 = vld [vmem:[#allocation11_spill] sm:$0xff]  ;;  %v2804_v43 = vld [vmem:[#allocation5_spill] sm:$0xff] }
 0x293   : > { %v1287_v46 = vsel %vm664_vm5, %v2799_v15, %v2442_v2  ;;  %v1188_v23 = vadd.f32 %v1184_v47, %v1152_v42  ;;  %v2800_v52 = vrot.slane %v2128_v31, 1  ;;  %v1439_v50 = vrot.slane %v2801_v26, 1 }
 0x294   : > { %v1228_v60 = vmul.f32 %v2796_v32, %v1208_v51  ;;  %v1261_v7 = vmul.f32 %v2797_v48, %v1251_v38  ;;  %v1262_v10 = vmul.f32 %v2798_v5, %v1250_v39  ;;  %v1440_v25 = vrot.slane %v2802_v45, 1 }
 0x295   : > { %v2533_v44 = vpop.permute.xlu1 %1309  ;;  %v1263_v27 = vmul.f32 %v2800_v52, %v1249_v17  ;;  %v1229_v36 = vadd.f32 %v1225_v34, %v1185_v19  ;;  %v1230_v24 = vadd.f32 %v1226_v6, %v1186_v0  ;;  %v1231_v51 = vadd.f32 %v1227_v14, %v1187_v22  ;;  %v2806_v39 = vld [vmem:[#allocation21_spill] sm:$0xff]  ;;  %v2807_v17 = vld [vmem:[#allocation3_spill] sm:$0xff]  ;;  %v2809_v22 = vld [vmem:[#allocation4_spill] sm:$0xff] }
 0x296   : > { %v1312_v35 = vpop.permute.xlu0 %1311  ;;  %v2803_v30 = vrot.slane %v2137_v16, 1  ;;  %v2805_v38 = vrot.slane %v2804_v43, 1  ;;  %v1286_v42 = vsel %vm664_vm5, %v2442_v2, %v2806_v39  ;;  %v1285_v31 = vsel %vm664_vm5, %v2806_v39, %v2474_v41 }
 0x297   : > { %v1288_v47 = vsel %vm664_vm5, %v2474_v41, %v2799_v15  ;;  %v1232_v29 = vadd.f32 %v1228_v60, %v1188_v23  ;;  %v1265_v34 = vadd.f32 %v1261_v7, %v1229_v36  ;;  %v1266_v12 = vadd.f32 %v1262_v10, %v1230_v24  ;;  %v2811_v60 = vld [vmem:[#allocation6_spill] sm:$0xff] }
 0x298   : > { %v1264_v53 = vmul.f32 %v2803_v30, %v1252_v49  ;;  %v1289_v55 = vmul.f32 %v1287_v46, %v2805_v38  ;;  %v1315_v6 = vsel %vm693_vm6, %v2498_v62, %v2506_v33  ;;  %v1267_v21 = vadd.f32 %v1263_v27, %v1231_v51  ;;  %v2814_v46 = vld [vmem:[#allocation12_spill] sm:$0xff]  ;;  %v2816_v27 = vld [vmem:[#allocation13_spill] sm:$0xff]  ;;  %v2818_v51 = vld [vmem:[#allocation14_spill] sm:$0xff] }
 0x299   : > { %v2565_v40 = vpop.permute.xlu1 %1337  ;;  %v1314_v14 = vsel %vm693_vm6, %v2506_v33, %v2533_v44  ;;  %v1313_v41 = vsel %vm693_vm6, %v2533_v44, %v1312_v35  ;;  %v1316_v13 = vsel %vm693_vm6, %v1312_v35, %v2498_v62  ;;  %v2808_v19 = vrot.slane %v2807_v17, 1 }
 0x29a   : > { %v1340_v4 = vpop.permute.xlu0 %1339  ;;  %v2810_v49 = vrot.slane %v2809_v22, 1  ;;  %v2812_v48 = vrot.slane %v2811_v60, 1  ;;  %v1268_v5 = vadd.f32 %v1264_v53, %v1232_v29  ;;  %v1293_v10 = vadd.f32 %v1289_v55, %v1265_v34 }
 0x29b   : > { %v1290_v0 = vmul.f32 %v1286_v42, %v2808_v19  ;;  %v1347_v33 = vsel %vm726_vm7, %v2565_v40, %v1340_v4  ;;  %v2813_v44 = vrot.slane %v2033_v54, 1  ;;  %v2815_v23 = vrot.slane %v2814_v46, 1 }
 0x29c   : > { %v1291_v32 = vmul.f32 %v1285_v31, %v2810_v49  ;;  %v1292_v7 = vmul.f32 %v1288_v47, %v2812_v48  ;;  %v2817_v36 = vrot.slane %v2816_v27, 1  ;;  %v2819_v30 = vrot.slane %v2818_v51, 1 }
 0x29d   : > { %v1342_v9 = vpop.permute.xlu1 %1341  ;;  %v1329_v15 = vmul.f32 %v2813_v44, %v1315_v6  ;;  %v1330_v52 = vmul.f32 %v2815_v23, %v1314_v14  ;;  %v1365_v54 = vmul.f32 %v1357_v56, %v1347_v33  ;;  %v1294_v42 = vadd.f32 %v1290_v0, %v1266_v12 }
 0x29e   : > { %v1344_v3 = vpop.permute.xlu0 %1343  ;;  %v1346_v62 = vsel %vm726_vm7, %v1340_v4, %v1342_v9  ;;  %v1331_v24 = vmul.f32 %v2817_v36, %v1313_v41  ;;  %v1332_v43 = vmul.f32 %v2819_v30, %v1316_v13  ;;  %v1295_v31 = vadd.f32 %v1291_v32, %v1267_v21 }
 0x29f   : > { %v1345_v4 = vsel %vm726_vm7, %v1342_v9, %v1344_v3  ;;  %v1348_v55 = vsel %vm726_vm7, %v1344_v3, %v2565_v40  ;;  %v1296_v47 = vadd.f32 %v1292_v7, %v1268_v5  ;;  %v2820_v29 = vrot.slane %v2456_v11, 1 }
 0x2a0   : > { %v1333_v6 = vadd.f32 %v1329_v15, %v1293_v10  ;;  %v1334_v3 = vadd.f32 %v1330_v52, %v1294_v42  ;;  %v2823_v21 = vrot.slane %v2468_v18, 1  ;;  %v2824_v11 = vrot.slane %v1907_v58, 1 }
 0x2a1   : > { %v1386_v16 = vpop.permute.xlu1 %1385  ;;  %v1366_v34 = vmul.f32 %v2820_v29, %v1346_v62  ;;  %v1335_v63 = vadd.f32 %v1331_v24, %v1295_v31  ;;  %v1336_v19 = vadd.f32 %v1332_v43, %v1296_v47  ;;  %v2827_v18 = vrot.slane %v2782_v37, 1 }
 0x2a2   : > { %v1388_v2 = vpop.permute.xlu0 %1387  ;;  %v1368_v41 = vmul.f32 %v2823_v21, %v1348_v55  ;;  %v1369_v0 = vadd.f32 %v1365_v54, %v1333_v6  ;;  %vm1453_vm1 = vcmask 1040384  }
 0x2a3   : > { %v1395_v53 = vsel %vm771_vm8, %v1386_v16, %v1388_v2  ;;  %v1370_v49 = vadd.f32 %v1366_v34, %v1334_v3 }
 0x2a4   : > { %v1405_v56 = vmul.f32 %v2821_v28, %v1395_v53  ;;  %v1372_v5 = vadd.f32 %v1368_v41, %v1336_v19 }
 0x2a5   : > { %v1390_v35 = vpop.permute.xlu1 %1389 }
 0x2a6   : > { %v1392_v38 = vpop.permute.xlu0 %1391  ;;  %v1394_v39 = vsel %vm771_vm8, %v1388_v2, %v1390_v35  ;;  %v2822_v2 = vrot.slane %v2464_v59, 1  ;;  %v2826_v59 = vrot.slane %v1932_v1, 1  ;;  %v1409_v7 = vadd.f32 %v1405_v56, %v1369_v0 }
 0x2a7   : > { %v1393_v9 = vsel %vm771_vm8, %v1390_v35, %v1392_v38  ;;  %v1396_v14 = vsel %vm771_vm8, %v1392_v38, %v1386_v16  ;;  %v1406_v13 = vmul.f32 %v2824_v11, %v1394_v39  ;;  %v2825_v16 = vrot.slane %v1915_v61, 1  ;;  %v2828_v11 = vld [vmem:[#allocation7_spill] sm:$0xff] }
 0x2a8   : > { %v1367_v12 = vmul.f32 %v2822_v2, %v1345_v4  ;;  %v1408_v60 = vmul.f32 %v2826_v59, %v1396_v14  ;;  %v1662_v2 = vmov 1966171168  }
 0x2a9   : > { %v1422_v40 = vpop.permute.xlu1 %1421  ;;  %v1407_v32 = vmul.f32 %v2825_v16, %v1393_v9  ;;  %v1410_v10 = vadd.f32 %v1406_v13, %v1370_v49 }
 0x2aa   : > { %v1424_v17 = vpop.permute.xlu0 %1423  ;;  %v1371_v33 = vadd.f32 %v1367_v12, %v1335_v63  ;;  %v1412_v46 = vadd.f32 %v1408_v60, %v1372_v5  ;;  %v1496_v12 = vunpack.c.l.s4 %v1662_v2  ;;  %v2829_v60 = vlaneseq }
 0x2ab   : > { %v1431_v22 = vsel %vm792_vm9, %v1422_v40, %v1424_v17 }
 0x2ac   : > { %v1445_v48 = vmul.f32 %v2827_v18, %v1431_v22  ;;  %v1411_v35 = vadd.f32 %v1407_v32, %v1371_v33  ;;  %v1497_v21 = vunpack.c.0.s8 %v1496_v12  ;;  %vm1520_vm2 = vcmp.lt.s32.totalorder %v2829_v60, 512 }
 0x2ad   : > { %v1426_v58 = vpop.permute.xlu1 %1425 }
 0x2ae   : > { %v1430_v44 = vsel %vm792_vm9, %v1424_v17, %v1426_v58  ;;  %v1428_v15 = vpop.permute.xlu0 %1427  ;;  %v1449_v62 = vadd.f32 %v1445_v48, %v1409_v7  ;;  %v1500_v13 = vsub.s32 %v1497_v21, %v2828_v11 }
 0x2af   : > { %v1446_v61 = vmul.f32 %v1438_v20, %v1430_v44  ;;  %v1429_v1 = vsel %vm792_vm9, %v1426_v58, %v1428_v15  ;;  %v1432_v37 = vsel %vm792_vm9, %v1428_v15, %v1422_v40 }
 0x2b0   : > { %v1447_v23 = vmul.f32 %v1439_v50, %v1429_v1  ;;  %v1448_v52 = vmul.f32 %v1440_v25, %v1432_v37  ;;  %v1454_v8 = vsel %vm1453_vm1, %v1449_v62, -inf }
 0x2b1   : > { %v1450_v27 = vadd.f32 %v1446_v61, %v1410_v10 }
 0x2b2   : > { %v1451_v36 = vadd.f32 %v1447_v23, %v1411_v35  ;;  %v1452_v24 = vadd.f32 %v1448_v52, %v1412_v46 }
 0x2b3   : > { %v1455_v20 = vsel %vm1453_vm1, %v1450_v27, -inf }
 0x2b4   : > { %v1456_v51 = vsel %vm1453_vm1, %v1451_v36, -inf  ;;  %v1457_v57 = vsel %vm1453_vm1, %v1452_v24, -inf  ;;  %v1458_v30 = vmax.f32 %v1454_v8, %v1455_v20 }
 0x2b5   : > { %v1459_v43 = vmax.f32 %v1456_v51, %v1457_v57 }
 0x2b7   : > { %v1460_v53 = vmax.f32 %v1458_v30, %v1459_v43 }
 0x2b9   : > { %1461 = vmax.xlane.f32.xlu1 %v1460_v53 }
 0x346   : > { %v1462_v26 = vpop.xlane.xlu1 %1461 }
 0x347   : > { %v1463_v50 = vsub.f32 %v1449_v62, %v1462_v26  ;;  %v1464_v38 = vsub.f32 %v1450_v27, %v1462_v26  ;;  %v1465_v45 = vsub.f32 %v1451_v36, %v1462_v26  ;;  %v1466_v25 = vsub.f32 %v1452_v24, %v1462_v26 }
 0x349   : > { %v1467_v54 = vmul.f32 1.442695, %v1463_v50  ;;  %v1469_v4 = vmul.f32 1.442695, %v1464_v38  ;;  %v1471_v55 = vmul.f32 1.442695, %v1465_v45 }
 0x34a   : > { %v1473_v39 = vmul.f32 1.442695, %v1466_v25 }
 0x34b   : > { %1625 = vpow2.f32 %v1467_v54 }
 0x34c   : > { %1627 = vpow2.f32 %v1469_v4 }
 0x34d   : > { %1629 = vpow2.f32 %v1471_v55 }
 0x34e   : > { %1631 = vpow2.f32 %v1473_v39 }
 0x355   : > { %v1626_v42 = vpop.eup %1625 }
 0x356   : > { %v1628_v31 = vpop.eup %1627  ;;  %v1475_v47 = vsel %vm1453_vm1, %v1626_v42, 0.0 }
 0x357   : > { %v1630_v29 = vpop.eup %1629  ;;  %v1476_v34 = vsel %vm1453_vm1, %v1628_v31, 0.0 }
 0x358   : > { %v1632_v6 = vpop.eup %1631  ;;  %v1477_v28 = vadd.f32 %v1476_v34, %v1475_v47  ;;  %v1478_v56 = vsel %vm1453_vm1, %v1630_v29, 0.0 }
 0x359   : > { %v1480_v14 = vsel %vm1453_vm1, %v1632_v6, 0.0 }
 0x35a   : > { %v1479_v9 = vadd.f32 %v1478_v56, %v1477_v28 }
 0x35c   : > { %v1481_v40 = vadd.f32 %v1480_v14, %v1479_v9 }
 0x35e   : > { %1482 = vadd.xlane.f32.xlu0 %v1481_v40 }
 0x3eb   : > { %v1483_v3 = vpop.xlane.xlu0 %1482 }
 0x3ec   : > { %1633 = vrcp.f32 %v1483_v3 }
 0x3f6   : > { %v1634_v41 = vpop.eup %1633 }
 0x3f7   : > { %v1485_v17 = vmul.f32 %v1634_v41, %v1626_v42  ;;  %v1486_v63 = vmul.f32 %v1634_v41, %v1628_v31  ;;  %v1487_v19 = vmul.f32 %v1634_v41, %v1630_v29  ;;  %v1488_v0 = vmul.f32 %v1634_v41, %v1632_v6 }
 0x3f9   : > { %v1493_v22 = vcombine.low %v1485_v17, %v1486_v63  ;;  %v1494_v49 = vcombine.low %v1487_v19, %v1488_v0 }
 0x3fb   : > { %v1501_v16 = vrot.slane %v1493_v22, %v1500_v13  ;;  %v1508_v32 = vrot.slane %v1494_v49, %v1500_v13 }
 0x3fd   : > { %v1509_v59 = vcombine.low %v1501_v16, %v1508_v32 }
 0x3ff   : > { %v1516_v18 = vrot.slane %v1509_v59, %v1500_v13 }
 0x401   : > { %1522 = vst.msk [vmem:[%s251_s19] sm:$0xf] %vm1520_vm2, %v1516_v18 }
 0x402 PF: > { %s18_s23 = sadd.s32 1, %s1641_s23  }
 0x403   : > { %p15_p4 = scmp.ge.s32.totalorder %s18_s23, 4  }
 0x405   :  { %17 = sbr.rel (!%p15_p4) target bundleno = 3 (0x3), region = 74 }

// kernel: attention_gate.9
= control target key start
LH: loop header
LB: loop body
LE: loop exit
PB: predicated region body
PF: predicated region fallthrough
CT: control target
= control target key end

     0   :  { %s1079_s9 = smov 0   ;;  %s1081_s10 = smov 0   ;;  %s1184_s0 = inlined_call_operand.vmem [shape: f32[2,8,8,8], index: 0, kind: input, shape index: {}]   ;;  %s1185_s1 = inlined_call_operand.vmem [shape: f32[8,8,8,8], index: 1, kind: input, shape index: {}]   ;;  %s1186_s2 = inlined_call_operand.vmem [shape: f32[8,8,8,8], index: 2, kind: output, shape index: {}]  }
   0x1   :  { %s1083_s11 = smov 0   ;;  %s1085_s12 = smov 0  }
   0x2   :  { %s1087_s13 = smov 0  }
   0x3 LB: > { %s21_s14 = sadd.s32 1, %s1052_s11  ;;  %s24_s15 = sadd.s32 1, %s1056_s12  ;;  %s1060_s13 = sphi %s1087_s13, %s12_s13   ;;  %s1056_s12 = sphi %s1085_s12, %s1190_s12   ;;  %s1052_s11 = sphi %s1083_s11, %s1189_s11   ;;  %s1048_s10 = sphi %s1081_s10, %s1188_s10   ;;  %s1044_s9 = sphi %s1079_s9, %s1187_s9  }
   0x4   : > { %p22_p0 = scmp.ge.s32.totalorder %s21_s14, 4  ;;  %p902_p1 = scmp.ge.s32.totalorder %s1060_s13, 1 }
   0x5   : > { %p146_p2 = scmp.lt.s32.totalorder %s1060_s13, 9 }
   0x6   : > { %s1192_s14 = smov (%p22_p0, %s21_s14), 0  ;;  %s1194_s15 = smov (!%p22_p0, %s24_s15), %s1056_s12 }
   0x7   : > { %p147_p3 = pnand %p902_p1, %p146_p2  ;;  %p26_p4 = scmp.ge.s32.totalorder %s1194_s15, 2 }
   0x8   : > { %s905_s16 = sshll.u32 (!%p147_p3), %s1048_s10, 2  ;;  %p177_p5 = scmp.lt.s32.totalorder (!%p147_p3), %s1048_s10, 1  ;;  %v1062_v0 = vmov (!%p147_p3), 0.0   ;;  %vm1063_vm0 = vmmov (!%p147_p3), 0   ;;  %vm216_vm1 = vcmask (!%p147_p3), 64512  }
   0x9   : > { %s1196_s15 = smov (%p26_p4, %s1194_s15), 0  ;;  %150 = sbr.rel (%p147_p3) target bundleno = 247 (0xf7), region = 28 }
   0xa   : > { %940 = vmatprep.subr.mxu0 (!%p147_p3), %v1062_v0  ;;  %945 = vmatprep.subr.mxu1 (!%p147_p3), %v1062_v0  ;;  %s183_s17 = sadd.s32 (!%p147_p3), %s1044_s9, %s905_s16 }
   0xb   : > { %p184_p6 = scmp.lt.s32.totalorder (!%p147_p3), %s183_s17, 7  ;;  %942 = vmatprep.mubr.msk.f32.mxu0 (!%p147_p3), %vm1063_vm0, %v1062_v0  ;;  %947 = vmatprep.mubr.msk.f32.mxu1 (!%p147_p3), %vm1063_vm0, %v1062_v0 }
  0x10   : > { %s1198_s10 = smov (!%p177_p5, %s1048_s10), 1  ;;  %s1200_s17 = smov (!%p184_p6, %s183_s17), 7 }
  0x11   : > { %s921_s18 = sshll.u32 %s1198_s10, 6  ;;  %s922_s19 = sshll.u32 %s1200_s17, 6 }
  0x12   : > { %s1117_s22 = scalar_lea.vmem %s1184_s0, %s921_s18  ;;  %s1124_s25 = scalar_lea.vmem %s1185_s1, %s922_s19 }
  0x13   : > { %v200_v1 = vld [vmem:[%s1117_s22] sm:$0xff]  ;;  %v201_v2 = vld [vmem:[%s1117_s22 + $0x8] sm:$0xff]  ;;  %v210_v5 = vld [vmem:[%s1124_s25 + $0x10] sm:$0xff]  ;;  %s197_s28 = scalar_lea.vmem %s1186_s2, %s922_s19 }
  0x14   : > { %v208_v3 = vld [vmem:[%s1124_s25] sm:$0xff]  ;;  %v209_v4 = vld [vmem:[%s1124_s25 + $0x8] sm:$0xff]  ;;  %v211_v6 = vld [vmem:[%s1124_s25 + $0x18] sm:$0xff] }
  0x15   : > { %941 = vmatpush3.msra.mxu0 %v208_v3  ;;  %946 = vmatpush3.msra.mxu1 %v209_v4  ;;  %v202_v7 = vld [vmem:[%s1117_s22 + $0x10] sm:$0xff]  ;;  %v203_v8 = vld [vmem:[%s1117_s22 + $0x18] sm:$0xff]  ;;  %v212_v9 = vld [vmem:[%s1124_s25 + $0x20] sm:$0xff] }
  0x16   : > { %943 = vmatmul.mubr.msk.f32.vlgmr.msra.gmra.mrb[0].mxu0 %vm216_vm1, %v200_v1  ;;  %948 = vmatmul.mubr.msk.f32.vlgmr.msra.gmra.mrb[0].mxu1 %vm216_vm1, %v201_v2  ;;  %v213_v10 = vld [vmem:[%s1124_s25 + $0x28] sm:$0xff]  ;;  %v204_v11 = vld [vmem:[%s1117_s22 + $0x20] sm:$0xff]  ;;  %v214_v13 = vld [vmem:[%s1124_s25 + $0x30] sm:$0xff] }
  0x17   : > { %950 = vmatprep.subr.mxu0 %v1062_v0  ;;  %955 = vmatprep.subr.mxu1 %v1062_v0  ;;  %v205_v12 = vld [vmem:[%s1117_s22 + $0x28] sm:$0xff]  ;;  %v215_v14 = vld [vmem:[%s1124_s25 + $0x38] sm:$0xff]  ;;  %v206_v15 = vld [vmem:[%s1117_s22 + $0x30] sm:$0xff] }
  0x18   : > { %951 = vmatpush3.msra.mxu0 %v210_v5  ;;  %956 = vmatpush3.msra.mxu1 %v211_v6  ;;  %v207_v16 = vld [vmem:[%s1117_s22 + $0x38] sm:$0xff] }
  0x19   : > { %952 = vmatprep.mubr.msk.f32.mxu0 %vm1063_vm0, %v1062_v0  ;;  %957 = vmatprep.mubr.msk.f32.mxu1 %vm1063_vm0, %v1062_v0 }
  0x1a   : > { %953 = vmatmul.mubr.msk.f32.vlgmr.msra.gmra.mrb[2].mxu0 %vm216_vm1, %v202_v7  ;;  %958 = vmatmul.mubr.msk.f32.vlgmr.msra.gmra.mrb[2].mxu1 %vm216_vm1, %v203_v8 }
  0x1b   : > { %960 = vmatprep.subr.mxu0 %v1062_v0  ;;  %965 = vmatprep.subr.mxu1 %v1062_v0 }
  0x1c   : > { %961 = vmatpush3.msra.mxu0 %v212_v9  ;;  %966 = vmatpush3.msra.mxu1 %v213_v10 }
  0x1d   : > { %962 = vmatprep.mubr.msk.f32.mxu0 %vm1063_vm0, %v1062_v0  ;;  %967 = vmatprep.mubr.msk.f32.mxu1 %vm1063_vm0, %v1062_v0 }
  0x1e   : > { %963 = vmatmul.mubr.msk.f32.vlgmr.msra.gmra.mrb[4].mxu0 %vm216_vm1, %v204_v11  ;;  %968 = vmatmul.mubr.msk.f32.vlgmr.msra.gmra.mrb[4].mxu1 %vm216_vm1, %v205_v12 }
  0x1f   : > { %970 = vmatprep.subr.mxu0 %v1062_v0  ;;  %975 = vmatprep.subr.mxu1 %v1062_v0 }
  0x20   : > { %971 = vmatpush3.msra.mxu0 %v214_v13  ;;  %976 = vmatpush3.msra.mxu1 %v215_v14 }
  0x21   : > { %972 = vmatprep.mubr.msk.f32.mxu0 %vm1063_vm0, %v1062_v0  ;;  %977 = vmatprep.mubr.msk.f32.mxu1 %vm1063_vm0, %v1062_v0 }
  0x22   : > { %973 = vmatmul.mubr.msk.f32.vlgmr.msra.gmra.mrb[6].mxu0 %vm216_vm1, %v206_v15  ;;  %978 = vmatmul.mubr.msk.f32.vlgmr.msra.gmra.mrb[6].mxu1 %vm216_vm1, %v207_v16 }
  0xe9   : > { %v286_v17 = vpop.f32.mrb[0].mxu0  ;;  %v359_v18 = vpop.f32.mrb[0].mxu1 }
  0xea   : > { %801 = vst.msk [vmem:[%s197_s28] sm:$0xff] %vm216_vm1, %v286_v17  ;;  %802 = vst.msk [vmem:[%s197_s28 + $0x8] sm:$0xff] %vm216_vm1, %v359_v18  ;;  %v944_v19 = vpop.f32.mrb[1].mxu0  ;;  %v949_v20 = vpop.f32.mrb[1].mxu1 }
  0xed   : > { %v432_v21 = vpop.f32.mrb[2].mxu0  ;;  %v505_v22 = vpop.f32.mrb[2].mxu1 }
  0xee   : > { %803 = vst.msk [vmem:[%s197_s28 + $0x10] sm:$0xff] %vm216_vm1, %v432_v21  ;;  %804 = vst.msk [vmem:[%s197_s28 + $0x18] sm:$0xff] %vm216_vm1, %v505_v22  ;;  %v954_v23 = vpop.f32.mrb[3].mxu0  ;;  %v959_v24 = vpop.f32.mrb[3].mxu1 }
  0xf1   : > { %v578_v25 = vpop.f32.mrb[4].mxu0  ;;  %v651_v26 = vpop.f32.mrb[4].mxu1 }
  0xf2   : > { %805 = vst.msk [vmem:[%s197_s28 + $0x20] sm:$0xff] %vm216_vm1, %v578_v25  ;;  %806 = vst.msk [vmem:[%s197_s28 + $0x28] sm:$0xff] %vm216_vm1, %v651_v26  ;;  %v964_v27 = vpop.f32.mrb[5].mxu0  ;;  %v969_v28 = vpop.f32.mrb[5].mxu1 }
  0xf5   : > { %v724_v29 = vpop.f32.mrb[6].mxu0  ;;  %v797_v30 = vpop.f32.mrb[6].mxu1 }
  0xf6   : > { %807 = vst.msk [vmem:[%s197_s28 + $0x30] sm:$0xff] %vm216_vm1, %v724_v29  ;;  %808 = vst.msk [vmem:[%s197_s28 + $0x38] sm:$0xff] %vm216_vm1, %v797_v30  ;;  %v974_v31 = vpop.f32.mrb[7].mxu0  ;;  %v979_v32 = vpop.f32.mrb[7].mxu1 }
  0xf7 PF: > { %s12_s13 = sadd.s32 1, %s1060_s13   ;;  %s1187_s9 = smov %s1052_s11 }
  0xf8   : > { %p9_p7 = scmp.ge.s32.totalorder %s12_s13, 10   ;;  %s1188_s10 = smov %s1056_s12 }
  0xf9   : > { %s1189_s11 = smov %s1192_s14  ;;  %s1190_s12 = smov %s1196_s15 }
  0xfa   :  { %11 = sbr.rel (!%p9_p7) target bundleno = 3 (0x3), region = 61 }

// kernel: attention_gate.11
= control target key start
LH: loop header
LB: loop body
LE: loop exit
PB: predicated region body
PF: predicated region fallthrough
CT: control target
= control target key end

     0   :  { %s316_s12 = smov 0   ;;  %s339_s0 = inlined_call_operand.vmem [shape: f32[2,4,512], index: 0, kind: input, shape index: {}]   ;;  %s340_s1 = inlined_call_operand.vmem [shape: f32[4,1], index: 1, kind: input, shape index: {}]   ;;  %s341_s2 = inlined_call_operand.vmem [shape: f32[4,1], index: 2, kind: input, shape index: {}]   ;;  %s342_s3 = inlined_call_operand.vmem [shape: f32[2,4,512], index: 3, kind: output, shape index: {}]  }
   0x1 LB: > { %s262_s13 = sadd.s32 4294967295, %s292_s12   ;;  %p266_p0 = scmp.ge.s32.totalorder %s292_s12, 1  ;;  %s292_s12 = sphi %s316_s12, %s13_s12  }
   0x2   : > { %p137_p1 = scmp.lt.s32.totalorder %s292_s12, 3 }
   0x4   : > { %p138_p2 = pnand %p266_p0, %p137_p1 }
   0x5   : > { %v173_v0 = vld [vmem:[%s340_s1] sm:$0xf] (!%p138_p2)  ;;  %v294_v1 = vmov (!%p138_p2), 0   ;;  %p161_p3 = scmp.lt.s32.totalorder (!%p138_p2), %s262_s13, 1  ;;  %v295_v3 = vmov (!%p138_p2), 839922192   ;;  %v181_v5 = vlaneseq (!%p138_p2) }
   0x6   : > { %141 = sbr.rel (%p138_p2) target bundleno = 146 (0x92), region = 32  ;;  %285 = vset.pattern.permute.xlu0 (!%p138_p2), %v294_v1  ;;  %v188_v2 = vld [vmem:[%s341_s2] sm:$0xf] (!%p138_p2)  ;;  %v179_v4 = vunpack.c.l.s4 (!%p138_p2), %v295_v3 }
   0x7   : > { %176 = vperm.xlu0 (!%p138_p2), %285, %v173_v0   ;;  %v182_v7 = vshrl.u32 (!%p138_p2), %v181_v5, 7 }
   0x8   : > { %v180_v6 = vunpack.c.0.s8 (!%p138_p2), %v179_v4 }
   0xa   : > { %v183_v8 = vsub.s32 (!%p138_p2), %v180_v6, %v182_v7 }
   0xb   : > { %191 = vperm.xlu0 (!%p138_p2), %285, %v188_v2  }
   0xd   : > { %s344_s13 = smov (!%p161_p3, %s262_s13), 1 }
   0xe   : > { %s273_s18 = sshll.u32 %s344_s13, 4 }
   0xf   : > { %s165_s21 = scalar_lea.vmem %s339_s0, %s273_s18  ;;  %s170_s24 = scalar_lea.vmem %s342_s3, %s273_s18 }
  0x10   : > { %v171_v11 = vld [vmem:[%s165_s21] sm:$0xff]  ;;  %v172_v12 = vld [vmem:[%s165_s21 + $0x8] sm:$0xff] }
  0x86   : > { %v177_v9 = vpop.permute.xlu0 %176 }
  0x87   : > { %v184_v10 = vrot.slane %v177_v9, %v183_v8 }
  0x89   : > { %v186_v14 = vmul.f32 %v184_v10, %v171_v11  ;;  %v187_v15 = vmul.f32 %v184_v10, %v172_v12 }
  0x8a   : > { %v192_v13 = vpop.permute.xlu0 %191 }
  0x8b   : > { %v199_v16 = vrot.slane %v192_v13, %v183_v8 }
  0x8d   : > { %v201_v17 = vadd.f32 %v199_v16, %v186_v14  ;;  %v202_v18 = vadd.f32 %v199_v16, %v187_v15 }
  0x8f   : > { %v203_v19 = vmax.f32 %v201_v17, 0.0  ;;  %v204_v20 = vmax.f32 %v202_v18, 0.0 }
  0x91   : > { %205 = vst [vmem:[%s170_s24] sm:$0xff] %v203_v19  ;;  %206 = vst [vmem:[%s170_s24 + $0x8] sm:$0xff] %v204_v20 }
  0x92 PF: > { %s13_s12 = sadd.s32 1, %s292_s12  }
  0x93   : > { %p10_p4 = scmp.ge.s32.totalorder %s13_s12, 4  }
  0x95   :  { %12 = sbr.rel (!%p10_p4) target bundleno = 1 (0x1), region = 62 }

// kernel: attention_gate.10
= control target key start
LH: loop header
LB: loop body
LE: loop exit
PB: predicated region body
PF: predicated region fallthrough
CT: control target
= control target key end

     0   :  { %s5723_s21 = smov 0   ;;  %s7328_s0 = inlined_call_operand.vmem [shape: f32[2,4,512], index: 0, kind: input, shape index: {}]   ;;  %s7329_s1 = inlined_call_operand.vmem [shape: f32[27,4,4], index: 1, kind: input, shape index: {}]   ;;  %s7330_s2 = inlined_call_operand.vmem [shape: f32[4,1], index: 2, kind: input, shape index: {}]   ;;  %s7331_s3 = inlined_call_operand.vmem [shape: f32[6,512], index: 3, kind: input, shape index: {}]   ;;  %s7332_s4 = inlined_call_operand.vmem [shape: f32[2,4,512], index: 4, kind: output, shape index: {0}]   ;;  %s7333_s5 = inlined_call_operand.vmem [shape: f32[2,4,1], index: 5, kind: output, shape index: {1}]   ;;  %s7334_s6 = inlined_call_operand.vmem [shape: f32[2,4,1], index: 6, kind: output, shape index: {2}]  }
   0x1 LB: > { %s5453_s22 = sadd.s32 4294967295, %s5667_s21   ;;  %p5457_p0 = scmp.ge.s32.totalorder %s5667_s21, 1  ;;  %s5667_s21 = sphi %s5723_s21, %s17_s21  }
   0x2   : > { %p217_p1 = scmp.lt.s32.totalorder %s5667_s21, 3 }
   0x4   : > { %p218_p2 = pnand %p5457_p0, %p217_p1 }
   0x6   : > { %221 = sbr.rel (%p218_p2) target bundleno = 868 (0x364), region = 36 }
   0xd   : > { %p255_p3 = scmp.lt.s32.totalorder %s5453_s22, 1  ;;  %v5669_v0 = vmov 0.0   ;;  %v5670_v1 = vmov 0   ;;  %vm314_vm0 = vcmask 1043456   ;;  %v279_v6 = vld [vmem:[%s7329_s1] sm:$0xf] }
   0xe   : > { %387 = vmatprep.mubr.f32.mxu0 %v5669_v0  ;;  %458 = vmatprep.mubr.f32.mxu1 %v5669_v0  ;;  %vm310_vm1 = vcmask 31744   ;;  %v280_v7 = vld [vmem:[%s7329_s1 + $0x4] sm:$0xf]  ;;  %v281_v8 = vld [vmem:[%s7329_s1 + $0x8] sm:$0xf]  ;;  %s5671_s17 = smov 73  }
   0xf   : > { %s7490_s22 = smov (!%p255_p3, %s5453_s22), 1  ;;  %5657 = vset.pattern.permute.xlu1 %v5670_v1  ;;  %5658 = vset.pattern.permute.xlu0 %v5670_v1  ;;  %v282_v9 = vld [vmem:[%s7329_s1 + $0xc] sm:$0xf]  ;;  %v283_v10 = vld [vmem:[%s7329_s1 + $0x10] sm:$0xf]  ;;  %s5672_s18 = smov 72  }
  0x10   : > { %s5628_s23 = sshll.u32 %s7490_s22, 4  ;;  %v284_v11 = vld [vmem:[%s7329_s1 + $0x14] sm:$0xf]  ;;  %v285_v12 = vld [vmem:[%s7329_s1 + $0x18] sm:$0xf]  ;;  %s5673_s19 = smov 71  }
  0x11   : > { %s259_s26 = scalar_lea.vmem %s7328_s0, %s5628_s23  ;;  %v286_v13 = vld [vmem:[%s7329_s1 + $0x1c] sm:$0xf]  ;;  %v287_v14 = vld [vmem:[%s7329_s1 + $0x20] sm:$0xf]  ;;  %v288_v15 = vld [vmem:[%s7329_s1 + $0x24] sm:$0xf] }
  0x12   : > { %v5741_v2 = vld [vmem:[%s259_s26] sm:$0xff]  ;;  %v5743_v3 = vld [vmem:[%s259_s26 + $0x8] sm:$0xff]  ;;  %v291_v18 = vld [vmem:[%s7329_s1 + $0x30] sm:$0xf]  ;;  %s5674_s20 = smov 65   ;;  %s5675_s24 = smov 64  }
  0x13   : > { %v5747_v4 = vcombine.high %v5741_v2, %v5741_v2  ;;  %v5751_v5 = vcombine.high %v5743_v3, %v5743_v3  ;;  %v289_v16 = vld [vmem:[%s7329_s1 + $0x28] sm:$0xf]  ;;  %v290_v17 = vld [vmem:[%s7329_s1 + $0x2c] sm:$0xf]  ;;  %v292_v19 = vld [vmem:[%s7329_s1 + $0x34] sm:$0xf] }
  0x14   : > { %v293_v20 = vld [vmem:[%s7329_s1 + $0x38] sm:$0xf]  ;;  %v294_v21 = vld [vmem:[%s7329_s1 + $0x3c] sm:$0xf]  ;;  %v295_v22 = vld [vmem:[%s7329_s1 + $0x40] sm:$0xf] }
  0x15   : > { %5464 = vmatprep.subr.msk.mxu0 %vm314_vm0, %v5747_v4  ;;  %5467 = vmatprep.subr.msk.mxu1 %vm314_vm0, %v5751_v5  ;;  %v296_v23 = vld [vmem:[%s7329_s1 + $0x44] sm:$0xf]  ;;  %v297_v24 = vld [vmem:[%s7329_s1 + $0x48] sm:$0xf]  ;;  %v298_v25 = vld [vmem:[%s7329_s1 + $0x4c] sm:$0xf] }
  0x16   : > { %5465 = vmatpush1.msk.msra.mxu0 %vm314_vm0, %v5741_v2  ;;  %5468 = vmatpush1.msk.msra.mxu1 %vm314_vm0, %v5743_v3  ;;  %v299_v26 = vld [vmem:[%s7329_s1 + $0x50] sm:$0xf]  ;;  %v300_v27 = vld [vmem:[%s7329_s1 + $0x54] sm:$0xf]  ;;  %v301_v28 = vld [vmem:[%s7329_s1 + $0x58] sm:$0xf] }
  0x17   : > { %5466 = vmatmul.mubr.msk.f32.vlgmr.msra.gmra.mrb[0].mxu0 %vm310_vm1, %v279_v6  ;;  %5469 = vmatmul.mubr.msk.f32.vlgmr.msra.gmra.mrb[0].mxu1 %vm310_vm1, %v279_v6  ;;  %v302_v29 = vld [vmem:[%s7329_s1 + $0x5c] sm:$0xf]  ;;  %v303_v30 = vld [vmem:[%s7329_s1 + $0x60] sm:$0xf]  ;;  %v304_v31 = vld [vmem:[%s7329_s1 + $0x64] sm:$0xf] }
  0x18   : > { %5470 = vmatprep.subr.msk.mxu0 %vm314_vm0, %v5747_v4  ;;  %599 = vmatprep.mubr.f32.mxu0 %v5669_v0  ;;  %v5286_v32 = vld [vmem:[%s7330_s2] sm:$0xf]  ;;  %v305_v33 = vld [vmem:[%s7329_s1 + $0x68] sm:$0xf]  ;;  %s5676_s25 = smov 63   ;;  %s5677_s26 = smov 57  }
  0x19   : > { %5471 = vmatpush1.msk.msra.mxu0 %vm314_vm0, %v5741_v2  ;;  %5473 = vmatprep.subr.msk.mxu1 %vm314_vm0, %v5751_v5  ;;  %s5678_s27 = smov 56   ;;  %s5679_s28 = smov 55  }
  0x1a   : > { %5474 = vmatpush1.msk.msra.mxu1 %vm314_vm0, %v5743_v3  ;;  %670 = vmatprep.mubr.f32.mxu1 %v5669_v0  ;;  %s5680_s29 = smov 9   ;;  %s5681_s30 = smov 8  }
  0x1b   : > { %5472 = vmatmul.mubr.msk.f32.vlgmr.msra.gmra.mrb[2].mxu0 %vm310_vm1, %v280_v7  ;;  %5475 = vmatmul.mubr.msk.f32.vlgmr.msra.gmra.mrb[2].mxu1 %vm310_vm1, %v280_v7  ;;  %s5682_s7 = smov 7   ;;  %s5683_s8 = smov 1  }
  0x1c   : > { %5476 = vmatprep.subr.msk.mxu0 %vm314_vm0, %v5747_v4  ;;  %781 = vmatprep.mubr.f32.mxu0 %v5669_v0  ;;  %s5684_s9 = smov 127   ;;  %s5685_s10 = smov 121  }
  0x1d   : > { %5477 = vmatpush1.msk.msra.mxu0 %vm314_vm0, %v5741_v2  ;;  %5479 = vmatprep.subr.msk.mxu1 %vm314_vm0, %v5751_v5 }
  0x1e   : > { %5480 = vmatpush1.msk.msra.mxu1 %vm314_vm0, %v5743_v3  ;;  %852 = vmatprep.mubr.f32.mxu1 %v5669_v0 }
  0x1f   : > { %5478 = vmatmul.mubr.msk.f32.vlgmr.msra.gmra.mrb[4].mxu0 %vm310_vm1, %v281_v8  ;;  %5481 = vmatmul.mubr.msk.f32.vlgmr.msra.gmra.mrb[4].mxu1 %vm310_vm1, %v281_v8 }
  0x20   : > { %5482 = vmatprep.subr.msk.mxu0 %vm314_vm0, %v5747_v4  ;;  %975 = vmatprep.mubr.f32.mxu0 %v5669_v0 }
  0x21   : > { %5483 = vmatpush1.msk.msra.mxu0 %vm314_vm0, %v5741_v2  ;;  %5485 = vmatprep.subr.msk.mxu1 %vm314_vm0, %v5751_v5 }
  0x22   : > { %5486 = vmatpush1.msk.msra.mxu1 %vm314_vm0, %v5743_v3  ;;  %1046 = vmatprep.mubr.f32.mxu1 %v5669_v0 }
  0x23   : > { %5484 = vmatmul.mubr.msk.f32.vlgmr.msra.gmra.mrb[6].mxu0 %vm310_vm1, %v282_v9  ;;  %5487 = vmatmul.mubr.msk.f32.vlgmr.msra.gmra.mrb[6].mxu1 %vm310_vm1, %v282_v9 }
  0x24   : > { %5488 = vmatprep.subr.msk.mxu0 %vm314_vm0, %v5747_v4  ;;  %1161 = vmatprep.mubr.f32.mxu0 %v5669_v0 }
  0x25   : > { %5489 = vmatpush1.msk.msra.mxu0 %vm314_vm0, %v5741_v2  ;;  %5491 = vmatprep.subr.msk.mxu1 %vm314_vm0, %v5751_v5 }
  0x26   : > { %5492 = vmatpush1.msk.msra.mxu1 %vm314_vm0, %v5743_v3  ;;  %1232 = vmatprep.mubr.f32.mxu1 %v5669_v0 }
  0x27   : > { %5490 = vmatmul.mubr.msk.f32.vlgmr.msra.gmra.mrb[8].mxu0 %vm310_vm1, %v283_v10  ;;  %5493 = vmatmul.mubr.msk.f32.vlgmr.msra.gmra.mrb[8].mxu1 %vm310_vm1, %v283_v10 }
  0x28   : > { %5494 = vmatprep.subr.msk.mxu0 %vm314_vm0, %v5747_v4  ;;  %1343 = vmatprep.mubr.f32.mxu0 %v5669_v0 }
  0x29   : > { %5495 = vmatpush1.msk.msra.mxu0 %vm314_vm0, %v5741_v2  ;;  %5497 = vmatprep.subr.msk.mxu1 %vm314_vm0, %v5751_v5 }
  0x2a   : > { %5498 = vmatpush1.msk.msra.mxu1 %vm314_vm0, %v5743_v3  ;;  %1414 = vmatprep.mubr.f32.mxu1 %v5669_v0 }
  0x2b   : > { %5496 = vmatmul.mubr.msk.f32.vlgmr.msra.gmra.mrb[10].mxu0 %vm310_vm1, %v284_v11  ;;  %5499 = vmatmul.mubr.msk.f32.vlgmr.msra.gmra.mrb[10].mxu1 %vm310_vm1, %v284_v11 }
  0x2c   : > { %5500 = vmatprep.subr.msk.mxu0 %vm314_vm0, %v5747_v4  ;;  %1529 = vmatprep.mubr.f32.mxu0 %v5669_v0 }
  0x2d   : > { %5501 = vmatpush1.msk.msra.mxu0 %vm314_vm0, %v5741_v2  ;;  %5503 = vmatprep.subr.msk.mxu1 %vm314_vm0, %v5751_v5 }
  0x2e   : > { %5504 = vmatpush1.msk.msra.mxu1 %vm314_vm0, %v5743_v3  ;;  %1600 = vmatprep.mubr.f32.mxu1 %v5669_v0 }
  0x2f   : > { %5502 = vmatmul.mubr.msk.f32.vlgmr.msra.gmra.mrb[12].mxu0 %vm310_vm1, %v285_v12  ;;  %5505 = vmatmul.mubr.msk.f32.vlgmr.msra.gmra.mrb[12].mxu1 %vm310_vm1, %v285_v12 }
  0x30   : > { %5506 = vmatprep.subr.msk.mxu0 %vm314_vm0, %v5747_v4  ;;  %1727 = vmatprep.mubr.f32.mxu0 %v5669_v0 }
  0x31   : > { %5507 = vmatpush1.msk.msra.mxu0 %vm314_vm0, %v5741_v2  ;;  %5509 = vmatprep.subr.msk.mxu1 %vm314_vm0, %v5751_v5 }
  0x32   : > { %5510 = vmatpush1.msk.msra.mxu1 %vm314_vm0, %v5743_v3  ;;  %1798 = vmatprep.mubr.f32.mxu1 %v5669_v0 }
  0x33   : > { %5508 = vmatmul.mubr.msk.f32.vlgmr.msra.gmra.mrb[14].mxu0 %vm310_vm1, %v286_v13  ;;  %5511 = vmatmul.mubr.msk.f32.vlgmr.msra.gmra.mrb[14].mxu1 %vm310_vm1, %v286_v13 }
  0x34   : > { %5512 = vmatprep.subr.msk.mxu0 %vm314_vm0, %v5747_v4  ;;  %1909 = vmatprep.mubr.f32.mxu0 %v5669_v0 }
  0x35   : > { %5513 = vmatpush1.msk.msra.mxu0 %vm314_vm0, %v5741_v2  ;;  %5515 = vmatprep.subr.msk.mxu1 %vm314_vm0, %v5751_v5 }
  0x36   : > { %5516 = vmatpush1.msk.msra.mxu1 %vm314_vm0, %v5743_v3  ;;  %1980 = vmatprep.mubr.f32.mxu1 %v5669_v0 }
  0x37   : > { %5514 = vmatmul.mubr.msk.f32.vlgmr.msra.gmra.mrb[16].mxu0 %vm310_vm1, %v287_v14  ;;  %5517 = vmatmul.mubr.msk.f32.vlgmr.msra.gmra.mrb[16].mxu1 %vm310_vm1, %v287_v14 }
  0x38   : > { %5518 = vmatprep.subr.msk.mxu0 %vm314_vm0, %v5747_v4  ;;  %2095 = vmatprep.mubr.f32.mxu0 %v5669_v0 }
  0x39   : > { %5519 = vmatpush1.msk.msra.mxu0 %vm314_vm0, %v5741_v2  ;;  %5521 = vmatprep.subr.msk.mxu1 %vm314_vm0, %v5751_v5 }
  0x3a   : > { %5522 = vmatpush1.msk.msra.mxu1 %vm314_vm0, %v5743_v3  ;;  %2166 = vmatprep.mubr.f32.mxu1 %v5669_v0 }
  0x3b   : > { %5520 = vmatmul.mubr.msk.f32.vlgmr.msra.gmra.mrb[18].mxu0 %vm310_vm1, %v288_v15  ;;  %5523 = vmatmul.mubr.msk.f32.vlgmr.msra.gmra.mrb[18].mxu1 %vm310_vm1, %v288_v15 }
  0x3c   : > { %5524 = vmatprep.subr.msk.mxu0 %vm314_vm0, %v5747_v4  ;;  %2277 = vmatprep.mubr.f32.mxu0 %v5669_v0 }
  0x3d   : > { %5525 = vmatpush1.msk.msra.mxu0 %vm314_vm0, %v5741_v2  ;;  %5527 = vmatprep.subr.msk.mxu1 %vm314_vm0, %v5751_v5 }
  0x3e   : > { %5528 = vmatpush1.msk.msra.mxu1 %vm314_vm0, %v5743_v3  ;;  %2348 = vmatprep.mubr.f32.mxu1 %v5669_v0 }
  0x3f   : > { %5526 = vmatmul.mubr.msk.f32.vlgmr.msra.gmra.mrb[20].mxu0 %vm310_vm1, %v289_v16  ;;  %5529 = vmatmul.mubr.msk.f32.vlgmr.msra.gmra.mrb[20].mxu1 %vm310_vm1, %v289_v16 }
  0x40   : > { %5530 = vmatprep.subr.msk.mxu0 %vm314_vm0, %v5747_v4  ;;  %2459 = vmatprep.mubr.f32.mxu0 %v5669_v0 }
  0x41   : > { %5531 = vmatpush1.msk.msra.mxu0 %vm314_vm0, %v5741_v2  ;;  %5533 = vmatprep.subr.msk.mxu1 %vm314_vm0, %v5751_v5 }
  0x42   : > { %5534 = vmatpush1.msk.msra.mxu1 %vm314_vm0, %v5743_v3  ;;  %2530 = vmatprep.mubr.f32.mxu1 %v5669_v0 }
  0x43   : > { %5532 = vmatmul.mubr.msk.f32.vlgmr.msra.gmra.mrb[22].mxu0 %vm310_vm1, %v290_v17  ;;  %5535 = vmatmul.mubr.msk.f32.vlgmr.msra.gmra.mrb[22].mxu1 %vm310_vm1, %v290_v17 }
  0x44   : > { %5536 = vmatprep.subr.msk.mxu0 %vm314_vm0, %v5747_v4  ;;  %2641 = vmatprep.mubr.f32.mxu0 %v5669_v0 }
  0x45   : > { %5537 = vmatpush1.msk.msra.mxu0 %vm314_vm0, %v5741_v2  ;;  %5539 = vmatprep.subr.msk.mxu1 %vm314_vm0, %v5751_v5 }
  0x46   : > { %5540 = vmatpush1.msk.msra.mxu1 %vm314_vm0, %v5743_v3  ;;  %5542 = vmatprep.subr.msk.mxu0 %vm314_vm0, %v5747_v4 }
  0x47   : > { %5538 = vmatmul.mubr.msk.f32.vlgmr.msra.gmra.mrb[24].mxu0 %vm310_vm1, %v291_v18  ;;  %2712 = vmatprep.mubr.f32.mxu1 %v5669_v0 }
  0x48   : > { %5543 = vmatpush1.msk.msra.mxu0 %vm314_vm0, %v5741_v2  ;;  %5541 = vmatmul.mubr.msk.f32.vlgmr.msra.gmra.mrb[24].mxu1 %vm310_vm1, %v291_v18 }
  0x49   : > { %2823 = vmatprep.mubr.f32.mxu0 %v5669_v0  ;;  %5545 = vmatprep.subr.msk.mxu1 %vm314_vm0, %v5751_v5 }
  0x4a   : > { %5548 = vmatprep.subr.msk.mxu0 %vm314_vm0, %v5747_v4  ;;  %5546 = vmatpush1.msk.msra.mxu1 %vm314_vm0, %v5743_v3 }
  0x4b   : > { %5544 = vmatmul.mubr.msk.f32.vlgmr.msra.gmra.mrb[26].mxu0 %vm310_vm1, %v292_v19  ;;  %2894 = vmatprep.mubr.f32.mxu1 %v5669_v0 }
  0x4c   : > { %5549 = vmatpush1.msk.msra.mxu0 %vm314_vm0, %v5741_v2  ;;  %2972 = vmatprep.mubr.f32.mxu0 %v5669_v0 }
  0x4d   : > { %5547 = vmatmul.mubr.msk.f32.vlgmr.msra.gmra.mrb[26].mxu1 %vm310_vm1, %v292_v19  ;;  %5551 = vmatprep.subr.msk.mxu1 %vm314_vm0, %v5751_v5 }
  0x4e   : > { %5552 = vmatpush1.msk.msra.mxu1 %vm314_vm0, %v5743_v3  ;;  %3043 = vmatprep.mubr.f32.mxu1 %v5669_v0 }
  0x4f   : > { %5550 = vmatmul.mubr.msk.f32.vlgmr.msra.gmra.mrb[28].mxu0 %vm310_vm1, %v293_v20  ;;  %5554 = vmatprep.subr.msk.mxu0 %vm314_vm0, %v5747_v4 }
  0x50   : > { %5555 = vmatpush1.msk.msra.mxu0 %vm314_vm0, %v5741_v2  ;;  %3154 = vmatprep.mubr.f32.mxu0 %v5669_v0 }
  0x51   : > { %5553 = vmatmul.mubr.msk.f32.vlgmr.msra.gmra.mrb[28].mxu1 %vm310_vm1, %v293_v20  ;;  %5557 = vmatprep.subr.msk.mxu1 %vm314_vm0, %v5751_v5 }
  0x52   : > { %5558 = vmatpush1.msk.msra.mxu1 %vm314_vm0, %v5743_v3  ;;  %3225 = vmatprep.mubr.f32.mxu1 %v5669_v0 }
  0x53   : > { %5556 = vmatmul.mubr.msk.f32.vlgmr.msra.gmra.mrb[30].mxu0 %vm310_vm1, %v294_v21  ;;  %5560 = vmatprep.subr.msk.mxu0 %vm314_vm0, %v5747_v4 }
  0x54   : > { %5561 = vmatpush1.msk.msra.mxu0 %vm314_vm0, %v5741_v2  ;;  %3348 = vmatprep.mubr.f32.mxu0 %v5669_v0 }
  0x55   : > { %5559 = vmatmul.mubr.msk.f32.vlgmr.msra.gmra.mrb[30].mxu1 %vm310_vm1, %v294_v21  ;;  %5563 = vmatprep.subr.msk.mxu1 %vm314_vm0, %v5751_v5 }
  0x56   : > { %5564 = vmatpush1.msk.msra.mxu1 %vm314_vm0, %v5743_v3  ;;  %3419 = vmatprep.mubr.f32.mxu1 %v5669_v0 }
  0x57   : > { %5562 = vmatmul.mubr.msk.f32.vlgmr.msra.gmra.mrb[32].mxu0 %vm310_vm1, %v295_v22  ;;  %5566 = vmatprep.subr.msk.mxu0 %vm314_vm0, %v5747_v4 }
  0x58   : > { %5567 = vmatpush1.msk.msra.mxu0 %vm314_vm0, %v5741_v2  ;;  %3530 = vmatprep.mubr.f32.mxu0 %v5669_v0 }
  0x59   : > { %5565 = vmatmul.mubr.msk.f32.vlgmr.msra.gmra.mrb[32].mxu1 %vm310_vm1, %v295_v22  ;;  %5569 = vmatprep.subr.msk.mxu1 %vm314_vm0, %v5751_v5 }
  0x5a   : > { %5570 = vmatpush1.msk.msra.mxu1 %vm314_vm0, %v5743_v3  ;;  %3601 = vmatprep.mubr.f32.mxu1 %v5669_v0 }
  0x5b   : > { %5568 = vmatmul.mubr.msk.f32.vlgmr.msra.gmra.mrb[34].mxu0 %vm310_vm1, %v296_v23  ;;  %5572 = vmatprep.subr.msk.mxu0 %vm314_vm0, %v5747_v4 }
  0x5c   : > { %5573 = vmatpush1.msk.msra.mxu0 %vm314_vm0, %v5741_v2  ;;  %3712 = vmatprep.mubr.f32.mxu0 %v5669_v0 }
  0x5d   : > { %5571 = vmatmul.mubr.msk.f32.vlgmr.msra.gmra.mrb[34].mxu1 %vm310_vm1, %v296_v23  ;;  %5575 = vmatprep.subr.msk.mxu1 %vm314_vm0, %v5751_v5 }
  0x5e   : > { %5576 = vmatpush1.msk.msra.mxu1 %vm314_vm0, %v5743_v3  ;;  %3783 = vmatprep.mubr.f32.mxu1 %v5669_v0 }
  0x5f   : > { %5574 = vmatmul.mubr.msk.f32.vlgmr.msra.gmra.mrb[36].mxu0 %vm310_vm1, %v297_v24  ;;  %5578 = vmatprep.subr.msk.mxu0 %vm314_vm0, %v5747_v4 }
  0x60   : > { %5579 = vmatpush1.msk.msra.mxu0 %vm314_vm0, %v5741_v2  ;;  %3897 = vmatprep.mubr.f32.mxu0 %v5669_v0 }
  0x61   : > { %5577 = vmatmul.mubr.msk.f32.vlgmr.msra.gmra.mrb[36].mxu1 %vm310_vm1, %v297_v24  ;;  %5581 = vmatprep.subr.msk.mxu1 %vm314_vm0, %v5751_v5 }
  0x62   : > { %5582 = vmatpush1.msk.msra.mxu1 %vm314_vm0, %v5743_v3  ;;  %3968 = vmatprep.mubr.f32.mxu1 %v5669_v0 }
  0x63   : > { %5580 = vmatmul.mubr.msk.f32.vlgmr.msra.gmra.mrb[38].mxu0 %vm310_vm1, %v298_v25  ;;  %5584 = vmatprep.subr.msk.mxu0 %vm314_vm0, %v5747_v4 }
  0x64   : > { %5585 = vmatpush1.msk.msra.mxu0 %vm314_vm0, %v5741_v2  ;;  %4078 = vmatprep.mubr.f32.mxu0 %v5669_v0 }
  0x65   : > { %5583 = vmatmul.mubr.msk.f32.vlgmr.msra.gmra.mrb[38].mxu1 %vm310_vm1, %v298_v25  ;;  %5587 = vmatprep.subr.msk.mxu1 %vm314_vm0, %v5751_v5 }
  0x66   : > { %5588 = vmatpush1.msk.msra.mxu1 %vm314_vm0, %v5743_v3  ;;  %4149 = vmatprep.mubr.f32.mxu1 %v5669_v0 }
  0x67   : > { %5586 = vmatmul.mubr.msk.f32.vlgmr.msra.gmra.mrb[40].mxu0 %vm310_vm1, %v299_v26  ;;  %5590 = vmatprep.subr.msk.mxu0 %vm314_vm0, %v5747_v4 }
  0x68   : > { %5591 = vmatpush1.msk.msra.mxu0 %vm314_vm0, %v5741_v2  ;;  %4263 = vmatprep.mubr.f32.mxu0 %v5669_v0 }
  0x69   : > { %5589 = vmatmul.mubr.msk.f32.vlgmr.msra.gmra.mrb[40].mxu1 %vm310_vm1, %v299_v26  ;;  %5593 = vmatprep.subr.msk.mxu1 %vm314_vm0, %v5751_v5 }
  0x6a   : > { %5594 = vmatpush1.msk.msra.mxu1 %vm314_vm0, %v5743_v3  ;;  %4334 = vmatprep.mubr.f32.mxu1 %v5669_v0 }
  0x6b   : > { %5592 = vmatmul.mubr.msk.f32.vlgmr.msra.gmra.mrb[42].mxu0 %vm310_vm1, %v300_v27  ;;  %5596 = vmatprep.subr.msk.mxu0 %vm314_vm0, %v5747_v4 }
  0x6c   : > { %5597 = vmatpush1.msk.msra.mxu0 %vm314_vm0, %v5741_v2  ;;  %4444 = vmatprep.mubr.f32.mxu0 %v5669_v0 }
  0x6d   : > { %5595 = vmatmul.mubr.msk.f32.vlgmr.msra.gmra.mrb[42].mxu1 %vm310_vm1, %v300_v27  ;;  %5599 = vmatprep.subr.msk.mxu1 %vm314_vm0, %v5751_v5 }
  0x6e   : > { %5600 = vmatpush1.msk.msra.mxu1 %vm314_vm0, %v5743_v3  ;;  %4515 = vmatprep.mubr.f32.mxu1 %v5669_v0 }
  0x6f   : > { %5598 = vmatmul.mubr.msk.f32.vlgmr.msra.gmra.mrb[44].mxu0 %vm310_vm1, %v301_v28  ;;  %5602 = vmatprep.subr.msk.mxu0 %vm314_vm0, %v5747_v4 }
  0x70   : > { %5603 = vmatpush1.msk.msra.mxu0 %vm314_vm0, %v5741_v2  ;;  %4625 = vmatprep.mubr.f32.mxu0 %v5669_v0 }
  0x71   : > { %5601 = vmatmul.mubr.msk.f32.vlgmr.msra.gmra.mrb[44].mxu1 %vm310_vm1, %v301_v28  ;;  %5605 = vmatprep.subr.msk.mxu1 %vm314_vm0, %v5751_v5 }
  0x72   : > { %5606 = vmatpush1.msk.msra.mxu1 %vm314_vm0, %v5743_v3  ;;  %4696 = vmatprep.mubr.f32.mxu1 %v5669_v0 }
  0x73   : > { %5604 = vmatmul.mubr.msk.f32.vlgmr.msra.gmra.mrb[46].mxu0 %vm310_vm1, %v302_v29  ;;  %5608 = vmatprep.subr.msk.mxu0 %vm314_vm0, %v5747_v4 }
  0x74   : > { %5609 = vmatpush1.msk.msra.mxu0 %vm314_vm0, %v5741_v2  ;;  %4806 = vmatprep.mubr.f32.mxu0 %v5669_v0 }
  0x75   : > { %5607 = vmatmul.mubr.msk.f32.vlgmr.msra.gmra.mrb[46].mxu1 %vm310_vm1, %v302_v29  ;;  %5611 = vmatprep.subr.msk.mxu1 %vm314_vm0, %v5751_v5 }
  0x76   : > { %5612 = vmatpush1.msk.msra.mxu1 %vm314_vm0, %v5743_v3  ;;  %4877 = vmatprep.mubr.f32.mxu1 %v5669_v0 }
  0x77   : > { %5610 = vmatmul.mubr.msk.f32.vlgmr.msra.gmra.mrb[48].mxu0 %vm310_vm1, %v303_v30  ;;  %5614 = vmatprep.subr.msk.mxu0 %vm314_vm0, %v5747_v4 }
  0x78   : > { %5615 = vmatpush1.msk.msra.mxu0 %vm314_vm0, %v5741_v2  ;;  %4991 = vmatprep.mubr.f32.mxu0 %v5669_v0 }
  0x79   : > { %5613 = vmatmul.mubr.msk.f32.vlgmr.msra.gmra.mrb[48].mxu1 %vm310_vm1, %v303_v30  ;;  %5617 = vmatprep.subr.msk.mxu1 %vm314_vm0, %v5751_v5 }
  0x7a   : > { %5618 = vmatpush1.msk.msra.mxu1 %vm314_vm0, %v5743_v3  ;;  %5062 = vmatprep.mubr.f32.mxu1 %v5669_v0 }
  0x7b   : > { %5616 = vmatmul.mubr.msk.f32.vlgmr.msra.gmra.mrb[50].mxu0 %vm310_vm1, %v304_v31  ;;  %5289 = vperm.xlu1 %5657, %v5286_v32  }
  0x7c   : > { %5620 = vmatprep.subr.msk.mxu0 %vm314_vm0, %v5747_v4  ;;  %5172 = vmatprep.mubr.f32.mxu0 %v5669_v0 }
  0x7d   : > { %5619 = vmatmul.mubr.msk.f32.vlgmr.msra.gmra.mrb[50].mxu1 %vm310_vm1, %v304_v31  ;;  %5621 = vmatpush1.msk.msra.mxu0 %vm314_vm0, %v5741_v2 }
  0x7e   : > { %5623 = vmatprep.subr.msk.mxu1 %vm314_vm0, %v5751_v5  ;;  %5243 = vmatprep.mubr.f32.mxu1 %v5669_v0 }
  0x7f   : > { %5622 = vmatmul.mubr.msk.f32.vlgmr.msra.gmra.mrb[52].mxu0 %vm310_vm1, %v305_v33  ;;  %5624 = vmatpush1.msk.msra.mxu1 %vm314_vm0, %v5743_v3 }
  0x81   : > { %5625 = vmatmul.mubr.msk.f32.vlgmr.msra.gmra.mrb[52].mxu1 %vm310_vm1, %v305_v33 }
  0xea   : > { %v389_v34 = vpop.f32.mrb[0].mxu0  ;;  %v460_v35 = vpop.f32.mrb[0].mxu1 }
  0xeb   : > { %v462_v36 = vpop.f32.mrb[1].mxu1  ;;  %465 = vrot.lane.b32.xlu0 %v389_v34, %s5671_s17  ;;  %v391_v37 = vpop.f32.mrb[1].mxu0 }
  0xec   : > { %471 = vrot.lane.b32.xlu1 %v462_v36, %s5671_s17 }
  0xee   : > { %v601_v38 = vpop.f32.mrb[2].mxu0  ;;  %v672_v39 = vpop.f32.mrb[2].mxu1 }
  0xef   : > { %469 = vrot.lane.b32.xlu0 %v460_v35, %s5671_s17  ;;  %v603_v40 = vpop.f32.mrb[3].mxu0  ;;  %v674_v41 = vpop.f32.mrb[3].mxu1 }
  0xf0   : > { %677 = vrot.lane.b32.xlu1 %v601_v38, %s5672_s18 }
  0xf2   : > { %v783_v42 = vpop.f32.mrb[4].mxu0  ;;  %v854_v43 = vpop.f32.mrb[4].mxu1 }
  0xf3   : > { %467 = vrot.lane.b32.xlu0 %v391_v37, %s5671_s17  ;;  %v785_v44 = vpop.f32.mrb[5].mxu0  ;;  %v856_v45 = vpop.f32.mrb[5].mxu1 }
  0xf4   : > { %681 = vrot.lane.b32.xlu1 %v672_v39, %s5672_s18 }
  0xf6   : > { %v977_v46 = vpop.f32.mrb[6].mxu0  ;;  %v1048_v47 = vpop.f32.mrb[6].mxu1 }
  0xf7   : > { %679 = vrot.lane.b32.xlu0 %v603_v40, %s5672_s18  ;;  %v979_v48 = vpop.f32.mrb[7].mxu0  ;;  %v1050_v49 = vpop.f32.mrb[7].mxu1 }
  0xf8   : > { %683 = vrot.lane.b32.xlu1 %v674_v41, %s5672_s18 }
  0xfa   : > { %v1163_v50 = vpop.f32.mrb[8].mxu0  ;;  %v1234_v51 = vpop.f32.mrb[8].mxu1 }
  0xfb   : > { %859 = vrot.lane.b32.xlu0 %v783_v42, %s5673_s19  ;;  %v1165_v52 = vpop.f32.mrb[9].mxu0  ;;  %v1236_v53 = vpop.f32.mrb[9].mxu1 }
  0xfc   : > { %863 = vrot.lane.b32.xlu1 %v854_v43, %s5673_s19 }
  0xfe   : > { %v1345_v54 = vpop.f32.mrb[10].mxu0  ;;  %v1416_v55 = vpop.f32.mrb[10].mxu1 }
  0xff   : > { %865 = vrot.lane.b32.xlu0 %v856_v45, %s5673_s19  ;;  %v1347_v56 = vpop.f32.mrb[11].mxu0  ;;  %v1418_v57 = vpop.f32.mrb[11].mxu1 }
 0x100   : > { %861 = vrot.lane.b32.xlu1 %v785_v44, %s5673_s19 }
 0x102   : > { %v1531_v58 = vpop.f32.mrb[12].mxu0  ;;  %v1602_v59 = vpop.f32.mrb[12].mxu1 }
 0x103   : > { %1053 = vrot.lane.b32.xlu0 %v977_v46, %s5674_s20  ;;  %v1533_v60 = vpop.f32.mrb[13].mxu0  ;;  %v1604_v61 = vpop.f32.mrb[13].mxu1 }
 0x104   : > { %1057 = vrot.lane.b32.xlu1 %v1048_v47, %s5674_s20 }
 0x106   : > { %v1729_v62 = vpop.f32.mrb[14].mxu0  ;;  %v1800_v63 = vpop.f32.mrb[14].mxu1 }
 0x107   : > { %1059 = vrot.lane.b32.xlu0 %v1050_v49, %s5674_s20  ;;  %v1731_v0 = vpop.f32.mrb[15].mxu0  ;;  %v1802_v1 = vpop.f32.mrb[15].mxu1 }
 0x108   : > { %1055 = vrot.lane.b32.xlu1 %v979_v48, %s5674_s20 }
 0x10a   : > { %v1911_v2 = vpop.f32.mrb[16].mxu0  ;;  %v1982_v3 = vpop.f32.mrb[16].mxu1 }
 0x10b   : > { %1239 = vrot.lane.b32.xlu0 %v1163_v50, %s5675_s24  ;;  %v1913_v4 = vpop.f32.mrb[17].mxu0  ;;  %v1984_v5 = vpop.f32.mrb[17].mxu1 }
 0x10c   : > { %1243 = vrot.lane.b32.xlu1 %v1234_v51, %s5675_s24 }
 0x10e   : > { %v2097_v6 = vpop.f32.mrb[18].mxu0  ;;  %v2168_v7 = vpop.f32.mrb[18].mxu1 }
 0x10f   : > { %1245 = vrot.lane.b32.xlu0 %v1236_v53, %s5675_s24  ;;  %v6178_v8 = vpop.f32.mrb[19].mxu0  ;;  %v2170_v9 = vpop.f32.mrb[19].mxu1 }
 0x110   : > { %1241 = vrot.lane.b32.xlu1 %v1165_v52, %s5675_s24 }
 0x112   : > { %v6181_v10 = vpop.f32.mrb[20].mxu0  ;;  %v6183_v11 = vpop.f32.mrb[20].mxu1 }
 0x113   : > { %1421 = vrot.lane.b32.xlu0 %v1345_v54, %s5676_s25  ;;  %v6186_v12 = vpop.f32.mrb[21].mxu0  ;;  %v6188_v13 = vpop.f32.mrb[21].mxu1 }
 0x114   : > { %1425 = vrot.lane.b32.xlu1 %v1416_v55, %s5676_s25 }
 0x116   : > { %v6191_v14 = vpop.f32.mrb[22].mxu0  ;;  %v6193_v15 = vpop.f32.mrb[22].mxu1 }
 0x117   : > { %1427 = vrot.lane.b32.xlu0 %v1418_v57, %s5676_s25  ;;  %v6196_v16 = vpop.f32.mrb[23].mxu0  ;;  %v6198_v17 = vpop.f32.mrb[23].mxu1 }
 0x118   : > { %1423 = vrot.lane.b32.xlu1 %v1347_v56, %s5676_s25 }
 0x11a   : > { %v6201_v18 = vpop.f32.mrb[24].mxu0 }
 0x11b   : > { %1607 = vrot.lane.b32.xlu0 %v1531_v58, %s5677_s26  ;;  %v6204_v19 = vpop.f32.mrb[25].mxu0  ;;  %v6206_v20 = vpop.f32.mrb[24].mxu1 }
 0x11c   : > { %1611 = vrot.lane.b32.xlu1 %v1602_v59, %s5677_s26  ;;  %v6209_v21 = vpop.f32.mrb[25].mxu1 }
 0x11e   : > { %v6211_v22 = vpop.f32.mrb[26].mxu0 }
 0x11f   : > { %7363 = vst [vmem:[#allocation2_spill] sm:$0xff] %v6211_v22  ;;  %1613 = vrot.lane.b32.xlu0 %v1604_v61, %s5677_s26  ;;  %v6214_v23 = vpop.f32.mrb[27].mxu0 }
 0x120   : > { %7364 = vst [vmem:[#allocation3_spill] sm:$0xff] %v6214_v23  ;;  %1609 = vrot.lane.b32.xlu1 %v1533_v60, %s5677_s26  ;;  %v6217_v24 = vpop.f32.mrb[26].mxu1 }
 0x121   : > { %7365 = vst [vmem:[#allocation4_spill] sm:$0xff] %v6217_v24  ;;  %v6219_v25 = vpop.f32.mrb[27].mxu1 }
 0x122   : > { %7366 = vst [vmem:[#allocation5_spill] sm:$0xff] %v6219_v25  ;;  %v6221_v26 = vpop.f32.mrb[28].mxu0 }
 0x123   : > { %1805 = vrot.lane.b32.xlu0 %v1729_v62, %s5678_s27  ;;  %v6224_v27 = vpop.f32.mrb[29].mxu0 }
 0x124   : > { %1809 = vrot.lane.b32.xlu1 %v1800_v63, %s5678_s27  ;;  %v6227_v28 = vpop.f32.mrb[28].mxu1 }
 0x125   : > { %v6229_v29 = vpop.f32.mrb[29].mxu1 }
 0x126   : > { %v6231_v30 = vpop.f32.mrb[30].mxu0 }
 0x127   : > { %1811 = vrot.lane.b32.xlu0 %v1802_v1, %s5678_s27  ;;  %v6234_v31 = vpop.f32.mrb[31].mxu0 }
 0x128   : > { %1807 = vrot.lane.b32.xlu1 %v1731_v0, %s5678_s27  ;;  %v6237_v32 = vpop.f32.mrb[30].mxu1 }
 0x129   : > { %v6239_v33 = vpop.f32.mrb[31].mxu1 }
 0x12a   : > { %v6241_v34 = vpop.f32.mrb[32].mxu0 }
 0x12b   : > { %1987 = vrot.lane.b32.xlu0 %v1911_v2, %s5679_s28  ;;  %v6244_v35 = vpop.f32.mrb[33].mxu0 }
 0x12c   : > { %1991 = vrot.lane.b32.xlu1 %v1982_v3, %s5679_s28  ;;  %v6247_v36 = vpop.f32.mrb[32].mxu1 }
 0x12d   : > { %v6249_v37 = vpop.f32.mrb[33].mxu1 }
 0x12e   : > { %v6251_v38 = vpop.f32.mrb[34].mxu0 }
 0x12f   : > { %1993 = vrot.lane.b32.xlu0 %v1984_v5, %s5679_s28  ;;  %v6254_v39 = vpop.f32.mrb[35].mxu0 }
 0x130   : > { %1989 = vrot.lane.b32.xlu1 %v1913_v4, %s5679_s28  ;;  %v6257_v40 = vpop.f32.mrb[34].mxu1 }
 0x131   : > { %v6259_v41 = vpop.f32.mrb[35].mxu1 }
 0x132   : > { %v6261_v42 = vpop.f32.mrb[36].mxu0 }
 0x133   : > { %2173 = vrot.lane.b32.xlu0 %v2097_v6, %s5680_s29  ;;  %v6263_v43 = vpop.f32.mrb[37].mxu0 }
 0x134   : > { %2177 = vrot.lane.b32.xlu1 %v2168_v7, %s5680_s29  ;;  %v6265_v44 = vpop.f32.mrb[36].mxu1 }
 0x135   : > { %v6267_v45 = vpop.f32.mrb[37].mxu1 }
 0x136   : > { %v6269_v46 = vpop.f32.mrb[38].mxu0 }
 0x137   : > { %2179 = vrot.lane.b32.xlu0 %v2170_v9, %s5680_s29  ;;  %v6271_v47 = vpop.f32.mrb[39].mxu0 }
 0x138   : > { %2175 = vrot.lane.b32.xlu1 %v6178_v8, %s5680_s29  ;;  %v6274_v48 = vpop.f32.mrb[38].mxu1 }
 0x139   : > { %v6276_v49 = vpop.f32.mrb[39].mxu1 }
 0x13a   : > { %v6278_v50 = vpop.f32.mrb[40].mxu0 }
 0x13b   : > { %2355 = vrot.lane.b32.xlu0 %v6181_v10, %s5681_s30  ;;  %v6281_v51 = vpop.f32.mrb[41].mxu0 }
 0x13c   : > { %2359 = vrot.lane.b32.xlu1 %v6183_v11, %s5681_s30  ;;  %v6284_v52 = vpop.f32.mrb[40].mxu1 }
 0x13d   : > { %v6286_v53 = vpop.f32.mrb[41].mxu1 }
 0x13e   : > { %v6288_v54 = vpop.f32.mrb[42].mxu0 }
 0x13f   : > { %2361 = vrot.lane.b32.xlu0 %v6188_v13, %s5681_s30  ;;  %v6291_v55 = vpop.f32.mrb[43].mxu0 }
 0x140   : > { %2357 = vrot.lane.b32.xlu1 %v6186_v12, %s5681_s30  ;;  %v6294_v56 = vpop.f32.mrb[42].mxu1 }
 0x141   : > { %v6296_v57 = vpop.f32.mrb[43].mxu1 }
 0x142   : > { %v6298_v58 = vpop.f32.mrb[44].mxu0 }
 0x143   : > { %7367 = vst [vmem:[#allocation6_spill] sm:$0xff] %v6298_v58  ;;  %2537 = vrot.lane.b32.xlu0 %v6191_v14, %s5682_s7  ;;  %v6301_v59 = vpop.f32.mrb[45].mxu0  ;;  %v6350_v14 = vpop.permute.xlu1 %5289 }
 0x144   : > { %7368 = vst [vmem:[#allocation7_spill] sm:$0xff] %v6301_v59  ;;  %2541 = vrot.lane.b32.xlu1 %v6193_v15, %s5682_s7  ;;  %v6304_v60 = vpop.f32.mrb[44].mxu1  ;;  %7387 = vst [vmem:[#allocation26_spill] sm:$0xff] %v6350_v14  ;;  %v6357_v15 = vld [vmem:[%s7331_s3] sm:$0x3f] }
 0x145   : > { %7369 = vst [vmem:[#allocation8_spill] sm:$0xff] %v6304_v60  ;;  %v6306_v61 = vpop.f32.mrb[45].mxu1 }
 0x146   : > { %7370 = vst [vmem:[#allocation9_spill] sm:$0xff] %v6306_v61  ;;  %v6308_v62 = vpop.f32.mrb[46].mxu0 }
 0x147   : > { %7371 = vst [vmem:[#allocation10_spill] sm:$0xff] %v6308_v62  ;;  %2543 = vrot.lane.b32.xlu0 %v6198_v17, %s5682_s7  ;;  %v6311_v63 = vpop.f32.mrb[47].mxu0  ;;  %v6364_v17 = vld [vmem:[%s7331_s3 + $0x18] sm:$0x3f] }
 0x148   : > { %7372 = vst [vmem:[#allocation11_spill] sm:$0xff] %v6311_v63  ;;  %2539 = vrot.lane.b32.xlu1 %v6196_v16, %s5682_s7  ;;  %v6314_v0 = vpop.f32.mrb[46].mxu1  ;;  %s5686_s7 = smov 120   ;;  %v6398_v24 = vrot.slane %v6364_v17, 4 }
 0x149   : > { %7373 = vst [vmem:[#allocation12_spill] sm:$0xff] %v6314_v0  ;;  %v6316_v1 = vpop.f32.mrb[47].mxu1 }
 0x14a   : > { %7374 = vst [vmem:[#allocation13_spill] sm:$0xff] %v6316_v1  ;;  %v6318_v2 = vpop.f32.mrb[48].mxu0 }
 0x14b   : > { %7375 = vst [vmem:[#allocation14_spill] sm:$0xff] %v6318_v2  ;;  %2719 = vrot.lane.b32.xlu0 %v6201_v18, %s5683_s8  ;;  %v6321_v3 = vpop.f32.mrb[49].mxu0 }
 0x14c   : > { %7376 = vst [vmem:[#allocation15_spill] sm:$0xff] %v6321_v3  ;;  %2723 = vrot.lane.b32.xlu1 %v6206_v20, %s5683_s8  ;;  %v6324_v4 = vpop.f32.mrb[48].mxu1  ;;  %v484_v20 = vrot.slane %v6357_v15, 2 }
 0x14d   : > { %7377 = vst [vmem:[#allocation16_spill] sm:$0xff] %v6324_v4  ;;  %v6326_v5 = vpop.f32.mrb[49].mxu1 }
 0x14e   : > { %7378 = vst [vmem:[#allocation17_spill] sm:$0xff] %v6326_v5  ;;  %v6328_v6 = vpop.f32.mrb[50].mxu0 }
 0x14f   : > { %7379 = vst [vmem:[#allocation18_spill] sm:$0xff] %v6328_v6  ;;  %2725 = vrot.lane.b32.xlu0 %v6209_v21, %s5683_s8  ;;  %v6331_v7 = vpop.f32.mrb[51].mxu0  ;;  %v473_v21 = vlaneseq }
 0x150   : > { %7380 = vst [vmem:[#allocation19_spill] sm:$0xff] %v6331_v7  ;;  %2721 = vrot.lane.b32.xlu1 %v6204_v19, %s5683_s8  ;;  %v6334_v8 = vpop.f32.mrb[50].mxu1  ;;  %v6369_v19 = vld [vmem:[%s7331_s3 + $0x8] sm:$0x3f]  ;;  %s5687_s8 = smov 119  }
 0x151   : > { %7381 = vst [vmem:[#allocation20_spill] sm:$0xff] %v6334_v8  ;;  %v6336_v9 = vpop.f32.mrb[51].mxu1  ;;  %v6410_v22 = vand.u32 127, %v473_v21  ;;  %v6456_v4 = vrot.slane %v6369_v19, 5 }
 0x152   : > { %7382 = vst [vmem:[#allocation21_spill] sm:$0xff] %v6336_v9  ;;  %v6338_v10 = vpop.f32.mrb[52].mxu0 }
 0x153   : > { %7383 = vst [vmem:[#allocation22_spill] sm:$0xff] %v6338_v10  ;;  %3050 = vrot.lane.b32.xlu0 %v6221_v26, %s5684_s9  ;;  %v6341_v11 = vpop.f32.mrb[53].mxu0  ;;  %v487_v26 = vrot.slane %v6364_v17, 2  ;;  %vm685_vm2 = vcmp.lt.s32.totalorder %v6410_v22, 72  ;;  %vm475_vm3 = vcmp.lt.s32.totalorder %v6410_v22, 73  ;;  %vm867_vm4 = vcmp.lt.s32.totalorder %v6410_v22, 71 }
 0x154   : > { %7384 = vst [vmem:[#allocation23_spill] sm:$0xff] %v6341_v11  ;;  %3052 = vrot.lane.b32.xlu1 %v6224_v27, %s5684_s9  ;;  %v6344_v12 = vpop.f32.mrb[52].mxu1  ;;  %vm1061_vm5 = vcmp.lt.s32.totalorder %v6410_v22, 65  ;;  %vm1247_vm6 = vcmp.lt.s32.totalorder %v6410_v22, 64  ;;  %vm1429_vm7 = vcmp.lt.s32.totalorder %v6410_v22, 63  ;;  %vm1615_vm8 = vcmp.lt.s32.totalorder %v6410_v22, 57 }
 0x155   : > { %7385 = vst [vmem:[#allocation24_spill] sm:$0xff] %v6344_v12  ;;  %v6346_v13 = vpop.f32.mrb[53].mxu1  ;;  %v6395_v14 = vmul.f32 %v487_v26, %v6364_v17  ;;  %v6414_v26 = vrot.slane %v6357_v15, 5  ;;  %vm1813_vm9 = vcmp.lt.s32.totalorder %v6410_v22, 56  ;;  %vm1995_vm10 = vcmp.lt.s32.totalorder %v6410_v22, 55 }
 0x156   : > { %7386 = vst [vmem:[#allocation25_spill] sm:$0xff] %v6346_v13  ;;  %vm2181_vm11 = vcmp.lt.s32.totalorder %v6410_v22, 9  ;;  %vm2363_vm12 = vcmp.lt.s32.totalorder %v6410_v22, 8  ;;  %vm2545_vm13 = vcmp.lt.s32.totalorder %v6410_v22, 7  ;;  %vm2727_vm14 = vcmp.lt.s32.totalorder %v6410_v22, 1 }
 0x157   : > { %3054 = vrot.lane.b32.xlu0 %v6227_v28, %s5684_s9  ;;  %v485_v28 = vrot.slane %v6369_v19, 2  ;;  %7390 = vst [vmem:[#allocation29_spill] sm:$0xff] %v6395_v14  ;;  %vm3058_vm15 = vcmp.lt.s32.totalorder %v6410_v22, 127  ;;  %vm3240_vm1 = vcmp.lt.s32.totalorder %v6410_v22, 121 }
 0x158   : > { %3056 = vrot.lane.b32.xlu1 %v6229_v29, %s5684_s9 }
 0x15b   : > { %3232 = vrot.lane.b32.xlu0 %v6231_v30, %s5685_s10  ;;  %v6383_v30 = vld [vmem:[%s7331_s3 + $0x10] sm:$0x3f] }
 0x15c   : > { %3234 = vrot.lane.b32.xlu1 %v6234_v31, %s5685_s10  ;;  %v6386_v31 = vmul.f32 %v484_v20, %v6357_v15  ;;  %v486_v23 = vrot.slane %v6383_v30, 2  ;;  %v6403_v20 = vmul.f32 %v485_v28, %v6369_v19  ;;  %v6436_v12 = vrot.slane %v6383_v30, 4 }
 0x15d   : > { %v6359_v16 = vpop.permute.xlu0 %465 }
 0x15e   : > { %v472_v18 = vpop.permute.xlu1 %471  ;;  %7388 = vst [vmem:[#allocation27_spill] sm:$0xff] %v6386_v31  ;;  %7391 = vst [vmem:[#allocation30_spill] sm:$0xff] %v6403_v20  ;;  %v880_v6 = vmul.f32 %v6414_v26, %v6386_v31  ;;  %v881_v60 = vmul.f32 %v6456_v4, %v6403_v20 }
 0x15f   : > { %3236 = vrot.lane.b32.xlu0 %v6237_v32, %s5685_s10  ;;  %v6390_v32 = vrot.slane %v6357_v15, 4 }
 0x160   : > { %3238 = vrot.lane.b32.xlu1 %v6239_v33, %s5685_s10  ;;  %v6392_v33 = vshrl.u32 %v473_v21, 7  ;;  %v6428_v21 = vmul.f32 %v6398_v24, %v6395_v14 }
 0x161   : > { %v6375_v27 = vpop.permute.xlu0 %469  ;;  %v6421_v28 = vmul.f32 %v6390_v32, %v6386_v31 }
 0x162   : > { %v6378_v29 = vpop.permute.xlu1 %677  ;;  %7389 = vst [vmem:[#allocation28_spill] sm:$0xff] %v6392_v33  ;;  %v6424_v11 = vsub.s32 0, %v6392_v33  ;;  %7393 = vst [vmem:[#allocation32_spill] sm:$0xff] %v6428_v21 }
 0x163   : > { %3426 = vrot.lane.b32.xlu0 %v6241_v34, %s5686_s7  ;;  %v6406_v34 = vrot.slane %v6369_v19, 4  ;;  %7392 = vst [vmem:[#allocation31_spill] sm:$0xff] %v6421_v28 }
 0x164   : > { %3428 = vrot.lane.b32.xlu1 %v6244_v35, %s5686_s7  ;;  %v6417_v35 = vrot.slane %v6364_v17, 5  ;;  %v693_v8 = vrot.slane %v6386_v31, %v6424_v11  ;;  %v511_v3 = vrot.slane %v6421_v28, %v6424_v11  ;;  %v523_v2 = vrot.slane %v6428_v21, %v6424_v11 }
 0x165   : > { %v6408_v25 = vpop.permute.xlu0 %467  ;;  %v6440_v9 = vmul.f32 %v6406_v34, %v6403_v20  ;;  %v697_v21 = vrot.slane %v6403_v20, %v6424_v11 }
 0x166   : > { %v682_v13 = vpop.permute.xlu1 %681  ;;  %v883_v5 = vmul.f32 %v6417_v35, %v6395_v14 }
 0x167   : > { %3430 = vrot.lane.b32.xlu0 %v6247_v36, %s5686_s7  ;;  %v6433_v36 = vmul.f32 %v486_v23, %v6383_v30  ;;  %7395 = vst [vmem:[#allocation34_spill] sm:$0xff] %v6440_v9  ;;  %v515_v28 = vrot.slane %v6440_v9, %v6424_v11  ;;  %v887_v9 = vrot.slane %v880_v6, %v6424_v11 }
 0x168   : > { %3432 = vrot.lane.b32.xlu1 %v6249_v37, %s5686_s7  ;;  %v705_v37 = vrot.slane %v6395_v14, %v6424_v11  ;;  %v479_v14 = vsel %vm475_vm3, %v472_v18, %v6359_v16  ;;  %v899_v61 = vrot.slane %v883_v5, %v6424_v11 }
 0x169   : > { %7394 = vst [vmem:[#allocation33_spill] sm:$0xff] %v6433_v36  ;;  %v680_v10 = vpop.permute.xlu0 %679  ;;  %v6473_v31 = vmul.f32 %v6436_v12, %v6433_v36  ;;  %v701_v1 = vrot.slane %v6433_v36, %v6424_v11  ;;  %v524_v59 = vmul.f32 %v511_v3, %v479_v14  ;;  %v6505_v3 = vmul.f32 %v6406_v34, %v6369_v19 }
 0x16a   : > { %v684_v7 = vpop.permute.xlu1 %683  ;;  %v687_v5 = vsel %vm685_vm2, %v680_v10, %v682_v13  ;;  %v688_v14 = vsel %vm685_vm2, %v6378_v29, %v680_v10 }
 0x16b   : > { %v689_v23 = vsel %vm685_vm2, %v684_v7, %v6378_v29  ;;  %3608 = vrot.lane.b32.xlu0 %v6251_v38, %s5687_s8  ;;  %v686_v33 = vsel %vm685_vm2, %v682_v13, %v684_v7  ;;  %v6466_v38 = vrot.slane %v6383_v30, 5  ;;  %7396 = vst [vmem:[#allocation35_spill] sm:$0xff] %v6473_v31  ;;  %7397 = vst [vmem:[#allocation36_spill] sm:$0xff] %v6505_v3 }
 0x16c   : > { %3610 = vrot.lane.b32.xlu1 %v6254_v39, %s5687_s8  ;;  %v476_v39 = vsel %vm475_vm3, %v6375_v27, %v472_v18  ;;  %v706_v0 = vmul.f32 %v693_v8, %v689_v23  ;;  %v709_v62 = vmul.f32 %v705_v37, %v686_v33  ;;  %v6495_v8 = vmul.f32 %v6390_v32, %v6357_v15 }
 0x16d   : > { %v860_v7 = vpop.permute.xlu0 %859  ;;  %v882_v18 = vmul.f32 %v6466_v38, %v6433_v36  ;;  %v527_v6 = vmul.f32 %v523_v2, %v476_v39  ;;  %v519_v10 = vrot.slane %v6473_v31, %v6424_v11 }
 0x16e   : > { %v864_v63 = vpop.permute.xlu1 %863  ;;  %v710_v37 = vadd.f32 %v706_v0, %v524_v59  ;;  %v477_v59 = vsel %vm475_vm3, %v6408_v25, %v6375_v27  ;;  %v891_v0 = vrot.slane %v881_v60, %v6424_v11  ;;  %v708_v27 = vmul.f32 %v701_v1, %v687_v5 }
 0x16f   : > { %3612 = vrot.lane.b32.xlu0 %v6257_v40, %s5687_s8  ;;  %v6499_v40 = vmul.f32 %v6398_v24, %v6364_v17  ;;  %v713_v39 = vadd.f32 %v709_v62, %v527_v6  ;;  %v895_v62 = vrot.slane %v882_v18, %v6424_v11  ;;  %v707_v6 = vmul.f32 %v697_v21, %v688_v14 }
 0x170   : > { %3614 = vrot.lane.b32.xlu1 %v6259_v41, %s5687_s8  ;;  %v6509_v41 = vmul.f32 %v6436_v12, %v6383_v30  ;;  %v1077_v60 = vrot.slane %v6505_v3, %v6424_v11  ;;  %v526_v1 = vmul.f32 %v519_v10, %v477_v59 }
 0x171   : > { %v866_v33 = vpop.permute.xlu0 %865 }
 0x172   : > { %v868_v2 = vsel %vm867_vm4, %v864_v63, %v866_v33  ;;  %v871_v13 = vsel %vm867_vm4, %v866_v33, %v860_v7  ;;  %v862_v23 = vpop.permute.xlu1 %861  ;;  %v712_v18 = vadd.f32 %v708_v27, %v526_v1  ;;  %v1437_v27 = vmul.f32 %v6417_v35, %v6364_v17 }
 0x173   : > { %v900_v36 = vmul.f32 %v887_v9, %v871_v13  ;;  %v903_v20 = vmul.f32 %v899_v61, %v868_v2  ;;  %v869_v58 = vsel %vm867_vm4, %v862_v23, %v864_v63  ;;  %3790 = vrot.lane.b32.xlu0 %v6261_v42, %s5671_s17  ;;  %v478_v42 = vsel %vm475_vm3, %v6359_v16, %v6408_v25 }
 0x174   : > { %3792 = vrot.lane.b32.xlu1 %v6263_v43, %s5671_s17  ;;  %v870_v9 = vsel %vm867_vm4, %v860_v7, %v862_v23  ;;  %v1073_v43 = vrot.slane %v6495_v8, %v6424_v11  ;;  %v1085_v25 = vrot.slane %v6499_v40, %v6424_v11  ;;  %v1081_v16 = vrot.slane %v6509_v41, %v6424_v11 }
 0x175   : > { %v904_v61 = vadd.f32 %v900_v36, %v710_v37  ;;  %v907_v63 = vadd.f32 %v903_v20, %v713_v39  ;;  %v1054_v29 = vpop.permute.xlu0 %1053  ;;  %v525_v20 = vmul.f32 %v515_v28, %v478_v42  ;;  %v901_v21 = vmul.f32 %v891_v0, %v870_v9 }
 0x176   : > { %v1058_v33 = vpop.permute.xlu1 %1057  ;;  %v902_v36 = vmul.f32 %v895_v62, %v869_v58 }
 0x177   : > { %3794 = vrot.lane.b32.xlu0 %v6265_v44, %s5671_s17  ;;  %v711_v7 = vadd.f32 %v707_v6, %v525_v20  ;;  %v6592_v20 = vrot.slane %v6364_v17, 3 }
 0x178   : > { %3796 = vrot.lane.b32.xlu1 %v6267_v45, %s5671_s17  ;;  %v906_v23 = vadd.f32 %v902_v36, %v712_v18 }
 0x179   : > { %v1060_v44 = vpop.permute.xlu0 %1059  ;;  %v905_v45 = vadd.f32 %v901_v21, %v711_v7 }
 0x17a   : > { %v1062_v5 = vsel %vm1061_vm5, %v1058_v33, %v1060_v44  ;;  %v1065_v14 = vsel %vm1061_vm5, %v1060_v44, %v1054_v29  ;;  %v1056_v37 = vpop.permute.xlu1 %1055 }
 0x17b   : > { %v1086_v2 = vmul.f32 %v1073_v43, %v1065_v14  ;;  %v1089_v13 = vmul.f32 %v1085_v25, %v1062_v5  ;;  %v1063_v28 = vsel %vm1061_vm5, %v1056_v37, %v1058_v33  ;;  %v1064_v58 = vsel %vm1061_vm5, %v1054_v29, %v1056_v37  ;;  %3975 = vrot.lane.b32.xlu0 %v6269_v46, %s5672_s18 }
 0x17c   : > { %v1087_v39 = vmul.f32 %v1077_v60, %v1064_v58  ;;  %v1088_v10 = vmul.f32 %v1081_v16, %v1063_v28  ;;  %3977 = vrot.lane.b32.xlu1 %v6271_v47, %s5672_s18  ;;  %v1255_v46 = vrot.slane %v6357_v15, %v6424_v11  ;;  %v1267_v29 = vrot.slane %v6364_v17, %v6424_v11 }
 0x17d   : > { %v1090_v59 = vadd.f32 %v1086_v2, %v904_v61  ;;  %v1093_v0 = vadd.f32 %v1089_v13, %v907_v63  ;;  %v1240_v62 = vpop.permute.xlu0 %1239  ;;  %v1259_v47 = vrot.slane %v6369_v19, %v6424_v11  ;;  %v1263_v61 = vrot.slane %v6383_v30, %v6424_v11 }
 0x17e   : > { %v1091_v42 = vadd.f32 %v1087_v39, %v905_v45  ;;  %v1092_v9 = vadd.f32 %v1088_v10, %v906_v23  ;;  %v1244_v6 = vpop.permute.xlu1 %1243  ;;  %v1435_v33 = vmul.f32 %v6456_v4, %v6369_v19  ;;  %v1436_v43 = vmul.f32 %v6466_v38, %v6383_v30 }
 0x17f   : > { %3979 = vrot.lane.b32.xlu0 %v6274_v48, %s5672_s18  ;;  %v1434_v48 = vmul.f32 %v6414_v26, %v6357_v15  ;;  %v6589_v16 = vrot.slane %v6357_v15, 3  ;;  %v6603_v5 = vrot.slane %v6369_v19, 3  ;;  %v6606_v14 = vrot.slane %v6383_v30, 3 }
 0x180   : > { %3981 = vrot.lane.b32.xlu1 %v6276_v49, %s5672_s18  ;;  %v6614_v23 = vmul.f32 %v6592_v20, %v6364_v17  ;;  %v1453_v39 = vrot.slane %v1437_v27, %v6424_v11  ;;  %v1445_v10 = vrot.slane %v1435_v33, %v6424_v11 }
 0x181   : > { %v1246_v63 = vpop.permute.xlu0 %1245 }
 0x182   : > { %v1248_v49 = vsel %vm1247_vm6, %v1244_v6, %v1246_v63  ;;  %v1251_v25 = vsel %vm1247_vm6, %v1246_v63, %v1240_v62  ;;  %v1242_v60 = vpop.permute.xlu1 %1241 }
 0x183   : > { %v1268_v1 = vmul.f32 %v1255_v46, %v1251_v25  ;;  %v1271_v21 = vmul.f32 %v1267_v29, %v1248_v49  ;;  %v1249_v36 = vsel %vm1247_vm6, %v1242_v60, %v1244_v6  ;;  %v1250_v44 = vsel %vm1247_vm6, %v1240_v62, %v1242_v60  ;;  %4156 = vrot.lane.b32.xlu0 %v6278_v50, %s5673_s19 }
 0x184   : > { %v1269_v7 = vmul.f32 %v1259_v47, %v1250_v44  ;;  %v1270_v18 = vmul.f32 %v1263_v61, %v1249_v36  ;;  %4158 = vrot.lane.b32.xlu1 %v6281_v51, %s5673_s19  ;;  %v6610_v50 = vmul.f32 %v6589_v16, %v6357_v15  ;;  %v1441_v51 = vrot.slane %v1434_v48, %v6424_v11 }
 0x185   : > { %v1272_v37 = vadd.f32 %v1268_v1, %v1090_v59  ;;  %v1275_v2 = vadd.f32 %v1271_v21, %v1093_v0  ;;  %v1422_v13 = vpop.permute.xlu0 %1421  ;;  %v1449_v59 = vrot.slane %v1436_v43, %v6424_v11  ;;  %v6627_v0 = vmul.f32 %v6603_v5, %v6369_v19 }
 0x186   : > { %v1273_v28 = vadd.f32 %v1269_v7, %v1091_v42  ;;  %v1274_v58 = vadd.f32 %v1270_v18, %v1092_v9  ;;  %v1426_v45 = vpop.permute.xlu1 %1425  ;;  %v1632_v6 = vmul.f32 %v6610_v50, %v6390_v32  ;;  %v1635_v46 = vmul.f32 %v6614_v23, %v6398_v24 }
 0x187   : > { %4160 = vrot.lane.b32.xlu0 %v6284_v52, %s5673_s19  ;;  %v6631_v52 = vmul.f32 %v6606_v14, %v6383_v30  ;;  %v1633_v33 = vmul.f32 %v6627_v0, %v6406_v34 }
 0x188   : > { %4162 = vrot.lane.b32.xlu1 %v6286_v53, %s5673_s19  ;;  %s264_s19 = scalar_lea.vmem %s7332_s4, %s5628_s23  ;;  %s5462_s23 = sshll.u32 %s7490_s22, 2 }
 0x189   : > { %v1428_v62 = vpop.permute.xlu0 %1427  ;;  %v1634_v43 = vmul.f32 %v6631_v52, %v6436_v12  ;;  %v1643_v44 = vrot.slane %v1633_v33, %v6424_v11 }
 0x18a   : > { %v1430_v42 = vsel %vm1429_vm7, %v1426_v45, %v1428_v62  ;;  %v1433_v9 = vsel %vm1429_vm7, %v1428_v62, %v1422_v13  ;;  %v1424_v53 = vpop.permute.xlu1 %1423 }
 0x18b   : > { %v1454_v29 = vmul.f32 %v1441_v51, %v1433_v9  ;;  %v1457_v47 = vmul.f32 %v1453_v39, %v1430_v42  ;;  %v1431_v61 = vsel %vm1429_vm7, %v1424_v53, %v1426_v45  ;;  %v1432_v63 = vsel %vm1429_vm7, %v1422_v13, %v1424_v53  ;;  %4341 = vrot.lane.b32.xlu0 %v6288_v54, %s5674_s20  ;;  %v7398_v45 = vld [vmem:[#allocation6_spill] sm:$0xff] }
 0x18c   : > { %v1455_v48 = vmul.f32 %v1445_v10, %v1432_v63  ;;  %v1456_v27 = vmul.f32 %v1449_v59, %v1431_v61  ;;  %4343 = vrot.lane.b32.xlu1 %v6291_v55, %s5674_s20  ;;  %v1639_v54 = vrot.slane %v1632_v6, %v6424_v11  ;;  %v1651_v55 = vrot.slane %v1635_v46, %v6424_v11  ;;  %v7399_v10 = vld [vmem:[#allocation7_spill] sm:$0xff]  ;;  %v7400_v46 = vld [vmem:[#allocation8_spill] sm:$0xff]  ;;  %v7401_v61 = vld [vmem:[#allocation9_spill] sm:$0xff] }
 0x18d   : > { %v1458_v49 = vadd.f32 %v1454_v29, %v1272_v37  ;;  %v1461_v25 = vadd.f32 %v1457_v47, %v1275_v2  ;;  %v1608_v60 = vpop.permute.xlu0 %1607  ;;  %v1647_v7 = vrot.slane %v1634_v43, %v6424_v11  ;;  %v1821_v29 = vrot.slane %v6610_v50, %v6424_v11 }
 0x18e   : > { %v1459_v1 = vadd.f32 %v1455_v48, %v1273_v28  ;;  %v1460_v21 = vadd.f32 %v1456_v27, %v1274_v58  ;;  %v1612_v36 = vpop.permute.xlu1 %1611  ;;  %v1833_v47 = vrot.slane %v6614_v23, %v6424_v11  ;;  %v1825_v63 = vrot.slane %v6627_v0, %v6424_v11 }
 0x18f   : > { %4345 = vrot.lane.b32.xlu0 %v6294_v56, %s5674_s20  ;;  %v1829_v48 = vrot.slane %v6631_v52, %v6424_v11 }
 0x190   : > { %4347 = vrot.lane.b32.xlu1 %v6296_v57, %s5674_s20 }
 0x191   : > { %v1614_v18 = vpop.permute.xlu0 %1613 }
 0x192   : > { %v1616_v37 = vsel %vm1615_vm8, %v1612_v36, %v1614_v18  ;;  %v1619_v56 = vsel %vm1615_vm8, %v1614_v18, %v1608_v60  ;;  %v1610_v2 = vpop.permute.xlu1 %1609  ;;  %v7403_v18 = vld [vmem:[#allocation11_spill] sm:$0xff] }
 0x193   : > { %v1652_v13 = vmul.f32 %v1639_v54, %v1619_v56  ;;  %v1655_v28 = vmul.f32 %v1651_v55, %v1616_v37  ;;  %v1617_v58 = vsel %vm1615_vm8, %v1610_v2, %v1612_v36  ;;  %v1618_v57 = vsel %vm1615_vm8, %v1608_v60, %v1610_v2  ;;  %4522 = vrot.lane.b32.xlu0 %v7398_v45, %s5675_s24  ;;  %v7402_v55 = vld [vmem:[#allocation10_spill] sm:$0xff] }
 0x194   : > { %v1653_v51 = vmul.f32 %v1643_v44, %v1618_v57  ;;  %v1654_v39 = vmul.f32 %v1647_v7, %v1617_v58  ;;  %4524 = vrot.lane.b32.xlu1 %v7399_v10, %s5675_s24  ;;  %v2003_v60 = vmul.f32 %v6614_v23, %v6417_v35  ;;  %v2002_v35 = vmul.f32 %v6631_v52, %v6466_v38  ;;  %v7404_v57 = vld [vmem:[#allocation12_spill] sm:$0xff] }
 0x195   : > { %v1656_v59 = vadd.f32 %v1652_v13, %v1458_v49  ;;  %v1659_v62 = vadd.f32 %v1655_v28, %v1461_v25  ;;  %v1806_v42 = vpop.permute.xlu0 %1805  ;;  %v2000_v25 = vmul.f32 %v6610_v50, %v6414_v26  ;;  %v2001_v26 = vmul.f32 %v6627_v0, %v6456_v4  ;;  %v7405_v4 = vld [vmem:[#allocation13_spill] sm:$0xff] }
 0x196   : > { %v1657_v9 = vadd.f32 %v1653_v51, %v1459_v1  ;;  %v1658_v53 = vadd.f32 %v1654_v39, %v1460_v21  ;;  %v1810_v6 = vpop.permute.xlu1 %1809  ;;  %v2019_v51 = vrot.slane %v2003_v60, %v6424_v11  ;;  %v2015_v39 = vrot.slane %v2002_v35, %v6424_v11 }
 0x197   : > { %4526 = vrot.lane.b32.xlu0 %v7400_v46, %s5675_s24  ;;  %v2007_v45 = vrot.slane %v2000_v25, %v6424_v11  ;;  %v2011_v38 = vrot.slane %v2001_v26, %v6424_v11  ;;  %v7407_v11 = vld [vmem:[#allocation14_spill] sm:$0xff]  ;;  %v7414_v26 = vld [vmem:[#allocation33_spill] sm:$0xff] }
 0x198   : > { %4528 = vrot.lane.b32.xlu1 %v7401_v61, %s5675_s24 }
 0x199   : > { %v1812_v27 = vpop.permute.xlu0 %1811 }
 0x19a   : > { %v1814_v33 = vsel %vm1813_vm9, %v1810_v6, %v1812_v27  ;;  %v1817_v43 = vsel %vm1813_vm9, %v1812_v27, %v1806_v42  ;;  %v1808_v49 = vpop.permute.xlu1 %1807 }
 0x19b   : > { %v1834_v1 = vmul.f32 %v1821_v29, %v1817_v43  ;;  %v1837_v21 = vmul.f32 %v1833_v47, %v1814_v33  ;;  %v1815_v36 = vsel %vm1813_vm9, %v1808_v49, %v1810_v6  ;;  %v1816_v54 = vsel %vm1813_vm9, %v1806_v42, %v1808_v49  ;;  %4703 = vrot.lane.b32.xlu0 %v7402_v55, %s5676_s25 }
 0x19c   : > { %v1835_v44 = vmul.f32 %v1825_v63, %v1816_v54  ;;  %v1836_v7 = vmul.f32 %v1829_v48, %v1815_v36  ;;  %4705 = vrot.lane.b32.xlu1 %v7403_v18, %s5676_s25  ;;  %v7408_v48 = vld [vmem:[#allocation15_spill] sm:$0xff]  ;;  %v7411_v54 = vld [vmem:[#allocation29_spill] sm:$0xff] }
 0x19d   : > { %v1838_v37 = vadd.f32 %v1834_v1, %v1656_v59  ;;  %v1841_v56 = vadd.f32 %v1837_v21, %v1659_v62  ;;  %v1988_v2 = vpop.permute.xlu0 %1987  ;;  %v7409_v1 = vld [vmem:[#allocation16_spill] sm:$0xff]  ;;  %v7410_v21 = vld [vmem:[#allocation27_spill] sm:$0xff] }
 0x19e   : > { %v1839_v13 = vadd.f32 %v1835_v44, %v1657_v9  ;;  %v1840_v28 = vadd.f32 %v1836_v7, %v1658_v53  ;;  %v1992_v58 = vpop.permute.xlu1 %1991  ;;  %v7406_v9 = vld [vmem:[#allocation28_spill] sm:$0xff]  ;;  %v7412_v44 = vld [vmem:[#allocation17_spill] sm:$0xff]  ;;  %v7413_v7 = vld [vmem:[#allocation30_spill] sm:$0xff] }
 0x19f   : > { %4707 = vrot.lane.b32.xlu0 %v7404_v57, %s5676_s25  ;;  %v6721_v53 = vsub.s32 2, %v7406_v9 }
 0x1a0   : > { %4709 = vrot.lane.b32.xlu1 %v7405_v4, %s5676_s25  ;;  %s268_s25 = scalar_lea.vmem %s7333_s5, %s5462_s23 }
 0x1a1   : > { %v1994_v10 = vpop.permute.xlu0 %1993  ;;  %v2189_v36 = vrot.slane %v7410_v21, %v6721_v53  ;;  %v2201_v55 = vrot.slane %v7411_v54, %v6721_v53  ;;  %v2193_v18 = vrot.slane %v7413_v7, %v6721_v53  ;;  %v2197_v35 = vrot.slane %v7414_v26, %v6721_v53 }
 0x1a2   : > { %v1996_v59 = vsel %vm1995_vm10, %v1992_v58, %v1994_v10  ;;  %v1999_v62 = vsel %vm1995_vm10, %v1994_v10, %v1988_v2  ;;  %v1990_v42 = vpop.permute.xlu1 %1989 }
 0x1a3   : > { %v2020_v6 = vmul.f32 %v2007_v45, %v1999_v62  ;;  %v2023_v46 = vmul.f32 %v2019_v51, %v1996_v59  ;;  %v1997_v29 = vsel %vm1995_vm10, %v1990_v42, %v1992_v58  ;;  %v1998_v47 = vsel %vm1995_vm10, %v1988_v2, %v1990_v42  ;;  %4884 = vrot.lane.b32.xlu0 %v7407_v11, %s5677_s26  ;;  %v7415_v51 = vld [vmem:[#allocation18_spill] sm:$0xff] }
 0x1a4   : > { %v2021_v61 = vmul.f32 %v2011_v38, %v1998_v47  ;;  %v2022_v63 = vmul.f32 %v2015_v39, %v1997_v29  ;;  %4886 = vrot.lane.b32.xlu1 %v7408_v48, %s5677_s26  ;;  %v7416_v39 = vld [vmem:[#allocation19_spill] sm:$0xff]  ;;  %v7417_v29 = vld [vmem:[#allocation20_spill] sm:$0xff]  ;;  %v2371_v47 = vrot.slane %v6357_v15, %v6721_v53  ;;  %v2383_v11 = vrot.slane %v6364_v17, %v6721_v53  ;;  %v7418_v48 = vld [vmem:[#allocation22_spill] sm:$0xff] }
 0x1a5   : > { %v2024_v27 = vadd.f32 %v2020_v6, %v1838_v37  ;;  %v2027_v33 = vadd.f32 %v2023_v46, %v1841_v56  ;;  %v2174_v43 = vpop.permute.xlu0 %2173 }
 0x1a6   : > { %v2025_v49 = vadd.f32 %v2021_v61, %v1839_v13  ;;  %v2026_v25 = vadd.f32 %v2022_v63, %v1840_v28  ;;  %v2178_v60 = vpop.permute.xlu1 %2177  ;;  %v2375_v61 = vrot.slane %v6369_v19, %v6721_v53  ;;  %v2379_v63 = vrot.slane %v6383_v30, %v6721_v53 }
 0x1a7   : > { %4888 = vrot.lane.b32.xlu0 %v7409_v1, %s5677_s26 }
 0x1a8   : > { %4890 = vrot.lane.b32.xlu1 %v7412_v44, %s5677_s26 }
 0x1a9   : > { %v2180_v37 = vpop.permute.xlu0 %2179 }
 0x1aa   : > { %v2182_v56 = vsel %vm2181_vm11, %v2178_v60, %v2180_v37  ;;  %v2185_v2 = vsel %vm2181_vm11, %v2180_v37, %v2174_v43  ;;  %v2176_v13 = vpop.permute.xlu1 %2175 }
 0x1ab   : > { %v2202_v28 = vmul.f32 %v2189_v36, %v2185_v2  ;;  %v2205_v58 = vmul.f32 %v2201_v55, %v2182_v56  ;;  %v2183_v57 = vsel %vm2181_vm11, %v2176_v13, %v2178_v60  ;;  %v2184_v45 = vsel %vm2181_vm11, %v2174_v43, %v2176_v13  ;;  %5069 = vrot.lane.b32.xlu0 %v7415_v51, %s5678_s27  ;;  %v7419_v55 = vld [vmem:[#allocation21_spill] sm:$0xff] }
 0x1ac   : > { %v2203_v4 = vmul.f32 %v2193_v18, %v2184_v45  ;;  %v2204_v38 = vmul.f32 %v2197_v35, %v2183_v57  ;;  %5071 = vrot.lane.b32.xlu1 %v7416_v39, %s5678_s27  ;;  %v7420_v35 = vld [vmem:[#allocation24_spill] sm:$0xff]  ;;  %v7421_v57 = vld [vmem:[#allocation23_spill] sm:$0xff]  ;;  %v2553_v45 = vrot.slane %v6610_v50, %v6721_v53  ;;  %v2565_v51 = vrot.slane %v6614_v23, %v6721_v53 }
 0x1ad   : > { %v2206_v10 = vadd.f32 %v2202_v28, %v2024_v27  ;;  %v2209_v59 = vadd.f32 %v2205_v58, %v2027_v33  ;;  %v2356_v62 = vpop.permute.xlu0 %2355  ;;  %vm3434_vm11 = vcmp.lt.s32.totalorder %v6410_v22, 120 }
 0x1ae   : > { %v2207_v42 = vadd.f32 %v2203_v4, %v2025_v49  ;;  %v2208_v6 = vadd.f32 %v2204_v38, %v2026_v25  ;;  %v2360_v46 = vpop.permute.xlu1 %2359  ;;  %v2557_v4 = vrot.slane %v6627_v0, %v6721_v53  ;;  %v2561_v38 = vrot.slane %v6631_v52, %v6721_v53 }
 0x1af   : > { %5073 = vrot.lane.b32.xlu0 %v7417_v29, %s5678_s27 }
 0x1b0   : > { %5250 = vrot.lane.b32.xlu1 %v7418_v48, %s5679_s28 }
 0x1b1   : > { %v2362_v27 = vpop.permute.xlu0 %2361 }
 0x1b2   : > { %v2364_v33 = vsel %vm2363_vm12, %v2360_v46, %v2362_v27  ;;  %v2367_v43 = vsel %vm2363_vm12, %v2362_v27, %v2356_v62  ;;  %v2358_v49 = vpop.permute.xlu1 %2357 }
 0x1b3   : > { %v2384_v25 = vmul.f32 %v2371_v47, %v2367_v43  ;;  %v2387_v60 = vmul.f32 %v2383_v11, %v2364_v33  ;;  %v2365_v1 = vsel %vm2363_vm12, %v2358_v49, %v2360_v46  ;;  %v2366_v36 = vsel %vm2363_vm12, %v2356_v62, %v2358_v49  ;;  %5075 = vrot.lane.b32.xlu0 %v7419_v55, %s5678_s27  ;;  %v7422_v11 = vld [vmem:[#allocation25_spill] sm:$0xff]  ;;  %s272_s27 = scalar_lea.vmem %s7334_s6, %s5462_s23 }
 0x1b4   : > { %v2385_v44 = vmul.f32 %v2375_v61, %v2366_v36  ;;  %v2386_v18 = vmul.f32 %v2379_v63, %v2365_v1  ;;  %5254 = vrot.lane.b32.xlu1 %v7420_v35, %s5679_s28  ;;  %vm3616_vm12 = vcmp.lt.s32.totalorder %v6410_v22, 119 }
 0x1b5   : > { %v2388_v37 = vadd.f32 %v2384_v25, %v2206_v10  ;;  %v2391_v56 = vadd.f32 %v2387_v60, %v2209_v59  ;;  %v2538_v2 = vpop.permute.xlu0 %2537  ;;  %v3065_v25 = vsub.s32 5, %v7406_v9 }
 0x1b6   : > { %v2389_v13 = vadd.f32 %v2385_v44, %v2207_v42  ;;  %v2390_v28 = vadd.f32 %v2386_v18, %v2208_v6  ;;  %v2542_v58 = vpop.permute.xlu1 %2541  ;;  %v2734_v42 = vsub.s32 4, %v7406_v9  ;;  %v3245_v18 = vrot.slane %v6357_v15, 1 }
 0x1b7   : > { %5252 = vrot.lane.b32.xlu0 %v7421_v57, %s5679_s28 }
 0x1b8   : > { %v2735_v60 = vrot.slane %v6357_v15, %v2734_v42  ;;  %v2747_v1 = vrot.slane %v6364_v17, %v2734_v42  ;;  %v2739_v36 = vrot.slane %v6369_v19, %v2734_v42  ;;  %v2743_v55 = vrot.slane %v6383_v30, %v2734_v42 }
 0x1b9   : > { %v2544_v39 = vpop.permute.xlu0 %2543  ;;  %v6792_v42 = vmul.f32 %v3245_v18, %v6357_v15 }
 0x1ba   : > { %v2546_v10 = vsel %vm2545_vm13, %v2542_v58, %v2544_v39  ;;  %v2549_v59 = vsel %vm2545_vm13, %v2544_v39, %v2538_v2  ;;  %v2540_v62 = vpop.permute.xlu1 %2539 }
 0x1bb   : > { %v2566_v6 = vmul.f32 %v2553_v45, %v2549_v59  ;;  %v2569_v46 = vmul.f32 %v2565_v51, %v2546_v10  ;;  %v2547_v29 = vsel %vm2545_vm13, %v2540_v62, %v2542_v58  ;;  %v2548_v47 = vsel %vm2545_vm13, %v2538_v2, %v2540_v62  ;;  %5256 = vrot.lane.b32.xlu0 %v7422_v11, %s5679_s28 }
 0x1bc   : > { %v2567_v61 = vmul.f32 %v2557_v4, %v2548_v47  ;;  %v2568_v63 = vmul.f32 %v2561_v38, %v2547_v29  ;;  %v3066_v2 = vrot.slane %v6357_v15, %v3065_v25  ;;  %v3070_v4 = vrot.slane %v6369_v19, %v3065_v25 }
 0x1bd   : > { %v2570_v48 = vadd.f32 %v2566_v6, %v2388_v37  ;;  %v2573_v27 = vadd.f32 %v2569_v46, %v2391_v56  ;;  %v2720_v33 = vpop.permute.xlu0 %2719  ;;  %v3074_v38 = vrot.slane %v6383_v30, %v3065_v25  ;;  %v3078_v62 = vrot.slane %v6364_v17, %v3065_v25 }
 0x1be   : > { %v2571_v43 = vadd.f32 %v2567_v61, %v2389_v13  ;;  %v2572_v53 = vadd.f32 %v2568_v63, %v2390_v28  ;;  %v2724_v49 = vpop.permute.xlu1 %2723  ;;  %v6795_v47 = vsub.s32 3, %v7406_v9  ;;  %v3246_v11 = vrot.slane %v6369_v19, 1  ;;  %v7423_v61 = vld [vmem:[#allocation2_spill] sm:$0xff] }
 0x1c1   : > { %v2726_v44 = vpop.permute.xlu0 %2725 }
 0x1c2   : > { %v2728_v35 = vsel %vm2727_vm14, %v2724_v49, %v2726_v44  ;;  %v2731_v37 = vsel %vm2727_vm14, %v2726_v44, %v2720_v33  ;;  %v2722_v56 = vpop.permute.xlu1 %2721 }
 0x1c3   : > { %v2748_v13 = vmul.f32 %v2735_v60, %v2731_v37  ;;  %v2751_v28 = vmul.f32 %v2747_v1, %v2728_v35  ;;  %v2729_v58 = vsel %vm2727_vm14, %v2722_v56, %v2724_v49  ;;  %v2730_v57 = vsel %vm2727_vm14, %v2720_v33, %v2722_v56  ;;  %v7425_v60 = vld [vmem:[#allocation3_spill] sm:$0xff] }
 0x1c4   : > { %v2749_v45 = vmul.f32 %v2739_v36, %v2730_v57  ;;  %v2750_v51 = vmul.f32 %v2743_v55, %v2729_v58  ;;  %v3247_v49 = vrot.slane %v6383_v30, 1  ;;  %v3248_v36 = vrot.slane %v6364_v17, 1 }
 0x1c5   : > { %v2752_v39 = vadd.f32 %v2748_v13, %v2570_v48  ;;  %v2755_v10 = vadd.f32 %v2751_v28, %v2573_v27  ;;  %v3051_v59 = vpop.permute.xlu0 %3050  ;;  %v7424_v27 = vld [vmem:[#allocation5_spill] sm:$0xff]  ;;  %v3260_v37 = vrot.slane %v6792_v42, %v6795_v47  ;;  %v6816_v28 = vmul.f32 %v3246_v11, %v6369_v19 }
 0x1c6   : > { %v2753_v6 = vadd.f32 %v2749_v45, %v2571_v43  ;;  %v2754_v46 = vadd.f32 %v2750_v51, %v2572_v53  ;;  %v3053_v29 = vpop.permute.xlu1 %3052  ;;  %v7426_v43 = vld [vmem:[#allocation4_spill] sm:$0xff]  ;;  %v6819_v45 = vmul.f32 %v3247_v49, %v6383_v30  ;;  %v6822_v51 = vmul.f32 %v3248_v36, %v6364_v17 }
 0x1c7   : > { %v2901_v63 = vadd.f32 %v7423_v61, %v2752_v39  ;;  %v3061_v48 = vsel %vm3058_vm15, %v3051_v59, %v3053_v29  ;;  %v2904_v33 = vadd.f32 %v7424_v27, %v2755_v10  ;;  %v6933_v31 = vmul.f32 %v6816_v28, %v6406_v34 }
 0x1c8   : > { %v3079_v25 = vmul.f32 %v3066_v2, %v3061_v48  ;;  %v2902_v1 = vadd.f32 %v7425_v60, %v2753_v6  ;;  %v2903_v53 = vadd.f32 %v7426_v43, %v2754_v46  ;;  %7427 = vst [vmem:[#allocation6_spill] sm:$0xff] %v6822_v51  ;;  %v3442_v43 = vrot.slane %v6357_v15, %v6795_v47 }
 0x1c9   : > { %v3055_v55 = vpop.permute.xlu0 %3054  ;;  %v3636_v34 = vrot.slane %v7411_v54, %v6795_v47 }
 0x1ca   : > { %v3083_v44 = vadd.f32 %v3079_v25, %v2901_v63  ;;  %v3060_v18 = vsel %vm3058_vm15, %v3053_v29, %v3055_v55  ;;  %v3057_v35 = vpop.permute.xlu1 %3056 }
 0x1cb   : > { %v3080_v56 = vmul.f32 %v3070_v4, %v3060_v18  ;;  %v3059_v2 = vsel %vm3058_vm15, %v3055_v55, %v3057_v35  ;;  %v3062_v13 = vsel %vm3058_vm15, %v3057_v35, %v3051_v59  ;;  %v3264_v59 = vrot.slane %v6816_v28, %v6795_v47 }
 0x1cc   : > { %v3081_v58 = vmul.f32 %v3074_v38, %v3059_v2  ;;  %v3082_v57 = vmul.f32 %v3078_v62, %v3062_v13  ;;  %v3268_v38 = vrot.slane %v6819_v45, %v6795_v47  ;;  %v3272_v62 = vrot.slane %v6822_v51, %v6795_v47 }
 0x1cd   : > { %v3084_v39 = vadd.f32 %v3080_v56, %v2902_v1  ;;  %v3233_v10 = vpop.permute.xlu0 %3232  ;;  %v3450_v56 = vrot.slane %v6383_v30, %v6795_v47  ;;  %v3454_v2 = vrot.slane %v6364_v17, %v6795_v47 }
 0x1ce   : > { %v3085_v4 = vadd.f32 %v3081_v58, %v2903_v53  ;;  %v3086_v6 = vadd.f32 %v3082_v57, %v2904_v33  ;;  %v3235_v46 = vpop.permute.xlu1 %3234 }
 0x1cf   : > { %v3243_v29 = vsel %vm3240_vm1, %v3233_v10, %v3235_v46 }
 0x1d0   : > { %v3273_v11 = vmul.f32 %v3260_v37, %v3243_v29 }
 0x1d1   : > { %v3237_v61 = vpop.permute.xlu0 %3236 }
 0x1d2   : > { %v3277_v63 = vadd.f32 %v3273_v11, %v3083_v44  ;;  %v3242_v48 = vsel %vm3240_vm1, %v3235_v46, %v3237_v61  ;;  %v3239_v27 = vpop.permute.xlu1 %3238 }
 0x1d3   : > { %v3274_v33 = vmul.f32 %v3264_v59, %v3242_v48  ;;  %v3241_v49 = vsel %vm3240_vm1, %v3237_v61, %v3239_v27  ;;  %v3244_v25 = vsel %vm3240_vm1, %v3239_v27, %v3233_v10 }
 0x1d4   : > { %v3275_v60 = vmul.f32 %v3268_v38, %v3241_v49  ;;  %v3276_v1 = vmul.f32 %v3272_v62, %v3244_v25 }
 0x1d5   : > { %v6841_v53 = vadd.f32 %v3274_v33, %v3084_v39  ;;  %v3427_v36 = vpop.permute.xlu0 %3426 }
 0x1d6   : > { %v3279_v55 = vadd.f32 %v3275_v60, %v3085_v4  ;;  %v3280_v44 = vadd.f32 %v3276_v1, %v3086_v6  ;;  %v6843_v18 = vpop.permute.xlu1 %3428 }
 0x1d7   : > { %v3437_v35 = vsel %vm3434_vm11, %v3427_v36, %v6843_v18 }
 0x1d8   : > { %v3455_v37 = vmul.f32 %v3442_v43, %v3437_v35 }
 0x1d9   : > { %v6852_v13 = vpop.permute.xlu0 %3430 }
 0x1da   : > { %v6854_v58 = vadd.f32 %v3455_v37, %v3277_v63  ;;  %v3433_v57 = vpop.permute.xlu1 %3432 }
 0x1db   : > { %v3435_v39 = vsel %vm3434_vm11, %v6852_v13, %v3433_v57  ;;  %v3438_v10 = vsel %vm3434_vm11, %v3433_v57, %v3427_v36  ;;  %v6912_v57 = vmul.f32 %v6816_v28, %v6603_v5 }
 0x1dc   : > { %v3457_v4 = vmul.f32 %v3450_v56, %v3435_v39  ;;  %v3458_v6 = vmul.f32 %v3454_v2, %v3438_v10  ;;  %v6904_v56 = vsub.s32 1, %v7406_v9  ;;  %v6908_v2 = vmul.f32 %v6792_v42, %v6589_v16 }
 0x1dd   : > { %v6861_v46 = vpop.permute.xlu0 %3608  ;;  %v6916_v39 = vmul.f32 %v6819_v45, %v6606_v14  ;;  %v6924_v9 = vmul.f32 %v6822_v51, %v6592_v20 }
 0x1de   : > { %v6863_v29 = vadd.f32 %v3457_v4, %v3279_v55  ;;  %v6865_v59 = vadd.f32 %v3458_v6, %v3280_v44  ;;  %v6867_v11 = vpop.permute.xlu1 %3610  ;;  %v3446_v4 = vrot.slane %v6369_v19, %v6795_v47  ;;  %v6929_v6 = vmul.f32 %v6792_v42, %v6390_v32 }
 0x1df   : > { %v6947_v32 = vmul.f32 %v6822_v51, %v6398_v24 }
 0x1e0   : > { %7428 = vst [vmem:[#allocation7_spill] sm:$0xff] %v6863_v29  ;;  %7429 = vst [vmem:[#allocation8_spill] sm:$0xff] %v6865_v59  ;;  %v3813_v59 = vrot.slane %v6912_v57, %v6904_v56  ;;  %v7003_v57 = vmul.f32 %v6606_v14, %v7414_v26 }
 0x1e1   : > { %v6869_v38 = vpop.permute.xlu0 %3612 }
 0x1e2   : > { %v6871_v62 = vpop.permute.xlu1 %3614 }
 0x1e3   : > { %v3620_v14 = vsel %vm3616_vm12, %v6871_v62, %v6861_v46 }
 0x1e5   : > { %v6873_v61 = vpop.permute.xlu0 %3790 }
 0x1e6   : > { %v6875_v63 = vpop.permute.xlu1 %3792 }
 0x1e7   : > { %v3800_v3 = vsel %vm475_vm3, %v6873_v61, %v6875_v63 }
 0x1e9   : > { %v6877_v48 = vpop.permute.xlu0 %3794 }
 0x1ea   : > { %v6879_v27 = vpop.permute.xlu1 %3796 }
 0x1ed   : > { %v6881_v33 = vpop.permute.xlu0 %3975 }
 0x1ee   : > { %v6883_v49 = vpop.permute.xlu1 %3977 }
 0x1f1   : > { %v6885_v25 = vpop.permute.xlu0 %3979 }
 0x1f2   : > { %v6887_v60 = vpop.permute.xlu1 %3981 }
 0x1f5   : > { %v6889_v1 = vpop.permute.xlu0 %4156 }
 0x1f6   : > { %v6891_v43 = vpop.permute.xlu1 %4158 }
 0x1f9   : > { %v6893_v36 = vpop.permute.xlu0 %4160 }
 0x1fa   : > { %7430 = vst [vmem:[#allocation9_spill] sm:$0xff] %v6893_v36  ;;  %v6895_v55 = vpop.permute.xlu1 %4162 }
 0x1fb   : > { %7431 = vst [vmem:[#allocation10_spill] sm:$0xff] %v6895_v55 }
 0x1fd   : > { %v6897_v44 = vpop.permute.xlu0 %4341 }
 0x1fe   : > { %7432 = vst [vmem:[#allocation11_spill] sm:$0xff] %v6897_v44  ;;  %v6899_v35 = vpop.permute.xlu1 %4343  ;;  %v3628_v44 = vrot.slane %v7413_v7, %v6795_v47 }
 0x1ff   : > { %7433 = vst [vmem:[#allocation12_spill] sm:$0xff] %v6899_v35  ;;  %v3632_v35 = vrot.slane %v7414_v26, %v6795_v47 }
 0x201   : > { %v6901_v37 = vpop.permute.xlu0 %4345 }
 0x202   : > { %7434 = vst [vmem:[#allocation13_spill] sm:$0xff] %v6901_v37  ;;  %v6918_v10 = vpop.permute.xlu1 %4347  ;;  %v3624_v37 = vrot.slane %v7410_v21, %v6795_v47  ;;  %v6999_v47 = vmul.f32 %v6603_v5, %v7413_v7 }
 0x203   : > { %7435 = vst [vmem:[#allocation28_spill] sm:$0xff] %v6918_v10  ;;  %v6937_v10 = vmul.f32 %v6819_v45, %v6436_v12  ;;  %v3809_v12 = vrot.slane %v6908_v2, %v6904_v56 }
 0x204   : > { %7438 = vst [vmem:[#allocation16_spill] sm:$0xff] %v6999_v47 }
 0x205   : > { %v6949_v55 = vpop.permute.xlu0 %4522 }
 0x206   : > { %7436 = vst [vmem:[#allocation14_spill] sm:$0xff] %v6949_v55  ;;  %v6959_v36 = vpop.permute.xlu1 %4524  ;;  %v6995_v55 = vmul.f32 %v6589_v16, %v7410_v21  ;;  %v7013_v16 = vmul.f32 %v6592_v20, %v7411_v54  ;;  %v3618_v20 = vsel %vm3616_vm12, %v6867_v11, %v6869_v38 }
 0x207   : > { %7437 = vst [vmem:[#allocation15_spill] sm:$0xff] %v6959_v36  ;;  %v3436_v36 = vsel %vm3434_vm11, %v6843_v18, %v6852_v13  ;;  %v3619_v13 = vsel %vm3616_vm12, %v6861_v46, %v6867_v11  ;;  %v3617_v11 = vsel %vm3616_vm12, %v6869_v38, %v6871_v62  ;;  %v3638_v47 = vmul.f32 %v3628_v44, %v3618_v20  ;;  %v7451_v44 = vld [vmem:[#allocation10_spill] sm:$0xff] }
 0x208   : > { %v3456_v18 = vmul.f32 %v3446_v4, %v3436_v36  ;;  %v3637_v2 = vmul.f32 %v3624_v37, %v3619_v13  ;;  %v3799_v38 = vsel %vm475_vm3, %v6875_v63, %v6877_v48  ;;  %v3639_v13 = vmul.f32 %v3632_v35, %v3617_v11  ;;  %v7439_v11 = vld [vmem:[#allocation31_spill] sm:$0xff] }
 0x209   : > { %v6985_v51 = vpop.permute.xlu0 %4526  ;;  %v3640_v20 = vmul.f32 %v3636_v34, %v3620_v14  ;;  %v3798_v63 = vsel %vm475_vm3, %v6877_v48, %v6879_v27  ;;  %v3822_v36 = vmul.f32 %v3809_v12, %v3800_v3  ;;  %v3823_v4 = vmul.f32 %v3813_v59, %v3799_v38 }
 0x20a   : > { %v6991_v24 = vpop.permute.xlu1 %4528  ;;  %v3460_v46 = vadd.f32 %v3456_v18, %v6841_v53  ;;  %v3801_v53 = vsel %vm475_vm3, %v6879_v27, %v6873_v61  ;;  %v3985_v35 = vsel %vm685_vm2, %v6881_v33, %v6883_v49  ;;  %v3984_v34 = vsel %vm685_vm2, %v6883_v49, %v6885_v25  ;;  %v7440_v27 = vld [vmem:[#allocation34_spill] sm:$0xff] }
 0x20b   : > { %v3641_v48 = vadd.f32 %v3637_v2, %v6854_v58  ;;  %v7441_v59 = vrot.slane %v6916_v39, %v6904_v56  ;;  %v7442_v38 = vrot.slane %v6924_v9, %v6904_v56  ;;  %v3983_v58 = vsel %vm685_vm2, %v6885_v25, %v6887_v60 }
 0x20c   : > { %v3642_v14 = vadd.f32 %v3638_v47, %v3460_v46  ;;  %v3986_v49 = vsel %vm685_vm2, %v6887_v60, %v6881_v33  ;;  %v7443_v39 = vrot.slane %v6792_v42, %v6904_v56  ;;  %v7444_v9 = vrot.slane %v6816_v28, %v6904_v56 }
 0x20d   : > { %v7031_v5 = vpop.permute.xlu0 %4703  ;;  %v3824_v12 = vmul.f32 %v7441_v59, %v3798_v63  ;;  %v3825_v37 = vmul.f32 %v7442_v38, %v3801_v53  ;;  %v4166_v25 = vsel %vm867_vm4, %v6889_v1, %v6891_v43  ;;  %v7445_v63 = vld [vmem:[#allocation9_spill] sm:$0xff]  ;;  %v7446_v53 = vld [vmem:[#allocation7_spill] sm:$0xff]  ;;  %v7447_v38 = vld [vmem:[#allocation8_spill] sm:$0xff]  ;;  %v7448_v28 = vrot.slane %v6819_v45, %v6904_v56 }
 0x20e   : > { %v7035_v29 = vpop.permute.xlu1 %4705  ;;  %v4003_v2 = vmul.f32 %v7443_v39, %v3985_v35  ;;  %v4004_v46 = vmul.f32 %v7444_v9, %v3984_v34  ;;  %v4165_v33 = vsel %vm867_vm4, %v6891_v43, %v7445_v63  ;;  %v3643_v59 = vadd.f32 %v3639_v13, %v7446_v53  ;;  %v7449_v9 = vld [vmem:[#allocation6_spill] sm:$0xff] }
 0x20f   : > { %v3644_v42 = vadd.f32 %v3640_v20, %v7447_v38  ;;  %v3826_v35 = vadd.f32 %v3822_v36, %v3641_v48  ;;  %v3827_v39 = vadd.f32 %v3823_v4, %v3642_v14  ;;  %v4005_v34 = vmul.f32 %v7448_v28, %v3983_v58  ;;  %v7454_v48 = vld [vmem:[#allocation12_spill] sm:$0xff]  ;;  %v7455_v14 = vld [vmem:[#allocation11_spill] sm:$0xff]  ;;  %v7456_v58 = vld [vmem:[#allocation13_spill] sm:$0xff] }
 0x210   : > { %v7450_v3 = vrot.slane %v7449_v9, %v6904_v56  ;;  %v4164_v43 = vsel %vm867_vm4, %v7445_v63, %v7451_v44  ;;  %v4167_v13 = vsel %vm867_vm4, %v7451_v44, %v6889_v1  ;;  %v7452_v36 = vrot.slane %v6929_v6, %v6904_v56  ;;  %v7459_v9 = vld [vmem:[#allocation28_spill] sm:$0xff] }
 0x211   : > { %v7066_v62 = vpop.permute.xlu0 %4707  ;;  %v7453_v45 = vrot.slane %v6933_v31, %v6904_v56  ;;  %v3828_v1 = vadd.f32 %v3824_v12, %v3643_v59  ;;  %v3829_v44 = vadd.f32 %v3825_v37, %v3644_v42  ;;  %v4007_v53 = vadd.f32 %v4003_v2, %v3826_v35  ;;  %v7463_v59 = vld [vmem:[#allocation14_spill] sm:$0xff] }
 0x212   : > { %v7082_v18 = vpop.permute.xlu1 %4709  ;;  %v4006_v61 = vmul.f32 %v7450_v3, %v3986_v49  ;;  %v4188_v4 = vmul.f32 %v7452_v36, %v4166_v25  ;;  %v4351_v3 = vsel %vm1061_vm5, %v7455_v14, %v7454_v48  ;;  %v4350_v49 = vsel %vm1061_vm5, %v7454_v48, %v7456_v58 }
 0x213   : > { %v4189_v20 = vmul.f32 %v7453_v45, %v4165_v33  ;;  %v4008_v6 = vadd.f32 %v4004_v46, %v3827_v39  ;;  %v7457_v31 = vrot.slane %v6937_v10, %v6904_v56  ;;  %v7458_v38 = vrot.slane %v6947_v32, %v6904_v56  ;;  %v7462_v32 = vld [vmem:[#allocation15_spill] sm:$0xff] }
 0x214   : > { %v4349_v36 = vsel %vm1061_vm5, %v7456_v58, %v7459_v9  ;;  %v4352_v37 = vsel %vm1061_vm5, %v7459_v9, %v7455_v14  ;;  %v7460_v12 = vrot.slane %v6610_v50, %v6904_v56  ;;  %v7461_v10 = vrot.slane %v6627_v0, %v6904_v56  ;;  %v7471_v9 = vld [vmem:[#allocation36_spill] sm:$0xff] }
 0x215   : > { %v7111_v47 = vpop.permute.xlu0 %4884  ;;  %v4190_v33 = vmul.f32 %v7457_v31, %v4164_v43  ;;  %v4191_v28 = vmul.f32 %v7458_v38, %v4167_v13  ;;  %v4532_v42 = vsel %vm1247_vm6, %v7463_v59, %v7462_v32  ;;  %v4531_v35 = vsel %vm1247_vm6, %v7462_v32, %v6985_v51 }
 0x216   : > { %v4887_v60 = vpop.permute.xlu1 %4886  ;;  %v4369_v2 = vmul.f32 %v7460_v12, %v4351_v3  ;;  %v4370_v46 = vmul.f32 %v7461_v10, %v4350_v49  ;;  %v4009_v39 = vadd.f32 %v4005_v34, %v3828_v1  ;;  %v4010_v43 = vadd.f32 %v4006_v61, %v3829_v44 }
 0x217   : > { %v4192_v13 = vadd.f32 %v4188_v4, %v4007_v53  ;;  %v4193_v45 = vadd.f32 %v4189_v20, %v4008_v6  ;;  %v7464_v48 = vrot.slane %v6631_v52, %v6904_v56  ;;  %v7465_v14 = vrot.slane %v6614_v23, %v6904_v56 }
 0x218   : > { %v4530_v58 = vsel %vm1247_vm6, %v6985_v51, %v6991_v24  ;;  %v4533_v61 = vsel %vm1247_vm6, %v6991_v24, %v7463_v59  ;;  %v7466_v4 = vrot.slane %v6357_v15, %v6904_v56  ;;  %v7467_v20 = vrot.slane %v6369_v19, %v6904_v56 }
 0x219   : > { %v4889_v63 = vpop.permute.xlu0 %4888  ;;  %v4371_v0 = vmul.f32 %v7464_v48, %v4349_v36  ;;  %v4372_v3 = vmul.f32 %v7465_v14, %v4352_v37  ;;  %v4713_v49 = vsel %vm1429_vm7, %v7031_v5, %v7035_v29  ;;  %v4712_v51 = vsel %vm1429_vm7, %v7035_v29, %v7066_v62 }
 0x21a   : > { %v4891_v25 = vpop.permute.xlu1 %4890  ;;  %v4550_v52 = vmul.f32 %v7466_v4, %v4532_v42  ;;  %v4551_v23 = vmul.f32 %v7467_v20, %v4531_v35  ;;  %v4194_v24 = vadd.f32 %v4190_v33, %v4009_v39  ;;  %v4195_v1 = vadd.f32 %v4191_v28, %v4010_v43  ;;  %v7476_v43 = vld [vmem:[#allocation16_spill] sm:$0xff] }
 0x21b   : > { %v4373_v44 = vadd.f32 %v4369_v2, %v4192_v13  ;;  %v4374_v53 = vadd.f32 %v4370_v46, %v4193_v45  ;;  %v7468_v15 = vrot.slane %v6383_v30, %v6904_v56  ;;  %v7469_v19 = vrot.slane %v6364_v17, %v6904_v56 }
 0x21c   : > { %v4711_v38 = vsel %vm1429_vm7, %v7066_v62, %v7082_v18  ;;  %v4714_v29 = vsel %vm1429_vm7, %v7082_v18, %v7031_v5  ;;  %v7470_v28 = vrot.slane %v6495_v8, %v6904_v56  ;;  %v7472_v36 = vrot.slane %v7471_v9, %v6904_v56 }
 0x21d   : > { %v5070_v50 = vpop.permute.xlu0 %5069  ;;  %v4552_v6 = vmul.f32 %v7468_v15, %v4530_v58  ;;  %v4553_v31 = vmul.f32 %v7469_v19, %v4533_v61  ;;  %v4894_v37 = vsel %vm1615_vm8, %v7111_v47, %v4887_v60  ;;  %v4893_v62 = vsel %vm1615_vm8, %v4887_v60, %v4889_v63 }
 0x21e   : > { %v5072_v34 = vpop.permute.xlu1 %5071  ;;  %v4731_v30 = vmul.f32 %v7470_v28, %v4713_v49  ;;  %v4732_v17 = vmul.f32 %v7472_v36, %v4712_v51  ;;  %v4375_v2 = vadd.f32 %v4371_v0, %v4194_v24  ;;  %v4376_v10 = vadd.f32 %v4372_v3, %v4195_v1  ;;  %v7482_v49 = vld [vmem:[#allocation35_spill] sm:$0xff] }
 0x21f   : > { %v4554_v5 = vadd.f32 %v4550_v52, %v4373_v44  ;;  %v4555_v18 = vadd.f32 %v4551_v23, %v4374_v53  ;;  %v7473_v8 = vrot.slane %v6509_v41, %v6904_v56  ;;  %v7474_v32 = vrot.slane %v6499_v40, %v6904_v56 }
 0x220   : > { %v5079_v42 = vsel %vm1813_vm9, %v5070_v50, %v5072_v34  ;;  %v7475_v60 = vrot.slane %v6995_v55, %v6904_v56  ;;  %v7477_v13 = vrot.slane %v7476_v43, %v6904_v56  ;;  %v4892_v41 = vsel %vm1615_vm8, %v4889_v63, %v4891_v25 }
 0x221   : > { %v5074_v33 = vpop.permute.xlu0 %5073  ;;  %v4733_v46 = vmul.f32 %v7473_v8, %v4711_v38  ;;  %v4734_v59 = vmul.f32 %v7474_v32, %v4714_v29  ;;  %v4895_v40 = vsel %vm1615_vm8, %v4891_v25, %v7111_v47  ;;  %v4556_v0 = vadd.f32 %v4552_v6, %v4375_v2 }
 0x222   : > { %v5251_v12 = vpop.permute.xlu1 %5250  ;;  %v5078_v35 = vsel %vm1813_vm9, %v5072_v34, %v5074_v33  ;;  %v4916_v39 = vmul.f32 %v7475_v60, %v4894_v37  ;;  %v4917_v45 = vmul.f32 %v7477_v13, %v4893_v62  ;;  %v4557_v14 = vadd.f32 %v4553_v31, %v4376_v10 }
 0x223   : > { %v4735_v3 = vadd.f32 %v4731_v30, %v4554_v5  ;;  %v4736_v58 = vadd.f32 %v4732_v17, %v4555_v18  ;;  %v7478_v55 = vrot.slane %v7410_v21, %v6904_v56  ;;  %v7479_v34 = vrot.slane %v7413_v7, %v6904_v56  ;;  %v7483_v7 = vld [vmem:[#allocation32_spill] sm:$0xff] }
 0x224   : > { %v7480_v25 = vrot.slane %v7003_v57, %v6904_v56  ;;  %v7481_v23 = vrot.slane %v7013_v16, %v6904_v56  ;;  %v5273_v51 = vrot.slane %v7482_v49, %v6904_v56  ;;  %v5277_v24 = vrot.slane %v7483_v7, %v6904_v56 }
 0x225   : > { %v5076_v48 = vpop.permute.xlu0 %5075  ;;  %v5097_v61 = vmul.f32 %v7478_v55, %v5079_v42  ;;  %v5098_v4 = vmul.f32 %v7479_v34, %v5078_v35  ;;  %v4737_v1 = vadd.f32 %v4733_v46, %v4556_v0  ;;  %v4738_v44 = vadd.f32 %v4734_v59, %v4557_v14 }
 0x226   : > { %v5077_v63 = vsel %vm1813_vm9, %v5074_v33, %v5076_v48  ;;  %v5080_v52 = vsel %vm1813_vm9, %v5076_v48, %v5070_v50  ;;  %v5255_v47 = vpop.permute.xlu1 %5254  ;;  %v4918_v20 = vmul.f32 %v7480_v25, %v4892_v41  ;;  %v4919_v21 = vmul.f32 %v7481_v23, %v4895_v40 }
 0x227   : > { %v4920_v53 = vadd.f32 %v4916_v39, %v4735_v3  ;;  %v4921_v15 = vadd.f32 %v4917_v45, %v4736_v58  ;;  %v7484_v6 = vrot.slane %v7414_v26, %v6904_v56  ;;  %v7485_v19 = vrot.slane %v7411_v54, %v6904_v56 }
 0x228   : > { %v7486_v28 = vrot.slane %v7439_v11, %v6904_v56  ;;  %v7487_v26 = vrot.slane %v7440_v27, %v6904_v56  ;;  %v4922_v36 = vadd.f32 %v4918_v20, %v4737_v1  ;;  %v4923_v54 = vadd.f32 %v4919_v21, %v4738_v44  ;;  %v7488_v11 = vld [vmem:[#allocation26_spill] sm:$0xff] }
 0x229   : > { %v5253_v50 = vpop.permute.xlu0 %5252  ;;  %v5099_v57 = vmul.f32 %v7484_v6, %v5077_v63  ;;  %v5100_v16 = vmul.f32 %v7485_v19, %v5080_v52  ;;  %v5101_v29 = vadd.f32 %v5097_v61, %v4920_v53  ;;  %v5102_v33 = vadd.f32 %v5098_v4, %v4921_v15 }
 0x22a   : > { %v5259_v31 = vsel %vm1995_vm10, %v5253_v50, %v5255_v47  ;;  %v5260_v38 = vsel %vm1995_vm10, %v5251_v12, %v5253_v50  ;;  %vm5320_vm2 = vcmask 3072  }
 0x22b   : > { %v5278_v30 = vmul.f32 %v7486_v28, %v5260_v38  ;;  %v5279_v9 = vmul.f32 %v7487_v26, %v5259_v31  ;;  %v5103_v2 = vadd.f32 %v5099_v57, %v4922_v36  ;;  %v5104_v10 = vadd.f32 %v5100_v16, %v4923_v54 }
 0x22d   : > { %v5282_v17 = vadd.f32 %v5278_v30, %v5101_v29  ;;  %v5283_v37 = vadd.f32 %v5279_v9, %v5102_v33  ;;  %v5257_v62 = vpop.permute.xlu0 %5256 }
 0x22e   : > { %v5258_v5 = vsel %vm1995_vm10, %v5255_v47, %v5257_v62  ;;  %v5261_v18 = vsel %vm1995_vm10, %v5257_v62, %v5251_v12 }
 0x22f   : > { %v5292_v8 = vadd.f32 %v7488_v11, %v5282_v17  ;;  %v5293_v46 = vadd.f32 %v7488_v11, %v5283_v37  ;;  %v5280_v32 = vmul.f32 %v5273_v51, %v5258_v5  ;;  %v5281_v56 = vmul.f32 %v5277_v24, %v5261_v18 }
 0x231   : > { %v5300_v27 = vcombine.low %v5292_v8, %v5293_v46  ;;  %v5284_v59 = vadd.f32 %v5280_v32, %v5103_v2  ;;  %v5285_v42 = vadd.f32 %v5281_v56, %v5104_v10  ;;  %v5306_v35 = vsel %vm314_vm0, %v5292_v8, 0.0 }
 0x232   : > { %v5307_v22 = vsel %vm314_vm0, %v5293_v46, 0.0 }
 0x233   : > { %5304 = vst [vmem:[%s264_s19] sm:$0xff] %v5300_v27  ;;  %v5294_v12 = vadd.f32 %v7488_v11, %v5284_v59  ;;  %v5295_v60 = vadd.f32 %v7488_v11, %v5285_v42  ;;  %v5308_v39 = vadd.f32 %v5307_v22, %v5306_v35 }
 0x235   : > { %v5301_v43 = vcombine.low %v5294_v12, %v5295_v60  ;;  %v5309_v13 = vsel %vm314_vm0, %v5294_v12, 0.0  ;;  %v5311_v41 = vsel %vm314_vm0, %v5295_v60, 0.0 }
 0x236   : > { %v5310_v45 = vadd.f32 %v5309_v13, %v5308_v39 }
 0x237   : > { %5305 = vst [vmem:[%s264_s19 + $0x8] sm:$0xff] %v5301_v43 }
 0x238   : > { %v5312_v40 = vadd.f32 %v5311_v41, %v5310_v45 }
 0x23a   : > { %5313 = vadd.xlane.f32.xlu1 %v5312_v40 }
 0x2c7   : > { %v5314_v48 = vpop.xlane.xlu1 %5313 }
 0x2c8   : > { %v5315_v0 = vmul.f32 0.001953125, %v5314_v48  ;;  %5321 = vst.msk [vmem:[%s268_s25] sm:$0xf] %vm5320_vm2, %v5314_v48 }
 0x2ca   : > { %v5316_v14 = vsub.f32 %v5292_v8, %v5315_v0  ;;  %v5317_v3 = vsub.f32 %v5293_v46, %v5315_v0  ;;  %v5318_v58 = vsub.f32 %v5294_v12, %v5315_v0  ;;  %v5319_v55 = vsub.f32 %v5295_v60, %v5315_v0 }
 0x2cc   : > { %v5322_v61 = vmul.f32 %v5316_v14, %v5316_v14  ;;  %v5323_v34 = vmul.f32 %v5317_v3, %v5317_v3  ;;  %v5324_v4 = vmul.f32 %v5318_v58, %v5318_v58  ;;  %v5325_v63 = vmul.f32 %v5319_v55, %v5319_v55 }
 0x2ce   : > { %v5326_v52 = vsel %vm314_vm0, %v5322_v61, 0.0  ;;  %v5327_v47 = vsel %vm314_vm0, %v5323_v34, 0.0  ;;  %v5329_v20 = vsel %vm314_vm0, %v5324_v4, 0.0  ;;  %v5331_v21 = vsel %vm314_vm0, %v5325_v63, 0.0 }
 0x2cf   : > { %v5328_v25 = vadd.f32 %v5327_v47, %v5326_v52 }
 0x2d1   : > { %v5330_v23 = vadd.f32 %v5329_v20, %v5328_v25 }
 0x2d3   : > { %v5332_v49 = vadd.f32 %v5331_v21, %v5330_v23 }
 0x2d5   : > { %5333 = vadd.xlane.f32.xlu0 %v5332_v49 }
 0x362   : > { %v5334_v51 = vpop.xlane.xlu0 %5333 }
 0x363   : > { %5335 = vst.msk [vmem:[%s272_s27] sm:$0xf] %vm5320_vm2, %v5334_v51 }
 0x364 PF: > { %s17_s21 = sadd.s32 1, %s5667_s21  }
 0x365   : > { %p14_p4 = scmp.ge.s32.totalorder %s17_s21, 4  }
 0x367   :  { %16 = sbr.rel (!%p14_p4) target bundleno = 1 (0x1), region = 90 }

</bundles_post_ra>
